<compile_context>
chip_gen: v5e
topology: v5e:2x2
jax: 0.10.0
libtpu: 0.0.40
codegen_flags: <defaults>
</compile_context>

<pallas_src>
from functools import lru_cache, partial

import jax
import jax.numpy as jnp
from jax.experimental import pallas as pl
from jax.experimental.pallas import tpu as pltpu


# ----------------------------------------------------------------------------
# Global config
# ----------------------------------------------------------------------------
LANE = 128                 # output channels padded to this (lane-dense stores)
STEM_K_PAD = 256           # stem im2col K (7*7*3 = 147) padded to 256
REAL_WIDTHS = (16, 32, 64, 128)
STEM_CH = 16
STRIDES = (1, 2, 2, 2)


@lru_cache(maxsize=None)
def _vmem_limit_bytes():
    """Generation-aware scoped-VMEM limit (48 MiB on v7x, 96 MiB on v5e/v6e)."""
    cap = 128 * 1024 * 1024
    try:
        cap = int(getattr(pltpu.get_tpu_info(), "vmem_capacity_bytes", cap))
    except Exception:
        pass
    return int(max(32 * 1024 * 1024, min(3 * cap // 4, 96 * 1024 * 1024)))


def _pick_tile_m(M, bytes_per_row):
    """Largest row tile fitting ~half the VMEM limit with >=4 grid steps
    (so both v7x TensorCores get pipelined work); single step for tiny M."""
    budget = _vmem_limit_bytes() // 2
    if M <= 8:
        return M
    for tm in (1024, 512, 256, 128, 64, 32, 16, 8):
        if M % tm == 0 and M // tm >= 4 and 2 * tm * bytes_per_row <= budget:
            return tm
    return M


# ----------------------------------------------------------------------------
# Pallas kernels
# ----------------------------------------------------------------------------
def _conv_tap_kernel(*refs, n_x, plan, wo, cin, cin_proj, apply_relu,
                     has_residual, has_proj):
    """Row-structured 3x3 conv: y = sum_t dot(tap_t, w_t) + shift
       [+ residual | + dot(xd, wd)] -> relu."""
    x_refs = refs[:n_x]
    w_ref, b_ref = refs[n_x], refs[n_x + 1]
    idx = n_x + 2
    if has_residual:
        r_ref = refs[idx]
        idx += 1
    if has_proj:
        xd_ref, wd_ref = refs[idx], refs[idx + 1]
        idx += 2
    o_ref = refs[idx]

    cout = o_ref.shape[-1]
    rows = [r[0, 0, :, :] for r in x_refs]            # each (Wrow, 128)

    y = jnp.zeros((wo, cout), jnp.float32)
    for t, (ri, w_off) in enumerate(plan):
        row = rows[ri]
        tap = row if w_off is None else row[w_off:w_off + wo, :]
        if cin != tap.shape[-1]:
            tap = tap[:, :cin]                        # drop zero channel padding
        y = y + jnp.dot(tap, w_ref[t, :, :], preferred_element_type=jnp.float32)
    y = y + b_ref[...]                                # folded BN shift(s)
    if has_residual:
        y = y + r_ref[0, 0, :, :].astype(jnp.float32)
    if has_proj:
        xd = xd_ref[0, 0, :, :]
        if cin_proj != xd.shape[-1]:
            xd = xd[:, :cin_proj]
        y = y + jnp.dot(xd, wd_ref[...], preferred_element_type=jnp.float32)
    if apply_relu:
        y = jnp.maximum(y, 0.0)
    o_ref[0, 0, :, :] = y.astype(o_ref.dtype)


def _gemm_bn_relu_kernel(x_ref, w_ref, b_ref, o_ref):
    """Stem im2col GEMM: relu(x @ w + shift)."""
    y = jnp.dot(x_ref[...], w_ref[...], preferred_element_type=jnp.float32)
    o_ref[...] = jnp.maximum(y + b_ref[...], 0.0).astype(o_ref.dtype)


def _maxpool_tree_kernel(*refs):
    """Pairwise-tree max over the 9 pooling taps of one output row."""
    o_ref = refs[-1]
    vals = [r[0, 0, :, :] for r in refs[:-1]]
    while len(vals) > 1:
        nxt = [jnp.maximum(vals[i], vals[i + 1])
               for i in range(0, len(vals) - 1, 2)]
        if len(vals) % 2:
            nxt.append(vals[-1])
        vals = nxt
    o_ref[0, 0, :, :] = vals[0]


# ----------------------------------------------------------------------------
# Pallas wrappers
# ----------------------------------------------------------------------------
def conv3x3_bn(x, w_taps, shift, stride, residual=None, proj=None,
               apply_relu=True):
    """3x3/pad-1 conv with folded BN (+identity residual | +1x1 proj) + ReLU.

    x:        (N, H, W, 128) bf16, real input channels = w_taps.shape[1]
    w_taps:   (9, cin_real, 128) bf16 (BN scale folded, cout zero-padded)
    shift:    (128,) f32 BN shift (projection shift pre-added when proj given)
    residual: (N, Ho, Wo, 128) bf16, identity shortcut
    proj:     (x_in, wd, proj_stride) fused 1x1 downsample shortcut
    """
    N, H, W, C = x.shape
    cin = w_taps.shape[1]
    cout = w_taps.shape[2]
    s = stride
    Ho = (H + 2 - 3) // s + 1
    Wo = (W + 2 - 3) // s + 1
    xp = jnp.pad(x, ((0, 0), (1, 1), (1, 1), (0, 0)))
    Wp = W + 2

    x_args, x_specs, plan = [], [], {}
    if s == 1:
        # Same padded HBM buffer passed 3x; H offset lives in the index_map,
        # W taps are static slices inside the kernel (no HBM copies at all).
        for dh in range(3):
            x_args.append(xp)
            x_specs.append(pl.BlockSpec(
                (1, 1, Wp, C), lambda n, h, dh=dh: (n, h + dh, 0, 0)))
        for dh in range(3):
            for dw in range(3):
                plan[dh * 3 + dw] = (dh, dw)
    else:
        # Strided W handled by 3 pre-sliced views; H offsets in the index_map.
        for dw in range(3):
            xw = xp[:, :, dw: dw + s * (Wo - 1) + 1: s, :]   # (N, H+2, Wo, C)
            for dh in range(3):
                plan[dh * 3 + dw] = (len(x_args), None)
                x_args.append(xw)
                x_specs.append(pl.BlockSpec(
                    (1, 1, Wo, C),
                    lambda n, h, dh=dh, s=s: (n, s * h + dh, 0, 0)))
    plan = tuple(plan[t] for t in range(9))

    args = list(x_args) + [w_taps, shift.reshape(1, cout)]
    in_specs = list(x_specs) + [
        pl.BlockSpec((9, cin, cout), lambda n, h: (0, 0, 0)),
        pl.BlockSpec((1, cout), lambda n, h: (0, 0)),
    ]

    has_res = residual is not None
    has_proj = proj is not None
    cin_proj = 0
    if has_res:
        in_specs.append(pl.BlockSpec((1, 1, Wo, cout), lambda n, h: (n, h, 0, 0)))
        args.append(residual)
    if has_proj:
        x_in, wd, ps = proj
        cin_proj = wd.shape[0]
        xd = x_in[:, :, ::ps, :]            # W stride in wrapper, H stride below
        in_specs += [
            pl.BlockSpec((1, 1, Wo, x_in.shape[-1]),
                         lambda n, h, ps=ps: (n, ps * h, 0, 0)),
            pl.BlockSpec((cin_proj, cout), lambda n, h: (0, 0)),
        ]
        args += [xd, wd]

    kernel = partial(_conv_tap_kernel, n_x=len(x_args), plan=plan, wo=Wo,
                     cin=cin, cin_proj=cin_proj, apply_relu=apply_relu,
                     has_residual=has_res, has_proj=has_proj)
    return pl.pallas_call(
        kernel,
        out_shape=jax.ShapeDtypeStruct((N, Ho, Wo, cout), jnp.bfloat16),
        grid=(N, Ho),
        in_specs=in_specs,
        out_specs=pl.BlockSpec((1, 1, Wo, cout), lambda n, h: (n, h, 0, 0)),
        compiler_params=pltpu.CompilerParams(
            dimension_semantics=("parallel", "parallel"),
            vmem_limit_bytes=_vmem_limit_bytes(),
        ),
    )(*args)


def stem_conv_bn(x, w2d, shift):
    """7x7 / stride-2 / pad-3 stem conv + folded BN + ReLU via im2col GEMM."""
    # TODO(synk): stem keeps im2col (cin=3 would make per-tap dots degenerate);
    #             K is padded 147 -> 256 for aligned loads / full-depth MXU.
    N, H, W, Cin = x.shape
    k, s, pad = 7, 2, 3
    xp = jnp.pad(x, ((0, 0), (pad, pad), (pad, pad), (0, 0)))
    Ho = (H + 2 * pad - k) // s + 1
    Wo = (W + 2 * pad - k) // s + 1
    cols = [xp[:, i: i + s * (Ho - 1) + 1: s, j: j + s * (Wo - 1) + 1: s, :]
            for i in range(k) for j in range(k)]
    K = w2d.shape[0]
    if K > k * k * Cin:
        cols.append(jnp.zeros((N, Ho, Wo, K - k * k * Cin), x.dtype))
    patches = jnp.concatenate(cols, axis=-1).reshape(N * Ho * Wo, K)
    M = N * Ho * Wo
    cout = w2d.shape[1]
    tm = _pick_tile_m(M, (K + cout) * 2 + cout * 4)
    out = pl.pallas_call(
        _gemm_bn_relu_kernel,
        out_shape=jax.ShapeDtypeStruct((M, cout), jnp.bfloat16),
        grid=(M // tm,),
        in_specs=[pl.BlockSpec((tm, K), lambda i: (i, 0)),
                  pl.BlockSpec((K, cout), lambda i: (0, 0)),
                  pl.BlockSpec((1, cout), lambda i: (0, 0))],
        out_specs=pl.BlockSpec((tm, cout), lambda i: (i, 0)),
        compiler_params=pltpu.CompilerParams(
            dimension_semantics=("parallel",),
            vmem_limit_bytes=_vmem_limit_bytes(),
        ),
    )(patches, w2d, shift.reshape(1, cout))
    return out.reshape(N, Ho, Wo, cout)


def maxpool_3x3_s2(x):
    """3x3 / stride-2 / pad-1 max-pool (PyTorch semantics), x: NHWC bf16."""
    N, H, W, C = x.shape
    s = 2
    xp = jnp.pad(x, ((0, 0), (1, 1), (1, 1), (0, 0)), constant_values=-3.0e38)
    Ho = (H + 2 - 3) // s + 1
    Wo = (W + 2 - 3) // s + 1
    args, specs = [], []
    for dw in range(3):
        xw = xp[:, :, dw: dw + s * (Wo - 1) + 1: s, :]       # (N, H+2, Wo, C)
        for dh in range(3):
            args.append(xw)
            specs.append(pl.BlockSpec(
                (1, 1, Wo, C), lambda n, h, dh=dh: (n, s * h + dh, 0, 0)))
    return pl.pallas_call(
        _maxpool_tree_kernel,
        out_shape=jax.ShapeDtypeStruct((N, Ho, Wo, C), x.dtype),
        grid=(N, Ho),
        in_specs=specs,
        out_specs=pl.BlockSpec((1, 1, Wo, C), lambda n, h: (n, h, 0, 0)),
        compiler_params=pltpu.CompilerParams(
            dimension_semantics=("parallel", "parallel"),
            vmem_limit_bytes=_vmem_limit_bytes(),
        ),
    )(*args)


# ----------------------------------------------------------------------------
# Deterministic parameter construction (BN folded, cout padded, cin real)
# ----------------------------------------------------------------------------
def _make_conv(key, kh, kw, cin, cout):
    fan_in = kh * kw * cin
    return (jax.random.normal(key, (kh, kw, cin, cout), jnp.float32)
            / jnp.sqrt(jnp.float32(fan_in)))


def _make_bn(key, c, eps=1e-5):
    k1, k2, k3, k4 = jax.random.split(key, 4)
    gamma = 1.0 + 0.1 * jax.random.normal(k1, (c,), jnp.float32)
    beta = 0.1 * jax.random.normal(k2, (c,), jnp.float32)
    mean = 0.1 * jax.random.normal(k3, (c,), jnp.float32)
    var = 1.0 + jnp.abs(jax.random.normal(k4, (c,), jnp.float32))
    scale = gamma / jnp.sqrt(var + eps)
    shift = beta - mean * scale
    return scale, shift


def _fold_taps(w, scale, shift):
    """Fold BN scale, pad only cout to 128, reshape to (kh*kw, cin_real, 128)."""
    kh, kw, cin, cout = w.shape
    wf = w * scale.reshape(1, 1, 1, cout)
    wf = jnp.pad(wf, ((0, 0), (0, 0), (0, 0), (0, LANE - cout)))
    wt = wf.reshape(kh * kw, cin, LANE).astype(jnp.bfloat16)
    sh = jnp.pad(shift, (0, LANE - cout)).astype(jnp.float32)
    return wt, sh


def _fold_stem(w, scale, shift, k_pad):
    kh, kw, cin, cout = w.shape
    wf = (w * scale.reshape(1, 1, 1, cout)).reshape(kh * kw * cin, cout)
    wf = jnp.pad(wf, ((0, k_pad - kh * kw * cin), (0, LANE - cout)))
    sh = jnp.pad(shift, (0, LANE - cout)).astype(jnp.float32)
    return wf.astype(jnp.bfloat16), sh


def _make_block_params(key, cin, cout, stride):
    ks = jax.random.split(key, 6)
    w1 = _make_conv(ks[0], 3, 3, cin, cout)
    w2 = _make_conv(ks[1], 3, 3, cout, cout)
    s1, b1 = _make_bn(ks[2], cout)
    s2, b2 = _make_bn(ks[3], cout)
    p = {}
    p["w1"], p["b1"] = _fold_taps(w1, s1, b1)
    p["w2"], p["b2"] = _fold_taps(w2, s2, b2)
    if stride != 1 or cin != cout:
        wd = _make_conv(ks[4], 1, 1, cin, cout)
        sd, bd = _make_bn(ks[5], cout)
        wdt, bdt = _fold_taps(wd, sd, bd)
        p["wd"] = wdt[0]                 # (cin_real, 128)
        p["b2"] = p["b2"] + bdt          # fold projection BN shift into conv2 shift
    return p


def make_resnest_params(key, in_ch=3, stem_ch=STEM_CH, widths=REAL_WIDTHS):
    ks = jax.random.split(key, 6)
    sw = _make_conv(ks[0], 7, 7, in_ch, stem_ch)
    ss, sb = _make_bn(ks[1], stem_ch)
    params = {}
    params["stem_w"], params["stem_b"] = _fold_stem(sw, ss, sb, STEM_K_PAD)
    cin = stem_ch
    for li, (cout, st) in enumerate(zip(widths, STRIDES)):
        params[f"layer{li + 1}"] = _make_block_params(ks[2 + li], cin, cout, st)
        cin = cout
    return params


# ----------------------------------------------------------------------------
# Forward pass (mirrors Resnest.forward)
# ----------------------------------------------------------------------------
def _basic_block(x, p, stride):
    # conv1 -> bn1 -> relu
    out1 = conv3x3_bn(x, p["w1"], p["b1"], stride=stride, apply_relu=True)
    # conv2 -> bn2 -> (+ identity / fused 1x1 downsample projection) -> relu
    if "wd" in p:
        return conv3x3_bn(out1, p["w2"], p["b2"], stride=1,
                          proj=(x, p["wd"], stride), apply_relu=True)
    return conv3x3_bn(out1, p["w2"], p["b2"], stride=1,
                      residual=x, apply_relu=True)


def resnest_forward(params, x_nchw, return_feature_maps=False,
                    widths=REAL_WIDTHS):
    # NCHW (PyTorch) -> NHWC (kernel layout), bf16 activations
    x = jnp.transpose(x_nchw, (0, 2, 3, 1)).astype(jnp.bfloat16)

    # x = relu1(bn1(conv1(x))) ; x = maxpool(x)
    x = stem_conv_bn(x, params["stem_w"], params["stem_b"])
    x = maxpool_3x3_s2(x)

    conv_out = []
    for li, st in enumerate(STRIDES):
        x = _basic_block(x, params[f"layer{li + 1}"], st)
        conv_out.append(x)

    def to_out(t, c_real):
        t = t[..., :c_real]                       # drop channel padding
        return jnp.transpose(t, (0, 3, 1, 2)).astype(jnp.float32)

    if return_feature_maps:
        return [to_out(t, c) for t, c in zip(conv_out, widths)]
    return [to_out(conv_out[-1], widths[-1])]


# ----------------------------------------------------------------------------
# Main
# ----------------------------------------------------------------------------
if __name__ == "__main__":
    key = jax.random.PRNGKey(0)
    k_param, k_input = jax.random.split(key)

    params = make_resnest_params(k_param)

    # Small NCHW input, PyTorch convention: (batch=2, channels=3, 64, 64)
    x = jax.random.normal(k_input, (2, 3, 64, 64), jnp.float32)

    fwd = jax.jit(partial(resnest_forward, return_feature_maps=False))
    out = fwd(params, x)
    jax.block_until_ready(out)

    feats = jax.jit(partial(resnest_forward, return_feature_maps=True))(params, x)
    jax.block_until_ready(feats)

    assert out[0].shape == (2, 128, 2, 2)
    assert [f.shape for f in feats] == [
        (2, 16, 16, 16), (2, 32, 8, 8), (2, 64, 4, 4), (2, 128, 2, 2)
    ]
    assert bool(jnp.all(jnp.isfinite(out[0])))
    print("KERNEL_OK")
</pallas_src>

<mosaic_0001>
module attributes {stable_mosaic.version = 11 : i64} {
  func.func @_gemm_bn_relu_kernel(%arg0: i32, %arg1: memref<512x256xbf16, #tpu.memory_space<vmem>>, %arg2: memref<256x128xbf16, #tpu.memory_space<vmem>>, %arg3: memref<1x128xf32, #tpu.memory_space<vmem>>, %arg4: memref<512x128xbf16, #tpu.memory_space<vmem>>) attributes {dimension_semantics = [#tpu.dimension_semantics<parallel>], iteration_bounds = array<i64: 4>, scalar_prefetch = 0 : i64, scratch_operands = 0 : i64, tpu.core_type = #tpu.core_type<tc>, window_params = [{transform_indices = @transform_0, window_bounds = array<i64: 512, 256>}, {pipeline_mode = #tpu.pipeline_mode<synchronous>, transform_indices = @transform_1, window_bounds = array<i64: 256, 128>}, {pipeline_mode = #tpu.pipeline_mode<synchronous>, transform_indices = @transform_2, window_bounds = array<i64: 1, 128>}, {transform_indices = @transform_3, window_bounds = array<i64: 512, 128>}]} {
    %c0 = arith.constant 0 : index
    %c0_0 = arith.constant 0 : index
    %0 = vector.load %arg1[%c0, %c0_0] : memref<512x256xbf16, #tpu.memory_space<vmem>>, vector<512x256xbf16>
    %c0_1 = arith.constant 0 : index
    %c0_2 = arith.constant 0 : index
    %1 = vector.load %arg2[%c0_1, %c0_2] : memref<256x128xbf16, #tpu.memory_space<vmem>>, vector<256x128xbf16>
    %cst = arith.constant dense<0.000000e+00> : vector<512x128xf32>
    %2 = tpu.matmul %0, %1, %cst {dimension_numbers = #tpu.dot_dimension_numbers<[1], [0], [0], [1], [0, 0, 1, 1], [], []>} : vector<512x256xbf16>, vector<256x128xbf16>, vector<512x128xf32> -> vector<512x128xf32>
    %c0_3 = arith.constant 0 : index
    %c0_4 = arith.constant 0 : index
    %3 = vector.load %arg3[%c0_3, %c0_4] : memref<1x128xf32, #tpu.memory_space<vmem>>, vector<1x128xf32>
    %4 = vector.broadcast %3 : vector<1x128xf32> to vector<512x128xf32>
    %5 = arith.addf %2, %4 : vector<512x128xf32>
    %cst_5 = arith.constant 0.000000e+00 : f32
    %6 = vector.broadcast %cst_5 : f32 to vector<512x128xf32>
    %7 = arith.maximumf %5, %6 : vector<512x128xf32>
    %8 = arith.truncf %7 : vector<512x128xf32> to vector<512x128xbf16>
    %c0_6 = arith.constant 0 : index
    %c0_7 = arith.constant 0 : index
    %9 = vector.load %arg4[%c0_6, %c0_7] : memref<512x128xbf16, #tpu.memory_space<vmem>>, vector<512x128xbf16>
    tpu.vector_store %arg4[%c0_6, %c0_7], %8 {strides = array<i32>} : memref<512x128xbf16, #tpu.memory_space<vmem>>, vector<512x128xbf16>,
    return
  }
  func.func @transform_0(%arg0: i32) -> (i32, i32) {
    %c0_i32 = arith.constant 0 : i32
    %c0_i32_0 = arith.constant 0 : i32
    return %arg0, %c0_i32 : i32, i32
  }
  func.func @transform_1(%arg0: i32) -> (i32, i32) {
    %c0_i32 = arith.constant 0 : i32
    %c0_i32_0 = arith.constant 0 : i32
    %c0_i32_1 = arith.constant 0 : i32
    return %c0_i32, %c0_i32_0 : i32, i32
  }
  func.func @transform_2(%arg0: i32) -> (i32, i32) {
    %c0_i32 = arith.constant 0 : i32
    %c0_i32_0 = arith.constant 0 : i32
    %c0_i32_1 = arith.constant 0 : i32
    return %c0_i32, %c0_i32_0 : i32, i32
  }
  func.func @transform_3(%arg0: i32) -> (i32, i32) {
    %c0_i32 = arith.constant 0 : i32
    %c0_i32_0 = arith.constant 0 : i32
    return %arg0, %c0_i32 : i32, i32
  }
}

module attributes {stable_mosaic.version = 11 : i64} {
  func.func @_maxpool_tree_kernel(%arg0: i32, %arg1: i32, %arg2: memref<1x1x16x128xbf16, #tpu.memory_space<vmem>>, %arg3: memref<1x1x16x128xbf16, #tpu.memory_space<vmem>>, %arg4: memref<1x1x16x128xbf16, #tpu.memory_space<vmem>>, %arg5: memref<1x1x16x128xbf16, #tpu.memory_space<vmem>>, %arg6: memref<1x1x16x128xbf16, #tpu.memory_space<vmem>>, %arg7: memref<1x1x16x128xbf16, #tpu.memory_space<vmem>>, %arg8: memref<1x1x16x128xbf16, #tpu.memory_space<vmem>>, %arg9: memref<1x1x16x128xbf16, #tpu.memory_space<vmem>>, %arg10: memref<1x1x16x128xbf16, #tpu.memory_space<vmem>>, %arg11: memref<1x1x16x128xbf16, #tpu.memory_space<vmem>>) attributes {dimension_semantics = [#tpu.dimension_semantics<parallel>, #tpu.dimension_semantics<parallel>], iteration_bounds = array<i64: 2, 16>, scalar_prefetch = 0 : i64, scratch_operands = 0 : i64, tpu.core_type = #tpu.core_type<tc>, window_params = [{transform_indices = @transform_0, window_bounds = array<i64: 1, 1, 16, 128>}, {transform_indices = @transform_1, window_bounds = array<i64: 1, 1, 16, 128>}, {transform_indices = @transform_2, window_bounds = array<i64: 1, 1, 16, 128>}, {transform_indices = @transform_3, window_bounds = array<i64: 1, 1, 16, 128>}, {transform_indices = @transform_4, window_bounds = array<i64: 1, 1, 16, 128>}, {transform_indices = @transform_5, window_bounds = array<i64: 1, 1, 16, 128>}, {transform_indices = @transform_6, window_bounds = array<i64: 1, 1, 16, 128>}, {transform_indices = @transform_7, window_bounds = array<i64: 1, 1, 16, 128>}, {transform_indices = @transform_8, window_bounds = array<i64: 1, 1, 16, 128>}, {transform_indices = @transform_9, window_bounds = array<i64: 1, 1, 16, 128>}]} {
    %c0 = arith.constant 0 : index
    %c0_0 = arith.constant 0 : index
    %c0_1 = arith.constant 0 : index
    %c0_2 = arith.constant 0 : index
    %0 = vector.load %arg2[%c0, %c0_0, %c0_1, %c0_2] : memref<1x1x16x128xbf16, #tpu.memory_space<vmem>>, vector<1x1x16x128xbf16>
    %1 = vector.shape_cast %0 : vector<1x1x16x128xbf16> to vector<16x128xbf16>
    %c0_3 = arith.constant 0 : index
    %c0_4 = arith.constant 0 : index
    %c0_5 = arith.constant 0 : index
    %c0_6 = arith.constant 0 : index
    %2 = vector.load %arg3[%c0_3, %c0_4, %c0_5, %c0_6] : memref<1x1x16x128xbf16, #tpu.memory_space<vmem>>, vector<1x1x16x128xbf16>
    %3 = vector.shape_cast %2 : vector<1x1x16x128xbf16> to vector<16x128xbf16>
    %c0_7 = arith.constant 0 : index
    %c0_8 = arith.constant 0 : index
    %c0_9 = arith.constant 0 : index
    %c0_10 = arith.constant 0 : index
    %4 = vector.load %arg4[%c0_7, %c0_8, %c0_9, %c0_10] : memref<1x1x16x128xbf16, #tpu.memory_space<vmem>>, vector<1x1x16x128xbf16>
    %5 = vector.shape_cast %4 : vector<1x1x16x128xbf16> to vector<16x128xbf16>
    %c0_11 = arith.constant 0 : index
    %c0_12 = arith.constant 0 : index
    %c0_13 = arith.constant 0 : index
    %c0_14 = arith.constant 0 : index
    %6 = vector.load %arg5[%c0_11, %c0_12, %c0_13, %c0_14] : memref<1x1x16x128xbf16, #tpu.memory_space<vmem>>, vector<1x1x16x128xbf16>
    %7 = vector.shape_cast %6 : vector<1x1x16x128xbf16> to vector<16x128xbf16>
    %c0_15 = arith.constant 0 : index
    %c0_16 = arith.constant 0 : index
    %c0_17 = arith.constant 0 : index
    %c0_18 = arith.constant 0 : index
    %8 = vector.load %arg6[%c0_15, %c0_16, %c0_17, %c0_18] : memref<1x1x16x128xbf16, #tpu.memory_space<vmem>>, vector<1x1x16x128xbf16>
    %9 = vector.shape_cast %8 : vector<1x1x16x128xbf16> to vector<16x128xbf16>
    %c0_19 = arith.constant 0 : index
    %c0_20 = arith.constant 0 : index
    %c0_21 = arith.constant 0 : index
    %c0_22 = arith.constant 0 : index
    %10 = vector.load %arg7[%c0_19, %c0_20, %c0_21, %c0_22] : memref<1x1x16x128xbf16, #tpu.memory_space<vmem>>, vector<1x1x16x128xbf16>
    %11 = vector.shape_cast %10 : vector<1x1x16x128xbf16> to vector<16x128xbf16>
    %c0_23 = arith.constant 0 : index
    %c0_24 = arith.constant 0 : index
    %c0_25 = arith.constant 0 : index
    %c0_26 = arith.constant 0 : index
    %12 = vector.load %arg8[%c0_23, %c0_24, %c0_25, %c0_26] : memref<1x1x16x128xbf16, #tpu.memory_space<vmem>>, vector<1x1x16x128xbf16>
    %13 = vector.shape_cast %12 : vector<1x1x16x128xbf16> to vector<16x128xbf16>
    %c0_27 = arith.constant 0 : index
    %c0_28 = arith.constant 0 : index
    %c0_29 = arith.constant 0 : index
    %c0_30 = arith.constant 0 : index
    %14 = vector.load %arg9[%c0_27, %c0_28, %c0_29, %c0_30] : memref<1x1x16x128xbf16, #tpu.memory_space<vmem>>, vector<1x1x16x128xbf16>
    %15 = vector.shape_cast %14 : vector<1x1x16x128xbf16> to vector<16x128xbf16>
    %c0_31 = arith.constant 0 : index
    %c0_32 = arith.constant 0 : index
    %c0_33 = arith.constant 0 : index
    %c0_34 = arith.constant 0 : index
    %16 = vector.load %arg10[%c0_31, %c0_32, %c0_33, %c0_34] : memref<1x1x16x128xbf16, #tpu.memory_space<vmem>>, vector<1x1x16x128xbf16>
    %17 = vector.shape_cast %16 : vector<1x1x16x128xbf16> to vector<16x128xbf16>
    %18 = arith.maximumf %1, %3 : vector<16x128xbf16>
    %19 = arith.maximumf %5, %7 : vector<16x128xbf16>
    %20 = arith.maximumf %9, %11 : vector<16x128xbf16>
    %21 = arith.maximumf %13, %15 : vector<16x128xbf16>
    %22 = arith.maximumf %18, %19 : vector<16x128xbf16>
    %23 = arith.maximumf %20, %21 : vector<16x128xbf16>
    %24 = arith.maximumf %22, %23 : vector<16x128xbf16>
    %25 = arith.maximumf %24, %17 : vector<16x128xbf16>
    %c0_35 = arith.constant 0 : index
    %c0_36 = arith.constant 0 : index
    %c0_37 = arith.constant 0 : index
    %c0_38 = arith.constant 0 : index
    %26 = vector.load %arg11[%c0_35, %c0_36, %c0_37, %c0_38] : memref<1x1x16x128xbf16, #tpu.memory_space<vmem>>, vector<1x1x16x128xbf16>
    %27 = vector.shape_cast %26 : vector<1x1x16x128xbf16> to vector<16x128xbf16>
    %28 = vector.shape_cast %25 : vector<16x128xbf16> to vector<1x1x16x128xbf16>
    tpu.vector_store %arg11[%c0_35, %c0_36, %c0_37, %c0_38], %28 {strides = array<i32>} : memref<1x1x16x128xbf16, #tpu.memory_space<vmem>>, vector<1x1x16x128xbf16>,
    return
  }
  func.func @transform_0(%arg0: i32, %arg1: i32) -> (i32, i32, i32, i32) {
    %c2_i32 = arith.constant 2 : i32
    %0 = arith.muli %c2_i32, %arg1 : i32
    %c0_i32 = arith.constant 0 : i32
    %1 = arith.addi %0, %c0_i32 : i32
    %c0_i32_0 = arith.constant 0 : i32
    %c0_i32_1 = arith.constant 0 : i32
    %c0_i32_2 = arith.constant 0 : i32
    return %arg0, %1, %c0_i32_0, %c0_i32_1 : i32, i32, i32, i32
  }
  func.func @transform_1(%arg0: i32, %arg1: i32) -> (i32, i32, i32, i32) {
    %c2_i32 = arith.constant 2 : i32
    %0 = arith.muli %c2_i32, %arg1 : i32
    %c1_i32 = arith.constant 1 : i32
    %1 = arith.addi %0, %c1_i32 : i32
    %c0_i32 = arith.constant 0 : i32
    %c0_i32_0 = arith.constant 0 : i32
    %c0_i32_1 = arith.constant 0 : i32
    return %arg0, %1, %c0_i32, %c0_i32_0 : i32, i32, i32, i32
  }
  func.func @transform_2(%arg0: i32, %arg1: i32) -> (i32, i32, i32, i32) {
    %c2_i32 = arith.constant 2 : i32
    %0 = arith.muli %c2_i32, %arg1 : i32
    %c2_i32_0 = arith.constant 2 : i32
    %1 = arith.addi %0, %c2_i32_0 : i32
    %c0_i32 = arith.constant 0 : i32
    %c0_i32_1 = arith.constant 0 : i32
    %c0_i32_2 = arith.constant 0 : i32
    return %arg0, %1, %c0_i32, %c0_i32_1 : i32, i32, i32, i32
  }
  func.func @transform_3(%arg0: i32, %arg1: i32) -> (i32, i32, i32, i32) {
    %c2_i32 = arith.constant 2 : i32
    %0 = arith.muli %c2_i32, %arg1 : i32
    %c0_i32 = arith.constant 0 : i32
    %1 = arith.addi %0, %c0_i32 : i32
    %c0_i32_0 = arith.constant 0 : i32
    %c0_i32_1 = arith.constant 0 : i32
    %c0_i32_2 = arith.constant 0 : i32
    return %arg0, %1, %c0_i32_0, %c0_i32_1 : i32, i32, i32, i32
  }
  func.func @transform_4(%arg0: i32, %arg1: i32) -> (i32, i32, i32, i32) {
    %c2_i32 = arith.constant 2 : i32
    %0 = arith.muli %c2_i32, %arg1 : i32
    %c1_i32 = arith.constant 1 : i32
    %1 = arith.addi %0, %c1_i32 : i32
    %c0_i32 = arith.constant 0 : i32
    %c0_i32_0 = arith.constant 0 : i32
    %c0_i32_1 = arith.constant 0 : i32
    return %arg0, %1, %c0_i32, %c0_i32_0 : i32, i32, i32, i32
  }
  func.func @transform_5(%arg0: i32, %arg1: i32) -> (i32, i32, i32, i32) {
    %c2_i32 = arith.constant 2 : i32
    %0 = arith.muli %c2_i32, %arg1 : i32
    %c2_i32_0 = arith.constant 2 : i32
    %1 = arith.addi %0, %c2_i32_0 : i32
    %c0_i32 = arith.constant 0 : i32
    %c0_i32_1 = arith.constant 0 : i32
    %c0_i32_2 = arith.constant 0 : i32
    return %arg0, %1, %c0_i32, %c0_i32_1 : i32, i32, i32, i32
  }
  func.func @transform_6(%arg0: i32, %arg1: i32) -> (i32, i32, i32, i32) {
    %c2_i32 = arith.constant 2 : i32
    %0 = arith.muli %c2_i32, %arg1 : i32
    %c0_i32 = arith.constant 0 : i32
    %1 = arith.addi %0, %c0_i32 : i32
    %c0_i32_0 = arith.constant 0 : i32
    %c0_i32_1 = arith.constant 0 : i32
    %c0_i32_2 = arith.constant 0 : i32
    return %arg0, %1, %c0_i32_0, %c0_i32_1 : i32, i32, i32, i32
  }
  func.func @transform_7(%arg0: i32, %arg1: i32) -> (i32, i32, i32, i32) {
    %c2_i32 = arith.constant 2 : i32
    %0 = arith.muli %c2_i32, %arg1 : i32
    %c1_i32 = arith.constant 1 : i32
    %1 = arith.addi %0, %c1_i32 : i32
    %c0_i32 = arith.constant 0 : i32
    %c0_i32_0 = arith.constant 0 : i32
    %c0_i32_1 = arith.constant 0 : i32
    return %arg0, %1, %c0_i32, %c0_i32_0 : i32, i32, i32, i32
  }
  func.func @transform_8(%arg0: i32, %arg1: i32) -> (i32, i32, i32, i32) {
    %c2_i32 = arith.constant 2 : i32
    %0 = arith.muli %c2_i32, %arg1 : i32
    %c2_i32_0 = arith.constant 2 : i32
    %1 = arith.addi %0, %c2_i32_0 : i32
    %c0_i32 = arith.constant 0 : i32
    %c0_i32_1 = arith.constant 0 : i32
    %c0_i32_2 = arith.constant 0 : i32
    return %arg0, %1, %c0_i32, %c0_i32_1 : i32, i32, i32, i32
  }
  func.func @transform_9(%arg0: i32, %arg1: i32) -> (i32, i32, i32, i32) {
    %c0_i32 = arith.constant 0 : i32
    %c0_i32_0 = arith.constant 0 : i32
    %c0_i32_1 = arith.constant 0 : i32
    return %arg0, %arg1, %c0_i32, %c0_i32_0 : i32, i32, i32, i32
  }
}

module attributes {stable_mosaic.version = 11 : i64} {
  func.func @_conv_tap_kernel(%arg0: i32, %arg1: i32, %arg2: memref<1x1x18x128xbf16, #tpu.memory_space<vmem>>, %arg3: memref<1x1x18x128xbf16, #tpu.memory_space<vmem>>, %arg4: memref<1x1x18x128xbf16, #tpu.memory_space<vmem>>, %arg5: memref<9x16x128xbf16, #tpu.memory_space<vmem>>, %arg6: memref<1x128xf32, #tpu.memory_space<vmem>>, %arg7: memref<1x1x16x128xbf16, #tpu.memory_space<vmem>>) attributes {dimension_semantics = [#tpu.dimension_semantics<parallel>, #tpu.dimension_semantics<parallel>], iteration_bounds = array<i64: 2, 16>, scalar_prefetch = 0 : i64, scratch_operands = 0 : i64, tpu.core_type = #tpu.core_type<tc>, window_params = [{transform_indices = @transform_0, window_bounds = array<i64: 1, 1, 18, 128>}, {transform_indices = @transform_1, window_bounds = array<i64: 1, 1, 18, 128>}, {transform_indices = @transform_2, window_bounds = array<i64: 1, 1, 18, 128>}, {pipeline_mode = #tpu.pipeline_mode<synchronous>, transform_indices = @transform_3, window_bounds = array<i64: 9, 16, 128>}, {pipeline_mode = #tpu.pipeline_mode<synchronous>, transform_indices = @transform_4, window_bounds = array<i64: 1, 128>}, {transform_indices = @transform_5, window_bounds = array<i64: 1, 1, 16, 128>}]} {
    %c0 = arith.constant 0 : index
    %c0_0 = arith.constant 0 : index
    %c0_1 = arith.constant 0 : index
    %c0_2 = arith.constant 0 : index
    %0 = vector.load %arg2[%c0, %c0_0, %c0_1, %c0_2] : memref<1x1x18x128xbf16, #tpu.memory_space<vmem>>, vector<1x1x18x128xbf16>
    %1 = vector.shape_cast %0 : vector<1x1x18x128xbf16> to vector<18x128xbf16>
    %c0_3 = arith.constant 0 : index
    %c0_4 = arith.constant 0 : index
    %c0_5 = arith.constant 0 : index
    %c0_6 = arith.constant 0 : index
    %2 = vector.load %arg3[%c0_3, %c0_4, %c0_5, %c0_6] : memref<1x1x18x128xbf16, #tpu.memory_space<vmem>>, vector<1x1x18x128xbf16>
    %3 = vector.shape_cast %2 : vector<1x1x18x128xbf16> to vector<18x128xbf16>
    %c0_7 = arith.constant 0 : index
    %c0_8 = arith.constant 0 : index
    %c0_9 = arith.constant 0 : index
    %c0_10 = arith.constant 0 : index
    %4 = vector.load %arg4[%c0_7, %c0_8, %c0_9, %c0_10] : memref<1x1x18x128xbf16, #tpu.memory_space<vmem>>, vector<1x1x18x128xbf16>
    %5 = vector.shape_cast %4 : vector<1x1x18x128xbf16> to vector<18x128xbf16>
    %cst = arith.constant 0.000000e+00 : f32
    %6 = vector.broadcast %cst : f32 to vector<16x128xf32>
    %7 = vector.extract_strided_slice %1 {offsets = [0, 0], sizes = [16, 128], strides = [1, 1]} : vector<18x128xbf16> to vector<16x128xbf16>
    %8 = vector.extract_strided_slice %7 {offsets = [0, 0], sizes = [16, 16], strides = [1, 1]} : vector<16x128xbf16> to vector<16x16xbf16>
    %c0_11 = arith.constant 0 : index
    %c0_12 = arith.constant 0 : index
    %c0_13 = arith.constant 0 : index
    %9 = vector.load %arg5[%c0_11, %c0_12, %c0_13] : memref<9x16x128xbf16, #tpu.memory_space<vmem>>, vector<1x16x128xbf16>
    %10 = vector.shape_cast %9 : vector<1x16x128xbf16> to vector<16x128xbf16>
    %cst_14 = arith.constant dense<0.000000e+00> : vector<16x128xf32>
    %11 = tpu.matmul %8, %10, %cst_14 {dimension_numbers = #tpu.dot_dimension_numbers<[1], [0], [0], [1], [0, 0, 1, 1], [], []>} : vector<16x16xbf16>, vector<16x128xbf16>, vector<16x128xf32> -> vector<16x128xf32>
    %12 = arith.addf %6, %11 : vector<16x128xf32>
    %13 = vector.extract_strided_slice %1 {offsets = [1, 0], sizes = [16, 128], strides = [1, 1]} : vector<18x128xbf16> to vector<16x128xbf16>
    %14 = vector.extract_strided_slice %13 {offsets = [0, 0], sizes = [16, 16], strides = [1, 1]} : vector<16x128xbf16> to vector<16x16xbf16>
    %c1 = arith.constant 1 : index
    %c0_15 = arith.constant 0 : index
    %c0_16 = arith.constant 0 : index
    %15 = vector.load %arg5[%c1, %c0_15, %c0_16] : memref<9x16x128xbf16, #tpu.memory_space<vmem>>, vector<1x16x128xbf16>
    %16 = vector.shape_cast %15 : vector<1x16x128xbf16> to vector<16x128xbf16>
    %cst_17 = arith.constant dense<0.000000e+00> : vector<16x128xf32>
    %17 = tpu.matmul %14, %16, %cst_17 {dimension_numbers = #tpu.dot_dimension_numbers<[1], [0], [0], [1], [0, 0, 1, 1], [], []>} : vector<16x16xbf16>, vector<16x128xbf16>, vector<16x128xf32> -> vector<16x128xf32>
    %18 = arith.addf %12, %17 : vector<16x128xf32>
    %19 = vector.extract_strided_slice %1 {offsets = [2, 0], sizes = [16, 128], strides = [1, 1]} : vector<18x128xbf16> to vector<16x128xbf16>
    %20 = vector.extract_strided_slice %19 {offsets = [0, 0], sizes = [16, 16], strides = [1, 1]} : vector<16x128xbf16> to vector<16x16xbf16>
    %c2 = arith.constant 2 : index
    %c0_18 = arith.constant 0 : index
    %c0_19 = arith.constant 0 : index
    %21 = vector.load %arg5[%c2, %c0_18, %c0_19] : memref<9x16x128xbf16, #tpu.memory_space<vmem>>, vector<1x16x128xbf16>
    %22 = vector.shape_cast %21 : vector<1x16x128xbf16> to vector<16x128xbf16>
    %cst_20 = arith.constant dense<0.000000e+00> : vector<16x128xf32>
    %23 = tpu.matmul %20, %22, %cst_20 {dimension_numbers = #tpu.dot_dimension_numbers<[1], [0], [0], [1], [0, 0, 1, 1], [], []>} : vector<16x16xbf16>, vector<16x128xbf16>, vector<16x128xf32> -> vector<16x128xf32>
    %24 = arith.addf %18, %23 : vector<16x128xf32>
    %25 = vector.extract_strided_slice %3 {offsets = [0, 0], sizes = [16, 128], strides = [1, 1]} : vector<18x128xbf16> to vector<16x128xbf16>
    %26 = vector.extract_strided_slice %25 {offsets = [0, 0], sizes = [16, 16], strides = [1, 1]} : vector<16x128xbf16> to vector<16x16xbf16>
    %c3 = arith.constant 3 : index
    %c0_21 = arith.constant 0 : index
    %c0_22 = arith.constant 0 : index
    %27 = vector.load %arg5[%c3, %c0_21, %c0_22] : memref<9x16x128xbf16, #tpu.memory_space<vmem>>, vector<1x16x128xbf16>
    %28 = vector.shape_cast %27 : vector<1x16x128xbf16> to vector<16x128xbf16>
    %cst_23 = arith.constant dense<0.000000e+00> : vector<16x128xf32>
    %29 = tpu.matmul %26, %28, %cst_23 {dimension_numbers = #tpu.dot_dimension_numbers<[1], [0], [0], [1], [0, 0, 1, 1], [], []>} : vector<16x16xbf16>, vector<16x128xbf16>, vector<16x128xf32> -> vector<16x128xf32>
    %30 = arith.addf %24, %29 : vector<16x128xf32>
    %31 = vector.extract_strided_slice %3 {offsets = [1, 0], sizes = [16, 128], strides = [1, 1]} : vector<18x128xbf16> to vector<16x128xbf16>
    %32 = vector.extract_strided_slice %31 {offsets = [0, 0], sizes = [16, 16], strides = [1, 1]} : vector<16x128xbf16> to vector<16x16xbf16>
    %c4 = arith.constant 4 : index
    %c0_24 = arith.constant 0 : index
    %c0_25 = arith.constant 0 : index
    %33 = vector.load %arg5[%c4, %c0_24, %c0_25] : memref<9x16x128xbf16, #tpu.memory_space<vmem>>, vector<1x16x128xbf16>
    %34 = vector.shape_cast %33 : vector<1x16x128xbf16> to vector<16x128xbf16>
    %cst_26 = arith.constant dense<0.000000e+00> : vector<16x128xf32>
    %35 = tpu.matmul %32, %34, %cst_26 {dimension_numbers = #tpu.dot_dimension_numbers<[1], [0], [0], [1], [0, 0, 1, 1], [], []>} : vector<16x16xbf16>, vector<16x128xbf16>, vector<16x128xf32> -> vector<16x128xf32>
    %36 = arith.addf %30, %35 : vector<16x128xf32>
    %37 = vector.extract_strided_slice %3 {offsets = [2, 0], sizes = [16, 128], strides = [1, 1]} : vector<18x128xbf16> to vector<16x128xbf16>
    %38 = vector.extract_strided_slice %37 {offsets = [0, 0], sizes = [16, 16], strides = [1, 1]} : vector<16x128xbf16> to vector<16x16xbf16>
    %c5 = arith.constant 5 : index
    %c0_27 = arith.constant 0 : index
    %c0_28 = arith.constant 0 : index
    %39 = vector.load %arg5[%c5, %c0_27, %c0_28] : memref<9x16x128xbf16, #tpu.memory_space<vmem>>, vector<1x16x128xbf16>
    %40 = vector.shape_cast %39 : vector<1x16x128xbf16> to vector<16x128xbf16>
    %cst_29 = arith.constant dense<0.000000e+00> : vector<16x128xf32>
    %41 = tpu.matmul %38, %40, %cst_29 {dimension_numbers = #tpu.dot_dimension_numbers<[1], [0], [0], [1], [0, 0, 1, 1], [], []>} : vector<16x16xbf16>, vector<16x128xbf16>, vector<16x128xf32> -> vector<16x128xf32>
    %42 = arith.addf %36, %41 : vector<16x128xf32>
    %43 = vector.extract_strided_slice %5 {offsets = [0, 0], sizes = [16, 128], strides = [1, 1]} : vector<18x128xbf16> to vector<16x128xbf16>
    %44 = vector.extract_strided_slice %43 {offsets = [0, 0], sizes = [16, 16], strides = [1, 1]} : vector<16x128xbf16> to vector<16x16xbf16>
    %c6 = arith.constant 6 : index
    %c0_30 = arith.constant 0 : index
    %c0_31 = arith.constant 0 : index
    %45 = vector.load %arg5[%c6, %c0_30, %c0_31] : memref<9x16x128xbf16, #tpu.memory_space<vmem>>, vector<1x16x128xbf16>
    %46 = vector.shape_cast %45 : vector<1x16x128xbf16> to vector<16x128xbf16>
    %cst_32 = arith.constant dense<0.000000e+00> : vector<16x128xf32>
    %47 = tpu.matmul %44, %46, %cst_32 {dimension_numbers = #tpu.dot_dimension_numbers<[1], [0], [0], [1], [0, 0, 1, 1], [], []>} : vector<16x16xbf16>, vector<16x128xbf16>, vector<16x128xf32> -> vector<16x128xf32>
    %48 = arith.addf %42, %47 : vector<16x128xf32>
    %49 = vector.extract_strided_slice %5 {offsets = [1, 0], sizes = [16, 128], strides = [1, 1]} : vector<18x128xbf16> to vector<16x128xbf16>
    %50 = vector.extract_strided_slice %49 {offsets = [0, 0], sizes = [16, 16], strides = [1, 1]} : vector<16x128xbf16> to vector<16x16xbf16>
    %c7 = arith.constant 7 : index
    %c0_33 = arith.constant 0 : index
    %c0_34 = arith.constant 0 : index
    %51 = vector.load %arg5[%c7, %c0_33, %c0_34] : memref<9x16x128xbf16, #tpu.memory_space<vmem>>, vector<1x16x128xbf16>
    %52 = vector.shape_cast %51 : vector<1x16x128xbf16> to vector<16x128xbf16>
    %cst_35 = arith.constant dense<0.000000e+00> : vector<16x128xf32>
    %53 = tpu.matmul %50, %52, %cst_35 {dimension_numbers = #tpu.dot_dimension_numbers<[1], [0], [0], [1], [0, 0, 1, 1], [], []>} : vector<16x16xbf16>, vector<16x128xbf16>, vector<16x128xf32> -> vector<16x128xf32>
    %54 = arith.addf %48, %53 : vector<16x128xf32>
    %55 = vector.extract_strided_slice %5 {offsets = [2, 0], sizes = [16, 128], strides = [1, 1]} : vector<18x128xbf16> to vector<16x128xbf16>
    %56 = vector.extract_strided_slice %55 {offsets = [0, 0], sizes = [16, 16], strides = [1, 1]} : vector<16x128xbf16> to vector<16x16xbf16>
    %c8 = arith.constant 8 : index
    %c0_36 = arith.constant 0 : index
    %c0_37 = arith.constant 0 : index
    %57 = vector.load %arg5[%c8, %c0_36, %c0_37] : memref<9x16x128xbf16, #tpu.memory_space<vmem>>, vector<1x16x128xbf16>
    %58 = vector.shape_cast %57 : vector<1x16x128xbf16> to vector<16x128xbf16>
    %cst_38 = arith.constant dense<0.000000e+00> : vector<16x128xf32>
    %59 = tpu.matmul %56, %58, %cst_38 {dimension_numbers = #tpu.dot_dimension_numbers<[1], [0], [0], [1], [0, 0, 1, 1], [], []>} : vector<16x16xbf16>, vector<16x128xbf16>, vector<16x128xf32> -> vector<16x128xf32>
    %60 = arith.addf %54, %59 : vector<16x128xf32>
    %c0_39 = arith.constant 0 : index
    %c0_40 = arith.constant 0 : index
    %61 = vector.load %arg6[%c0_39, %c0_40] : memref<1x128xf32, #tpu.memory_space<vmem>>, vector<1x128xf32>
    %62 = vector.broadcast %61 : vector<1x128xf32> to vector<16x128xf32>
    %63 = arith.addf %60, %62 : vector<16x128xf32>
    %cst_41 = arith.constant 0.000000e+00 : f32
    %64 = vector.broadcast %cst_41 : f32 to vector<16x128xf32>
    %65 = arith.maximumf %63, %64 : vector<16x128xf32>
    %66 = arith.truncf %65 : vector<16x128xf32> to vector<16x128xbf16>
    %c0_42 = arith.constant 0 : index
    %c0_43 = arith.constant 0 : index
    %c0_44 = arith.constant 0 : index
    %c0_45 = arith.constant 0 : index
    %67 = vector.load %arg7[%c0_42, %c0_43, %c0_44, %c0_45] : memref<1x1x16x128xbf16, #tpu.memory_space<vmem>>, vector<1x1x16x128xbf16>
    %68 = vector.shape_cast %67 : vector<1x1x16x128xbf16> to vector<16x128xbf16>
    %69 = vector.shape_cast %66 : vector<16x128xbf16> to vector<1x1x16x128xbf16>
    tpu.vector_store %arg7[%c0_42, %c0_43, %c0_44, %c0_45], %69 {strides = array<i32>} : memref<1x1x16x128xbf16, #tpu.memory_space<vmem>>, vector<1x1x16x128xbf16>,
    return
  }
  func.func @transform_0(%arg0: i32, %arg1: i32) -> (i32, i32, i32, i32) {
    %c0_i32 = arith.constant 0 : i32
    %0 = arith.addi %arg1, %c0_i32 : i32
    %c0_i32_0 = arith.constant 0 : i32
    %c0_i32_1 = arith.constant 0 : i32
    %c0_i32_2 = arith.constant 0 : i32
    return %arg0, %0, %c0_i32_0, %c0_i32_1 : i32, i32, i32, i32
  }
  func.func @transform_1(%arg0: i32, %arg1: i32) -> (i32, i32, i32, i32) {
    %c1_i32 = arith.constant 1 : i32
    %0 = arith.addi %arg1, %c1_i32 : i32
    %c0_i32 = arith.constant 0 : i32
    %c0_i32_0 = arith.constant 0 : i32
    %c0_i32_1 = arith.constant 0 : i32
    return %arg0, %0, %c0_i32, %c0_i32_0 : i32, i32, i32, i32
  }
  func.func @transform_2(%arg0: i32, %arg1: i32) -> (i32, i32, i32, i32) {
    %c2_i32 = arith.constant 2 : i32
    %0 = arith.addi %arg1, %c2_i32 : i32
    %c0_i32 = arith.constant 0 : i32
    %c0_i32_0 = arith.constant 0 : i32
    %c0_i32_1 = arith.constant 0 : i32
    return %arg0, %0, %c0_i32, %c0_i32_0 : i32, i32, i32, i32
  }
  func.func @transform_3(%arg0: i32, %arg1: i32) -> (i32, i32, i32) {
    %c0_i32 = arith.constant 0 : i32
    %c0_i32_0 = arith.constant 0 : i32
    %c0_i32_1 = arith.constant 0 : i32
    %c0_i32_2 = arith.constant 0 : i32
    return %c0_i32, %c0_i32_0, %c0_i32_1 : i32, i32, i32
  }
  func.func @transform_4(%arg0: i32, %arg1: i32) -> (i32, i32) {
    %c0_i32 = arith.constant 0 : i32
    %c0_i32_0 = arith.constant 0 : i32
    %c0_i32_1 = arith.constant 0 : i32
    return %c0_i32, %c0_i32_0 : i32, i32
  }
  func.func @transform_5(%arg0: i32, %arg1: i32) -> (i32, i32, i32, i32) {
    %c0_i32 = arith.constant 0 : i32
    %c0_i32_0 = arith.constant 0 : i32
    %c0_i32_1 = arith.constant 0 : i32
    return %arg0, %arg1, %c0_i32, %c0_i32_0 : i32, i32, i32, i32
  }
}

module attributes {stable_mosaic.version = 11 : i64} {
  func.func @_conv_tap_kernel(%arg0: i32, %arg1: i32, %arg2: memref<1x1x18x128xbf16, #tpu.memory_space<vmem>>, %arg3: memref<1x1x18x128xbf16, #tpu.memory_space<vmem>>, %arg4: memref<1x1x18x128xbf16, #tpu.memory_space<vmem>>, %arg5: memref<9x16x128xbf16, #tpu.memory_space<vmem>>, %arg6: memref<1x128xf32, #tpu.memory_space<vmem>>, %arg7: memref<1x1x16x128xbf16, #tpu.memory_space<vmem>>, %arg8: memref<1x1x16x128xbf16, #tpu.memory_space<vmem>>) attributes {dimension_semantics = [#tpu.dimension_semantics<parallel>, #tpu.dimension_semantics<parallel>], iteration_bounds = array<i64: 2, 16>, scalar_prefetch = 0 : i64, scratch_operands = 0 : i64, tpu.core_type = #tpu.core_type<tc>, window_params = [{transform_indices = @transform_0, window_bounds = array<i64: 1, 1, 18, 128>}, {transform_indices = @transform_1, window_bounds = array<i64: 1, 1, 18, 128>}, {transform_indices = @transform_2, window_bounds = array<i64: 1, 1, 18, 128>}, {pipeline_mode = #tpu.pipeline_mode<synchronous>, transform_indices = @transform_3, window_bounds = array<i64: 9, 16, 128>}, {pipeline_mode = #tpu.pipeline_mode<synchronous>, transform_indices = @transform_4, window_bounds = array<i64: 1, 128>}, {transform_indices = @transform_5, window_bounds = array<i64: 1, 1, 16, 128>}, {transform_indices = @transform_6, window_bounds = array<i64: 1, 1, 16, 128>}]} {
    %c0 = arith.constant 0 : index
    %c0_0 = arith.constant 0 : index
    %c0_1 = arith.constant 0 : index
    %c0_2 = arith.constant 0 : index
    %0 = vector.load %arg2[%c0, %c0_0, %c0_1, %c0_2] : memref<1x1x18x128xbf16, #tpu.memory_space<vmem>>, vector<1x1x18x128xbf16>
    %1 = vector.shape_cast %0 : vector<1x1x18x128xbf16> to vector<18x128xbf16>
    %c0_3 = arith.constant 0 : index
    %c0_4 = arith.constant 0 : index
    %c0_5 = arith.constant 0 : index
    %c0_6 = arith.constant 0 : index
    %2 = vector.load %arg3[%c0_3, %c0_4, %c0_5, %c0_6] : memref<1x1x18x128xbf16, #tpu.memory_space<vmem>>, vector<1x1x18x128xbf16>
    %3 = vector.shape_cast %2 : vector<1x1x18x128xbf16> to vector<18x128xbf16>
    %c0_7 = arith.constant 0 : index
    %c0_8 = arith.constant 0 : index
    %c0_9 = arith.constant 0 : index
    %c0_10 = arith.constant 0 : index
    %4 = vector.load %arg4[%c0_7, %c0_8, %c0_9, %c0_10] : memref<1x1x18x128xbf16, #tpu.memory_space<vmem>>, vector<1x1x18x128xbf16>
    %5 = vector.shape_cast %4 : vector<1x1x18x128xbf16> to vector<18x128xbf16>
    %cst = arith.constant 0.000000e+00 : f32
    %6 = vector.broadcast %cst : f32 to vector<16x128xf32>
    %7 = vector.extract_strided_slice %1 {offsets = [0, 0], sizes = [16, 128], strides = [1, 1]} : vector<18x128xbf16> to vector<16x128xbf16>
    %8 = vector.extract_strided_slice %7 {offsets = [0, 0], sizes = [16, 16], strides = [1, 1]} : vector<16x128xbf16> to vector<16x16xbf16>
    %c0_11 = arith.constant 0 : index
    %c0_12 = arith.constant 0 : index
    %c0_13 = arith.constant 0 : index
    %9 = vector.load %arg5[%c0_11, %c0_12, %c0_13] : memref<9x16x128xbf16, #tpu.memory_space<vmem>>, vector<1x16x128xbf16>
    %10 = vector.shape_cast %9 : vector<1x16x128xbf16> to vector<16x128xbf16>
    %cst_14 = arith.constant dense<0.000000e+00> : vector<16x128xf32>
    %11 = tpu.matmul %8, %10, %cst_14 {dimension_numbers = #tpu.dot_dimension_numbers<[1], [0], [0], [1], [0, 0, 1, 1], [], []>} : vector<16x16xbf16>, vector<16x128xbf16>, vector<16x128xf32> -> vector<16x128xf32>
    %12 = arith.addf %6, %11 : vector<16x128xf32>
    %13 = vector.extract_strided_slice %1 {offsets = [1, 0], sizes = [16, 128], strides = [1, 1]} : vector<18x128xbf16> to vector<16x128xbf16>
    %14 = vector.extract_strided_slice %13 {offsets = [0, 0], sizes = [16, 16], strides = [1, 1]} : vector<16x128xbf16> to vector<16x16xbf16>
    %c1 = arith.constant 1 : index
    %c0_15 = arith.constant 0 : index
    %c0_16 = arith.constant 0 : index
    %15 = vector.load %arg5[%c1, %c0_15, %c0_16] : memref<9x16x128xbf16, #tpu.memory_space<vmem>>, vector<1x16x128xbf16>
    %16 = vector.shape_cast %15 : vector<1x16x128xbf16> to vector<16x128xbf16>
    %cst_17 = arith.constant dense<0.000000e+00> : vector<16x128xf32>
    %17 = tpu.matmul %14, %16, %cst_17 {dimension_numbers = #tpu.dot_dimension_numbers<[1], [0], [0], [1], [0, 0, 1, 1], [], []>} : vector<16x16xbf16>, vector<16x128xbf16>, vector<16x128xf32> -> vector<16x128xf32>
    %18 = arith.addf %12, %17 : vector<16x128xf32>
    %19 = vector.extract_strided_slice %1 {offsets = [2, 0], sizes = [16, 128], strides = [1, 1]} : vector<18x128xbf16> to vector<16x128xbf16>
    %20 = vector.extract_strided_slice %19 {offsets = [0, 0], sizes = [16, 16], strides = [1, 1]} : vector<16x128xbf16> to vector<16x16xbf16>
    %c2 = arith.constant 2 : index
    %c0_18 = arith.constant 0 : index
    %c0_19 = arith.constant 0 : index
    %21 = vector.load %arg5[%c2, %c0_18, %c0_19] : memref<9x16x128xbf16, #tpu.memory_space<vmem>>, vector<1x16x128xbf16>
    %22 = vector.shape_cast %21 : vector<1x16x128xbf16> to vector<16x128xbf16>
    %cst_20 = arith.constant dense<0.000000e+00> : vector<16x128xf32>
    %23 = tpu.matmul %20, %22, %cst_20 {dimension_numbers = #tpu.dot_dimension_numbers<[1], [0], [0], [1], [0, 0, 1, 1], [], []>} : vector<16x16xbf16>, vector<16x128xbf16>, vector<16x128xf32> -> vector<16x128xf32>
    %24 = arith.addf %18, %23 : vector<16x128xf32>
    %25 = vector.extract_strided_slice %3 {offsets = [0, 0], sizes = [16, 128], strides = [1, 1]} : vector<18x128xbf16> to vector<16x128xbf16>
    %26 = vector.extract_strided_slice %25 {offsets = [0, 0], sizes = [16, 16], strides = [1, 1]} : vector<16x128xbf16> to vector<16x16xbf16>
    %c3 = arith.constant 3 : index
    %c0_21 = arith.constant 0 : index
    %c0_22 = arith.constant 0 : index
    %27 = vector.load %arg5[%c3, %c0_21, %c0_22] : memref<9x16x128xbf16, #tpu.memory_space<vmem>>, vector<1x16x128xbf16>
    %28 = vector.shape_cast %27 : vector<1x16x128xbf16> to vector<16x128xbf16>
    %cst_23 = arith.constant dense<0.000000e+00> : vector<16x128xf32>
    %29 = tpu.matmul %26, %28, %cst_23 {dimension_numbers = #tpu.dot_dimension_numbers<[1], [0], [0], [1], [0, 0, 1, 1], [], []>} : vector<16x16xbf16>, vector<16x128xbf16>, vector<16x128xf32> -> vector<16x128xf32>
    %30 = arith.addf %24, %29 : vector<16x128xf32>
    %31 = vector.extract_strided_slice %3 {offsets = [1, 0], sizes = [16, 128], strides = [1, 1]} : vector<18x128xbf16> to vector<16x128xbf16>
    %32 = vector.extract_strided_slice %31 {offsets = [0, 0], sizes = [16, 16], strides = [1, 1]} : vector<16x128xbf16> to vector<16x16xbf16>
    %c4 = arith.constant 4 : index
    %c0_24 = arith.constant 0 : index
    %c0_25 = arith.constant 0 : index
    %33 = vector.load %arg5[%c4, %c0_24, %c0_25] : memref<9x16x128xbf16, #tpu.memory_space<vmem>>, vector<1x16x128xbf16>
    %34 = vector.shape_cast %33 : vector<1x16x128xbf16> to vector<16x128xbf16>
    %cst_26 = arith.constant dense<0.000000e+00> : vector<16x128xf32>
    %35 = tpu.matmul %32, %34, %cst_26 {dimension_numbers = #tpu.dot_dimension_numbers<[1], [0], [0], [1], [0, 0, 1, 1], [], []>} : vector<16x16xbf16>, vector<16x128xbf16>, vector<16x128xf32> -> vector<16x128xf32>
    %36 = arith.addf %30, %35 : vector<16x128xf32>
    %37 = vector.extract_strided_slice %3 {offsets = [2, 0], sizes = [16, 128], strides = [1, 1]} : vector<18x128xbf16> to vector<16x128xbf16>
    %38 = vector.extract_strided_slice %37 {offsets = [0, 0], sizes = [16, 16], strides = [1, 1]} : vector<16x128xbf16> to vector<16x16xbf16>
    %c5 = arith.constant 5 : index
    %c0_27 = arith.constant 0 : index
    %c0_28 = arith.constant 0 : index
    %39 = vector.load %arg5[%c5, %c0_27, %c0_28] : memref<9x16x128xbf16, #tpu.memory_space<vmem>>, vector<1x16x128xbf16>
    %40 = vector.shape_cast %39 : vector<1x16x128xbf16> to vector<16x128xbf16>
    %cst_29 = arith.constant dense<0.000000e+00> : vector<16x128xf32>
    %41 = tpu.matmul %38, %40, %cst_29 {dimension_numbers = #tpu.dot_dimension_numbers<[1], [0], [0], [1], [0, 0, 1, 1], [], []>} : vector<16x16xbf16>, vector<16x128xbf16>, vector<16x128xf32> -> vector<16x128xf32>
    %42 = arith.addf %36, %41 : vector<16x128xf32>
    %43 = vector.extract_strided_slice %5 {offsets = [0, 0], sizes = [16, 128], strides = [1, 1]} : vector<18x128xbf16> to vector<16x128xbf16>
    %44 = vector.extract_strided_slice %43 {offsets = [0, 0], sizes = [16, 16], strides = [1, 1]} : vector<16x128xbf16> to vector<16x16xbf16>
    %c6 = arith.constant 6 : index
    %c0_30 = arith.constant 0 : index
    %c0_31 = arith.constant 0 : index
    %45 = vector.load %arg5[%c6, %c0_30, %c0_31] : memref<9x16x128xbf16, #tpu.memory_space<vmem>>, vector<1x16x128xbf16>
    %46 = vector.shape_cast %45 : vector<1x16x128xbf16> to vector<16x128xbf16>
    %cst_32 = arith.constant dense<0.000000e+00> : vector<16x128xf32>
    %47 = tpu.matmul %44, %46, %cst_32 {dimension_numbers = #tpu.dot_dimension_numbers<[1], [0], [0], [1], [0, 0, 1, 1], [], []>} : vector<16x16xbf16>, vector<16x128xbf16>, vector<16x128xf32> -> vector<16x128xf32>
    %48 = arith.addf %42, %47 : vector<16x128xf32>
    %49 = vector.extract_strided_slice %5 {offsets = [1, 0], sizes = [16, 128], strides = [1, 1]} : vector<18x128xbf16> to vector<16x128xbf16>
    %50 = vector.extract_strided_slice %49 {offsets = [0, 0], sizes = [16, 16], strides = [1, 1]} : vector<16x128xbf16> to vector<16x16xbf16>
    %c7 = arith.constant 7 : index
    %c0_33 = arith.constant 0 : index
    %c0_34 = arith.constant 0 : index
    %51 = vector.load %arg5[%c7, %c0_33, %c0_34] : memref<9x16x128xbf16, #tpu.memory_space<vmem>>, vector<1x16x128xbf16>
    %52 = vector.shape_cast %51 : vector<1x16x128xbf16> to vector<16x128xbf16>
    %cst_35 = arith.constant dense<0.000000e+00> : vector<16x128xf32>
    %53 = tpu.matmul %50, %52, %cst_35 {dimension_numbers = #tpu.dot_dimension_numbers<[1], [0], [0], [1], [0, 0, 1, 1], [], []>} : vector<16x16xbf16>, vector<16x128xbf16>, vector<16x128xf32> -> vector<16x128xf32>
    %54 = arith.addf %48, %53 : vector<16x128xf32>
    %55 = vector.extract_strided_slice %5 {offsets = [2, 0], sizes = [16, 128], strides = [1, 1]} : vector<18x128xbf16> to vector<16x128xbf16>
    %56 = vector.extract_strided_slice %55 {offsets = [0, 0], sizes = [16, 16], strides = [1, 1]} : vector<16x128xbf16> to vector<16x16xbf16>
    %c8 = arith.constant 8 : index
    %c0_36 = arith.constant 0 : index
    %c0_37 = arith.constant 0 : index
    %57 = vector.load %arg5[%c8, %c0_36, %c0_37] : memref<9x16x128xbf16, #tpu.memory_space<vmem>>, vector<1x16x128xbf16>
    %58 = vector.shape_cast %57 : vector<1x16x128xbf16> to vector<16x128xbf16>
    %cst_38 = arith.constant dense<0.000000e+00> : vector<16x128xf32>
    %59 = tpu.matmul %56, %58, %cst_38 {dimension_numbers = #tpu.dot_dimension_numbers<[1], [0], [0], [1], [0, 0, 1, 1], [], []>} : vector<16x16xbf16>, vector<16x128xbf16>, vector<16x128xf32> -> vector<16x128xf32>
    %60 = arith.addf %54, %59 : vector<16x128xf32>
    %c0_39 = arith.constant 0 : index
    %c0_40 = arith.constant 0 : index
    %61 = vector.load %arg6[%c0_39, %c0_40] : memref<1x128xf32, #tpu.memory_space<vmem>>, vector<1x128xf32>
    %62 = vector.broadcast %61 : vector<1x128xf32> to vector<16x128xf32>
    %63 = arith.addf %60, %62 : vector<16x128xf32>
    %c0_41 = arith.constant 0 : index
    %c0_42 = arith.constant 0 : index
    %c0_43 = arith.constant 0 : index
    %c0_44 = arith.constant 0 : index
    %64 = vector.load %arg7[%c0_41, %c0_42, %c0_43, %c0_44] : memref<1x1x16x128xbf16, #tpu.memory_space<vmem>>, vector<1x1x16x128xbf16>
    %65 = vector.shape_cast %64 : vector<1x1x16x128xbf16> to vector<16x128xbf16>
    %66 = arith.extf %65 : vector<16x128xbf16> to vector<16x128xf32>
    %67 = arith.addf %63, %66 : vector<16x128xf32>
    %cst_45 = arith.constant 0.000000e+00 : f32
    %68 = vector.broadcast %cst_45 : f32 to vector<16x128xf32>
    %69 = arith.maximumf %67, %68 : vector<16x128xf32>
    %70 = arith.truncf %69 : vector<16x128xf32> to vector<16x128xbf16>
    %c0_46 = arith.constant 0 : index
    %c0_47 = arith.constant 0 : index
    %c0_48 = arith.constant 0 : index
    %c0_49 = arith.constant 0 : index
    %71 = vector.load %arg8[%c0_46, %c0_47, %c0_48, %c0_49] : memref<1x1x16x128xbf16, #tpu.memory_space<vmem>>, vector<1x1x16x128xbf16>
    %72 = vector.shape_cast %71 : vector<1x1x16x128xbf16> to vector<16x128xbf16>
    %73 = vector.shape_cast %70 : vector<16x128xbf16> to vector<1x1x16x128xbf16>
    tpu.vector_store %arg8[%c0_46, %c0_47, %c0_48, %c0_49], %73 {strides = array<i32>} : memref<1x1x16x128xbf16, #tpu.memory_space<vmem>>, vector<1x1x16x128xbf16>,
    return
  }
  func.func @transform_0(%arg0: i32, %arg1: i32) -> (i32, i32, i32, i32) {
    %c0_i32 = arith.constant 0 : i32
    %0 = arith.addi %arg1, %c0_i32 : i32
    %c0_i32_0 = arith.constant 0 : i32
    %c0_i32_1 = arith.constant 0 : i32
    %c0_i32_2 = arith.constant 0 : i32
    return %arg0, %0, %c0_i32_0, %c0_i32_1 : i32, i32, i32, i32
  }
  func.func @transform_1(%arg0: i32, %arg1: i32) -> (i32, i32, i32, i32) {
    %c1_i32 = arith.constant 1 : i32
    %0 = arith.addi %arg1, %c1_i32 : i32
    %c0_i32 = arith.constant 0 : i32
    %c0_i32_0 = arith.constant 0 : i32
    %c0_i32_1 = arith.constant 0 : i32
    return %arg0, %0, %c0_i32, %c0_i32_0 : i32, i32, i32, i32
  }
  func.func @transform_2(%arg0: i32, %arg1: i32) -> (i32, i32, i32, i32) {
    %c2_i32 = arith.constant 2 : i32
    %0 = arith.addi %arg1, %c2_i32 : i32
    %c0_i32 = arith.constant 0 : i32
    %c0_i32_0 = arith.constant 0 : i32
    %c0_i32_1 = arith.constant 0 : i32
    return %arg0, %0, %c0_i32, %c0_i32_0 : i32, i32, i32, i32
  }
  func.func @transform_3(%arg0: i32, %arg1: i32) -> (i32, i32, i32) {
    %c0_i32 = arith.constant 0 : i32
    %c0_i32_0 = arith.constant 0 : i32
    %c0_i32_1 = arith.constant 0 : i32
    %c0_i32_2 = arith.constant 0 : i32
    return %c0_i32, %c0_i32_0, %c0_i32_1 : i32, i32, i32
  }
  func.func @transform_4(%arg0: i32, %arg1: i32) -> (i32, i32) {
    %c0_i32 = arith.constant 0 : i32
    %c0_i32_0 = arith.constant 0 : i32
    %c0_i32_1 = arith.constant 0 : i32
    return %c0_i32, %c0_i32_0 : i32, i32
  }
  func.func @transform_5(%arg0: i32, %arg1: i32) -> (i32, i32, i32, i32) {
    %c0_i32 = arith.constant 0 : i32
    %c0_i32_0 = arith.constant 0 : i32
    %c0_i32_1 = arith.constant 0 : i32
    return %arg0, %arg1, %c0_i32, %c0_i32_0 : i32, i32, i32, i32
  }
  func.func @transform_6(%arg0: i32, %arg1: i32) -> (i32, i32, i32, i32) {
    %c0_i32 = arith.constant 0 : i32
    %c0_i32_0 = arith.constant 0 : i32
    %c0_i32_1 = arith.constant 0 : i32
    return %arg0, %arg1, %c0_i32, %c0_i32_0 : i32, i32, i32, i32
  }
}

module attributes {stable_mosaic.version = 11 : i64} {
  func.func @_conv_tap_kernel(%arg0: i32, %arg1: i32, %arg2: memref<1x1x8x128xbf16, #tpu.memory_space<vmem>>, %arg3: memref<1x1x8x128xbf16, #tpu.memory_space<vmem>>, %arg4: memref<1x1x8x128xbf16, #tpu.memory_space<vmem>>, %arg5: memref<1x1x8x128xbf16, #tpu.memory_space<vmem>>, %arg6: memref<1x1x8x128xbf16, #tpu.memory_space<vmem>>, %arg7: memref<1x1x8x128xbf16, #tpu.memory_space<vmem>>, %arg8: memref<1x1x8x128xbf16, #tpu.memory_space<vmem>>, %arg9: memref<1x1x8x128xbf16, #tpu.memory_space<vmem>>, %arg10: memref<1x1x8x128xbf16, #tpu.memory_space<vmem>>, %arg11: memref<9x16x128xbf16, #tpu.memory_space<vmem>>, %arg12: memref<1x128xf32, #tpu.memory_space<vmem>>, %arg13: memref<1x1x8x128xbf16, #tpu.memory_space<vmem>>) attributes {dimension_semantics = [#tpu.dimension_semantics<parallel>, #tpu.dimension_semantics<parallel>], iteration_bounds = array<i64: 2, 8>, scalar_prefetch = 0 : i64, scratch_operands = 0 : i64, tpu.core_type = #tpu.core_type<tc>, window_params = [{transform_indices = @transform_0, window_bounds = array<i64: 1, 1, 8, 128>}, {transform_indices = @transform_1, window_bounds = array<i64: 1, 1, 8, 128>}, {transform_indices = @transform_2, window_bounds = array<i64: 1, 1, 8, 128>}, {transform_indices = @transform_3, window_bounds = array<i64: 1, 1, 8, 128>}, {transform_indices = @transform_4, window_bounds = array<i64: 1, 1, 8, 128>}, {transform_indices = @transform_5, window_bounds = array<i64: 1, 1, 8, 128>}, {transform_indices = @transform_6, window_bounds = array<i64: 1, 1, 8, 128>}, {transform_indices = @transform_7, window_bounds = array<i64: 1, 1, 8, 128>}, {transform_indices = @transform_8, window_bounds = array<i64: 1, 1, 8, 128>}, {pipeline_mode = #tpu.pipeline_mode<synchronous>, transform_indices = @transform_9, window_bounds = array<i64: 9, 16, 128>}, {pipeline_mode = #tpu.pipeline_mode<synchronous>, transform_indices = @transform_10, window_bounds = array<i64: 1, 128>}, {transform_indices = @transform_11, window_bounds = array<i64: 1, 1, 8, 128>}]} {
    %c0 = arith.constant 0 : index
    %c0_0 = arith.constant 0 : index
    %c0_1 = arith.constant 0 : index
    %c0_2 = arith.constant 0 : index
    %0 = vector.load %arg2[%c0, %c0_0, %c0_1, %c0_2] : memref<1x1x8x128xbf16, #tpu.memory_space<vmem>>, vector<1x1x8x128xbf16>
    %1 = vector.shape_cast %0 : vector<1x1x8x128xbf16> to vector<8x128xbf16>
    %c0_3 = arith.constant 0 : index
    %c0_4 = arith.constant 0 : index
    %c0_5 = arith.constant 0 : index
    %c0_6 = arith.constant 0 : index
    %2 = vector.load %arg3[%c0_3, %c0_4, %c0_5, %c0_6] : memref<1x1x8x128xbf16, #tpu.memory_space<vmem>>, vector<1x1x8x128xbf16>
    %3 = vector.shape_cast %2 : vector<1x1x8x128xbf16> to vector<8x128xbf16>
    %c0_7 = arith.constant 0 : index
    %c0_8 = arith.constant 0 : index
    %c0_9 = arith.constant 0 : index
    %c0_10 = arith.constant 0 : index
    %4 = vector.load %arg4[%c0_7, %c0_8, %c0_9, %c0_10] : memref<1x1x8x128xbf16, #tpu.memory_space<vmem>>, vector<1x1x8x128xbf16>
    %5 = vector.shape_cast %4 : vector<1x1x8x128xbf16> to vector<8x128xbf16>
    %c0_11 = arith.constant 0 : index
    %c0_12 = arith.constant 0 : index
    %c0_13 = arith.constant 0 : index
    %c0_14 = arith.constant 0 : index
    %6 = vector.load %arg5[%c0_11, %c0_12, %c0_13, %c0_14] : memref<1x1x8x128xbf16, #tpu.memory_space<vmem>>, vector<1x1x8x128xbf16>
    %7 = vector.shape_cast %6 : vector<1x1x8x128xbf16> to vector<8x128xbf16>
    %c0_15 = arith.constant 0 : index
    %c0_16 = arith.constant 0 : index
    %c0_17 = arith.constant 0 : index
    %c0_18 = arith.constant 0 : index
    %8 = vector.load %arg6[%c0_15, %c0_16, %c0_17, %c0_18] : memref<1x1x8x128xbf16, #tpu.memory_space<vmem>>, vector<1x1x8x128xbf16>
    %9 = vector.shape_cast %8 : vector<1x1x8x128xbf16> to vector<8x128xbf16>
    %c0_19 = arith.constant 0 : index
    %c0_20 = arith.constant 0 : index
    %c0_21 = arith.constant 0 : index
    %c0_22 = arith.constant 0 : index
    %10 = vector.load %arg7[%c0_19, %c0_20, %c0_21, %c0_22] : memref<1x1x8x128xbf16, #tpu.memory_space<vmem>>, vector<1x1x8x128xbf16>
    %11 = vector.shape_cast %10 : vector<1x1x8x128xbf16> to vector<8x128xbf16>
    %c0_23 = arith.constant 0 : index
    %c0_24 = arith.constant 0 : index
    %c0_25 = arith.constant 0 : index
    %c0_26 = arith.constant 0 : index
    %12 = vector.load %arg8[%c0_23, %c0_24, %c0_25, %c0_26] : memref<1x1x8x128xbf16, #tpu.memory_space<vmem>>, vector<1x1x8x128xbf16>
    %13 = vector.shape_cast %12 : vector<1x1x8x128xbf16> to vector<8x128xbf16>
    %c0_27 = arith.constant 0 : index
    %c0_28 = arith.constant 0 : index
    %c0_29 = arith.constant 0 : index
    %c0_30 = arith.constant 0 : index
    %14 = vector.load %arg9[%c0_27, %c0_28, %c0_29, %c0_30] : memref<1x1x8x128xbf16, #tpu.memory_space<vmem>>, vector<1x1x8x128xbf16>
    %15 = vector.shape_cast %14 : vector<1x1x8x128xbf16> to vector<8x128xbf16>
    %c0_31 = arith.constant 0 : index
    %c0_32 = arith.constant 0 : index
    %c0_33 = arith.constant 0 : index
    %c0_34 = arith.constant 0 : index
    %16 = vector.load %arg10[%c0_31, %c0_32, %c0_33, %c0_34] : memref<1x1x8x128xbf16, #tpu.memory_space<vmem>>, vector<1x1x8x128xbf16>
    %17 = vector.shape_cast %16 : vector<1x1x8x128xbf16> to vector<8x128xbf16>
    %cst = arith.constant 0.000000e+00 : f32
    %18 = vector.broadcast %cst : f32 to vector<8x128xf32>
    %19 = vector.extract_strided_slice %1 {offsets = [0, 0], sizes = [8, 16], strides = [1, 1]} : vector<8x128xbf16> to vector<8x16xbf16>
    %c0_35 = arith.constant 0 : index
    %c0_36 = arith.constant 0 : index
    %c0_37 = arith.constant 0 : index
    %20 = vector.load %arg11[%c0_35, %c0_36, %c0_37] : memref<9x16x128xbf16, #tpu.memory_space<vmem>>, vector<1x16x128xbf16>
    %21 = vector.shape_cast %20 : vector<1x16x128xbf16> to vector<16x128xbf16>
    %cst_38 = arith.constant dense<0.000000e+00> : vector<8x128xf32>
    %22 = tpu.matmul %19, %21, %cst_38 {dimension_numbers = #tpu.dot_dimension_numbers<[1], [0], [0], [1], [0, 0, 1, 1], [], []>} : vector<8x16xbf16>, vector<16x128xbf16>, vector<8x128xf32> -> vector<8x128xf32>
    %23 = arith.addf %18, %22 : vector<8x128xf32>
    %24 = vector.extract_strided_slice %7 {offsets = [0, 0], sizes = [8, 16], strides = [1, 1]} : vector<8x128xbf16> to vector<8x16xbf16>
    %c1 = arith.constant 1 : index
    %c0_39 = arith.constant 0 : index
    %c0_40 = arith.constant 0 : index
    %25 = vector.load %arg11[%c1, %c0_39, %c0_40] : memref<9x16x128xbf16, #tpu.memory_space<vmem>>, vector<1x16x128xbf16>
    %26 = vector.shape_cast %25 : vector<1x16x128xbf16> to vector<16x128xbf16>
    %cst_41 = arith.constant dense<0.000000e+00> : vector<8x128xf32>
    %27 = tpu.matmul %24, %26, %cst_41 {dimension_numbers = #tpu.dot_dimension_numbers<[1], [0], [0], [1], [0, 0, 1, 1], [], []>} : vector<8x16xbf16>, vector<16x128xbf16>, vector<8x128xf32> -> vector<8x128xf32>
    %28 = arith.addf %23, %27 : vector<8x128xf32>
    %29 = vector.extract_strided_slice %13 {offsets = [0, 0], sizes = [8, 16], strides = [1, 1]} : vector<8x128xbf16> to vector<8x16xbf16>
    %c2 = arith.constant 2 : index
    %c0_42 = arith.constant 0 : index
    %c0_43 = arith.constant 0 : index
    %30 = vector.load %arg11[%c2, %c0_42, %c0_43] : memref<9x16x128xbf16, #tpu.memory_space<vmem>>, vector<1x16x128xbf16>
    %31 = vector.shape_cast %30 : vector<1x16x128xbf16> to vector<16x128xbf16>
    %cst_44 = arith.constant dense<0.000000e+00> : vector<8x128xf32>
    %32 = tpu.matmul %29, %31, %cst_44 {dimension_numbers = #tpu.dot_dimension_numbers<[1], [0], [0], [1], [0, 0, 1, 1], [], []>} : vector<8x16xbf16>, vector<16x128xbf16>, vector<8x128xf32> -> vector<8x128xf32>
    %33 = arith.addf %28, %32 : vector<8x128xf32>
    %34 = vector.extract_strided_slice %3 {offsets = [0, 0], sizes = [8, 16], strides = [1, 1]} : vector<8x128xbf16> to vector<8x16xbf16>
    %c3 = arith.constant 3 : index
    %c0_45 = arith.constant 0 : index
    %c0_46 = arith.constant 0 : index
    %35 = vector.load %arg11[%c3, %c0_45, %c0_46] : memref<9x16x128xbf16, #tpu.memory_space<vmem>>, vector<1x16x128xbf16>
    %36 = vector.shape_cast %35 : vector<1x16x128xbf16> to vector<16x128xbf16>
    %cst_47 = arith.constant dense<0.000000e+00> : vector<8x128xf32>
    %37 = tpu.matmul %34, %36, %cst_47 {dimension_numbers = #tpu.dot_dimension_numbers<[1], [0], [0], [1], [0, 0, 1, 1], [], []>} : vector<8x16xbf16>, vector<16x128xbf16>, vector<8x128xf32> -> vector<8x128xf32>
    %38 = arith.addf %33, %37 : vector<8x128xf32>
    %39 = vector.extract_strided_slice %9 {offsets = [0, 0], sizes = [8, 16], strides = [1, 1]} : vector<8x128xbf16> to vector<8x16xbf16>
    %c4 = arith.constant 4 : index
    %c0_48 = arith.constant 0 : index
    %c0_49 = arith.constant 0 : index
    %40 = vector.load %arg11[%c4, %c0_48, %c0_49] : memref<9x16x128xbf16, #tpu.memory_space<vmem>>, vector<1x16x128xbf16>
    %41 = vector.shape_cast %40 : vector<1x16x128xbf16> to vector<16x128xbf16>
    %cst_50 = arith.constant dense<0.000000e+00> : vector<8x128xf32>
    %42 = tpu.matmul %39, %41, %cst_50 {dimension_numbers = #tpu.dot_dimension_numbers<[1], [0], [0], [1], [0, 0, 1, 1], [], []>} : vector<8x16xbf16>, vector<16x128xbf16>, vector<8x128xf32> -> vector<8x128xf32>
    %43 = arith.addf %38, %42 : vector<8x128xf32>
    %44 = vector.extract_strided_slice %15 {offsets = [0, 0], sizes = [8, 16], strides = [1, 1]} : vector<8x128xbf16> to vector<8x16xbf16>
    %c5 = arith.constant 5 : index
    %c0_51 = arith.constant 0 : index
    %c0_52 = arith.constant 0 : index
    %45 = vector.load %arg11[%c5, %c0_51, %c0_52] : memref<9x16x128xbf16, #tpu.memory_space<vmem>>, vector<1x16x128xbf16>
    %46 = vector.shape_cast %45 : vector<1x16x128xbf16> to vector<16x128xbf16>
    %cst_53 = arith.constant dense<0.000000e+00> : vector<8x128xf32>
    %47 = tpu.matmul %44, %46, %cst_53 {dimension_numbers = #tpu.dot_dimension_numbers<[1], [0], [0], [1], [0, 0, 1, 1], [], []>} : vector<8x16xbf16>, vector<16x128xbf16>, vector<8x128xf32> -> vector<8x128xf32>
    %48 = arith.addf %43, %47 : vector<8x128xf32>
    %49 = vector.extract_strided_slice %5 {offsets = [0, 0], sizes = [8, 16], strides = [1, 1]} : vector<8x128xbf16> to vector<8x16xbf16>
    %c6 = arith.constant 6 : index
    %c0_54 = arith.constant 0 : index
    %c0_55 = arith.constant 0 : index
    %50 = vector.load %arg11[%c6, %c0_54, %c0_55] : memref<9x16x128xbf16, #tpu.memory_space<vmem>>, vector<1x16x128xbf16>
    %51 = vector.shape_cast %50 : vector<1x16x128xbf16> to vector<16x128xbf16>
    %cst_56 = arith.constant dense<0.000000e+00> : vector<8x128xf32>
    %52 = tpu.matmul %49, %51, %cst_56 {dimension_numbers = #tpu.dot_dimension_numbers<[1], [0], [0], [1], [0, 0, 1, 1], [], []>} : vector<8x16xbf16>, vector<16x128xbf16>, vector<8x128xf32> -> vector<8x128xf32>
    %53 = arith.addf %48, %52 : vector<8x128xf32>
    %54 = vector.extract_strided_slice %11 {offsets = [0, 0], sizes = [8, 16], strides = [1, 1]} : vector<8x128xbf16> to vector<8x16xbf16>
    %c7 = arith.constant 7 : index
    %c0_57 = arith.constant 0 : index
    %c0_58 = arith.constant 0 : index
    %55 = vector.load %arg11[%c7, %c0_57, %c0_58] : memref<9x16x128xbf16, #tpu.memory_space<vmem>>, vector<1x16x128xbf16>
    %56 = vector.shape_cast %55 : vector<1x16x128xbf16> to vector<16x128xbf16>
    %cst_59 = arith.constant dense<0.000000e+00> : vector<8x128xf32>
    %57 = tpu.matmul %54, %56, %cst_59 {dimension_numbers = #tpu.dot_dimension_numbers<[1], [0], [0], [1], [0, 0, 1, 1], [], []>} : vector<8x16xbf16>, vector<16x128xbf16>, vector<8x128xf32> -> vector<8x128xf32>
    %58 = arith.addf %53, %57 : vector<8x128xf32>
    %59 = vector.extract_strided_slice %17 {offsets = [0, 0], sizes = [8, 16], strides = [1, 1]} : vector<8x128xbf16> to vector<8x16xbf16>
    %c8 = arith.constant 8 : index
    %c0_60 = arith.constant 0 : index
    %c0_61 = arith.constant 0 : index
    %60 = vector.load %arg11[%c8, %c0_60, %c0_61] : memref<9x16x128xbf16, #tpu.memory_space<vmem>>, vector<1x16x128xbf16>
    %61 = vector.shape_cast %60 : vector<1x16x128xbf16> to vector<16x128xbf16>
    %cst_62 = arith.constant dense<0.000000e+00> : vector<8x128xf32>
    %62 = tpu.matmul %59, %61, %cst_62 {dimension_numbers = #tpu.dot_dimension_numbers<[1], [0], [0], [1], [0, 0, 1, 1], [], []>} : vector<8x16xbf16>, vector<16x128xbf16>, vector<8x128xf32> -> vector<8x128xf32>
    %63 = arith.addf %58, %62 : vector<8x128xf32>
    %c0_63 = arith.constant 0 : index
    %c0_64 = arith.constant 0 : index
    %64 = vector.load %arg12[%c0_63, %c0_64] : memref<1x128xf32, #tpu.memory_space<vmem>>, vector<1x128xf32>
    %65 = vector.broadcast %64 : vector<1x128xf32> to vector<8x128xf32>
    %66 = arith.addf %63, %65 : vector<8x128xf32>
    %cst_65 = arith.constant 0.000000e+00 : f32
    %67 = vector.broadcast %cst_65 : f32 to vector<8x128xf32>
    %68 = arith.maximumf %66, %67 : vector<8x128xf32>
    %69 = arith.truncf %68 : vector<8x128xf32> to vector<8x128xbf16>
    %c0_66 = arith.constant 0 : index
    %c0_67 = arith.constant 0 : index
    %c0_68 = arith.constant 0 : index
    %c0_69 = arith.constant 0 : index
    %70 = vector.load %arg13[%c0_66, %c0_67, %c0_68, %c0_69] : memref<1x1x8x128xbf16, #tpu.memory_space<vmem>>, vector<1x1x8x128xbf16>
    %71 = vector.shape_cast %70 : vector<1x1x8x128xbf16> to vector<8x128xbf16>
    %72 = vector.shape_cast %69 : vector<8x128xbf16> to vector<1x1x8x128xbf16>
    tpu.vector_store %arg13[%c0_66, %c0_67, %c0_68, %c0_69], %72 {strides = array<i32>} : memref<1x1x8x128xbf16, #tpu.memory_space<vmem>>, vector<1x1x8x128xbf16>,
    return
  }
  func.func @transform_0(%arg0: i32, %arg1: i32) -> (i32, i32, i32, i32) {
    %c2_i32 = arith.constant 2 : i32
    %0 = arith.muli %c2_i32, %arg1 : i32
    %c0_i32 = arith.constant 0 : i32
    %1 = arith.addi %0, %c0_i32 : i32
    %c0_i32_0 = arith.constant 0 : i32
    %c0_i32_1 = arith.constant 0 : i32
    %c0_i32_2 = arith.constant 0 : i32
    return %arg0, %1, %c0_i32_0, %c0_i32_1 : i32, i32, i32, i32
  }
  func.func @transform_1(%arg0: i32, %arg1: i32) -> (i32, i32, i32, i32) {
    %c2_i32 = arith.constant 2 : i32
    %0 = arith.muli %c2_i32, %arg1 : i32
    %c1_i32 = arith.constant 1 : i32
    %1 = arith.addi %0, %c1_i32 : i32
    %c0_i32 = arith.constant 0 : i32
    %c0_i32_0 = arith.constant 0 : i32
    %c0_i32_1 = arith.constant 0 : i32
    return %arg0, %1, %c0_i32, %c0_i32_0 : i32, i32, i32, i32
  }
  func.func @transform_2(%arg0: i32, %arg1: i32) -> (i32, i32, i32, i32) {
    %c2_i32 = arith.constant 2 : i32
    %0 = arith.muli %c2_i32, %arg1 : i32
    %c2_i32_0 = arith.constant 2 : i32
    %1 = arith.addi %0, %c2_i32_0 : i32
    %c0_i32 = arith.constant 0 : i32
    %c0_i32_1 = arith.constant 0 : i32
    %c0_i32_2 = arith.constant 0 : i32
    return %arg0, %1, %c0_i32, %c0_i32_1 : i32, i32, i32, i32
  }
  func.func @transform_3(%arg0: i32, %arg1: i32) -> (i32, i32, i32, i32) {
    %c2_i32 = arith.constant 2 : i32
    %0 = arith.muli %c2_i32, %arg1 : i32
    %c0_i32 = arith.constant 0 : i32
    %1 = arith.addi %0, %c0_i32 : i32
    %c0_i32_0 = arith.constant 0 : i32
    %c0_i32_1 = arith.constant 0 : i32
    %c0_i32_2 = arith.constant 0 : i32
    return %arg0, %1, %c0_i32_0, %c0_i32_1 : i32, i32, i32, i32
  }
  func.func @transform_4(%arg0: i32, %arg1: i32) -> (i32, i32, i32, i32) {
    %c2_i32 = arith.constant 2 : i32
    %0 = arith.muli %c2_i32, %arg1 : i32
    %c1_i32 = arith.constant 1 : i32
    %1 = arith.addi %0, %c1_i32 : i32
    %c0_i32 = arith.constant 0 : i32
    %c0_i32_0 = arith.constant 0 : i32
    %c0_i32_1 = arith.constant 0 : i32
    return %arg0, %1, %c0_i32, %c0_i32_0 : i32, i32, i32, i32
  }
  func.func @transform_5(%arg0: i32, %arg1: i32) -> (i32, i32, i32, i32) {
    %c2_i32 = arith.constant 2 : i32
    %0 = arith.muli %c2_i32, %arg1 : i32
    %c2_i32_0 = arith.constant 2 : i32
    %1 = arith.addi %0, %c2_i32_0 : i32
    %c0_i32 = arith.constant 0 : i32
    %c0_i32_1 = arith.constant 0 : i32
    %c0_i32_2 = arith.constant 0 : i32
    return %arg0, %1, %c0_i32, %c0_i32_1 : i32, i32, i32, i32
  }
  func.func @transform_6(%arg0: i32, %arg1: i32) -> (i32, i32, i32, i32) {
    %c2_i32 = arith.constant 2 : i32
    %0 = arith.muli %c2_i32, %arg1 : i32
    %c0_i32 = arith.constant 0 : i32
    %1 = arith.addi %0, %c0_i32 : i32
    %c0_i32_0 = arith.constant 0 : i32
    %c0_i32_1 = arith.constant 0 : i32
    %c0_i32_2 = arith.constant 0 : i32
    return %arg0, %1, %c0_i32_0, %c0_i32_1 : i32, i32, i32, i32
  }
  func.func @transform_7(%arg0: i32, %arg1: i32) -> (i32, i32, i32, i32) {
    %c2_i32 = arith.constant 2 : i32
    %0 = arith.muli %c2_i32, %arg1 : i32
    %c1_i32 = arith.constant 1 : i32
    %1 = arith.addi %0, %c1_i32 : i32
    %c0_i32 = arith.constant 0 : i32
    %c0_i32_0 = arith.constant 0 : i32
    %c0_i32_1 = arith.constant 0 : i32
    return %arg0, %1, %c0_i32, %c0_i32_0 : i32, i32, i32, i32
  }
  func.func @transform_8(%arg0: i32, %arg1: i32) -> (i32, i32, i32, i32) {
    %c2_i32 = arith.constant 2 : i32
    %0 = arith.muli %c2_i32, %arg1 : i32
    %c2_i32_0 = arith.constant 2 : i32
    %1 = arith.addi %0, %c2_i32_0 : i32
    %c0_i32 = arith.constant 0 : i32
    %c0_i32_1 = arith.constant 0 : i32
    %c0_i32_2 = arith.constant 0 : i32
    return %arg0, %1, %c0_i32, %c0_i32_1 : i32, i32, i32, i32
  }
  func.func @transform_9(%arg0: i32, %arg1: i32) -> (i32, i32, i32) {
    %c0_i32 = arith.constant 0 : i32
    %c0_i32_0 = arith.constant 0 : i32
    %c0_i32_1 = arith.constant 0 : i32
    %c0_i32_2 = arith.constant 0 : i32
    return %c0_i32, %c0_i32_0, %c0_i32_1 : i32, i32, i32
  }
  func.func @transform_10(%arg0: i32, %arg1: i32) -> (i32, i32) {
    %c0_i32 = arith.constant 0 : i32
    %c0_i32_0 = arith.constant 0 : i32
    %c0_i32_1 = arith.constant 0 : i32
    return %c0_i32, %c0_i32_0 : i32, i32
  }
  func.func @transform_11(%arg0: i32, %arg1: i32) -> (i32, i32, i32, i32) {
    %c0_i32 = arith.constant 0 : i32
    %c0_i32_0 = arith.constant 0 : i32
    %c0_i32_1 = arith.constant 0 : i32
    return %arg0, %arg1, %c0_i32, %c0_i32_0 : i32, i32, i32, i32
  }
}

module attributes {stable_mosaic.version = 11 : i64} {
  func.func @_conv_tap_kernel(%arg0: i32, %arg1: i32, %arg2: memref<1x1x10x128xbf16, #tpu.memory_space<vmem>>, %arg3: memref<1x1x10x128xbf16, #tpu.memory_space<vmem>>, %arg4: memref<1x1x10x128xbf16, #tpu.memory_space<vmem>>, %arg5: memref<9x32x128xbf16, #tpu.memory_space<vmem>>, %arg6: memref<1x128xf32, #tpu.memory_space<vmem>>, %arg7: memref<1x1x8x128xbf16, #tpu.memory_space<vmem>>, %arg8: memref<16x128xbf16, #tpu.memory_space<vmem>>, %arg9: memref<1x1x8x128xbf16, #tpu.memory_space<vmem>>) attributes {dimension_semantics = [#tpu.dimension_semantics<parallel>, #tpu.dimension_semantics<parallel>], iteration_bounds = array<i64: 2, 8>, scalar_prefetch = 0 : i64, scratch_operands = 0 : i64, tpu.core_type = #tpu.core_type<tc>, window_params = [{transform_indices = @transform_0, window_bounds = array<i64: 1, 1, 10, 128>}, {transform_indices = @transform_1, window_bounds = array<i64: 1, 1, 10, 128>}, {transform_indices = @transform_2, window_bounds = array<i64: 1, 1, 10, 128>}, {pipeline_mode = #tpu.pipeline_mode<synchronous>, transform_indices = @transform_3, window_bounds = array<i64: 9, 32, 128>}, {pipeline_mode = #tpu.pipeline_mode<synchronous>, transform_indices = @transform_4, window_bounds = array<i64: 1, 128>}, {transform_indices = @transform_5, window_bounds = array<i64: 1, 1, 8, 128>}, {pipeline_mode = #tpu.pipeline_mode<synchronous>, transform_indices = @transform_6, window_bounds = array<i64: 16, 128>}, {transform_indices = @transform_7, window_bounds = array<i64: 1, 1, 8, 128>}]} {
    %c0 = arith.constant 0 : index
    %c0_0 = arith.constant 0 : index
    %c0_1 = arith.constant 0 : index
    %c0_2 = arith.constant 0 : index
    %0 = vector.load %arg2[%c0, %c0_0, %c0_1, %c0_2] : memref<1x1x10x128xbf16, #tpu.memory_space<vmem>>, vector<1x1x10x128xbf16>
    %1 = vector.shape_cast %0 : vector<1x1x10x128xbf16> to vector<10x128xbf16>
    %c0_3 = arith.constant 0 : index
    %c0_4 = arith.constant 0 : index
    %c0_5 = arith.constant 0 : index
    %c0_6 = arith.constant 0 : index
    %2 = vector.load %arg3[%c0_3, %c0_4, %c0_5, %c0_6] : memref<1x1x10x128xbf16, #tpu.memory_space<vmem>>, vector<1x1x10x128xbf16>
    %3 = vector.shape_cast %2 : vector<1x1x10x128xbf16> to vector<10x128xbf16>
    %c0_7 = arith.constant 0 : index
    %c0_8 = arith.constant 0 : index
    %c0_9 = arith.constant 0 : index
    %c0_10 = arith.constant 0 : index
    %4 = vector.load %arg4[%c0_7, %c0_8, %c0_9, %c0_10] : memref<1x1x10x128xbf16, #tpu.memory_space<vmem>>, vector<1x1x10x128xbf16>
    %5 = vector.shape_cast %4 : vector<1x1x10x128xbf16> to vector<10x128xbf16>
    %cst = arith.constant 0.000000e+00 : f32
    %6 = vector.broadcast %cst : f32 to vector<8x128xf32>
    %7 = vector.extract_strided_slice %1 {offsets = [0, 0], sizes = [8, 128], strides = [1, 1]} : vector<10x128xbf16> to vector<8x128xbf16>
    %8 = vector.extract_strided_slice %7 {offsets = [0, 0], sizes = [8, 32], strides = [1, 1]} : vector<8x128xbf16> to vector<8x32xbf16>
    %c0_11 = arith.constant 0 : index
    %c0_12 = arith.constant 0 : index
    %c0_13 = arith.constant 0 : index
    %9 = vector.load %arg5[%c0_11, %c0_12, %c0_13] : memref<9x32x128xbf16, #tpu.memory_space<vmem>>, vector<1x32x128xbf16>
    %10 = vector.shape_cast %9 : vector<1x32x128xbf16> to vector<32x128xbf16>
    %cst_14 = arith.constant dense<0.000000e+00> : vector<8x128xf32>
    %11 = tpu.matmul %8, %10, %cst_14 {dimension_numbers = #tpu.dot_dimension_numbers<[1], [0], [0], [1], [0, 0, 1, 1], [], []>} : vector<8x32xbf16>, vector<32x128xbf16>, vector<8x128xf32> -> vector<8x128xf32>
    %12 = arith.addf %6, %11 : vector<8x128xf32>
    %13 = vector.extract_strided_slice %1 {offsets = [1, 0], sizes = [8, 128], strides = [1, 1]} : vector<10x128xbf16> to vector<8x128xbf16>
    %14 = vector.extract_strided_slice %13 {offsets = [0, 0], sizes = [8, 32], strides = [1, 1]} : vector<8x128xbf16> to vector<8x32xbf16>
    %c1 = arith.constant 1 : index
    %c0_15 = arith.constant 0 : index
    %c0_16 = arith.constant 0 : index
    %15 = vector.load %arg5[%c1, %c0_15, %c0_16] : memref<9x32x128xbf16, #tpu.memory_space<vmem>>, vector<1x32x128xbf16>
    %16 = vector.shape_cast %15 : vector<1x32x128xbf16> to vector<32x128xbf16>
    %cst_17 = arith.constant dense<0.000000e+00> : vector<8x128xf32>
    %17 = tpu.matmul %14, %16, %cst_17 {dimension_numbers = #tpu.dot_dimension_numbers<[1], [0], [0], [1], [0, 0, 1, 1], [], []>} : vector<8x32xbf16>, vector<32x128xbf16>, vector<8x128xf32> -> vector<8x128xf32>
    %18 = arith.addf %12, %17 : vector<8x128xf32>
    %19 = vector.extract_strided_slice %1 {offsets = [2, 0], sizes = [8, 128], strides = [1, 1]} : vector<10x128xbf16> to vector<8x128xbf16>
    %20 = vector.extract_strided_slice %19 {offsets = [0, 0], sizes = [8, 32], strides = [1, 1]} : vector<8x128xbf16> to vector<8x32xbf16>
    %c2 = arith.constant 2 : index
    %c0_18 = arith.constant 0 : index
    %c0_19 = arith.constant 0 : index
    %21 = vector.load %arg5[%c2, %c0_18, %c0_19] : memref<9x32x128xbf16, #tpu.memory_space<vmem>>, vector<1x32x128xbf16>
    %22 = vector.shape_cast %21 : vector<1x32x128xbf16> to vector<32x128xbf16>
    %cst_20 = arith.constant dense<0.000000e+00> : vector<8x128xf32>
    %23 = tpu.matmul %20, %22, %cst_20 {dimension_numbers = #tpu.dot_dimension_numbers<[1], [0], [0], [1], [0, 0, 1, 1], [], []>} : vector<8x32xbf16>, vector<32x128xbf16>, vector<8x128xf32> -> vector<8x128xf32>
    %24 = arith.addf %18, %23 : vector<8x128xf32>
    %25 = vector.extract_strided_slice %3 {offsets = [0, 0], sizes = [8, 128], strides = [1, 1]} : vector<10x128xbf16> to vector<8x128xbf16>
    %26 = vector.extract_strided_slice %25 {offsets = [0, 0], sizes = [8, 32], strides = [1, 1]} : vector<8x128xbf16> to vector<8x32xbf16>
    %c3 = arith.constant 3 : index
    %c0_21 = arith.constant 0 : index
    %c0_22 = arith.constant 0 : index
    %27 = vector.load %arg5[%c3, %c0_21, %c0_22] : memref<9x32x128xbf16, #tpu.memory_space<vmem>>, vector<1x32x128xbf16>
    %28 = vector.shape_cast %27 : vector<1x32x128xbf16> to vector<32x128xbf16>
    %cst_23 = arith.constant dense<0.000000e+00> : vector<8x128xf32>
    %29 = tpu.matmul %26, %28, %cst_23 {dimension_numbers = #tpu.dot_dimension_numbers<[1], [0], [0], [1], [0, 0, 1, 1], [], []>} : vector<8x32xbf16>, vector<32x128xbf16>, vector<8x128xf32> -> vector<8x128xf32>
    %30 = arith.addf %24, %29 : vector<8x128xf32>
    %31 = vector.extract_strided_slice %3 {offsets = [1, 0], sizes = [8, 128], strides = [1, 1]} : vector<10x128xbf16> to vector<8x128xbf16>
    %32 = vector.extract_strided_slice %31 {offsets = [0, 0], sizes = [8, 32], strides = [1, 1]} : vector<8x128xbf16> to vector<8x32xbf16>
    %c4 = arith.constant 4 : index
    %c0_24 = arith.constant 0 : index
    %c0_25 = arith.constant 0 : index
    %33 = vector.load %arg5[%c4, %c0_24, %c0_25] : memref<9x32x128xbf16, #tpu.memory_space<vmem>>, vector<1x32x128xbf16>
    %34 = vector.shape_cast %33 : vector<1x32x128xbf16> to vector<32x128xbf16>
    %cst_26 = arith.constant dense<0.000000e+00> : vector<8x128xf32>
    %35 = tpu.matmul %32, %34, %cst_26 {dimension_numbers = #tpu.dot_dimension_numbers<[1], [0], [0], [1], [0, 0, 1, 1], [], []>} : vector<8x32xbf16>, vector<32x128xbf16>, vector<8x128xf32> -> vector<8x128xf32>
    %36 = arith.addf %30, %35 : vector<8x128xf32>
    %37 = vector.extract_strided_slice %3 {offsets = [2, 0], sizes = [8, 128], strides = [1, 1]} : vector<10x128xbf16> to vector<8x128xbf16>
    %38 = vector.extract_strided_slice %37 {offsets = [0, 0], sizes = [8, 32], strides = [1, 1]} : vector<8x128xbf16> to vector<8x32xbf16>
    %c5 = arith.constant 5 : index
    %c0_27 = arith.constant 0 : index
    %c0_28 = arith.constant 0 : index
    %39 = vector.load %arg5[%c5, %c0_27, %c0_28] : memref<9x32x128xbf16, #tpu.memory_space<vmem>>, vector<1x32x128xbf16>
    %40 = vector.shape_cast %39 : vector<1x32x128xbf16> to vector<32x128xbf16>
    %cst_29 = arith.constant dense<0.000000e+00> : vector<8x128xf32>
    %41 = tpu.matmul %38, %40, %cst_29 {dimension_numbers = #tpu.dot_dimension_numbers<[1], [0], [0], [1], [0, 0, 1, 1], [], []>} : vector<8x32xbf16>, vector<32x128xbf16>, vector<8x128xf32> -> vector<8x128xf32>
    %42 = arith.addf %36, %41 : vector<8x128xf32>
    %43 = vector.extract_strided_slice %5 {offsets = [0, 0], sizes = [8, 128], strides = [1, 1]} : vector<10x128xbf16> to vector<8x128xbf16>
    %44 = vector.extract_strided_slice %43 {offsets = [0, 0], sizes = [8, 32], strides = [1, 1]} : vector<8x128xbf16> to vector<8x32xbf16>
    %c6 = arith.constant 6 : index
    %c0_30 = arith.constant 0 : index
    %c0_31 = arith.constant 0 : index
    %45 = vector.load %arg5[%c6, %c0_30, %c0_31] : memref<9x32x128xbf16, #tpu.memory_space<vmem>>, vector<1x32x128xbf16>
    %46 = vector.shape_cast %45 : vector<1x32x128xbf16> to vector<32x128xbf16>
    %cst_32 = arith.constant dense<0.000000e+00> : vector<8x128xf32>
    %47 = tpu.matmul %44, %46, %cst_32 {dimension_numbers = #tpu.dot_dimension_numbers<[1], [0], [0], [1], [0, 0, 1, 1], [], []>} : vector<8x32xbf16>, vector<32x128xbf16>, vector<8x128xf32> -> vector<8x128xf32>
    %48 = arith.addf %42, %47 : vector<8x128xf32>
    %49 = vector.extract_strided_slice %5 {offsets = [1, 0], sizes = [8, 128], strides = [1, 1]} : vector<10x128xbf16> to vector<8x128xbf16>
    %50 = vector.extract_strided_slice %49 {offsets = [0, 0], sizes = [8, 32], strides = [1, 1]} : vector<8x128xbf16> to vector<8x32xbf16>
    %c7 = arith.constant 7 : index
    %c0_33 = arith.constant 0 : index
    %c0_34 = arith.constant 0 : index
    %51 = vector.load %arg5[%c7, %c0_33, %c0_34] : memref<9x32x128xbf16, #tpu.memory_space<vmem>>, vector<1x32x128xbf16>
    %52 = vector.shape_cast %51 : vector<1x32x128xbf16> to vector<32x128xbf16>
    %cst_35 = arith.constant dense<0.000000e+00> : vector<8x128xf32>
    %53 = tpu.matmul %50, %52, %cst_35 {dimension_numbers = #tpu.dot_dimension_numbers<[1], [0], [0], [1], [0, 0, 1, 1], [], []>} : vector<8x32xbf16>, vector<32x128xbf16>, vector<8x128xf32> -> vector<8x128xf32>
    %54 = arith.addf %48, %53 : vector<8x128xf32>
    %55 = vector.extract_strided_slice %5 {offsets = [2, 0], sizes = [8, 128], strides = [1, 1]} : vector<10x128xbf16> to vector<8x128xbf16>
    %56 = vector.extract_strided_slice %55 {offsets = [0, 0], sizes = [8, 32], strides = [1, 1]} : vector<8x128xbf16> to vector<8x32xbf16>
    %c8 = arith.constant 8 : index
    %c0_36 = arith.constant 0 : index
    %c0_37 = arith.constant 0 : index
    %57 = vector.load %arg5[%c8, %c0_36, %c0_37] : memref<9x32x128xbf16, #tpu.memory_space<vmem>>, vector<1x32x128xbf16>
    %58 = vector.shape_cast %57 : vector<1x32x128xbf16> to vector<32x128xbf16>
    %cst_38 = arith.constant dense<0.000000e+00> : vector<8x128xf32>
    %59 = tpu.matmul %56, %58, %cst_38 {dimension_numbers = #tpu.dot_dimension_numbers<[1], [0], [0], [1], [0, 0, 1, 1], [], []>} : vector<8x32xbf16>, vector<32x128xbf16>, vector<8x128xf32> -> vector<8x128xf32>
    %60 = arith.addf %54, %59 : vector<8x128xf32>
    %c0_39 = arith.constant 0 : index
    %c0_40 = arith.constant 0 : index
    %61 = vector.load %arg6[%c0_39, %c0_40] : memref<1x128xf32, #tpu.memory_space<vmem>>, vector<1x128xf32>
    %62 = vector.broadcast %61 : vector<1x128xf32> to vector<8x128xf32>
    %63 = arith.addf %60, %62 : vector<8x128xf32>
    %c0_41 = arith.constant 0 : index
    %c0_42 = arith.constant 0 : index
    %c0_43 = arith.constant 0 : index
    %c0_44 = arith.constant 0 : index
    %64 = vector.load %arg7[%c0_41, %c0_42, %c0_43, %c0_44] : memref<1x1x8x128xbf16, #tpu.memory_space<vmem>>, vector<1x1x8x128xbf16>
    %65 = vector.shape_cast %64 : vector<1x1x8x128xbf16> to vector<8x128xbf16>
    %66 = vector.extract_strided_slice %65 {offsets = [0, 0], sizes = [8, 16], strides = [1, 1]} : vector<8x128xbf16> to vector<8x16xbf16>
    %c0_45 = arith.constant 0 : index
    %c0_46 = arith.constant 0 : index
    %67 = vector.load %arg8[%c0_45, %c0_46] : memref<16x128xbf16, #tpu.memory_space<vmem>>, vector<16x128xbf16>
    %cst_47 = arith.constant dense<0.000000e+00> : vector<8x128xf32>
    %68 = tpu.matmul %66, %67, %cst_47 {dimension_numbers = #tpu.dot_dimension_numbers<[1], [0], [0], [1], [0, 0, 1, 1], [], []>} : vector<8x16xbf16>, vector<16x128xbf16>, vector<8x128xf32> -> vector<8x128xf32>
    %69 = arith.addf %63, %68 : vector<8x128xf32>
    %cst_48 = arith.constant 0.000000e+00 : f32
    %70 = vector.broadcast %cst_48 : f32 to vector<8x128xf32>
    %71 = arith.maximumf %69, %70 : vector<8x128xf32>
    %72 = arith.truncf %71 : vector<8x128xf32> to vector<8x128xbf16>
    %c0_49 = arith.constant 0 : index
    %c0_50 = arith.constant 0 : index
    %c0_51 = arith.constant 0 : index
    %c0_52 = arith.constant 0 : index
    %73 = vector.load %arg9[%c0_49, %c0_50, %c0_51, %c0_52] : memref<1x1x8x128xbf16, #tpu.memory_space<vmem>>, vector<1x1x8x128xbf16>
    %74 = vector.shape_cast %73 : vector<1x1x8x128xbf16> to vector<8x128xbf16>
    %75 = vector.shape_cast %72 : vector<8x128xbf16> to vector<1x1x8x128xbf16>
    tpu.vector_store %arg9[%c0_49, %c0_50, %c0_51, %c0_52], %75 {strides = array<i32>} : memref<1x1x8x128xbf16, #tpu.memory_space<vmem>>, vector<1x1x8x128xbf16>,
    return
  }
  func.func @transform_0(%arg0: i32, %arg1: i32) -> (i32, i32, i32, i32) {
    %c0_i32 = arith.constant 0 : i32
    %0 = arith.addi %arg1, %c0_i32 : i32
    %c0_i32_0 = arith.constant 0 : i32
    %c0_i32_1 = arith.constant 0 : i32
    %c0_i32_2 = arith.constant 0 : i32
    return %arg0, %0, %c0_i32_0, %c0_i32_1 : i32, i32, i32, i32
  }
  func.func @transform_1(%arg0: i32, %arg1: i32) -> (i32, i32, i32, i32) {
    %c1_i32 = arith.constant 1 : i32
    %0 = arith.addi %arg1, %c1_i32 : i32
    %c0_i32 = arith.constant 0 : i32
    %c0_i32_0 = arith.constant 0 : i32
    %c0_i32_1 = arith.constant 0 : i32
    return %arg0, %0, %c0_i32, %c0_i32_0 : i32, i32, i32, i32
  }
  func.func @transform_2(%arg0: i32, %arg1: i32) -> (i32, i32, i32, i32) {
    %c2_i32 = arith.constant 2 : i32
    %0 = arith.addi %arg1, %c2_i32 : i32
    %c0_i32 = arith.constant 0 : i32
    %c0_i32_0 = arith.constant 0 : i32
    %c0_i32_1 = arith.constant 0 : i32
    return %arg0, %0, %c0_i32, %c0_i32_0 : i32, i32, i32, i32
  }
  func.func @transform_3(%arg0: i32, %arg1: i32) -> (i32, i32, i32) {
    %c0_i32 = arith.constant 0 : i32
    %c0_i32_0 = arith.constant 0 : i32
    %c0_i32_1 = arith.constant 0 : i32
    %c0_i32_2 = arith.constant 0 : i32
    return %c0_i32, %c0_i32_0, %c0_i32_1 : i32, i32, i32
  }
  func.func @transform_4(%arg0: i32, %arg1: i32) -> (i32, i32) {
    %c0_i32 = arith.constant 0 : i32
    %c0_i32_0 = arith.constant 0 : i32
    %c0_i32_1 = arith.constant 0 : i32
    return %c0_i32, %c0_i32_0 : i32, i32
  }
  func.func @transform_5(%arg0: i32, %arg1: i32) -> (i32, i32, i32, i32) {
    %c2_i32 = arith.constant 2 : i32
    %0 = arith.muli %c2_i32, %arg1 : i32
    %c0_i32 = arith.constant 0 : i32
    %c0_i32_0 = arith.constant 0 : i32
    %c0_i32_1 = arith.constant 0 : i32
    return %arg0, %0, %c0_i32, %c0_i32_0 : i32, i32, i32, i32
  }
  func.func @transform_6(%arg0: i32, %arg1: i32) -> (i32, i32) {
    %c0_i32 = arith.constant 0 : i32
    %c0_i32_0 = arith.constant 0 : i32
    %c0_i32_1 = arith.constant 0 : i32
    return %c0_i32, %c0_i32_0 : i32, i32
  }
  func.func @transform_7(%arg0: i32, %arg1: i32) -> (i32, i32, i32, i32) {
    %c0_i32 = arith.constant 0 : i32
    %c0_i32_0 = arith.constant 0 : i32
    %c0_i32_1 = arith.constant 0 : i32
    return %arg0, %arg1, %c0_i32, %c0_i32_0 : i32, i32, i32, i32
  }
}

module attributes {stable_mosaic.version = 11 : i64} {
  func.func @_conv_tap_kernel(%arg0: i32, %arg1: i32, %arg2: memref<1x1x4x128xbf16, #tpu.memory_space<vmem>>, %arg3: memref<1x1x4x128xbf16, #tpu.memory_space<vmem>>, %arg4: memref<1x1x4x128xbf16, #tpu.memory_space<vmem>>, %arg5: memref<1x1x4x128xbf16, #tpu.memory_space<vmem>>, %arg6: memref<1x1x4x128xbf16, #tpu.memory_space<vmem>>, %arg7: memref<1x1x4x128xbf16, #tpu.memory_space<vmem>>, %arg8: memref<1x1x4x128xbf16, #tpu.memory_space<vmem>>, %arg9: memref<1x1x4x128xbf16, #tpu.memory_space<vmem>>, %arg10: memref<1x1x4x128xbf16, #tpu.memory_space<vmem>>, %arg11: memref<9x32x128xbf16, #tpu.memory_space<vmem>>, %arg12: memref<1x128xf32, #tpu.memory_space<vmem>>, %arg13: memref<1x1x4x128xbf16, #tpu.memory_space<vmem>>) attributes {dimension_semantics = [#tpu.dimension_semantics<parallel>, #tpu.dimension_semantics<parallel>], iteration_bounds = array<i64: 2, 4>, scalar_prefetch = 0 : i64, scratch_operands = 0 : i64, tpu.core_type = #tpu.core_type<tc>, window_params = [{transform_indices = @transform_0, window_bounds = array<i64: 1, 1, 4, 128>}, {transform_indices = @transform_1, window_bounds = array<i64: 1, 1, 4, 128>}, {transform_indices = @transform_2, window_bounds = array<i64: 1, 1, 4, 128>}, {transform_indices = @transform_3, window_bounds = array<i64: 1, 1, 4, 128>}, {transform_indices = @transform_4, window_bounds = array<i64: 1, 1, 4, 128>}, {transform_indices = @transform_5, window_bounds = array<i64: 1, 1, 4, 128>}, {transform_indices = @transform_6, window_bounds = array<i64: 1, 1, 4, 128>}, {transform_indices = @transform_7, window_bounds = array<i64: 1, 1, 4, 128>}, {transform_indices = @transform_8, window_bounds = array<i64: 1, 1, 4, 128>}, {pipeline_mode = #tpu.pipeline_mode<synchronous>, transform_indices = @transform_9, window_bounds = array<i64: 9, 32, 128>}, {pipeline_mode = #tpu.pipeline_mode<synchronous>, transform_indices = @transform_10, window_bounds = array<i64: 1, 128>}, {transform_indices = @transform_11, window_bounds = array<i64: 1, 1, 4, 128>}]} {
    %c0 = arith.constant 0 : index
    %c0_0 = arith.constant 0 : index
    %c0_1 = arith.constant 0 : index
    %c0_2 = arith.constant 0 : index
    %0 = vector.load %arg2[%c0, %c0_0, %c0_1, %c0_2] : memref<1x1x4x128xbf16, #tpu.memory_space<vmem>>, vector<1x1x4x128xbf16>
    %1 = vector.shape_cast %0 : vector<1x1x4x128xbf16> to vector<4x128xbf16>
    %c0_3 = arith.constant 0 : index
    %c0_4 = arith.constant 0 : index
    %c0_5 = arith.constant 0 : index
    %c0_6 = arith.constant 0 : index
    %2 = vector.load %arg3[%c0_3, %c0_4, %c0_5, %c0_6] : memref<1x1x4x128xbf16, #tpu.memory_space<vmem>>, vector<1x1x4x128xbf16>
    %3 = vector.shape_cast %2 : vector<1x1x4x128xbf16> to vector<4x128xbf16>
    %c0_7 = arith.constant 0 : index
    %c0_8 = arith.constant 0 : index
    %c0_9 = arith.constant 0 : index
    %c0_10 = arith.constant 0 : index
    %4 = vector.load %arg4[%c0_7, %c0_8, %c0_9, %c0_10] : memref<1x1x4x128xbf16, #tpu.memory_space<vmem>>, vector<1x1x4x128xbf16>
    %5 = vector.shape_cast %4 : vector<1x1x4x128xbf16> to vector<4x128xbf16>
    %c0_11 = arith.constant 0 : index
    %c0_12 = arith.constant 0 : index
    %c0_13 = arith.constant 0 : index
    %c0_14 = arith.constant 0 : index
    %6 = vector.load %arg5[%c0_11, %c0_12, %c0_13, %c0_14] : memref<1x1x4x128xbf16, #tpu.memory_space<vmem>>, vector<1x1x4x128xbf16>
    %7 = vector.shape_cast %6 : vector<1x1x4x128xbf16> to vector<4x128xbf16>
    %c0_15 = arith.constant 0 : index
    %c0_16 = arith.constant 0 : index
    %c0_17 = arith.constant 0 : index
    %c0_18 = arith.constant 0 : index
    %8 = vector.load %arg6[%c0_15, %c0_16, %c0_17, %c0_18] : memref<1x1x4x128xbf16, #tpu.memory_space<vmem>>, vector<1x1x4x128xbf16>
    %9 = vector.shape_cast %8 : vector<1x1x4x128xbf16> to vector<4x128xbf16>
    %c0_19 = arith.constant 0 : index
    %c0_20 = arith.constant 0 : index
    %c0_21 = arith.constant 0 : index
    %c0_22 = arith.constant 0 : index
    %10 = vector.load %arg7[%c0_19, %c0_20, %c0_21, %c0_22] : memref<1x1x4x128xbf16, #tpu.memory_space<vmem>>, vector<1x1x4x128xbf16>
    %11 = vector.shape_cast %10 : vector<1x1x4x128xbf16> to vector<4x128xbf16>
    %c0_23 = arith.constant 0 : index
    %c0_24 = arith.constant 0 : index
    %c0_25 = arith.constant 0 : index
    %c0_26 = arith.constant 0 : index
    %12 = vector.load %arg8[%c0_23, %c0_24, %c0_25, %c0_26] : memref<1x1x4x128xbf16, #tpu.memory_space<vmem>>, vector<1x1x4x128xbf16>
    %13 = vector.shape_cast %12 : vector<1x1x4x128xbf16> to vector<4x128xbf16>
    %c0_27 = arith.constant 0 : index
    %c0_28 = arith.constant 0 : index
    %c0_29 = arith.constant 0 : index
    %c0_30 = arith.constant 0 : index
    %14 = vector.load %arg9[%c0_27, %c0_28, %c0_29, %c0_30] : memref<1x1x4x128xbf16, #tpu.memory_space<vmem>>, vector<1x1x4x128xbf16>
    %15 = vector.shape_cast %14 : vector<1x1x4x128xbf16> to vector<4x128xbf16>
    %c0_31 = arith.constant 0 : index
    %c0_32 = arith.constant 0 : index
    %c0_33 = arith.constant 0 : index
    %c0_34 = arith.constant 0 : index
    %16 = vector.load %arg10[%c0_31, %c0_32, %c0_33, %c0_34] : memref<1x1x4x128xbf16, #tpu.memory_space<vmem>>, vector<1x1x4x128xbf16>
    %17 = vector.shape_cast %16 : vector<1x1x4x128xbf16> to vector<4x128xbf16>
    %cst = arith.constant 0.000000e+00 : f32
    %18 = vector.broadcast %cst : f32 to vector<4x128xf32>
    %19 = vector.extract_strided_slice %1 {offsets = [0, 0], sizes = [4, 32], strides = [1, 1]} : vector<4x128xbf16> to vector<4x32xbf16>
    %c0_35 = arith.constant 0 : index
    %c0_36 = arith.constant 0 : index
    %c0_37 = arith.constant 0 : index
    %20 = vector.load %arg11[%c0_35, %c0_36, %c0_37] : memref<9x32x128xbf16, #tpu.memory_space<vmem>>, vector<1x32x128xbf16>
    %21 = vector.shape_cast %20 : vector<1x32x128xbf16> to vector<32x128xbf16>
    %cst_38 = arith.constant dense<0.000000e+00> : vector<4x128xf32>
    %22 = tpu.matmul %19, %21, %cst_38 {dimension_numbers = #tpu.dot_dimension_numbers<[1], [0], [0], [1], [0, 0, 1, 1], [], []>} : vector<4x32xbf16>, vector<32x128xbf16>, vector<4x128xf32> -> vector<4x128xf32>
    %23 = arith.addf %18, %22 : vector<4x128xf32>
    %24 = vector.extract_strided_slice %7 {offsets = [0, 0], sizes = [4, 32], strides = [1, 1]} : vector<4x128xbf16> to vector<4x32xbf16>
    %c1 = arith.constant 1 : index
    %c0_39 = arith.constant 0 : index
    %c0_40 = arith.constant 0 : index
    %25 = vector.load %arg11[%c1, %c0_39, %c0_40] : memref<9x32x128xbf16, #tpu.memory_space<vmem>>, vector<1x32x128xbf16>
    %26 = vector.shape_cast %25 : vector<1x32x128xbf16> to vector<32x128xbf16>
    %cst_41 = arith.constant dense<0.000000e+00> : vector<4x128xf32>
    %27 = tpu.matmul %24, %26, %cst_41 {dimension_numbers = #tpu.dot_dimension_numbers<[1], [0], [0], [1], [0, 0, 1, 1], [], []>} : vector<4x32xbf16>, vector<32x128xbf16>, vector<4x128xf32> -> vector<4x128xf32>
    %28 = arith.addf %23, %27 : vector<4x128xf32>
    %29 = vector.extract_strided_slice %13 {offsets = [0, 0], sizes = [4, 32], strides = [1, 1]} : vector<4x128xbf16> to vector<4x32xbf16>
    %c2 = arith.constant 2 : index
    %c0_42 = arith.constant 0 : index
    %c0_43 = arith.constant 0 : index
    %30 = vector.load %arg11[%c2, %c0_42, %c0_43] : memref<9x32x128xbf16, #tpu.memory_space<vmem>>, vector<1x32x128xbf16>
    %31 = vector.shape_cast %30 : vector<1x32x128xbf16> to vector<32x128xbf16>
    %cst_44 = arith.constant dense<0.000000e+00> : vector<4x128xf32>
    %32 = tpu.matmul %29, %31, %cst_44 {dimension_numbers = #tpu.dot_dimension_numbers<[1], [0], [0], [1], [0, 0, 1, 1], [], []>} : vector<4x32xbf16>, vector<32x128xbf16>, vector<4x128xf32> -> vector<4x128xf32>
    %33 = arith.addf %28, %32 : vector<4x128xf32>
    %34 = vector.extract_strided_slice %3 {offsets = [0, 0], sizes = [4, 32], strides = [1, 1]} : vector<4x128xbf16> to vector<4x32xbf16>
    %c3 = arith.constant 3 : index
    %c0_45 = arith.constant 0 : index
    %c0_46 = arith.constant 0 : index
    %35 = vector.load %arg11[%c3, %c0_45, %c0_46] : memref<9x32x128xbf16, #tpu.memory_space<vmem>>, vector<1x32x128xbf16>
    %36 = vector.shape_cast %35 : vector<1x32x128xbf16> to vector<32x128xbf16>
    %cst_47 = arith.constant dense<0.000000e+00> : vector<4x128xf32>
    %37 = tpu.matmul %34, %36, %cst_47 {dimension_numbers = #tpu.dot_dimension_numbers<[1], [0], [0], [1], [0, 0, 1, 1], [], []>} : vector<4x32xbf16>, vector<32x128xbf16>, vector<4x128xf32> -> vector<4x128xf32>
    %38 = arith.addf %33, %37 : vector<4x128xf32>
    %39 = vector.extract_strided_slice %9 {offsets = [0, 0], sizes = [4, 32], strides = [1, 1]} : vector<4x128xbf16> to vector<4x32xbf16>
    %c4 = arith.constant 4 : index
    %c0_48 = arith.constant 0 : index
    %c0_49 = arith.constant 0 : index
    %40 = vector.load %arg11[%c4, %c0_48, %c0_49] : memref<9x32x128xbf16, #tpu.memory_space<vmem>>, vector<1x32x128xbf16>
    %41 = vector.shape_cast %40 : vector<1x32x128xbf16> to vector<32x128xbf16>
    %cst_50 = arith.constant dense<0.000000e+00> : vector<4x128xf32>
    %42 = tpu.matmul %39, %41, %cst_50 {dimension_numbers = #tpu.dot_dimension_numbers<[1], [0], [0], [1], [0, 0, 1, 1], [], []>} : vector<4x32xbf16>, vector<32x128xbf16>, vector<4x128xf32> -> vector<4x128xf32>
    %43 = arith.addf %38, %42 : vector<4x128xf32>
    %44 = vector.extract_strided_slice %15 {offsets = [0, 0], sizes = [4, 32], strides = [1, 1]} : vector<4x128xbf16> to vector<4x32xbf16>
    %c5 = arith.constant 5 : index
    %c0_51 = arith.constant 0 : index
    %c0_52 = arith.constant 0 : index
    %45 = vector.load %arg11[%c5, %c0_51, %c0_52] : memref<9x32x128xbf16, #tpu.memory_space<vmem>>, vector<1x32x128xbf16>
    %46 = vector.shape_cast %45 : vector<1x32x128xbf16> to vector<32x128xbf16>
    %cst_53 = arith.constant dense<0.000000e+00> : vector<4x128xf32>
    %47 = tpu.matmul %44, %46, %cst_53 {dimension_numbers = #tpu.dot_dimension_numbers<[1], [0], [0], [1], [0, 0, 1, 1], [], []>} : vector<4x32xbf16>, vector<32x128xbf16>, vector<4x128xf32> -> vector<4x128xf32>
    %48 = arith.addf %43, %47 : vector<4x128xf32>
    %49 = vector.extract_strided_slice %5 {offsets = [0, 0], sizes = [4, 32], strides = [1, 1]} : vector<4x128xbf16> to vector<4x32xbf16>
    %c6 = arith.constant 6 : index
    %c0_54 = arith.constant 0 : index
    %c0_55 = arith.constant 0 : index
    %50 = vector.load %arg11[%c6, %c0_54, %c0_55] : memref<9x32x128xbf16, #tpu.memory_space<vmem>>, vector<1x32x128xbf16>
    %51 = vector.shape_cast %50 : vector<1x32x128xbf16> to vector<32x128xbf16>
    %cst_56 = arith.constant dense<0.000000e+00> : vector<4x128xf32>
    %52 = tpu.matmul %49, %51, %cst_56 {dimension_numbers = #tpu.dot_dimension_numbers<[1], [0], [0], [1], [0, 0, 1, 1], [], []>} : vector<4x32xbf16>, vector<32x128xbf16>, vector<4x128xf32> -> vector<4x128xf32>
    %53 = arith.addf %48, %52 : vector<4x128xf32>
    %54 = vector.extract_strided_slice %11 {offsets = [0, 0], sizes = [4, 32], strides = [1, 1]} : vector<4x128xbf16> to vector<4x32xbf16>
    %c7 = arith.constant 7 : index
    %c0_57 = arith.constant 0 : index
    %c0_58 = arith.constant 0 : index
    %55 = vector.load %arg11[%c7, %c0_57, %c0_58] : memref<9x32x128xbf16, #tpu.memory_space<vmem>>, vector<1x32x128xbf16>
    %56 = vector.shape_cast %55 : vector<1x32x128xbf16> to vector<32x128xbf16>
    %cst_59 = arith.constant dense<0.000000e+00> : vector<4x128xf32>
    %57 = tpu.matmul %54, %56, %cst_59 {dimension_numbers = #tpu.dot_dimension_numbers<[1], [0], [0], [1], [0, 0, 1, 1], [], []>} : vector<4x32xbf16>, vector<32x128xbf16>, vector<4x128xf32> -> vector<4x128xf32>
    %58 = arith.addf %53, %57 : vector<4x128xf32>
    %59 = vector.extract_strided_slice %17 {offsets = [0, 0], sizes = [4, 32], strides = [1, 1]} : vector<4x128xbf16> to vector<4x32xbf16>
    %c8 = arith.constant 8 : index
    %c0_60 = arith.constant 0 : index
    %c0_61 = arith.constant 0 : index
    %60 = vector.load %arg11[%c8, %c0_60, %c0_61] : memref<9x32x128xbf16, #tpu.memory_space<vmem>>, vector<1x32x128xbf16>
    %61 = vector.shape_cast %60 : vector<1x32x128xbf16> to vector<32x128xbf16>
    %cst_62 = arith.constant dense<0.000000e+00> : vector<4x128xf32>
    %62 = tpu.matmul %59, %61, %cst_62 {dimension_numbers = #tpu.dot_dimension_numbers<[1], [0], [0], [1], [0, 0, 1, 1], [], []>} : vector<4x32xbf16>, vector<32x128xbf16>, vector<4x128xf32> -> vector<4x128xf32>
    %63 = arith.addf %58, %62 : vector<4x128xf32>
    %c0_63 = arith.constant 0 : index
    %c0_64 = arith.constant 0 : index
    %64 = vector.load %arg12[%c0_63, %c0_64] : memref<1x128xf32, #tpu.memory_space<vmem>>, vector<1x128xf32>
    %65 = vector.broadcast %64 : vector<1x128xf32> to vector<4x128xf32>
    %66 = arith.addf %63, %65 : vector<4x128xf32>
    %cst_65 = arith.constant 0.000000e+00 : f32
    %67 = vector.broadcast %cst_65 : f32 to vector<4x128xf32>
    %68 = arith.maximumf %66, %67 : vector<4x128xf32>
    %69 = arith.truncf %68 : vector<4x128xf32> to vector<4x128xbf16>
    %c0_66 = arith.constant 0 : index
    %c0_67 = arith.constant 0 : index
    %c0_68 = arith.constant 0 : index
    %c0_69 = arith.constant 0 : index
    %70 = vector.load %arg13[%c0_66, %c0_67, %c0_68, %c0_69] : memref<1x1x4x128xbf16, #tpu.memory_space<vmem>>, vector<1x1x4x128xbf16>
    %71 = vector.shape_cast %70 : vector<1x1x4x128xbf16> to vector<4x128xbf16>
    %72 = vector.shape_cast %69 : vector<4x128xbf16> to vector<1x1x4x128xbf16>
    tpu.vector_store %arg13[%c0_66, %c0_67, %c0_68, %c0_69], %72 {strides = array<i32>} : memref<1x1x4x128xbf16, #tpu.memory_space<vmem>>, vector<1x1x4x128xbf16>,
    return
  }
  func.func @transform_0(%arg0: i32, %arg1: i32) -> (i32, i32, i32, i32) {
    %c2_i32 = arith.constant 2 : i32
    %0 = arith.muli %c2_i32, %arg1 : i32
    %c0_i32 = arith.constant 0 : i32
    %1 = arith.addi %0, %c0_i32 : i32
    %c0_i32_0 = arith.constant 0 : i32
    %c0_i32_1 = arith.constant 0 : i32
    %c0_i32_2 = arith.constant 0 : i32
    return %arg0, %1, %c0_i32_0, %c0_i32_1 : i32, i32, i32, i32
  }
  func.func @transform_1(%arg0: i32, %arg1: i32) -> (i32, i32, i32, i32) {
    %c2_i32 = arith.constant 2 : i32
    %0 = arith.muli %c2_i32, %arg1 : i32
    %c1_i32 = arith.constant 1 : i32
    %1 = arith.addi %0, %c1_i32 : i32
    %c0_i32 = arith.constant 0 : i32
    %c0_i32_0 = arith.constant 0 : i32
    %c0_i32_1 = arith.constant 0 : i32
    return %arg0, %1, %c0_i32, %c0_i32_0 : i32, i32, i32, i32
  }
  func.func @transform_2(%arg0: i32, %arg1: i32) -> (i32, i32, i32, i32) {
    %c2_i32 = arith.constant 2 : i32
    %0 = arith.muli %c2_i32, %arg1 : i32
    %c2_i32_0 = arith.constant 2 : i32
    %1 = arith.addi %0, %c2_i32_0 : i32
    %c0_i32 = arith.constant 0 : i32
    %c0_i32_1 = arith.constant 0 : i32
    %c0_i32_2 = arith.constant 0 : i32
    return %arg0, %1, %c0_i32, %c0_i32_1 : i32, i32, i32, i32
  }
  func.func @transform_3(%arg0: i32, %arg1: i32) -> (i32, i32, i32, i32) {
    %c2_i32 = arith.constant 2 : i32
    %0 = arith.muli %c2_i32, %arg1 : i32
    %c0_i32 = arith.constant 0 : i32
    %1 = arith.addi %0, %c0_i32 : i32
    %c0_i32_0 = arith.constant 0 : i32
    %c0_i32_1 = arith.constant 0 : i32
    %c0_i32_2 = arith.constant 0 : i32
    return %arg0, %1, %c0_i32_0, %c0_i32_1 : i32, i32, i32, i32
  }
  func.func @transform_4(%arg0: i32, %arg1: i32) -> (i32, i32, i32, i32) {
    %c2_i32 = arith.constant 2 : i32
    %0 = arith.muli %c2_i32, %arg1 : i32
    %c1_i32 = arith.constant 1 : i32
    %1 = arith.addi %0, %c1_i32 : i32
    %c0_i32 = arith.constant 0 : i32
    %c0_i32_0 = arith.constant 0 : i32
    %c0_i32_1 = arith.constant 0 : i32
    return %arg0, %1, %c0_i32, %c0_i32_0 : i32, i32, i32, i32
  }
  func.func @transform_5(%arg0: i32, %arg1: i32) -> (i32, i32, i32, i32) {
    %c2_i32 = arith.constant 2 : i32
    %0 = arith.muli %c2_i32, %arg1 : i32
    %c2_i32_0 = arith.constant 2 : i32
    %1 = arith.addi %0, %c2_i32_0 : i32
    %c0_i32 = arith.constant 0 : i32
    %c0_i32_1 = arith.constant 0 : i32
    %c0_i32_2 = arith.constant 0 : i32
    return %arg0, %1, %c0_i32, %c0_i32_1 : i32, i32, i32, i32
  }
  func.func @transform_6(%arg0: i32, %arg1: i32) -> (i32, i32, i32, i32) {
    %c2_i32 = arith.constant 2 : i32
    %0 = arith.muli %c2_i32, %arg1 : i32
    %c0_i32 = arith.constant 0 : i32
    %1 = arith.addi %0, %c0_i32 : i32
    %c0_i32_0 = arith.constant 0 : i32
    %c0_i32_1 = arith.constant 0 : i32
    %c0_i32_2 = arith.constant 0 : i32
    return %arg0, %1, %c0_i32_0, %c0_i32_1 : i32, i32, i32, i32
  }
  func.func @transform_7(%arg0: i32, %arg1: i32) -> (i32, i32, i32, i32) {
    %c2_i32 = arith.constant 2 : i32
    %0 = arith.muli %c2_i32, %arg1 : i32
    %c1_i32 = arith.constant 1 : i32
    %1 = arith.addi %0, %c1_i32 : i32
    %c0_i32 = arith.constant 0 : i32
    %c0_i32_0 = arith.constant 0 : i32
    %c0_i32_1 = arith.constant 0 : i32
    return %arg0, %1, %c0_i32, %c0_i32_0 : i32, i32, i32, i32
  }
  func.func @transform_8(%arg0: i32, %arg1: i32) -> (i32, i32, i32, i32) {
    %c2_i32 = arith.constant 2 : i32
    %0 = arith.muli %c2_i32, %arg1 : i32
    %c2_i32_0 = arith.constant 2 : i32
    %1 = arith.addi %0, %c2_i32_0 : i32
    %c0_i32 = arith.constant 0 : i32
    %c0_i32_1 = arith.constant 0 : i32
    %c0_i32_2 = arith.constant 0 : i32
    return %arg0, %1, %c0_i32, %c0_i32_1 : i32, i32, i32, i32
  }
  func.func @transform_9(%arg0: i32, %arg1: i32) -> (i32, i32, i32) {
    %c0_i32 = arith.constant 0 : i32
    %c0_i32_0 = arith.constant 0 : i32
    %c0_i32_1 = arith.constant 0 : i32
    %c0_i32_2 = arith.constant 0 : i32
    return %c0_i32, %c0_i32_0, %c0_i32_1 : i32, i32, i32
  }
  func.func @transform_10(%arg0: i32, %arg1: i32) -> (i32, i32) {
    %c0_i32 = arith.constant 0 : i32
    %c0_i32_0 = arith.constant 0 : i32
    %c0_i32_1 = arith.constant 0 : i32
    return %c0_i32, %c0_i32_0 : i32, i32
  }
  func.func @transform_11(%arg0: i32, %arg1: i32) -> (i32, i32, i32, i32) {
    %c0_i32 = arith.constant 0 : i32
    %c0_i32_0 = arith.constant 0 : i32
    %c0_i32_1 = arith.constant 0 : i32
    return %arg0, %arg1, %c0_i32, %c0_i32_0 : i32, i32, i32, i32
  }
}

module attributes {stable_mosaic.version = 11 : i64} {
  func.func @_conv_tap_kernel(%arg0: i32, %arg1: i32, %arg2: memref<1x1x6x128xbf16, #tpu.memory_space<vmem>>, %arg3: memref<1x1x6x128xbf16, #tpu.memory_space<vmem>>, %arg4: memref<1x1x6x128xbf16, #tpu.memory_space<vmem>>, %arg5: memref<9x64x128xbf16, #tpu.memory_space<vmem>>, %arg6: memref<1x128xf32, #tpu.memory_space<vmem>>, %arg7: memref<1x1x4x128xbf16, #tpu.memory_space<vmem>>, %arg8: memref<32x128xbf16, #tpu.memory_space<vmem>>, %arg9: memref<1x1x4x128xbf16, #tpu.memory_space<vmem>>) attributes {dimension_semantics = [#tpu.dimension_semantics<parallel>, #tpu.dimension_semantics<parallel>], iteration_bounds = array<i64: 2, 4>, scalar_prefetch = 0 : i64, scratch_operands = 0 : i64, tpu.core_type = #tpu.core_type<tc>, window_params = [{transform_indices = @transform_0, window_bounds = array<i64: 1, 1, 6, 128>}, {transform_indices = @transform_1, window_bounds = array<i64: 1, 1, 6, 128>}, {transform_indices = @transform_2, window_bounds = array<i64: 1, 1, 6, 128>}, {pipeline_mode = #tpu.pipeline_mode<synchronous>, transform_indices = @transform_3, window_bounds = array<i64: 9, 64, 128>}, {pipeline_mode = #tpu.pipeline_mode<synchronous>, transform_indices = @transform_4, window_bounds = array<i64: 1, 128>}, {transform_indices = @transform_5, window_bounds = array<i64: 1, 1, 4, 128>}, {pipeline_mode = #tpu.pipeline_mode<synchronous>, transform_indices = @transform_6, window_bounds = array<i64: 32, 128>}, {transform_indices = @transform_7, window_bounds = array<i64: 1, 1, 4, 128>}]} {
    %c0 = arith.constant 0 : index
    %c0_0 = arith.constant 0 : index
    %c0_1 = arith.constant 0 : index
    %c0_2 = arith.constant 0 : index
    %0 = vector.load %arg2[%c0, %c0_0, %c0_1, %c0_2] : memref<1x1x6x128xbf16, #tpu.memory_space<vmem>>, vector<1x1x6x128xbf16>
    %1 = vector.shape_cast %0 : vector<1x1x6x128xbf16> to vector<6x128xbf16>
    %c0_3 = arith.constant 0 : index
    %c0_4 = arith.constant 0 : index
    %c0_5 = arith.constant 0 : index
    %c0_6 = arith.constant 0 : index
    %2 = vector.load %arg3[%c0_3, %c0_4, %c0_5, %c0_6] : memref<1x1x6x128xbf16, #tpu.memory_space<vmem>>, vector<1x1x6x128xbf16>
    %3 = vector.shape_cast %2 : vector<1x1x6x128xbf16> to vector<6x128xbf16>
    %c0_7 = arith.constant 0 : index
    %c0_8 = arith.constant 0 : index
    %c0_9 = arith.constant 0 : index
    %c0_10 = arith.constant 0 : index
    %4 = vector.load %arg4[%c0_7, %c0_8, %c0_9, %c0_10] : memref<1x1x6x128xbf16, #tpu.memory_space<vmem>>, vector<1x1x6x128xbf16>
    %5 = vector.shape_cast %4 : vector<1x1x6x128xbf16> to vector<6x128xbf16>
    %cst = arith.constant 0.000000e+00 : f32
    %6 = vector.broadcast %cst : f32 to vector<4x128xf32>
    %7 = vector.extract_strided_slice %1 {offsets = [0, 0], sizes = [4, 128], strides = [1, 1]} : vector<6x128xbf16> to vector<4x128xbf16>
    %8 = vector.extract_strided_slice %7 {offsets = [0, 0], sizes = [4, 64], strides = [1, 1]} : vector<4x128xbf16> to vector<4x64xbf16>
    %c0_11 = arith.constant 0 : index
    %c0_12 = arith.constant 0 : index
    %c0_13 = arith.constant 0 : index
    %9 = vector.load %arg5[%c0_11, %c0_12, %c0_13] : memref<9x64x128xbf16, #tpu.memory_space<vmem>>, vector<1x64x128xbf16>
    %10 = vector.shape_cast %9 : vector<1x64x128xbf16> to vector<64x128xbf16>
    %cst_14 = arith.constant dense<0.000000e+00> : vector<4x128xf32>
    %11 = tpu.matmul %8, %10, %cst_14 {dimension_numbers = #tpu.dot_dimension_numbers<[1], [0], [0], [1], [0, 0, 1, 1], [], []>} : vector<4x64xbf16>, vector<64x128xbf16>, vector<4x128xf32> -> vector<4x128xf32>
    %12 = arith.addf %6, %11 : vector<4x128xf32>
    %13 = vector.extract_strided_slice %1 {offsets = [1, 0], sizes = [4, 128], strides = [1, 1]} : vector<6x128xbf16> to vector<4x128xbf16>
    %14 = vector.extract_strided_slice %13 {offsets = [0, 0], sizes = [4, 64], strides = [1, 1]} : vector<4x128xbf16> to vector<4x64xbf16>
    %c1 = arith.constant 1 : index
    %c0_15 = arith.constant 0 : index
    %c0_16 = arith.constant 0 : index
    %15 = vector.load %arg5[%c1, %c0_15, %c0_16] : memref<9x64x128xbf16, #tpu.memory_space<vmem>>, vector<1x64x128xbf16>
    %16 = vector.shape_cast %15 : vector<1x64x128xbf16> to vector<64x128xbf16>
    %cst_17 = arith.constant dense<0.000000e+00> : vector<4x128xf32>
    %17 = tpu.matmul %14, %16, %cst_17 {dimension_numbers = #tpu.dot_dimension_numbers<[1], [0], [0], [1], [0, 0, 1, 1], [], []>} : vector<4x64xbf16>, vector<64x128xbf16>, vector<4x128xf32> -> vector<4x128xf32>
    %18 = arith.addf %12, %17 : vector<4x128xf32>
    %19 = vector.extract_strided_slice %1 {offsets = [2, 0], sizes = [4, 128], strides = [1, 1]} : vector<6x128xbf16> to vector<4x128xbf16>
    %20 = vector.extract_strided_slice %19 {offsets = [0, 0], sizes = [4, 64], strides = [1, 1]} : vector<4x128xbf16> to vector<4x64xbf16>
    %c2 = arith.constant 2 : index
    %c0_18 = arith.constant 0 : index
    %c0_19 = arith.constant 0 : index
    %21 = vector.load %arg5[%c2, %c0_18, %c0_19] : memref<9x64x128xbf16, #tpu.memory_space<vmem>>, vector<1x64x128xbf16>
    %22 = vector.shape_cast %21 : vector<1x64x128xbf16> to vector<64x128xbf16>
    %cst_20 = arith.constant dense<0.000000e+00> : vector<4x128xf32>
    %23 = tpu.matmul %20, %22, %cst_20 {dimension_numbers = #tpu.dot_dimension_numbers<[1], [0], [0], [1], [0, 0, 1, 1], [], []>} : vector<4x64xbf16>, vector<64x128xbf16>, vector<4x128xf32> -> vector<4x128xf32>
    %24 = arith.addf %18, %23 : vector<4x128xf32>
    %25 = vector.extract_strided_slice %3 {offsets = [0, 0], sizes = [4, 128], strides = [1, 1]} : vector<6x128xbf16> to vector<4x128xbf16>
    %26 = vector.extract_strided_slice %25 {offsets = [0, 0], sizes = [4, 64], strides = [1, 1]} : vector<4x128xbf16> to vector<4x64xbf16>
    %c3 = arith.constant 3 : index
    %c0_21 = arith.constant 0 : index
    %c0_22 = arith.constant 0 : index
    %27 = vector.load %arg5[%c3, %c0_21, %c0_22] : memref<9x64x128xbf16, #tpu.memory_space<vmem>>, vector<1x64x128xbf16>
    %28 = vector.shape_cast %27 : vector<1x64x128xbf16> to vector<64x128xbf16>
    %cst_23 = arith.constant dense<0.000000e+00> : vector<4x128xf32>
    %29 = tpu.matmul %26, %28, %cst_23 {dimension_numbers = #tpu.dot_dimension_numbers<[1], [0], [0], [1], [0, 0, 1, 1], [], []>} : vector<4x64xbf16>, vector<64x128xbf16>, vector<4x128xf32> -> vector<4x128xf32>
    %30 = arith.addf %24, %29 : vector<4x128xf32>
    %31 = vector.extract_strided_slice %3 {offsets = [1, 0], sizes = [4, 128], strides = [1, 1]} : vector<6x128xbf16> to vector<4x128xbf16>
    %32 = vector.extract_strided_slice %31 {offsets = [0, 0], sizes = [4, 64], strides = [1, 1]} : vector<4x128xbf16> to vector<4x64xbf16>
    %c4 = arith.constant 4 : index
    %c0_24 = arith.constant 0 : index
    %c0_25 = arith.constant 0 : index
    %33 = vector.load %arg5[%c4, %c0_24, %c0_25] : memref<9x64x128xbf16, #tpu.memory_space<vmem>>, vector<1x64x128xbf16>
    %34 = vector.shape_cast %33 : vector<1x64x128xbf16> to vector<64x128xbf16>
    %cst_26 = arith.constant dense<0.000000e+00> : vector<4x128xf32>
    %35 = tpu.matmul %32, %34, %cst_26 {dimension_numbers = #tpu.dot_dimension_numbers<[1], [0], [0], [1], [0, 0, 1, 1], [], []>} : vector<4x64xbf16>, vector<64x128xbf16>, vector<4x128xf32> -> vector<4x128xf32>
    %36 = arith.addf %30, %35 : vector<4x128xf32>
    %37 = vector.extract_strided_slice %3 {offsets = [2, 0], sizes = [4, 128], strides = [1, 1]} : vector<6x128xbf16> to vector<4x128xbf16>
    %38 = vector.extract_strided_slice %37 {offsets = [0, 0], sizes = [4, 64], strides = [1, 1]} : vector<4x128xbf16> to vector<4x64xbf16>
    %c5 = arith.constant 5 : index
    %c0_27 = arith.constant 0 : index
    %c0_28 = arith.constant 0 : index
    %39 = vector.load %arg5[%c5, %c0_27, %c0_28] : memref<9x64x128xbf16, #tpu.memory_space<vmem>>, vector<1x64x128xbf16>
    %40 = vector.shape_cast %39 : vector<1x64x128xbf16> to vector<64x128xbf16>
    %cst_29 = arith.constant dense<0.000000e+00> : vector<4x128xf32>
    %41 = tpu.matmul %38, %40, %cst_29 {dimension_numbers = #tpu.dot_dimension_numbers<[1], [0], [0], [1], [0, 0, 1, 1], [], []>} : vector<4x64xbf16>, vector<64x128xbf16>, vector<4x128xf32> -> vector<4x128xf32>
    %42 = arith.addf %36, %41 : vector<4x128xf32>
    %43 = vector.extract_strided_slice %5 {offsets = [0, 0], sizes = [4, 128], strides = [1, 1]} : vector<6x128xbf16> to vector<4x128xbf16>
    %44 = vector.extract_strided_slice %43 {offsets = [0, 0], sizes = [4, 64], strides = [1, 1]} : vector<4x128xbf16> to vector<4x64xbf16>
    %c6 = arith.constant 6 : index
    %c0_30 = arith.constant 0 : index
    %c0_31 = arith.constant 0 : index
    %45 = vector.load %arg5[%c6, %c0_30, %c0_31] : memref<9x64x128xbf16, #tpu.memory_space<vmem>>, vector<1x64x128xbf16>
    %46 = vector.shape_cast %45 : vector<1x64x128xbf16> to vector<64x128xbf16>
    %cst_32 = arith.constant dense<0.000000e+00> : vector<4x128xf32>
    %47 = tpu.matmul %44, %46, %cst_32 {dimension_numbers = #tpu.dot_dimension_numbers<[1], [0], [0], [1], [0, 0, 1, 1], [], []>} : vector<4x64xbf16>, vector<64x128xbf16>, vector<4x128xf32> -> vector<4x128xf32>
    %48 = arith.addf %42, %47 : vector<4x128xf32>
    %49 = vector.extract_strided_slice %5 {offsets = [1, 0], sizes = [4, 128], strides = [1, 1]} : vector<6x128xbf16> to vector<4x128xbf16>
    %50 = vector.extract_strided_slice %49 {offsets = [0, 0], sizes = [4, 64], strides = [1, 1]} : vector<4x128xbf16> to vector<4x64xbf16>
    %c7 = arith.constant 7 : index
    %c0_33 = arith.constant 0 : index
    %c0_34 = arith.constant 0 : index
    %51 = vector.load %arg5[%c7, %c0_33, %c0_34] : memref<9x64x128xbf16, #tpu.memory_space<vmem>>, vector<1x64x128xbf16>
    %52 = vector.shape_cast %51 : vector<1x64x128xbf16> to vector<64x128xbf16>
    %cst_35 = arith.constant dense<0.000000e+00> : vector<4x128xf32>
    %53 = tpu.matmul %50, %52, %cst_35 {dimension_numbers = #tpu.dot_dimension_numbers<[1], [0], [0], [1], [0, 0, 1, 1], [], []>} : vector<4x64xbf16>, vector<64x128xbf16>, vector<4x128xf32> -> vector<4x128xf32>
    %54 = arith.addf %48, %53 : vector<4x128xf32>
    %55 = vector.extract_strided_slice %5 {offsets = [2, 0], sizes = [4, 128], strides = [1, 1]} : vector<6x128xbf16> to vector<4x128xbf16>
    %56 = vector.extract_strided_slice %55 {offsets = [0, 0], sizes = [4, 64], strides = [1, 1]} : vector<4x128xbf16> to vector<4x64xbf16>
    %c8 = arith.constant 8 : index
    %c0_36 = arith.constant 0 : index
    %c0_37 = arith.constant 0 : index
    %57 = vector.load %arg5[%c8, %c0_36, %c0_37] : memref<9x64x128xbf16, #tpu.memory_space<vmem>>, vector<1x64x128xbf16>
    %58 = vector.shape_cast %57 : vector<1x64x128xbf16> to vector<64x128xbf16>
    %cst_38 = arith.constant dense<0.000000e+00> : vector<4x128xf32>
    %59 = tpu.matmul %56, %58, %cst_38 {dimension_numbers = #tpu.dot_dimension_numbers<[1], [0], [0], [1], [0, 0, 1, 1], [], []>} : vector<4x64xbf16>, vector<64x128xbf16>, vector<4x128xf32> -> vector<4x128xf32>
    %60 = arith.addf %54, %59 : vector<4x128xf32>
    %c0_39 = arith.constant 0 : index
    %c0_40 = arith.constant 0 : index
    %61 = vector.load %arg6[%c0_39, %c0_40] : memref<1x128xf32, #tpu.memory_space<vmem>>, vector<1x128xf32>
    %62 = vector.broadcast %61 : vector<1x128xf32> to vector<4x128xf32>
    %63 = arith.addf %60, %62 : vector<4x128xf32>
    %c0_41 = arith.constant 0 : index
    %c0_42 = arith.constant 0 : index
    %c0_43 = arith.constant 0 : index
    %c0_44 = arith.constant 0 : index
    %64 = vector.load %arg7[%c0_41, %c0_42, %c0_43, %c0_44] : memref<1x1x4x128xbf16, #tpu.memory_space<vmem>>, vector<1x1x4x128xbf16>
    %65 = vector.shape_cast %64 : vector<1x1x4x128xbf16> to vector<4x128xbf16>
    %66 = vector.extract_strided_slice %65 {offsets = [0, 0], sizes = [4, 32], strides = [1, 1]} : vector<4x128xbf16> to vector<4x32xbf16>
    %c0_45 = arith.constant 0 : index
    %c0_46 = arith.constant 0 : index
    %67 = vector.load %arg8[%c0_45, %c0_46] : memref<32x128xbf16, #tpu.memory_space<vmem>>, vector<32x128xbf16>
    %cst_47 = arith.constant dense<0.000000e+00> : vector<4x128xf32>
    %68 = tpu.matmul %66, %67, %cst_47 {dimension_numbers = #tpu.dot_dimension_numbers<[1], [0], [0], [1], [0, 0, 1, 1], [], []>} : vector<4x32xbf16>, vector<32x128xbf16>, vector<4x128xf32> -> vector<4x128xf32>
    %69 = arith.addf %63, %68 : vector<4x128xf32>
    %cst_48 = arith.constant 0.000000e+00 : f32
    %70 = vector.broadcast %cst_48 : f32 to vector<4x128xf32>
    %71 = arith.maximumf %69, %70 : vector<4x128xf32>
    %72 = arith.truncf %71 : vector<4x128xf32> to vector<4x128xbf16>
    %c0_49 = arith.constant 0 : index
    %c0_50 = arith.constant 0 : index
    %c0_51 = arith.constant 0 : index
    %c0_52 = arith.constant 0 : index
    %73 = vector.load %arg9[%c0_49, %c0_50, %c0_51, %c0_52] : memref<1x1x4x128xbf16, #tpu.memory_space<vmem>>, vector<1x1x4x128xbf16>
    %74 = vector.shape_cast %73 : vector<1x1x4x128xbf16> to vector<4x128xbf16>
    %75 = vector.shape_cast %72 : vector<4x128xbf16> to vector<1x1x4x128xbf16>
    tpu.vector_store %arg9[%c0_49, %c0_50, %c0_51, %c0_52], %75 {strides = array<i32>} : memref<1x1x4x128xbf16, #tpu.memory_space<vmem>>, vector<1x1x4x128xbf16>,
    return
  }
  func.func @transform_0(%arg0: i32, %arg1: i32) -> (i32, i32, i32, i32) {
    %c0_i32 = arith.constant 0 : i32
    %0 = arith.addi %arg1, %c0_i32 : i32
    %c0_i32_0 = arith.constant 0 : i32
    %c0_i32_1 = arith.constant 0 : i32
    %c0_i32_2 = arith.constant 0 : i32
    return %arg0, %0, %c0_i32_0, %c0_i32_1 : i32, i32, i32, i32
  }
  func.func @transform_1(%arg0: i32, %arg1: i32) -> (i32, i32, i32, i32) {
    %c1_i32 = arith.constant 1 : i32
    %0 = arith.addi %arg1, %c1_i32 : i32
    %c0_i32 = arith.constant 0 : i32
    %c0_i32_0 = arith.constant 0 : i32
    %c0_i32_1 = arith.constant 0 : i32
    return %arg0, %0, %c0_i32, %c0_i32_0 : i32, i32, i32, i32
  }
  func.func @transform_2(%arg0: i32, %arg1: i32) -> (i32, i32, i32, i32) {
    %c2_i32 = arith.constant 2 : i32
    %0 = arith.addi %arg1, %c2_i32 : i32
    %c0_i32 = arith.constant 0 : i32
    %c0_i32_0 = arith.constant 0 : i32
    %c0_i32_1 = arith.constant 0 : i32
    return %arg0, %0, %c0_i32, %c0_i32_0 : i32, i32, i32, i32
  }
  func.func @transform_3(%arg0: i32, %arg1: i32) -> (i32, i32, i32) {
    %c0_i32 = arith.constant 0 : i32
    %c0_i32_0 = arith.constant 0 : i32
    %c0_i32_1 = arith.constant 0 : i32
    %c0_i32_2 = arith.constant 0 : i32
    return %c0_i32, %c0_i32_0, %c0_i32_1 : i32, i32, i32
  }
  func.func @transform_4(%arg0: i32, %arg1: i32) -> (i32, i32) {
    %c0_i32 = arith.constant 0 : i32
    %c0_i32_0 = arith.constant 0 : i32
    %c0_i32_1 = arith.constant 0 : i32
    return %c0_i32, %c0_i32_0 : i32, i32
  }
  func.func @transform_5(%arg0: i32, %arg1: i32) -> (i32, i32, i32, i32) {
    %c2_i32 = arith.constant 2 : i32
    %0 = arith.muli %c2_i32, %arg1 : i32
    %c0_i32 = arith.constant 0 : i32
    %c0_i32_0 = arith.constant 0 : i32
    %c0_i32_1 = arith.constant 0 : i32
    return %arg0, %0, %c0_i32, %c0_i32_0 : i32, i32, i32, i32
  }
  func.func @transform_6(%arg0: i32, %arg1: i32) -> (i32, i32) {
    %c0_i32 = arith.constant 0 : i32
    %c0_i32_0 = arith.constant 0 : i32
    %c0_i32_1 = arith.constant 0 : i32
    return %c0_i32, %c0_i32_0 : i32, i32
  }
  func.func @transform_7(%arg0: i32, %arg1: i32) -> (i32, i32, i32, i32) {
    %c0_i32 = arith.constant 0 : i32
    %c0_i32_0 = arith.constant 0 : i32
    %c0_i32_1 = arith.constant 0 : i32
    return %arg0, %arg1, %c0_i32, %c0_i32_0 : i32, i32, i32, i32
  }
}

module attributes {stable_mosaic.version = 11 : i64} {
  func.func @_conv_tap_kernel(%arg0: i32, %arg1: i32, %arg2: memref<1x1x2x128xbf16, #tpu.memory_space<vmem>>, %arg3: memref<1x1x2x128xbf16, #tpu.memory_space<vmem>>, %arg4: memref<1x1x2x128xbf16, #tpu.memory_space<vmem>>, %arg5: memref<1x1x2x128xbf16, #tpu.memory_space<vmem>>, %arg6: memref<1x1x2x128xbf16, #tpu.memory_space<vmem>>, %arg7: memref<1x1x2x128xbf16, #tpu.memory_space<vmem>>, %arg8: memref<1x1x2x128xbf16, #tpu.memory_space<vmem>>, %arg9: memref<1x1x2x128xbf16, #tpu.memory_space<vmem>>, %arg10: memref<1x1x2x128xbf16, #tpu.memory_space<vmem>>, %arg11: memref<9x64x128xbf16, #tpu.memory_space<vmem>>, %arg12: memref<1x128xf32, #tpu.memory_space<vmem>>, %arg13: memref<1x1x2x128xbf16, #tpu.memory_space<vmem>>) attributes {dimension_semantics = [#tpu.dimension_semantics<parallel>, #tpu.dimension_semantics<parallel>], iteration_bounds = array<i64: 2, 2>, scalar_prefetch = 0 : i64, scratch_operands = 0 : i64, tpu.core_type = #tpu.core_type<tc>, window_params = [{transform_indices = @transform_0, window_bounds = array<i64: 1, 1, 2, 128>}, {transform_indices = @transform_1, window_bounds = array<i64: 1, 1, 2, 128>}, {transform_indices = @transform_2, window_bounds = array<i64: 1, 1, 2, 128>}, {transform_indices = @transform_3, window_bounds = array<i64: 1, 1, 2, 128>}, {transform_indices = @transform_4, window_bounds = array<i64: 1, 1, 2, 128>}, {transform_indices = @transform_5, window_bounds = array<i64: 1, 1, 2, 128>}, {transform_indices = @transform_6, window_bounds = array<i64: 1, 1, 2, 128>}, {transform_indices = @transform_7, window_bounds = array<i64: 1, 1, 2, 128>}, {transform_indices = @transform_8, window_bounds = array<i64: 1, 1, 2, 128>}, {pipeline_mode = #tpu.pipeline_mode<synchronous>, transform_indices = @transform_9, window_bounds = array<i64: 9, 64, 128>}, {pipeline_mode = #tpu.pipeline_mode<synchronous>, transform_indices = @transform_10, window_bounds = array<i64: 1, 128>}, {transform_indices = @transform_11, window_bounds = array<i64: 1, 1, 2, 128>}]} {
    %c0 = arith.constant 0 : index
    %c0_0 = arith.constant 0 : index
    %c0_1 = arith.constant 0 : index
    %c0_2 = arith.constant 0 : index
    %0 = vector.load %arg2[%c0, %c0_0, %c0_1, %c0_2] : memref<1x1x2x128xbf16, #tpu.memory_space<vmem>>, vector<1x1x2x128xbf16>
    %1 = vector.shape_cast %0 : vector<1x1x2x128xbf16> to vector<2x128xbf16>
    %c0_3 = arith.constant 0 : index
    %c0_4 = arith.constant 0 : index
    %c0_5 = arith.constant 0 : index
    %c0_6 = arith.constant 0 : index
    %2 = vector.load %arg3[%c0_3, %c0_4, %c0_5, %c0_6] : memref<1x1x2x128xbf16, #tpu.memory_space<vmem>>, vector<1x1x2x128xbf16>
    %3 = vector.shape_cast %2 : vector<1x1x2x128xbf16> to vector<2x128xbf16>
    %c0_7 = arith.constant 0 : index
    %c0_8 = arith.constant 0 : index
    %c0_9 = arith.constant 0 : index
    %c0_10 = arith.constant 0 : index
    %4 = vector.load %arg4[%c0_7, %c0_8, %c0_9, %c0_10] : memref<1x1x2x128xbf16, #tpu.memory_space<vmem>>, vector<1x1x2x128xbf16>
    %5 = vector.shape_cast %4 : vector<1x1x2x128xbf16> to vector<2x128xbf16>
    %c0_11 = arith.constant 0 : index
    %c0_12 = arith.constant 0 : index
    %c0_13 = arith.constant 0 : index
    %c0_14 = arith.constant 0 : index
    %6 = vector.load %arg5[%c0_11, %c0_12, %c0_13, %c0_14] : memref<1x1x2x128xbf16, #tpu.memory_space<vmem>>, vector<1x1x2x128xbf16>
    %7 = vector.shape_cast %6 : vector<1x1x2x128xbf16> to vector<2x128xbf16>
    %c0_15 = arith.constant 0 : index
    %c0_16 = arith.constant 0 : index
    %c0_17 = arith.constant 0 : index
    %c0_18 = arith.constant 0 : index
    %8 = vector.load %arg6[%c0_15, %c0_16, %c0_17, %c0_18] : memref<1x1x2x128xbf16, #tpu.memory_space<vmem>>, vector<1x1x2x128xbf16>
    %9 = vector.shape_cast %8 : vector<1x1x2x128xbf16> to vector<2x128xbf16>
    %c0_19 = arith.constant 0 : index
    %c0_20 = arith.constant 0 : index
    %c0_21 = arith.constant 0 : index
    %c0_22 = arith.constant 0 : index
    %10 = vector.load %arg7[%c0_19, %c0_20, %c0_21, %c0_22] : memref<1x1x2x128xbf16, #tpu.memory_space<vmem>>, vector<1x1x2x128xbf16>
    %11 = vector.shape_cast %10 : vector<1x1x2x128xbf16> to vector<2x128xbf16>
    %c0_23 = arith.constant 0 : index
    %c0_24 = arith.constant 0 : index
    %c0_25 = arith.constant 0 : index
    %c0_26 = arith.constant 0 : index
    %12 = vector.load %arg8[%c0_23, %c0_24, %c0_25, %c0_26] : memref<1x1x2x128xbf16, #tpu.memory_space<vmem>>, vector<1x1x2x128xbf16>
    %13 = vector.shape_cast %12 : vector<1x1x2x128xbf16> to vector<2x128xbf16>
    %c0_27 = arith.constant 0 : index
    %c0_28 = arith.constant 0 : index
    %c0_29 = arith.constant 0 : index
    %c0_30 = arith.constant 0 : index
    %14 = vector.load %arg9[%c0_27, %c0_28, %c0_29, %c0_30] : memref<1x1x2x128xbf16, #tpu.memory_space<vmem>>, vector<1x1x2x128xbf16>
    %15 = vector.shape_cast %14 : vector<1x1x2x128xbf16> to vector<2x128xbf16>
    %c0_31 = arith.constant 0 : index
    %c0_32 = arith.constant 0 : index
    %c0_33 = arith.constant 0 : index
    %c0_34 = arith.constant 0 : index
    %16 = vector.load %arg10[%c0_31, %c0_32, %c0_33, %c0_34] : memref<1x1x2x128xbf16, #tpu.memory_space<vmem>>, vector<1x1x2x128xbf16>
    %17 = vector.shape_cast %16 : vector<1x1x2x128xbf16> to vector<2x128xbf16>
    %cst = arith.constant 0.000000e+00 : f32
    %18 = vector.broadcast %cst : f32 to vector<2x128xf32>
    %19 = vector.extract_strided_slice %1 {offsets = [0, 0], sizes = [2, 64], strides = [1, 1]} : vector<2x128xbf16> to vector<2x64xbf16>
    %c0_35 = arith.constant 0 : index
    %c0_36 = arith.constant 0 : index
    %c0_37 = arith.constant 0 : index
    %20 = vector.load %arg11[%c0_35, %c0_36, %c0_37] : memref<9x64x128xbf16, #tpu.memory_space<vmem>>, vector<1x64x128xbf16>
    %21 = vector.shape_cast %20 : vector<1x64x128xbf16> to vector<64x128xbf16>
    %cst_38 = arith.constant dense<0.000000e+00> : vector<2x128xf32>
    %22 = tpu.matmul %19, %21, %cst_38 {dimension_numbers = #tpu.dot_dimension_numbers<[1], [0], [0], [1], [0, 0, 1, 1], [], []>} : vector<2x64xbf16>, vector<64x128xbf16>, vector<2x128xf32> -> vector<2x128xf32>
    %23 = arith.addf %18, %22 : vector<2x128xf32>
    %24 = vector.extract_strided_slice %7 {offsets = [0, 0], sizes = [2, 64], strides = [1, 1]} : vector<2x128xbf16> to vector<2x64xbf16>
    %c1 = arith.constant 1 : index
    %c0_39 = arith.constant 0 : index
    %c0_40 = arith.constant 0 : index
    %25 = vector.load %arg11[%c1, %c0_39, %c0_40] : memref<9x64x128xbf16, #tpu.memory_space<vmem>>, vector<1x64x128xbf16>
    %26 = vector.shape_cast %25 : vector<1x64x128xbf16> to vector<64x128xbf16>
    %cst_41 = arith.constant dense<0.000000e+00> : vector<2x128xf32>
    %27 = tpu.matmul %24, %26, %cst_41 {dimension_numbers = #tpu.dot_dimension_numbers<[1], [0], [0], [1], [0, 0, 1, 1], [], []>} : vector<2x64xbf16>, vector<64x128xbf16>, vector<2x128xf32> -> vector<2x128xf32>
    %28 = arith.addf %23, %27 : vector<2x128xf32>
    %29 = vector.extract_strided_slice %13 {offsets = [0, 0], sizes = [2, 64], strides = [1, 1]} : vector<2x128xbf16> to vector<2x64xbf16>
    %c2 = arith.constant 2 : index
    %c0_42 = arith.constant 0 : index
    %c0_43 = arith.constant 0 : index
    %30 = vector.load %arg11[%c2, %c0_42, %c0_43] : memref<9x64x128xbf16, #tpu.memory_space<vmem>>, vector<1x64x128xbf16>
    %31 = vector.shape_cast %30 : vector<1x64x128xbf16> to vector<64x128xbf16>
    %cst_44 = arith.constant dense<0.000000e+00> : vector<2x128xf32>
    %32 = tpu.matmul %29, %31, %cst_44 {dimension_numbers = #tpu.dot_dimension_numbers<[1], [0], [0], [1], [0, 0, 1, 1], [], []>} : vector<2x64xbf16>, vector<64x128xbf16>, vector<2x128xf32> -> vector<2x128xf32>
    %33 = arith.addf %28, %32 : vector<2x128xf32>
    %34 = vector.extract_strided_slice %3 {offsets = [0, 0], sizes = [2, 64], strides = [1, 1]} : vector<2x128xbf16> to vector<2x64xbf16>
    %c3 = arith.constant 3 : index
    %c0_45 = arith.constant 0 : index
    %c0_46 = arith.constant 0 : index
    %35 = vector.load %arg11[%c3, %c0_45, %c0_46] : memref<9x64x128xbf16, #tpu.memory_space<vmem>>, vector<1x64x128xbf16>
    %36 = vector.shape_cast %35 : vector<1x64x128xbf16> to vector<64x128xbf16>
    %cst_47 = arith.constant dense<0.000000e+00> : vector<2x128xf32>
    %37 = tpu.matmul %34, %36, %cst_47 {dimension_numbers = #tpu.dot_dimension_numbers<[1], [0], [0], [1], [0, 0, 1, 1], [], []>} : vector<2x64xbf16>, vector<64x128xbf16>, vector<2x128xf32> -> vector<2x128xf32>
    %38 = arith.addf %33, %37 : vector<2x128xf32>
    %39 = vector.extract_strided_slice %9 {offsets = [0, 0], sizes = [2, 64], strides = [1, 1]} : vector<2x128xbf16> to vector<2x64xbf16>
    %c4 = arith.constant 4 : index
    %c0_48 = arith.constant 0 : index
    %c0_49 = arith.constant 0 : index
    %40 = vector.load %arg11[%c4, %c0_48, %c0_49] : memref<9x64x128xbf16, #tpu.memory_space<vmem>>, vector<1x64x128xbf16>
    %41 = vector.shape_cast %40 : vector<1x64x128xbf16> to vector<64x128xbf16>
    %cst_50 = arith.constant dense<0.000000e+00> : vector<2x128xf32>
    %42 = tpu.matmul %39, %41, %cst_50 {dimension_numbers = #tpu.dot_dimension_numbers<[1], [0], [0], [1], [0, 0, 1, 1], [], []>} : vector<2x64xbf16>, vector<64x128xbf16>, vector<2x128xf32> -> vector<2x128xf32>
    %43 = arith.addf %38, %42 : vector<2x128xf32>
    %44 = vector.extract_strided_slice %15 {offsets = [0, 0], sizes = [2, 64], strides = [1, 1]} : vector<2x128xbf16> to vector<2x64xbf16>
    %c5 = arith.constant 5 : index
    %c0_51 = arith.constant 0 : index
    %c0_52 = arith.constant 0 : index
    %45 = vector.load %arg11[%c5, %c0_51, %c0_52] : memref<9x64x128xbf16, #tpu.memory_space<vmem>>, vector<1x64x128xbf16>
    %46 = vector.shape_cast %45 : vector<1x64x128xbf16> to vector<64x128xbf16>
    %cst_53 = arith.constant dense<0.000000e+00> : vector<2x128xf32>
    %47 = tpu.matmul %44, %46, %cst_53 {dimension_numbers = #tpu.dot_dimension_numbers<[1], [0], [0], [1], [0, 0, 1, 1], [], []>} : vector<2x64xbf16>, vector<64x128xbf16>, vector<2x128xf32> -> vector<2x128xf32>
    %48 = arith.addf %43, %47 : vector<2x128xf32>
    %49 = vector.extract_strided_slice %5 {offsets = [0, 0], sizes = [2, 64], strides = [1, 1]} : vector<2x128xbf16> to vector<2x64xbf16>
    %c6 = arith.constant 6 : index
    %c0_54 = arith.constant 0 : index
    %c0_55 = arith.constant 0 : index
    %50 = vector.load %arg11[%c6, %c0_54, %c0_55] : memref<9x64x128xbf16, #tpu.memory_space<vmem>>, vector<1x64x128xbf16>
    %51 = vector.shape_cast %50 : vector<1x64x128xbf16> to vector<64x128xbf16>
    %cst_56 = arith.constant dense<0.000000e+00> : vector<2x128xf32>
    %52 = tpu.matmul %49, %51, %cst_56 {dimension_numbers = #tpu.dot_dimension_numbers<[1], [0], [0], [1], [0, 0, 1, 1], [], []>} : vector<2x64xbf16>, vector<64x128xbf16>, vector<2x128xf32> -> vector<2x128xf32>
    %53 = arith.addf %48, %52 : vector<2x128xf32>
    %54 = vector.extract_strided_slice %11 {offsets = [0, 0], sizes = [2, 64], strides = [1, 1]} : vector<2x128xbf16> to vector<2x64xbf16>
    %c7 = arith.constant 7 : index
    %c0_57 = arith.constant 0 : index
    %c0_58 = arith.constant 0 : index
    %55 = vector.load %arg11[%c7, %c0_57, %c0_58] : memref<9x64x128xbf16, #tpu.memory_space<vmem>>, vector<1x64x128xbf16>
    %56 = vector.shape_cast %55 : vector<1x64x128xbf16> to vector<64x128xbf16>
    %cst_59 = arith.constant dense<0.000000e+00> : vector<2x128xf32>
    %57 = tpu.matmul %54, %56, %cst_59 {dimension_numbers = #tpu.dot_dimension_numbers<[1], [0], [0], [1], [0, 0, 1, 1], [], []>} : vector<2x64xbf16>, vector<64x128xbf16>, vector<2x128xf32> -> vector<2x128xf32>
    %58 = arith.addf %53, %57 : vector<2x128xf32>
    %59 = vector.extract_strided_slice %17 {offsets = [0, 0], sizes = [2, 64], strides = [1, 1]} : vector<2x128xbf16> to vector<2x64xbf16>
    %c8 = arith.constant 8 : index
    %c0_60 = arith.constant 0 : index
    %c0_61 = arith.constant 0 : index
    %60 = vector.load %arg11[%c8, %c0_60, %c0_61] : memref<9x64x128xbf16, #tpu.memory_space<vmem>>, vector<1x64x128xbf16>
    %61 = vector.shape_cast %60 : vector<1x64x128xbf16> to vector<64x128xbf16>
    %cst_62 = arith.constant dense<0.000000e+00> : vector<2x128xf32>
    %62 = tpu.matmul %59, %61, %cst_62 {dimension_numbers = #tpu.dot_dimension_numbers<[1], [0], [0], [1], [0, 0, 1, 1], [], []>} : vector<2x64xbf16>, vector<64x128xbf16>, vector<2x128xf32> -> vector<2x128xf32>
    %63 = arith.addf %58, %62 : vector<2x128xf32>
    %c0_63 = arith.constant 0 : index
    %c0_64 = arith.constant 0 : index
    %64 = vector.load %arg12[%c0_63, %c0_64] : memref<1x128xf32, #tpu.memory_space<vmem>>, vector<1x128xf32>
    %65 = vector.broadcast %64 : vector<1x128xf32> to vector<2x128xf32>
    %66 = arith.addf %63, %65 : vector<2x128xf32>
    %cst_65 = arith.constant 0.000000e+00 : f32
    %67 = vector.broadcast %cst_65 : f32 to vector<2x128xf32>
    %68 = arith.maximumf %66, %67 : vector<2x128xf32>
    %69 = arith.truncf %68 : vector<2x128xf32> to vector<2x128xbf16>
    %c0_66 = arith.constant 0 : index
    %c0_67 = arith.constant 0 : index
    %c0_68 = arith.constant 0 : index
    %c0_69 = arith.constant 0 : index
    %70 = vector.load %arg13[%c0_66, %c0_67, %c0_68, %c0_69] : memref<1x1x2x128xbf16, #tpu.memory_space<vmem>>, vector<1x1x2x128xbf16>
    %71 = vector.shape_cast %70 : vector<1x1x2x128xbf16> to vector<2x128xbf16>
    %72 = vector.shape_cast %69 : vector<2x128xbf16> to vector<1x1x2x128xbf16>
    tpu.vector_store %arg13[%c0_66, %c0_67, %c0_68, %c0_69], %72 {strides = array<i32>} : memref<1x1x2x128xbf16, #tpu.memory_space<vmem>>, vector<1x1x2x128xbf16>,
    return
  }
  func.func @transform_0(%arg0: i32, %arg1: i32) -> (i32, i32, i32, i32) {
    %c2_i32 = arith.constant 2 : i32
    %0 = arith.muli %c2_i32, %arg1 : i32
    %c0_i32 = arith.constant 0 : i32
    %1 = arith.addi %0, %c0_i32 : i32
    %c0_i32_0 = arith.constant 0 : i32
    %c0_i32_1 = arith.constant 0 : i32
    %c0_i32_2 = arith.constant 0 : i32
    return %arg0, %1, %c0_i32_0, %c0_i32_1 : i32, i32, i32, i32
  }
  func.func @transform_1(%arg0: i32, %arg1: i32) -> (i32, i32, i32, i32) {
    %c2_i32 = arith.constant 2 : i32
    %0 = arith.muli %c2_i32, %arg1 : i32
    %c1_i32 = arith.constant 1 : i32
    %1 = arith.addi %0, %c1_i32 : i32
    %c0_i32 = arith.constant 0 : i32
    %c0_i32_0 = arith.constant 0 : i32
    %c0_i32_1 = arith.constant 0 : i32
    return %arg0, %1, %c0_i32, %c0_i32_0 : i32, i32, i32, i32
  }
  func.func @transform_2(%arg0: i32, %arg1: i32) -> (i32, i32, i32, i32) {
    %c2_i32 = arith.constant 2 : i32
    %0 = arith.muli %c2_i32, %arg1 : i32
    %c2_i32_0 = arith.constant 2 : i32
    %1 = arith.addi %0, %c2_i32_0 : i32
    %c0_i32 = arith.constant 0 : i32
    %c0_i32_1 = arith.constant 0 : i32
    %c0_i32_2 = arith.constant 0 : i32
    return %arg0, %1, %c0_i32, %c0_i32_1 : i32, i32, i32, i32
  }
  func.func @transform_3(%arg0: i32, %arg1: i32) -> (i32, i32, i32, i32) {
    %c2_i32 = arith.constant 2 : i32
    %0 = arith.muli %c2_i32, %arg1 : i32
    %c0_i32 = arith.constant 0 : i32
    %1 = arith.addi %0, %c0_i32 : i32
    %c0_i32_0 = arith.constant 0 : i32
    %c0_i32_1 = arith.constant 0 : i32
    %c0_i32_2 = arith.constant 0 : i32
    return %arg0, %1, %c0_i32_0, %c0_i32_1 : i32, i32, i32, i32
  }
  func.func @transform_4(%arg0: i32, %arg1: i32) -> (i32, i32, i32, i32) {
    %c2_i32 = arith.constant 2 : i32
    %0 = arith.muli %c2_i32, %arg1 : i32
    %c1_i32 = arith.constant 1 : i32
    %1 = arith.addi %0, %c1_i32 : i32
    %c0_i32 = arith.constant 0 : i32
    %c0_i32_0 = arith.constant 0 : i32
    %c0_i32_1 = arith.constant 0 : i32
    return %arg0, %1, %c0_i32, %c0_i32_0 : i32, i32, i32, i32
  }
  func.func @transform_5(%arg0: i32, %arg1: i32) -> (i32, i32, i32, i32) {
    %c2_i32 = arith.constant 2 : i32
    %0 = arith.muli %c2_i32, %arg1 : i32
    %c2_i32_0 = arith.constant 2 : i32
    %1 = arith.addi %0, %c2_i32_0 : i32
    %c0_i32 = arith.constant 0 : i32
    %c0_i32_1 = arith.constant 0 : i32
    %c0_i32_2 = arith.constant 0 : i32
    return %arg0, %1, %c0_i32, %c0_i32_1 : i32, i32, i32, i32
  }
  func.func @transform_6(%arg0: i32, %arg1: i32) -> (i32, i32, i32, i32) {
    %c2_i32 = arith.constant 2 : i32
    %0 = arith.muli %c2_i32, %arg1 : i32
    %c0_i32 = arith.constant 0 : i32
    %1 = arith.addi %0, %c0_i32 : i32
    %c0_i32_0 = arith.constant 0 : i32
    %c0_i32_1 = arith.constant 0 : i32
    %c0_i32_2 = arith.constant 0 : i32
    return %arg0, %1, %c0_i32_0, %c0_i32_1 : i32, i32, i32, i32
  }
  func.func @transform_7(%arg0: i32, %arg1: i32) -> (i32, i32, i32, i32) {
    %c2_i32 = arith.constant 2 : i32
    %0 = arith.muli %c2_i32, %arg1 : i32
    %c1_i32 = arith.constant 1 : i32
    %1 = arith.addi %0, %c1_i32 : i32
    %c0_i32 = arith.constant 0 : i32
    %c0_i32_0 = arith.constant 0 : i32
    %c0_i32_1 = arith.constant 0 : i32
    return %arg0, %1, %c0_i32, %c0_i32_0 : i32, i32, i32, i32
  }
  func.func @transform_8(%arg0: i32, %arg1: i32) -> (i32, i32, i32, i32) {
    %c2_i32 = arith.constant 2 : i32
    %0 = arith.muli %c2_i32, %arg1 : i32
    %c2_i32_0 = arith.constant 2 : i32
    %1 = arith.addi %0, %c2_i32_0 : i32
    %c0_i32 = arith.constant 0 : i32
    %c0_i32_1 = arith.constant 0 : i32
    %c0_i32_2 = arith.constant 0 : i32
    return %arg0, %1, %c0_i32, %c0_i32_1 : i32, i32, i32, i32
  }
  func.func @transform_9(%arg0: i32, %arg1: i32) -> (i32, i32, i32) {
    %c0_i32 = arith.constant 0 : i32
    %c0_i32_0 = arith.constant 0 : i32
    %c0_i32_1 = arith.constant 0 : i32
    %c0_i32_2 = arith.constant 0 : i32
    return %c0_i32, %c0_i32_0, %c0_i32_1 : i32, i32, i32
  }
  func.func @transform_10(%arg0: i32, %arg1: i32) -> (i32, i32) {
    %c0_i32 = arith.constant 0 : i32
    %c0_i32_0 = arith.constant 0 : i32
    %c0_i32_1 = arith.constant 0 : i32
    return %c0_i32, %c0_i32_0 : i32, i32
  }
  func.func @transform_11(%arg0: i32, %arg1: i32) -> (i32, i32, i32, i32) {
    %c0_i32 = arith.constant 0 : i32
    %c0_i32_0 = arith.constant 0 : i32
    %c0_i32_1 = arith.constant 0 : i32
    return %arg0, %arg1, %c0_i32, %c0_i32_0 : i32, i32, i32, i32
  }
}

module attributes {stable_mosaic.version = 11 : i64} {
  func.func @_conv_tap_kernel(%arg0: i32, %arg1: i32, %arg2: memref<1x1x4x128xbf16, #tpu.memory_space<vmem>>, %arg3: memref<1x1x4x128xbf16, #tpu.memory_space<vmem>>, %arg4: memref<1x1x4x128xbf16, #tpu.memory_space<vmem>>, %arg5: memref<9x128x128xbf16, #tpu.memory_space<vmem>>, %arg6: memref<1x128xf32, #tpu.memory_space<vmem>>, %arg7: memref<1x1x2x128xbf16, #tpu.memory_space<vmem>>, %arg8: memref<64x128xbf16, #tpu.memory_space<vmem>>, %arg9: memref<1x1x2x128xbf16, #tpu.memory_space<vmem>>) attributes {dimension_semantics = [#tpu.dimension_semantics<parallel>, #tpu.dimension_semantics<parallel>], iteration_bounds = array<i64: 2, 2>, scalar_prefetch = 0 : i64, scratch_operands = 0 : i64, tpu.core_type = #tpu.core_type<tc>, window_params = [{transform_indices = @transform_0, window_bounds = array<i64: 1, 1, 4, 128>}, {transform_indices = @transform_1, window_bounds = array<i64: 1, 1, 4, 128>}, {transform_indices = @transform_2, window_bounds = array<i64: 1, 1, 4, 128>}, {pipeline_mode = #tpu.pipeline_mode<synchronous>, transform_indices = @transform_3, window_bounds = array<i64: 9, 128, 128>}, {pipeline_mode = #tpu.pipeline_mode<synchronous>, transform_indices = @transform_4, window_bounds = array<i64: 1, 128>}, {transform_indices = @transform_5, window_bounds = array<i64: 1, 1, 2, 128>}, {pipeline_mode = #tpu.pipeline_mode<synchronous>, transform_indices = @transform_6, window_bounds = array<i64: 64, 128>}, {transform_indices = @transform_7, window_bounds = array<i64: 1, 1, 2, 128>}]} {
    %c0 = arith.constant 0 : index
    %c0_0 = arith.constant 0 : index
    %c0_1 = arith.constant 0 : index
    %c0_2 = arith.constant 0 : index
    %0 = vector.load %arg2[%c0, %c0_0, %c0_1, %c0_2] : memref<1x1x4x128xbf16, #tpu.memory_space<vmem>>, vector<1x1x4x128xbf16>
    %1 = vector.shape_cast %0 : vector<1x1x4x128xbf16> to vector<4x128xbf16>
    %c0_3 = arith.constant 0 : index
    %c0_4 = arith.constant 0 : index
    %c0_5 = arith.constant 0 : index
    %c0_6 = arith.constant 0 : index
    %2 = vector.load %arg3[%c0_3, %c0_4, %c0_5, %c0_6] : memref<1x1x4x128xbf16, #tpu.memory_space<vmem>>, vector<1x1x4x128xbf16>
    %3 = vector.shape_cast %2 : vector<1x1x4x128xbf16> to vector<4x128xbf16>
    %c0_7 = arith.constant 0 : index
    %c0_8 = arith.constant 0 : index
    %c0_9 = arith.constant 0 : index
    %c0_10 = arith.constant 0 : index
    %4 = vector.load %arg4[%c0_7, %c0_8, %c0_9, %c0_10] : memref<1x1x4x128xbf16, #tpu.memory_space<vmem>>, vector<1x1x4x128xbf16>
    %5 = vector.shape_cast %4 : vector<1x1x4x128xbf16> to vector<4x128xbf16>
    %cst = arith.constant 0.000000e+00 : f32
    %6 = vector.broadcast %cst : f32 to vector<2x128xf32>
    %7 = vector.extract_strided_slice %1 {offsets = [0, 0], sizes = [2, 128], strides = [1, 1]} : vector<4x128xbf16> to vector<2x128xbf16>
    %c0_11 = arith.constant 0 : index
    %c0_12 = arith.constant 0 : index
    %c0_13 = arith.constant 0 : index
    %8 = vector.load %arg5[%c0_11, %c0_12, %c0_13] : memref<9x128x128xbf16, #tpu.memory_space<vmem>>, vector<1x128x128xbf16>
    %9 = vector.shape_cast %8 : vector<1x128x128xbf16> to vector<128x128xbf16>
    %cst_14 = arith.constant dense<0.000000e+00> : vector<2x128xf32>
    %10 = tpu.matmul %7, %9, %cst_14 {dimension_numbers = #tpu.dot_dimension_numbers<[1], [0], [0], [1], [0, 0, 1, 1], [], []>} : vector<2x128xbf16>, vector<128x128xbf16>, vector<2x128xf32> -> vector<2x128xf32>
    %11 = arith.addf %6, %10 : vector<2x128xf32>
    %12 = vector.extract_strided_slice %1 {offsets = [1, 0], sizes = [2, 128], strides = [1, 1]} : vector<4x128xbf16> to vector<2x128xbf16>
    %c1 = arith.constant 1 : index
    %c0_15 = arith.constant 0 : index
    %c0_16 = arith.constant 0 : index
    %13 = vector.load %arg5[%c1, %c0_15, %c0_16] : memref<9x128x128xbf16, #tpu.memory_space<vmem>>, vector<1x128x128xbf16>
    %14 = vector.shape_cast %13 : vector<1x128x128xbf16> to vector<128x128xbf16>
    %cst_17 = arith.constant dense<0.000000e+00> : vector<2x128xf32>
    %15 = tpu.matmul %12, %14, %cst_17 {dimension_numbers = #tpu.dot_dimension_numbers<[1], [0], [0], [1], [0, 0, 1, 1], [], []>} : vector<2x128xbf16>, vector<128x128xbf16>, vector<2x128xf32> -> vector<2x128xf32>
    %16 = arith.addf %11, %15 : vector<2x128xf32>
    %17 = vector.extract_strided_slice %1 {offsets = [2, 0], sizes = [2, 128], strides = [1, 1]} : vector<4x128xbf16> to vector<2x128xbf16>
    %c2 = arith.constant 2 : index
    %c0_18 = arith.constant 0 : index
    %c0_19 = arith.constant 0 : index
    %18 = vector.load %arg5[%c2, %c0_18, %c0_19] : memref<9x128x128xbf16, #tpu.memory_space<vmem>>, vector<1x128x128xbf16>
    %19 = vector.shape_cast %18 : vector<1x128x128xbf16> to vector<128x128xbf16>
    %cst_20 = arith.constant dense<0.000000e+00> : vector<2x128xf32>
    %20 = tpu.matmul %17, %19, %cst_20 {dimension_numbers = #tpu.dot_dimension_numbers<[1], [0], [0], [1], [0, 0, 1, 1], [], []>} : vector<2x128xbf16>, vector<128x128xbf16>, vector<2x128xf32> -> vector<2x128xf32>
    %21 = arith.addf %16, %20 : vector<2x128xf32>
    %22 = vector.extract_strided_slice %3 {offsets = [0, 0], sizes = [2, 128], strides = [1, 1]} : vector<4x128xbf16> to vector<2x128xbf16>
    %c3 = arith.constant 3 : index
    %c0_21 = arith.constant 0 : index
    %c0_22 = arith.constant 0 : index
    %23 = vector.load %arg5[%c3, %c0_21, %c0_22] : memref<9x128x128xbf16, #tpu.memory_space<vmem>>, vector<1x128x128xbf16>
    %24 = vector.shape_cast %23 : vector<1x128x128xbf16> to vector<128x128xbf16>
    %cst_23 = arith.constant dense<0.000000e+00> : vector<2x128xf32>
    %25 = tpu.matmul %22, %24, %cst_23 {dimension_numbers = #tpu.dot_dimension_numbers<[1], [0], [0], [1], [0, 0, 1, 1], [], []>} : vector<2x128xbf16>, vector<128x128xbf16>, vector<2x128xf32> -> vector<2x128xf32>
    %26 = arith.addf %21, %25 : vector<2x128xf32>
    %27 = vector.extract_strided_slice %3 {offsets = [1, 0], sizes = [2, 128], strides = [1, 1]} : vector<4x128xbf16> to vector<2x128xbf16>
    %c4 = arith.constant 4 : index
    %c0_24 = arith.constant 0 : index
    %c0_25 = arith.constant 0 : index
    %28 = vector.load %arg5[%c4, %c0_24, %c0_25] : memref<9x128x128xbf16, #tpu.memory_space<vmem>>, vector<1x128x128xbf16>
    %29 = vector.shape_cast %28 : vector<1x128x128xbf16> to vector<128x128xbf16>
    %cst_26 = arith.constant dense<0.000000e+00> : vector<2x128xf32>
    %30 = tpu.matmul %27, %29, %cst_26 {dimension_numbers = #tpu.dot_dimension_numbers<[1], [0], [0], [1], [0, 0, 1, 1], [], []>} : vector<2x128xbf16>, vector<128x128xbf16>, vector<2x128xf32> -> vector<2x128xf32>
    %31 = arith.addf %26, %30 : vector<2x128xf32>
    %32 = vector.extract_strided_slice %3 {offsets = [2, 0], sizes = [2, 128], strides = [1, 1]} : vector<4x128xbf16> to vector<2x128xbf16>
    %c5 = arith.constant 5 : index
    %c0_27 = arith.constant 0 : index
    %c0_28 = arith.constant 0 : index
    %33 = vector.load %arg5[%c5, %c0_27, %c0_28] : memref<9x128x128xbf16, #tpu.memory_space<vmem>>, vector<1x128x128xbf16>
    %34 = vector.shape_cast %33 : vector<1x128x128xbf16> to vector<128x128xbf16>
    %cst_29 = arith.constant dense<0.000000e+00> : vector<2x128xf32>
    %35 = tpu.matmul %32, %34, %cst_29 {dimension_numbers = #tpu.dot_dimension_numbers<[1], [0], [0], [1], [0, 0, 1, 1], [], []>} : vector<2x128xbf16>, vector<128x128xbf16>, vector<2x128xf32> -> vector<2x128xf32>
    %36 = arith.addf %31, %35 : vector<2x128xf32>
    %37 = vector.extract_strided_slice %5 {offsets = [0, 0], sizes = [2, 128], strides = [1, 1]} : vector<4x128xbf16> to vector<2x128xbf16>
    %c6 = arith.constant 6 : index
    %c0_30 = arith.constant 0 : index
    %c0_31 = arith.constant 0 : index
    %38 = vector.load %arg5[%c6, %c0_30, %c0_31] : memref<9x128x128xbf16, #tpu.memory_space<vmem>>, vector<1x128x128xbf16>
    %39 = vector.shape_cast %38 : vector<1x128x128xbf16> to vector<128x128xbf16>
    %cst_32 = arith.constant dense<0.000000e+00> : vector<2x128xf32>
    %40 = tpu.matmul %37, %39, %cst_32 {dimension_numbers = #tpu.dot_dimension_numbers<[1], [0], [0], [1], [0, 0, 1, 1], [], []>} : vector<2x128xbf16>, vector<128x128xbf16>, vector<2x128xf32> -> vector<2x128xf32>
    %41 = arith.addf %36, %40 : vector<2x128xf32>
    %42 = vector.extract_strided_slice %5 {offsets = [1, 0], sizes = [2, 128], strides = [1, 1]} : vector<4x128xbf16> to vector<2x128xbf16>
    %c7 = arith.constant 7 : index
    %c0_33 = arith.constant 0 : index
    %c0_34 = arith.constant 0 : index
    %43 = vector.load %arg5[%c7, %c0_33, %c0_34] : memref<9x128x128xbf16, #tpu.memory_space<vmem>>, vector<1x128x128xbf16>
    %44 = vector.shape_cast %43 : vector<1x128x128xbf16> to vector<128x128xbf16>
    %cst_35 = arith.constant dense<0.000000e+00> : vector<2x128xf32>
    %45 = tpu.matmul %42, %44, %cst_35 {dimension_numbers = #tpu.dot_dimension_numbers<[1], [0], [0], [1], [0, 0, 1, 1], [], []>} : vector<2x128xbf16>, vector<128x128xbf16>, vector<2x128xf32> -> vector<2x128xf32>
    %46 = arith.addf %41, %45 : vector<2x128xf32>
    %47 = vector.extract_strided_slice %5 {offsets = [2, 0], sizes = [2, 128], strides = [1, 1]} : vector<4x128xbf16> to vector<2x128xbf16>
    %c8 = arith.constant 8 : index
    %c0_36 = arith.constant 0 : index
    %c0_37 = arith.constant 0 : index
    %48 = vector.load %arg5[%c8, %c0_36, %c0_37] : memref<9x128x128xbf16, #tpu.memory_space<vmem>>, vector<1x128x128xbf16>
    %49 = vector.shape_cast %48 : vector<1x128x128xbf16> to vector<128x128xbf16>
    %cst_38 = arith.constant dense<0.000000e+00> : vector<2x128xf32>
    %50 = tpu.matmul %47, %49, %cst_38 {dimension_numbers = #tpu.dot_dimension_numbers<[1], [0], [0], [1], [0, 0, 1, 1], [], []>} : vector<2x128xbf16>, vector<128x128xbf16>, vector<2x128xf32> -> vector<2x128xf32>
    %51 = arith.addf %46, %50 : vector<2x128xf32>
    %c0_39 = arith.constant 0 : index
    %c0_40 = arith.constant 0 : index
    %52 = vector.load %arg6[%c0_39, %c0_40] : memref<1x128xf32, #tpu.memory_space<vmem>>, vector<1x128xf32>
    %53 = vector.broadcast %52 : vector<1x128xf32> to vector<2x128xf32>
    %54 = arith.addf %51, %53 : vector<2x128xf32>
    %c0_41 = arith.constant 0 : index
    %c0_42 = arith.constant 0 : index
    %c0_43 = arith.constant 0 : index
    %c0_44 = arith.constant 0 : index
    %55 = vector.load %arg7[%c0_41, %c0_42, %c0_43, %c0_44] : memref<1x1x2x128xbf16, #tpu.memory_space<vmem>>, vector<1x1x2x128xbf16>
    %56 = vector.shape_cast %55 : vector<1x1x2x128xbf16> to vector<2x128xbf16>
    %57 = vector.extract_strided_slice %56 {offsets = [0, 0], sizes = [2, 64], strides = [1, 1]} : vector<2x128xbf16> to vector<2x64xbf16>
    %c0_45 = arith.constant 0 : index
    %c0_46 = arith.constant 0 : index
    %58 = vector.load %arg8[%c0_45, %c0_46] : memref<64x128xbf16, #tpu.memory_space<vmem>>, vector<64x128xbf16>
    %cst_47 = arith.constant dense<0.000000e+00> : vector<2x128xf32>
    %59 = tpu.matmul %57, %58, %cst_47 {dimension_numbers = #tpu.dot_dimension_numbers<[1], [0], [0], [1], [0, 0, 1, 1], [], []>} : vector<2x64xbf16>, vector<64x128xbf16>, vector<2x128xf32> -> vector<2x128xf32>
    %60 = arith.addf %54, %59 : vector<2x128xf32>
    %cst_48 = arith.constant 0.000000e+00 : f32
    %61 = vector.broadcast %cst_48 : f32 to vector<2x128xf32>
    %62 = arith.maximumf %60, %61 : vector<2x128xf32>
    %63 = arith.truncf %62 : vector<2x128xf32> to vector<2x128xbf16>
    %c0_49 = arith.constant 0 : index
    %c0_50 = arith.constant 0 : index
    %c0_51 = arith.constant 0 : index
    %c0_52 = arith.constant 0 : index
    %64 = vector.load %arg9[%c0_49, %c0_50, %c0_51, %c0_52] : memref<1x1x2x128xbf16, #tpu.memory_space<vmem>>, vector<1x1x2x128xbf16>
    %65 = vector.shape_cast %64 : vector<1x1x2x128xbf16> to vector<2x128xbf16>
    %66 = vector.shape_cast %63 : vector<2x128xbf16> to vector<1x1x2x128xbf16>
    tpu.vector_store %arg9[%c0_49, %c0_50, %c0_51, %c0_52], %66 {strides = array<i32>} : memref<1x1x2x128xbf16, #tpu.memory_space<vmem>>, vector<1x1x2x128xbf16>,
    return
  }
  func.func @transform_0(%arg0: i32, %arg1: i32) -> (i32, i32, i32, i32) {
    %c0_i32 = arith.constant 0 : i32
    %0 = arith.addi %arg1, %c0_i32 : i32
    %c0_i32_0 = arith.constant 0 : i32
    %c0_i32_1 = arith.constant 0 : i32
    %c0_i32_2 = arith.constant 0 : i32
    return %arg0, %0, %c0_i32_0, %c0_i32_1 : i32, i32, i32, i32
  }
  func.func @transform_1(%arg0: i32, %arg1: i32) -> (i32, i32, i32, i32) {
    %c1_i32 = arith.constant 1 : i32
    %0 = arith.addi %arg1, %c1_i32 : i32
    %c0_i32 = arith.constant 0 : i32
    %c0_i32_0 = arith.constant 0 : i32
    %c0_i32_1 = arith.constant 0 : i32
    return %arg0, %0, %c0_i32, %c0_i32_0 : i32, i32, i32, i32
  }
  func.func @transform_2(%arg0: i32, %arg1: i32) -> (i32, i32, i32, i32) {
    %c2_i32 = arith.constant 2 : i32
    %0 = arith.addi %arg1, %c2_i32 : i32
    %c0_i32 = arith.constant 0 : i32
    %c0_i32_0 = arith.constant 0 : i32
    %c0_i32_1 = arith.constant 0 : i32
    return %arg0, %0, %c0_i32, %c0_i32_0 : i32, i32, i32, i32
  }
  func.func @transform_3(%arg0: i32, %arg1: i32) -> (i32, i32, i32) {
    %c0_i32 = arith.constant 0 : i32
    %c0_i32_0 = arith.constant 0 : i32
    %c0_i32_1 = arith.constant 0 : i32
    %c0_i32_2 = arith.constant 0 : i32
    return %c0_i32, %c0_i32_0, %c0_i32_1 : i32, i32, i32
  }
  func.func @transform_4(%arg0: i32, %arg1: i32) -> (i32, i32) {
    %c0_i32 = arith.constant 0 : i32
    %c0_i32_0 = arith.constant 0 : i32
    %c0_i32_1 = arith.constant 0 : i32
    return %c0_i32, %c0_i32_0 : i32, i32
  }
  func.func @transform_5(%arg0: i32, %arg1: i32) -> (i32, i32, i32, i32) {
    %c2_i32 = arith.constant 2 : i32
    %0 = arith.muli %c2_i32, %arg1 : i32
    %c0_i32 = arith.constant 0 : i32
    %c0_i32_0 = arith.constant 0 : i32
    %c0_i32_1 = arith.constant 0 : i32
    return %arg0, %0, %c0_i32, %c0_i32_0 : i32, i32, i32, i32
  }
  func.func @transform_6(%arg0: i32, %arg1: i32) -> (i32, i32) {
    %c0_i32 = arith.constant 0 : i32
    %c0_i32_0 = arith.constant 0 : i32
    %c0_i32_1 = arith.constant 0 : i32
    return %c0_i32, %c0_i32_0 : i32, i32
  }
  func.func @transform_7(%arg0: i32, %arg1: i32) -> (i32, i32, i32, i32) {
    %c0_i32 = arith.constant 0 : i32
    %c0_i32_0 = arith.constant 0 : i32
    %c0_i32_1 = arith.constant 0 : i32
    return %arg0, %arg1, %c0_i32, %c0_i32_0 : i32, i32, i32, i32
  }
}

</mosaic_0001>

<bundles_post_ra>
// kernel: resnest_forward.10
= control target key start
LH: loop header
LB: loop body
LE: loop exit
PB: predicated region body
PF: predicated region fallthrough
CT: control target
= control target key end

     0   :  { %s1936_s12 = smov 0   ;;  %s2238_s0 = inlined_call_operand.vmem [shape: bf16[2048,256], index: 0, kind: input, shape index: {}]   ;;  %s2239_s1 = inlined_call_operand.vmem [shape: bf16[256,128], index: 1, kind: input, shape index: {}]   ;;  %s2240_s2 = inlined_call_operand.vmem [shape: f32[1,128], index: 2, kind: input, shape index: {}]   ;;  %s2241_s3 = inlined_call_operand.vmem [shape: bf16[2048,128], index: 3, kind: output, shape index: {}]  }
   0x1 LB: > { %s1279_s13 = sadd.s32 4294967295, %s1914_s12   ;;  %p1283_p0 = scmp.ge.s32.totalorder %s1914_s12, 1  ;;  %s1914_s12 = sphi %s1936_s12, %s13_s12  }
   0x2   : > { %p139_p1 = scmp.lt.s32.totalorder %s1914_s12, 5 }
   0x4   : > { %p140_p2 = pnand %p1283_p0, %p139_p1 }
   0x5   : > { %s1284_s26 = sshll.u32 (!%p140_p2), %s1279_s13, 6 }
   0x6   : > { %143 = sbr.rel (%p140_p2) target bundleno = 432 (0x1b0), region = 32  ;;  %p165_p3 = scmp.lt.s32.totalorder (!%p140_p2), %s1284_s26, 255 }
   0xb   : > { %v1683_v0 = vld [vmem:[%s2239_s1 + $0x38] sm:$0xff]  ;;  %v1682_v2 = vld [vmem:[%s2239_s1 + $0x30] sm:$0xff]  ;;  %v1681_v4 = vld [vmem:[%s2239_s1 + $0x28] sm:$0xff]  ;;  %s2243_s26 = smov (!%p165_p3, %s1284_s26), 255 }
   0xc   : > { %v1691_v1 = vld [vmem:[%s2239_s1 + $0x78] sm:$0xff]  ;;  %693 = vmatpush.bf16.msra.mxu0 %v1683_v0  ;;  %1883 = vmatpush.bf16.msra.mxu2 %v1683_v0  ;;  %v1690_v3 = vld [vmem:[%s2239_s1 + $0x70] sm:$0xff]  ;;  %v1689_v5 = vld [vmem:[%s2239_s1 + $0x68] sm:$0xff]  ;;  %s1611_s13 = sshll.u32 %s2243_s26, 3  ;;  %s1288_s28 = sshll.u32 %s2243_s26, 2 }
   0xd   : > { %862 = vmatpush.bf16.msra.mxu1 %v1691_v1  ;;  %1891 = vmatpush.bf16.msra.mxu3 %v1691_v1  ;;  %v1680_v6 = vld [vmem:[%s2239_s1 + $0x20] sm:$0xff]  ;;  %v1679_v8 = vld [vmem:[%s2239_s1 + $0x18] sm:$0xff]  ;;  %v1678_v10 = vld [vmem:[%s2239_s1 + $0x10] sm:$0xff]  ;;  %s1989_s18 = scalar_lea.vmem %s2238_s0, %s1611_s13  ;;  %s2092_s4 = scalar_lea.vmem %s2241_s3, %s1288_s28 }
   0xe   : > { %v1688_v7 = vld [vmem:[%s2239_s1 + $0x60] sm:$0xff]  ;;  %v1687_v9 = vld [vmem:[%s2239_s1 + $0x58] sm:$0xff]  ;;  %v1686_v11 = vld [vmem:[%s2239_s1 + $0x50] sm:$0xff] }
   0xf   : > { %v1677_v12 = vld [vmem:[%s2239_s1 + $0x8] sm:$0xff]  ;;  %v1676_v14 = vld [vmem:[%s2239_s1] sm:$0xff]  ;;  %v1299_v28 = vld [vmem:[%s1989_s18 + $0x10] sm:$0xf] }
  0x10   : > { %694 = vmatpush.bf16.msra.mxu0 %v1682_v2  ;;  %1884 = vmatpush.bf16.msra.mxu2 %v1682_v2  ;;  %v1685_v13 = vld [vmem:[%s2239_s1 + $0x48] sm:$0xff]  ;;  %v1684_v15 = vld [vmem:[%s2239_s1 + $0x40] sm:$0xff]  ;;  %v1615_v29 = vld [vmem:[%s1989_s18 + $0x14] sm:$0xf0] }
  0x11   : > { %863 = vmatpush.bf16.msra.mxu1 %v1690_v3  ;;  %1892 = vmatpush.bf16.msra.mxu3 %v1690_v3  ;;  %v1291_v16 = vld [vmem:[%s1989_s18] sm:$0xf]  ;;  %v1613_v17 = vld [vmem:[%s1989_s18 + $0x4] sm:$0xf0]  ;;  %v1612_v20 = vld [vmem:[%s1989_s18 + $0x4] sm:$0xf]  ;;  %v1300_v36 = vor.u32 %v1615_v29, %v1299_v28 }
  0x12   : > { %v1419_v18 = vld [vmem:[%s1989_s18 + $0x100] sm:$0xf]  ;;  %v1645_v19 = vld [vmem:[%s1989_s18 + $0x104] sm:$0xf0]  ;;  %v1293_v21 = vld [vmem:[%s1989_s18 + $0x8] sm:$0xf0]  ;;  %v1292_v24 = vor.u32 %v1613_v17, %v1291_v16 }
  0x13   : > { %v1644_v22 = vld [vmem:[%s1989_s18 + $0x104] sm:$0xf]  ;;  %v1421_v23 = vld [vmem:[%s1989_s18 + $0x108] sm:$0xf0]  ;;  %v1420_v25 = vor.u32 %v1645_v19, %v1419_v18  ;;  %v1296_v26 = vor.u32 %v1612_v20, %v1293_v21  ;;  %v1427_v30 = vld [vmem:[%s1989_s18 + $0x110] sm:$0xf] }
  0x14   : > { %695 = vmatpush.bf16.msra.mxu0 %v1681_v4  ;;  %1885 = vmatpush.bf16.msra.mxu2 %v1681_v4  ;;  %v1424_v27 = vor.u32 %v1644_v22, %v1421_v23  ;;  %v1647_v31 = vld [vmem:[%s1989_s18 + $0x114] sm:$0xf0]  ;;  %v1614_v32 = vld [vmem:[%s1989_s18 + $0x14] sm:$0xf]  ;;  %v1301_v33 = vld [vmem:[%s1989_s18 + $0x18] sm:$0xf0] }
  0x15   : > { %864 = vmatpush.bf16.msra.mxu1 %v1689_v5  ;;  %1893 = vmatpush.bf16.msra.mxu3 %v1689_v5  ;;  %v1646_v34 = vld [vmem:[%s1989_s18 + $0x114] sm:$0xf]  ;;  %v1429_v35 = vld [vmem:[%s1989_s18 + $0x118] sm:$0xf0]  ;;  %v1428_v37 = vor.u32 %v1647_v31, %v1427_v30  ;;  %v1304_v38 = vor.u32 %v1614_v32, %v1301_v33  ;;  %v1307_v40 = vld [vmem:[%s1989_s18 + $0x20] sm:$0xf] }
  0x16   : > { %v1432_v39 = vor.u32 %v1646_v34, %v1429_v35  ;;  %v1617_v41 = vld [vmem:[%s1989_s18 + $0x24] sm:$0xf0]  ;;  %v1435_v42 = vld [vmem:[%s1989_s18 + $0x120] sm:$0xf]  ;;  %v1616_v44 = vld [vmem:[%s1989_s18 + $0x24] sm:$0xf] }
  0x17   : > { %v1649_v43 = vld [vmem:[%s1989_s18 + $0x124] sm:$0xf0]  ;;  %v1309_v45 = vld [vmem:[%s1989_s18 + $0x28] sm:$0xf0]  ;;  %v1648_v46 = vld [vmem:[%s1989_s18 + $0x124] sm:$0xf]  ;;  %v1308_v48 = vor.u32 %v1617_v41, %v1307_v40 }
  0x18   : > { %696 = vmatpush.bf16.msra.mxu0 %v1680_v6  ;;  %1886 = vmatpush.bf16.msra.mxu2 %v1680_v6  ;;  %v1437_v47 = vld [vmem:[%s1989_s18 + $0x128] sm:$0xf0]  ;;  %v1436_v49 = vor.u32 %v1649_v43, %v1435_v42  ;;  %v1312_v50 = vor.u32 %v1616_v44, %v1309_v45  ;;  %v1315_v52 = vld [vmem:[%s1989_s18 + $0x30] sm:$0xf]  ;;  %v1619_v53 = vld [vmem:[%s1989_s18 + $0x34] sm:$0xf0] }
  0x19   : > { %865 = vmatpush.bf16.msra.mxu1 %v1688_v7  ;;  %1894 = vmatpush.bf16.msra.mxu3 %v1688_v7  ;;  %v1440_v51 = vor.u32 %v1648_v46, %v1437_v47  ;;  %v1443_v54 = vld [vmem:[%s1989_s18 + $0x130] sm:$0xf]  ;;  %v1651_v55 = vld [vmem:[%s1989_s18 + $0x134] sm:$0xf0]  ;;  %v1618_v56 = vld [vmem:[%s1989_s18 + $0x34] sm:$0xf]  ;;  %v1316_v60 = vor.u32 %v1619_v53, %v1315_v52 }
  0x1a   : > { %v1317_v57 = vld [vmem:[%s1989_s18 + $0x38] sm:$0xf0]  ;;  %v1650_v58 = vld [vmem:[%s1989_s18 + $0x134] sm:$0xf]  ;;  %v1444_v61 = vor.u32 %v1651_v55, %v1443_v54  ;;  %v1323_v0 = vld [vmem:[%s1989_s18 + $0x40] sm:$0xf] }
  0x1b   : > { %v1445_v59 = vld [vmem:[%s1989_s18 + $0x138] sm:$0xf0]  ;;  %v1320_v62 = vor.u32 %v1618_v56, %v1317_v57  ;;  %v1621_v1 = vld [vmem:[%s1989_s18 + $0x44] sm:$0xf0]  ;;  %v1451_v2 = vld [vmem:[%s1989_s18 + $0x140] sm:$0xf] }
  0x1c   : > { %697 = vmatpush.bf16.msra.mxu0 %v1679_v8  ;;  %1887 = vmatpush.bf16.msra.mxu2 %v1679_v8  ;;  %v1448_v63 = vor.u32 %v1650_v58, %v1445_v59  ;;  %v1653_v3 = vld [vmem:[%s1989_s18 + $0x144] sm:$0xf0]  ;;  %v1620_v4 = vld [vmem:[%s1989_s18 + $0x44] sm:$0xf]  ;;  %v1325_v5 = vld [vmem:[%s1989_s18 + $0x48] sm:$0xf0]  ;;  %v1324_v8 = vor.u32 %v1621_v1, %v1323_v0 }
  0x1d   : > { %866 = vmatpush.bf16.msra.mxu1 %v1687_v9  ;;  %1895 = vmatpush.bf16.msra.mxu3 %v1687_v9  ;;  %v1652_v6 = vld [vmem:[%s1989_s18 + $0x144] sm:$0xf]  ;;  %v1453_v7 = vld [vmem:[%s1989_s18 + $0x148] sm:$0xf0]  ;;  %v1452_v9 = vor.u32 %v1653_v3, %v1451_v2  ;;  %v1622_v16 = vld [vmem:[%s1989_s18 + $0x54] sm:$0xf] }
  0x1e   : > { %v1333_v17 = vld [vmem:[%s1989_s18 + $0x58] sm:$0xf0]  ;;  %v1654_v18 = vld [vmem:[%s1989_s18 + $0x154] sm:$0xf]  ;;  %v1624_v28 = vld [vmem:[%s1989_s18 + $0x64] sm:$0xf] }
  0x1f   : > { %v1461_v19 = vld [vmem:[%s1989_s18 + $0x158] sm:$0xf0]  ;;  %v1336_v22 = vor.u32 %v1622_v16, %v1333_v17  ;;  %v1341_v29 = vld [vmem:[%s1989_s18 + $0x68] sm:$0xf0]  ;;  %v1656_v30 = vld [vmem:[%s1989_s18 + $0x164] sm:$0xf] }
  0x20   : > { %698 = vmatpush.bf16.msra.mxu0 %v1678_v10  ;;  %1888 = vmatpush.bf16.msra.mxu2 %v1678_v10  ;;  %v1328_v10 = vor.u32 %v1620_v4, %v1325_v5  ;;  %v1464_v23 = vor.u32 %v1654_v18, %v1461_v19  ;;  %v1469_v31 = vld [vmem:[%s1989_s18 + $0x168] sm:$0xf0]  ;;  %v1344_v34 = vor.u32 %v1624_v28, %v1341_v29  ;;  %v1626_v40 = vld [vmem:[%s1989_s18 + $0x74] sm:$0xf]  ;;  %v1349_v41 = vld [vmem:[%s1989_s18 + $0x78] sm:$0xf0] }
  0x21   : > { %867 = vmatpush.bf16.msra.mxu1 %v1686_v11  ;;  %1896 = vmatpush.bf16.msra.mxu3 %v1686_v11  ;;  %v1456_v11 = vor.u32 %v1652_v6, %v1453_v7  ;;  %v1472_v35 = vor.u32 %v1656_v30, %v1469_v31  ;;  %v1658_v42 = vld [vmem:[%s1989_s18 + $0x174] sm:$0xf]  ;;  %v1477_v43 = vld [vmem:[%s1989_s18 + $0x178] sm:$0xf0]  ;;  %v1352_v46 = vor.u32 %v1626_v40, %v1349_v41  ;;  %v1628_v52 = vld [vmem:[%s1989_s18 + $0x84] sm:$0xf] }
  0x22   : > { %v1480_v47 = vor.u32 %v1658_v42, %v1477_v43  ;;  %v1357_v53 = vld [vmem:[%s1989_s18 + $0x88] sm:$0xf0]  ;;  %v1660_v54 = vld [vmem:[%s1989_s18 + $0x184] sm:$0xf]  ;;  %v1662_v16 = vld [vmem:[%s1989_s18 + $0x194] sm:$0xf] }
  0x23   : > { %v1485_v55 = vld [vmem:[%s1989_s18 + $0x188] sm:$0xf0]  ;;  %v1360_v59 = vor.u32 %v1628_v52, %v1357_v53  ;;  %v1493_v17 = vld [vmem:[%s1989_s18 + $0x198] sm:$0xf0]  ;;  %v1371_v42 = vld [vmem:[%s1989_s18 + $0xa0] sm:$0xf] }
  0x24   : > { %699 = vmatpush.bf16.msra.mxu0 %v1677_v12  ;;  %1889 = vmatpush.bf16.msra.mxu2 %v1677_v12  ;;  %v1331_v12 = vld [vmem:[%s1989_s18 + $0x50] sm:$0xf]  ;;  %v1633_v43 = vld [vmem:[%s1989_s18 + $0xa4] sm:$0xf0] }
  0x25   : > { %868 = vmatpush.bf16.msra.mxu1 %v1685_v13  ;;  %1897 = vmatpush.bf16.msra.mxu3 %v1685_v13  ;;  %v1623_v13 = vld [vmem:[%s1989_s18 + $0x54] sm:$0xf0]  ;;  %v1372_v53 = vor.u32 %v1633_v43, %v1371_v42 }
  0x26   : > { %v1332_v20 = vor.u32 %v1623_v13, %v1331_v12  ;;  %v1630_v12 = vld [vmem:[%s1989_s18 + $0x94] sm:$0xf]  ;;  %v1365_v13 = vld [vmem:[%s1989_s18 + $0x98] sm:$0xf0] }
  0x28   : > { %700 = vmatpush.bf16.msra.mxu0 %v1676_v14  ;;  %1890 = vmatpush.bf16.msra.mxu2 %v1676_v14  ;;  %v1459_v14 = vld [vmem:[%s1989_s18 + $0x150] sm:$0xf] }
  0x29   : > { %869 = vmatpush.bf16.msra.mxu1 %v1684_v15  ;;  %1898 = vmatpush.bf16.msra.mxu3 %v1684_v15  ;;  %v1655_v15 = vld [vmem:[%s1989_s18 + $0x154] sm:$0xf0] }
  0x2a   : > { %v1460_v21 = vor.u32 %v1655_v15, %v1459_v14 }
  0x2b   : > { %701 = vmatmul.bf16.vlgmr.msra.gmra.mxu0 %v1292_v24  ;;  %781 = vmatmul.bf16.vlgmr.msra.gmra.mxu2 %v1420_v25  ;;  %v1339_v24 = vld [vmem:[%s1989_s18 + $0x60] sm:$0xf]  ;;  %v1625_v25 = vld [vmem:[%s1989_s18 + $0x64] sm:$0xf0] }
  0x2c   : > { %870 = vmatmul.bf16.vlgmr.msra.gmra.mxu1 %v1296_v26  ;;  %950 = vmatmul.bf16.vlgmr.msra.gmra.mxu3 %v1424_v27  ;;  %v1467_v26 = vld [vmem:[%s1989_s18 + $0x160] sm:$0xf]  ;;  %v1657_v27 = vld [vmem:[%s1989_s18 + $0x164] sm:$0xf0]  ;;  %v1340_v32 = vor.u32 %v1625_v25, %v1339_v24 }
  0x2d   : > { %v1468_v33 = vor.u32 %v1657_v27, %v1467_v26  ;;  %v1368_v26 = vor.u32 %v1630_v12, %v1365_v13  ;;  %v1496_v27 = vor.u32 %v1662_v16, %v1493_v17  ;;  %v1379_v13 = vld [vmem:[%s1989_s18 + $0xb0] sm:$0xf]  ;;  %v1667_v16 = vld [vmem:[%s1989_s18 + $0x1b4] sm:$0xf0]  ;;  %v1634_v17 = vld [vmem:[%s1989_s18 + $0xb4] sm:$0xf] }
  0x3b   : > { %706 = vmatmul.bf16.gmra.mxu0 %v1300_v36  ;;  %786 = vmatmul.bf16.gmra.mxu2 %v1428_v37  ;;  %v1347_v36 = vld [vmem:[%s1989_s18 + $0x70] sm:$0xf]  ;;  %v1627_v37 = vld [vmem:[%s1989_s18 + $0x74] sm:$0xf0] }
  0x3c   : > { %875 = vmatmul.bf16.gmra.mxu1 %v1304_v38  ;;  %955 = vmatmul.bf16.gmra.mxu3 %v1432_v39  ;;  %v1475_v38 = vld [vmem:[%s1989_s18 + $0x170] sm:$0xf]  ;;  %v1659_v39 = vld [vmem:[%s1989_s18 + $0x174] sm:$0xf0]  ;;  %v1348_v44 = vor.u32 %v1627_v37, %v1347_v36 }
  0x3d   : > { %v1476_v45 = vor.u32 %v1659_v39, %v1475_v38 }
  0x4b   : > { %711 = vmatmul.bf16.gmra.mxu0 %v1308_v48  ;;  %791 = vmatmul.bf16.gmra.mxu2 %v1436_v49  ;;  %v1355_v48 = vld [vmem:[%s1989_s18 + $0x80] sm:$0xf]  ;;  %v1629_v49 = vld [vmem:[%s1989_s18 + $0x84] sm:$0xf0] }
  0x4c   : > { %880 = vmatmul.bf16.gmra.mxu1 %v1312_v50  ;;  %960 = vmatmul.bf16.gmra.mxu3 %v1440_v51  ;;  %v1483_v50 = vld [vmem:[%s1989_s18 + $0x180] sm:$0xf]  ;;  %v1661_v51 = vld [vmem:[%s1989_s18 + $0x184] sm:$0xf0]  ;;  %v1356_v56 = vor.u32 %v1629_v49, %v1355_v48 }
  0x4d   : > { %v1484_v57 = vor.u32 %v1661_v51, %v1483_v50  ;;  %v1664_v50 = vld [vmem:[%s1989_s18 + $0x1a4] sm:$0xf]  ;;  %v1501_v51 = vld [vmem:[%s1989_s18 + $0x1a8] sm:$0xf0] }
  0x5b   : > { %716 = vmatmul.bf16.gmra.mxu0 %v1316_v60  ;;  %796 = vmatmul.bf16.gmra.mxu2 %v1444_v61  ;;  %v1488_v60 = vor.u32 %v1660_v54, %v1485_v55  ;;  %v2075_v61 = vld [vmem:[%s2240_s2] ss:$0 sm:$0xff] }
  0x5c   : > { %885 = vmatmul.bf16.gmra.mxu1 %v1320_v62  ;;  %965 = vmatmul.bf16.gmra.mxu3 %v1448_v63 }
  0x6b   : > { %721 = vmatmul.bf16.gmra.mxu0 %v1324_v8  ;;  %801 = vmatmul.bf16.gmra.mxu2 %v1452_v9  ;;  %v1363_v8 = vld [vmem:[%s1989_s18 + $0x90] sm:$0xf]  ;;  %v1631_v9 = vld [vmem:[%s1989_s18 + $0x94] sm:$0xf0] }
  0x6c   : > { %890 = vmatmul.bf16.gmra.mxu1 %v1328_v10  ;;  %970 = vmatmul.bf16.gmra.mxu3 %v1456_v11  ;;  %v1491_v10 = vld [vmem:[%s1989_s18 + $0x190] sm:$0xf]  ;;  %v1663_v11 = vld [vmem:[%s1989_s18 + $0x194] sm:$0xf0]  ;;  %v1364_v19 = vor.u32 %v1631_v9, %v1363_v8 }
  0x6d   : > { %v1492_v24 = vor.u32 %v1663_v11, %v1491_v10 }
  0x7b   : > { %726 = vmatmul.bf16.gmra.mxu0 %v1332_v20  ;;  %806 = vmatmul.bf16.gmra.mxu2 %v1460_v21 }
  0x7c   : > { %895 = vmatmul.bf16.gmra.mxu1 %v1336_v22  ;;  %975 = vmatmul.bf16.gmra.mxu3 %v1464_v23 }
  0x8b   : > { %731 = vmatmul.bf16.gmra.mxu0 %v1340_v32  ;;  %811 = vmatmul.bf16.gmra.mxu2 %v1468_v33 }
  0x8c   : > { %900 = vmatmul.bf16.gmra.mxu1 %v1344_v34  ;;  %980 = vmatmul.bf16.gmra.mxu3 %v1472_v35 }
  0x9b   : > { %736 = vmatmul.bf16.gmra.mxu0 %v1348_v44  ;;  %816 = vmatmul.bf16.gmra.mxu2 %v1476_v45  ;;  %v1499_v44 = vld [vmem:[%s1989_s18 + $0x1a0] sm:$0xf]  ;;  %v1665_v45 = vld [vmem:[%s1989_s18 + $0x1a4] sm:$0xf0] }
  0x9c   : > { %905 = vmatmul.bf16.gmra.mxu1 %v1352_v46  ;;  %985 = vmatmul.bf16.gmra.mxu3 %v1480_v47  ;;  %v1632_v46 = vld [vmem:[%s1989_s18 + $0xa4] sm:$0xf]  ;;  %v1373_v47 = vld [vmem:[%s1989_s18 + $0xa8] sm:$0xf0] }
  0xa8   : > { %v702_v58 = vpop.f32.mrf.mxu0 }
  0xa9   : > { %v871_v62 = vpop.f32.mrf.mxu1  ;;  %v703_v63 = vadd.f32 %v2075_v61, %v702_v58  ;;  %v1500_v58 = vor.u32 %v1665_v45, %v1499_v44 }
  0xab   : > { %741 = vmatmul.bf16.gmra.mxu0 %v1356_v56  ;;  %821 = vmatmul.bf16.gmra.mxu2 %v1484_v57  ;;  %v872_v3 = vadd.f32 %v871_v62, %v703_v63  ;;  %v1504_v62 = vor.u32 %v1664_v50, %v1501_v51  ;;  %v1669_v50 = vld [vmem:[%s1989_s18 + $0x1c4] sm:$0xf0]  ;;  %v1636_v51 = vld [vmem:[%s1989_s18 + $0xc4] sm:$0xf] }
  0xac   : > { %910 = vmatmul.bf16.gmra.mxu1 %v1360_v59  ;;  %990 = vmatmul.bf16.gmra.mxu3 %v1488_v60  ;;  %v1376_v60 = vor.u32 %v1632_v46, %v1373_v47  ;;  %v1387_v47 = vld [vmem:[%s1989_s18 + $0xc0] sm:$0xf] }
  0xad   : > { %v1031_v14 = vmax.f32 %v872_v3, 0.0 }
  0xae   : > { %v782_v0 = vpop.f32.mrf.mxu2 }
  0xaf   : > { %v951_v1 = vpop.f32.mrf.mxu3  ;;  %v783_v6 = vadd.f32 %v2075_v61, %v782_v0 }
  0xb0   : > { %v704_v2 = vpop.f32.mrf.mxu0 }
  0xb1   : > { %v705_v4 = vadd.f32 %v2075_v61, %v704_v2  ;;  %v873_v5 = vpop.f32.mrf.mxu1  ;;  %v952_v20 = vadd.f32 %v951_v1, %v783_v6 }
  0xb3   : > { %v874_v7 = vadd.f32 %v873_v5, %v705_v4  ;;  %v1063_v30 = vmax.f32 %v952_v20, 0.0 }
  0xb5   : > { %v1032_v15 = vmax.f32 %v874_v7, 0.0 }
  0xb6   : > { %v784_v18 = vpop.f32.mrf.mxu2 }
  0xb7   : > { %v1695_v21 = vpack.c.bf16 %v1032_v15, %v1031_v14  ;;  %v785_v22 = vadd.f32 %v2075_v61, %v784_v18  ;;  %v953_v23 = vpop.f32.mrf.mxu3  ;;  %v1635_v14 = vld [vmem:[%s1989_s18 + $0xb4] sm:$0xf0]  ;;  %v1507_v15 = vld [vmem:[%s1989_s18 + $0x1b0] sm:$0xf]  ;;  %v1381_v18 = vld [vmem:[%s1989_s18 + $0xb8] sm:$0xf0] }
  0xb8   : > { %v707_v25 = vpop.f32.mrf.mxu0 }
  0xb9   : > { %1696 = vst [vmem:[%s2092_s4] sm:$0xff] %v1695_v21   ;;  %v954_v28 = vadd.f32 %v953_v23, %v785_v22  ;;  %v876_v29 = vpop.f32.mrf.mxu1  ;;  %v708_v33 = vadd.f32 %v2075_v61, %v707_v25  ;;  %v1666_v21 = vld [vmem:[%s1989_s18 + $0x1b4] sm:$0xf]  ;;  %v1509_v22 = vld [vmem:[%s1989_s18 + $0x1b8] sm:$0xf0] }
  0xbb   : > { %v1064_v31 = vmax.f32 %v954_v28, 0.0  ;;  %746 = vmatmul.bf16.gmra.mxu0 %v1364_v19  ;;  %826 = vmatmul.bf16.gmra.mxu2 %v1492_v24  ;;  %v877_v37 = vadd.f32 %v876_v29, %v708_v33  ;;  %v1380_v24 = vor.u32 %v1635_v14, %v1379_v13  ;;  %v1508_v29 = vor.u32 %v1667_v16, %v1507_v15 }
  0xbc   : > { %915 = vmatmul.bf16.gmra.mxu1 %v1368_v26  ;;  %995 = vmatmul.bf16.gmra.mxu3 %v1496_v27 }
  0xbd   : > { %v1775_v32 = vpack.c.bf16 %v1064_v31, %v1063_v30  ;;  %v1033_v48 = vmax.f32 %v877_v37, 0.0  ;;  %v1384_v31 = vor.u32 %v1634_v17, %v1381_v18  ;;  %v1395_v18 = vld [vmem:[%s1989_s18 + $0xd0] sm:$0xf] }
  0xbe   : > { %v787_v34 = vpop.f32.mrf.mxu2 }
  0xbf   : > { %1867 = vst [vmem:[%s2092_s4 + $0x80] sm:$0xff] %v1775_v32   ;;  %v956_v35 = vpop.f32.mrf.mxu3  ;;  %v788_v40 = vadd.f32 %v2075_v61, %v787_v34  ;;  %v1512_v32 = vor.u32 %v1666_v21, %v1509_v22  ;;  %v1671_v21 = vld [vmem:[%s1989_s18 + $0x1d4] sm:$0xf0]  ;;  %v1638_v22 = vld [vmem:[%s1989_s18 + $0xd4] sm:$0xf] }
  0xc0   : > { %v709_v36 = vpop.f32.mrf.mxu0 }
  0xc1   : > { %v710_v38 = vadd.f32 %v2075_v61, %v709_v36  ;;  %v878_v39 = vpop.f32.mrf.mxu1  ;;  %v957_v54 = vadd.f32 %v956_v35, %v788_v40 }
  0xc3   : > { %v879_v41 = vadd.f32 %v878_v39, %v710_v38  ;;  %v1065_v1 = vmax.f32 %v957_v54, 0.0 }
  0xc5   : > { %v1034_v49 = vmax.f32 %v879_v41, 0.0 }
  0xc6   : > { %v789_v52 = vpop.f32.mrf.mxu2 }
  0xc7   : > { %v1700_v55 = vpack.c.bf16 %v1034_v49, %v1033_v48  ;;  %v790_v56 = vadd.f32 %v2075_v61, %v789_v52  ;;  %v958_v57 = vpop.f32.mrf.mxu3  ;;  %v1637_v48 = vld [vmem:[%s1989_s18 + $0xc4] sm:$0xf0]  ;;  %v1515_v49 = vld [vmem:[%s1989_s18 + $0x1c0] sm:$0xf]  ;;  %v1389_v52 = vld [vmem:[%s1989_s18 + $0xc8] sm:$0xf0] }
  0xc8   : > { %v712_v59 = vpop.f32.mrf.mxu0 }
  0xc9   : > { %1852 = vst [vmem:[%s2092_s4 + $0x8] sm:$0xff] %v1700_v55   ;;  %v959_v63 = vadd.f32 %v958_v57, %v790_v56  ;;  %v881_v0 = vpop.f32.mrf.mxu1  ;;  %v713_v4 = vadd.f32 %v2075_v61, %v712_v59  ;;  %v1668_v55 = vld [vmem:[%s1989_s18 + $0x1c4] sm:$0xf]  ;;  %v1517_v56 = vld [vmem:[%s1989_s18 + $0x1c8] sm:$0xf0] }
  0xcb   : > { %v1066_v2 = vmax.f32 %v959_v63, 0.0  ;;  %751 = vmatmul.bf16.gmra.mxu0 %v1372_v53  ;;  %831 = vmatmul.bf16.gmra.mxu2 %v1500_v58  ;;  %v882_v8 = vadd.f32 %v881_v0, %v713_v4  ;;  %v1388_v58 = vor.u32 %v1637_v48, %v1387_v47  ;;  %v1516_v0 = vor.u32 %v1669_v50, %v1515_v49 }
  0xcc   : > { %920 = vmatmul.bf16.gmra.mxu1 %v1376_v60  ;;  %1000 = vmatmul.bf16.gmra.mxu3 %v1504_v62 }
  0xcd   : > { %v1780_v3 = vpack.c.bf16 %v1066_v2, %v1065_v1  ;;  %v1035_v19 = vmax.f32 %v882_v8, 0.0  ;;  %v1392_v2 = vor.u32 %v1636_v51, %v1389_v52  ;;  %v1403_v52 = vld [vmem:[%s1989_s18 + $0xe0] sm:$0xf] }
  0xce   : > { %v792_v5 = vpop.f32.mrf.mxu2 }
  0xcf   : > { %1868 = vst [vmem:[%s2092_s4 + $0x88] sm:$0xff] %v1780_v3   ;;  %v961_v6 = vpop.f32.mrf.mxu3  ;;  %v793_v11 = vadd.f32 %v2075_v61, %v792_v5  ;;  %v1520_v3 = vor.u32 %v1668_v55, %v1517_v56  ;;  %v1673_v55 = vld [vmem:[%s1989_s18 + $0x1e4] sm:$0xf0]  ;;  %v1640_v56 = vld [vmem:[%s1989_s18 + $0xe4] sm:$0xf] }
  0xd0   : > { %v714_v7 = vpop.f32.mrf.mxu0 }
  0xd1   : > { %v715_v9 = vadd.f32 %v2075_v61, %v714_v7  ;;  %v883_v10 = vpop.f32.mrf.mxu1  ;;  %v962_v25 = vadd.f32 %v961_v6, %v793_v11 }
  0xd3   : > { %v884_v12 = vadd.f32 %v883_v10, %v715_v9  ;;  %v1067_v35 = vmax.f32 %v962_v25, 0.0 }
  0xd5   : > { %v1036_v20 = vmax.f32 %v884_v12, 0.0 }
  0xd6   : > { %v794_v23 = vpop.f32.mrf.mxu2 }
  0xd7   : > { %v1705_v26 = vpack.c.bf16 %v1036_v20, %v1035_v19  ;;  %v795_v27 = vadd.f32 %v2075_v61, %v794_v23  ;;  %v963_v28 = vpop.f32.mrf.mxu3  ;;  %v1639_v19 = vld [vmem:[%s1989_s18 + $0xd4] sm:$0xf0]  ;;  %v1523_v20 = vld [vmem:[%s1989_s18 + $0x1d0] sm:$0xf]  ;;  %v1397_v23 = vld [vmem:[%s1989_s18 + $0xd8] sm:$0xf0] }
  0xd8   : > { %v717_v30 = vpop.f32.mrf.mxu0 }
  0xd9   : > { %1853 = vst [vmem:[%s2092_s4 + $0x10] sm:$0xff] %v1705_v26   ;;  %v964_v33 = vadd.f32 %v963_v28, %v795_v27  ;;  %v886_v34 = vpop.f32.mrf.mxu1  ;;  %v718_v38 = vadd.f32 %v2075_v61, %v717_v30  ;;  %v1670_v26 = vld [vmem:[%s1989_s18 + $0x1d4] sm:$0xf]  ;;  %v1525_v27 = vld [vmem:[%s1989_s18 + $0x1d8] sm:$0xf0] }
  0xdb   : > { %v1068_v36 = vmax.f32 %v964_v33, 0.0  ;;  %756 = vmatmul.bf16.gmra.mxu0 %v1380_v24  ;;  %836 = vmatmul.bf16.gmra.mxu2 %v1508_v29  ;;  %v887_v42 = vadd.f32 %v886_v34, %v718_v38  ;;  %v1396_v29 = vor.u32 %v1639_v19, %v1395_v18  ;;  %v1524_v34 = vor.u32 %v1671_v21, %v1523_v20 }
  0xdc   : > { %925 = vmatmul.bf16.gmra.mxu1 %v1384_v31  ;;  %1005 = vmatmul.bf16.gmra.mxu3 %v1512_v32 }
  0xdd   : > { %v1785_v37 = vpack.c.bf16 %v1068_v36, %v1067_v35  ;;  %v1037_v53 = vmax.f32 %v887_v42, 0.0  ;;  %v1400_v36 = vor.u32 %v1638_v22, %v1397_v23  ;;  %v1411_v23 = vld [vmem:[%s1989_s18 + $0xf0] sm:$0xf] }
  0xde   : > { %v797_v39 = vpop.f32.mrf.mxu2 }
  0xdf   : > { %1869 = vst [vmem:[%s2092_s4 + $0x90] sm:$0xff] %v1785_v37   ;;  %v966_v40 = vpop.f32.mrf.mxu3  ;;  %v798_v45 = vadd.f32 %v2075_v61, %v797_v39  ;;  %v1528_v37 = vor.u32 %v1670_v26, %v1525_v27  ;;  %v1675_v26 = vld [vmem:[%s1989_s18 + $0x1f4] sm:$0xf0]  ;;  %v1642_v27 = vld [vmem:[%s1989_s18 + $0xf4] sm:$0xf] }
  0xe0   : > { %v719_v41 = vpop.f32.mrf.mxu0 }
  0xe1   : > { %v720_v43 = vadd.f32 %v2075_v61, %v719_v41  ;;  %v888_v44 = vpop.f32.mrf.mxu1  ;;  %v967_v59 = vadd.f32 %v966_v40, %v798_v45 }
  0xe3   : > { %v889_v46 = vadd.f32 %v888_v44, %v720_v43  ;;  %v1069_v6 = vmax.f32 %v967_v59, 0.0 }
  0xe5   : > { %v1038_v54 = vmax.f32 %v889_v46, 0.0 }
  0xe6   : > { %v799_v57 = vpop.f32.mrf.mxu2 }
  0xe7   : > { %v1710_v60 = vpack.c.bf16 %v1038_v54, %v1037_v53  ;;  %v800_v62 = vadd.f32 %v2075_v61, %v799_v57  ;;  %v968_v63 = vpop.f32.mrf.mxu3  ;;  %v1641_v53 = vld [vmem:[%s1989_s18 + $0xe4] sm:$0xf0]  ;;  %v1531_v54 = vld [vmem:[%s1989_s18 + $0x1e0] sm:$0xf]  ;;  %v1405_v57 = vld [vmem:[%s1989_s18 + $0xe8] sm:$0xf0] }
  0xe8   : > { %v722_v1 = vpop.f32.mrf.mxu0 }
  0xe9   : > { %1854 = vst [vmem:[%s2092_s4 + $0x18] sm:$0xff] %v1710_v60   ;;  %v969_v4 = vadd.f32 %v968_v63, %v800_v62  ;;  %v891_v5 = vpop.f32.mrf.mxu1  ;;  %v723_v9 = vadd.f32 %v2075_v61, %v722_v1  ;;  %v1672_v60 = vld [vmem:[%s1989_s18 + $0x1e4] sm:$0xf]  ;;  %v1533_v62 = vld [vmem:[%s1989_s18 + $0x1e8] sm:$0xf0] }
  0xeb   : > { %v1070_v7 = vmax.f32 %v969_v4, 0.0  ;;  %761 = vmatmul.bf16.gmra.mxu0 %v1388_v58  ;;  %841 = vmatmul.bf16.gmra.mxu2 %v1516_v0  ;;  %v892_v13 = vadd.f32 %v891_v5, %v723_v9  ;;  %v1404_v0 = vor.u32 %v1641_v53, %v1403_v52  ;;  %v1532_v5 = vor.u32 %v1673_v55, %v1531_v54 }
  0xec   : > { %930 = vmatmul.bf16.gmra.mxu1 %v1392_v2  ;;  %1010 = vmatmul.bf16.gmra.mxu3 %v1520_v3 }
  0xed   : > { %v1790_v8 = vpack.c.bf16 %v1070_v7, %v1069_v6  ;;  %v1039_v24 = vmax.f32 %v892_v13, 0.0  ;;  %v1408_v7 = vor.u32 %v1640_v56, %v1405_v57 }
  0xee   : > { %v802_v10 = vpop.f32.mrf.mxu2 }
  0xef   : > { %1870 = vst [vmem:[%s2092_s4 + $0x98] sm:$0xff] %v1790_v8   ;;  %v971_v11 = vpop.f32.mrf.mxu3  ;;  %v803_v16 = vadd.f32 %v2075_v61, %v802_v10  ;;  %v1536_v8 = vor.u32 %v1672_v60, %v1533_v62 }
  0xf0   : > { %v724_v12 = vpop.f32.mrf.mxu0 }
  0xf1   : > { %v725_v14 = vadd.f32 %v2075_v61, %v724_v12  ;;  %v893_v15 = vpop.f32.mrf.mxu1  ;;  %v972_v30 = vadd.f32 %v971_v11, %v803_v16 }
  0xf3   : > { %v894_v17 = vadd.f32 %v893_v15, %v725_v14  ;;  %v1071_v40 = vmax.f32 %v972_v30, 0.0 }
  0xf5   : > { %v1040_v25 = vmax.f32 %v894_v17, 0.0 }
  0xf6   : > { %v804_v28 = vpop.f32.mrf.mxu2 }
  0xf7   : > { %v1715_v31 = vpack.c.bf16 %v1040_v25, %v1039_v24  ;;  %v805_v32 = vadd.f32 %v2075_v61, %v804_v28  ;;  %v973_v33 = vpop.f32.mrf.mxu3  ;;  %v1643_v24 = vld [vmem:[%s1989_s18 + $0xf4] sm:$0xf0]  ;;  %v1539_v25 = vld [vmem:[%s1989_s18 + $0x1f0] sm:$0xf]  ;;  %v1413_v28 = vld [vmem:[%s1989_s18 + $0xf8] sm:$0xf0] }
  0xf8   : > { %v727_v35 = vpop.f32.mrf.mxu0 }
  0xf9   : > { %1855 = vst [vmem:[%s2092_s4 + $0x20] sm:$0xff] %v1715_v31   ;;  %v974_v38 = vadd.f32 %v973_v33, %v805_v32  ;;  %v896_v39 = vpop.f32.mrf.mxu1  ;;  %v728_v43 = vadd.f32 %v2075_v61, %v727_v35  ;;  %v1674_v31 = vld [vmem:[%s1989_s18 + $0x1f4] sm:$0xf]  ;;  %v1541_v32 = vld [vmem:[%s1989_s18 + $0x1f8] sm:$0xf0] }
  0xfb   : > { %v1072_v41 = vmax.f32 %v974_v38, 0.0  ;;  %766 = vmatmul.bf16.gmra.mxu0 %v1396_v29  ;;  %846 = vmatmul.bf16.gmra.mxu2 %v1524_v34  ;;  %v897_v47 = vadd.f32 %v896_v39, %v728_v43  ;;  %v1412_v34 = vor.u32 %v1643_v24, %v1411_v23  ;;  %v1540_v39 = vor.u32 %v1675_v26, %v1539_v25 }
  0xfc   : > { %935 = vmatmul.bf16.gmra.mxu1 %v1400_v36  ;;  %1015 = vmatmul.bf16.gmra.mxu3 %v1528_v37 }
  0xfd   : > { %v1795_v42 = vpack.c.bf16 %v1072_v41, %v1071_v40  ;;  %v1041_v58 = vmax.f32 %v897_v47, 0.0  ;;  %v1416_v41 = vor.u32 %v1642_v27, %v1413_v28 }
  0xfe   : > { %v807_v44 = vpop.f32.mrf.mxu2 }
  0xff   : > { %1871 = vst [vmem:[%s2092_s4 + $0xa0] sm:$0xff] %v1795_v42   ;;  %v976_v45 = vpop.f32.mrf.mxu3  ;;  %v808_v50 = vadd.f32 %v2075_v61, %v807_v44  ;;  %v1544_v42 = vor.u32 %v1674_v31, %v1541_v32 }
 0x100   : > { %v729_v46 = vpop.f32.mrf.mxu0 }
 0x101   : > { %v730_v48 = vadd.f32 %v2075_v61, %v729_v46  ;;  %v898_v49 = vpop.f32.mrf.mxu1  ;;  %v977_v1 = vadd.f32 %v976_v45, %v808_v50 }
 0x103   : > { %v899_v51 = vadd.f32 %v898_v49, %v730_v48  ;;  %v1073_v11 = vmax.f32 %v977_v1, 0.0 }
 0x105   : > { %v1042_v59 = vmax.f32 %v899_v51, 0.0 }
 0x106   : > { %v809_v63 = vpop.f32.mrf.mxu2 }
 0x107   : > { %v1720_v2 = vpack.c.bf16 %v1042_v59, %v1041_v58  ;;  %v810_v3 = vadd.f32 %v2075_v61, %v809_v63  ;;  %v978_v4 = vpop.f32.mrf.mxu3 }
 0x108   : > { %v732_v6 = vpop.f32.mrf.mxu0 }
 0x109   : > { %1856 = vst [vmem:[%s2092_s4 + $0x28] sm:$0xff] %v1720_v2   ;;  %v979_v9 = vadd.f32 %v978_v4, %v810_v3  ;;  %v901_v10 = vpop.f32.mrf.mxu1  ;;  %v733_v14 = vadd.f32 %v2075_v61, %v732_v6 }
 0x10b   : > { %v1074_v12 = vmax.f32 %v979_v9, 0.0  ;;  %771 = vmatmul.bf16.gmra.mxu0 %v1404_v0  ;;  %851 = vmatmul.bf16.gmra.mxu2 %v1532_v5  ;;  %v902_v18 = vadd.f32 %v901_v10, %v733_v14 }
 0x10c   : > { %940 = vmatmul.bf16.gmra.mxu1 %v1408_v7  ;;  %1020 = vmatmul.bf16.gmra.mxu3 %v1536_v8 }
 0x10d   : > { %v1800_v13 = vpack.c.bf16 %v1074_v12, %v1073_v11  ;;  %v1043_v29 = vmax.f32 %v902_v18, 0.0 }
 0x10e   : > { %v812_v15 = vpop.f32.mrf.mxu2 }
 0x10f   : > { %1872 = vst [vmem:[%s2092_s4 + $0xa8] sm:$0xff] %v1800_v13   ;;  %v981_v16 = vpop.f32.mrf.mxu3  ;;  %v813_v21 = vadd.f32 %v2075_v61, %v812_v15 }
 0x110   : > { %v734_v17 = vpop.f32.mrf.mxu0 }
 0x111   : > { %v735_v19 = vadd.f32 %v2075_v61, %v734_v17  ;;  %v903_v20 = vpop.f32.mrf.mxu1  ;;  %v982_v35 = vadd.f32 %v981_v16, %v813_v21 }
 0x113   : > { %v904_v22 = vadd.f32 %v903_v20, %v735_v19  ;;  %v1075_v45 = vmax.f32 %v982_v35, 0.0 }
 0x115   : > { %v1044_v30 = vmax.f32 %v904_v22, 0.0 }
 0x116   : > { %v814_v33 = vpop.f32.mrf.mxu2 }
 0x117   : > { %v1725_v36 = vpack.c.bf16 %v1044_v30, %v1043_v29  ;;  %v815_v37 = vadd.f32 %v2075_v61, %v814_v33  ;;  %v983_v38 = vpop.f32.mrf.mxu3 }
 0x118   : > { %v737_v40 = vpop.f32.mrf.mxu0 }
 0x119   : > { %1857 = vst [vmem:[%s2092_s4 + $0x30] sm:$0xff] %v1725_v36   ;;  %v984_v43 = vadd.f32 %v983_v38, %v815_v37  ;;  %v906_v44 = vpop.f32.mrf.mxu1  ;;  %v738_v48 = vadd.f32 %v2075_v61, %v737_v40 }
 0x11b   : > { %v1076_v46 = vmax.f32 %v984_v43, 0.0  ;;  %776 = vmatmul.bf16.gmra.mxu0 %v1412_v34  ;;  %856 = vmatmul.bf16.gmra.mxu2 %v1540_v39  ;;  %v907_v52 = vadd.f32 %v906_v44, %v738_v48 }
 0x11c   : > { %945 = vmatmul.bf16.gmra.mxu1 %v1416_v41  ;;  %1025 = vmatmul.bf16.gmra.mxu3 %v1544_v42 }
 0x11d   : > { %v1805_v47 = vpack.c.bf16 %v1076_v46, %v1075_v45  ;;  %v1045_v57 = vmax.f32 %v907_v52, 0.0 }
 0x11e   : > { %v817_v49 = vpop.f32.mrf.mxu2 }
 0x11f   : > { %1873 = vst [vmem:[%s2092_s4 + $0xb0] sm:$0xff] %v1805_v47   ;;  %v986_v50 = vpop.f32.mrf.mxu3  ;;  %v818_v55 = vadd.f32 %v2075_v61, %v817_v49 }
 0x120   : > { %v739_v51 = vpop.f32.mrf.mxu0 }
 0x121   : > { %v740_v53 = vadd.f32 %v2075_v61, %v739_v51  ;;  %v908_v54 = vpop.f32.mrf.mxu1  ;;  %v987_v60 = vadd.f32 %v986_v50, %v818_v55 }
 0x123   : > { %v909_v56 = vadd.f32 %v908_v54, %v740_v53  ;;  %v1077_v4 = vmax.f32 %v987_v60, 0.0 }
 0x125   : > { %v1046_v58 = vmax.f32 %v909_v56, 0.0 }
 0x126   : > { %v819_v59 = vpop.f32.mrf.mxu2 }
 0x127   : > { %v1730_v62 = vpack.c.bf16 %v1046_v58, %v1045_v57  ;;  %v820_v63 = vadd.f32 %v2075_v61, %v819_v59  ;;  %v988_v0 = vpop.f32.mrf.mxu3 }
 0x128   : > { %v742_v1 = vpop.f32.mrf.mxu0 }
 0x129   : > { %1858 = vst [vmem:[%s2092_s4 + $0x38] sm:$0xff] %v1730_v62   ;;  %v989_v2 = vadd.f32 %v988_v0, %v820_v63  ;;  %v911_v3 = vpop.f32.mrf.mxu1  ;;  %v743_v7 = vadd.f32 %v2075_v61, %v742_v1 }
 0x12b   : > { %v1078_v5 = vmax.f32 %v989_v2, 0.0  ;;  %v912_v11 = vadd.f32 %v911_v3, %v743_v7 }
 0x12d   : > { %v1810_v6 = vpack.c.bf16 %v1078_v5, %v1077_v4  ;;  %v1047_v16 = vmax.f32 %v912_v11, 0.0 }
 0x12e   : > { %v822_v8 = vpop.f32.mrf.mxu2 }
 0x12f   : > { %1874 = vst [vmem:[%s2092_s4 + $0xb8] sm:$0xff] %v1810_v6   ;;  %v991_v9 = vpop.f32.mrf.mxu3  ;;  %v823_v14 = vadd.f32 %v2075_v61, %v822_v8 }
 0x130   : > { %v744_v10 = vpop.f32.mrf.mxu0 }
 0x131   : > { %v745_v12 = vadd.f32 %v2075_v61, %v744_v10  ;;  %v913_v13 = vpop.f32.mrf.mxu1  ;;  %v992_v19 = vadd.f32 %v991_v9, %v823_v14 }
 0x133   : > { %v914_v15 = vadd.f32 %v913_v13, %v745_v12  ;;  %v1079_v26 = vmax.f32 %v992_v19, 0.0 }
 0x135   : > { %v1048_v17 = vmax.f32 %v914_v15, 0.0 }
 0x136   : > { %v824_v18 = vpop.f32.mrf.mxu2 }
 0x137   : > { %v1735_v20 = vpack.c.bf16 %v1048_v17, %v1047_v16  ;;  %v825_v21 = vadd.f32 %v2075_v61, %v824_v18  ;;  %v993_v22 = vpop.f32.mrf.mxu3 }
 0x138   : > { %v747_v23 = vpop.f32.mrf.mxu0 }
 0x139   : > { %1859 = vst [vmem:[%s2092_s4 + $0x40] sm:$0xff] %v1735_v20   ;;  %v994_v24 = vadd.f32 %v993_v22, %v825_v21  ;;  %v916_v25 = vpop.f32.mrf.mxu1  ;;  %v748_v29 = vadd.f32 %v2075_v61, %v747_v23 }
 0x13b   : > { %v1080_v27 = vmax.f32 %v994_v24, 0.0  ;;  %v917_v33 = vadd.f32 %v916_v25, %v748_v29 }
 0x13d   : > { %v1815_v28 = vpack.c.bf16 %v1080_v27, %v1079_v26  ;;  %v1049_v38 = vmax.f32 %v917_v33, 0.0 }
 0x13e   : > { %v827_v30 = vpop.f32.mrf.mxu2 }
 0x13f   : > { %1875 = vst [vmem:[%s2092_s4 + $0xc0] sm:$0xff] %v1815_v28   ;;  %v996_v31 = vpop.f32.mrf.mxu3  ;;  %v828_v36 = vadd.f32 %v2075_v61, %v827_v30 }
 0x140   : > { %v749_v32 = vpop.f32.mrf.mxu0 }
 0x141   : > { %v750_v34 = vadd.f32 %v2075_v61, %v749_v32  ;;  %v918_v35 = vpop.f32.mrf.mxu1  ;;  %v997_v41 = vadd.f32 %v996_v31, %v828_v36 }
 0x143   : > { %v919_v37 = vadd.f32 %v918_v35, %v750_v34  ;;  %v1081_v48 = vmax.f32 %v997_v41, 0.0 }
 0x145   : > { %v1050_v39 = vmax.f32 %v919_v37, 0.0 }
 0x146   : > { %v829_v40 = vpop.f32.mrf.mxu2 }
 0x147   : > { %v1740_v42 = vpack.c.bf16 %v1050_v39, %v1049_v38  ;;  %v830_v43 = vadd.f32 %v2075_v61, %v829_v40  ;;  %v998_v44 = vpop.f32.mrf.mxu3 }
 0x148   : > { %v752_v45 = vpop.f32.mrf.mxu0 }
 0x149   : > { %1860 = vst [vmem:[%s2092_s4 + $0x48] sm:$0xff] %v1740_v42   ;;  %v999_v46 = vadd.f32 %v998_v44, %v830_v43  ;;  %v921_v47 = vpop.f32.mrf.mxu1  ;;  %v753_v51 = vadd.f32 %v2075_v61, %v752_v45 }
 0x14b   : > { %v1082_v49 = vmax.f32 %v999_v46, 0.0  ;;  %v922_v55 = vadd.f32 %v921_v47, %v753_v51 }
 0x14d   : > { %v1820_v50 = vpack.c.bf16 %v1082_v49, %v1081_v48  ;;  %v1051_v60 = vmax.f32 %v922_v55, 0.0 }
 0x14e   : > { %v832_v52 = vpop.f32.mrf.mxu2 }
 0x14f   : > { %1876 = vst [vmem:[%s2092_s4 + $0xc8] sm:$0xff] %v1820_v50   ;;  %v1001_v53 = vpop.f32.mrf.mxu3  ;;  %v833_v58 = vadd.f32 %v2075_v61, %v832_v52 }
 0x150   : > { %v754_v54 = vpop.f32.mrf.mxu0 }
 0x151   : > { %v755_v56 = vadd.f32 %v2075_v61, %v754_v54  ;;  %v923_v57 = vpop.f32.mrf.mxu1  ;;  %v1002_v0 = vadd.f32 %v1001_v53, %v833_v58 }
 0x153   : > { %v924_v59 = vadd.f32 %v923_v57, %v755_v56  ;;  %v1083_v7 = vmax.f32 %v1002_v0, 0.0 }
 0x155   : > { %v1052_v62 = vmax.f32 %v924_v59, 0.0 }
 0x156   : > { %v834_v63 = vpop.f32.mrf.mxu2 }
 0x157   : > { %v1745_v1 = vpack.c.bf16 %v1052_v62, %v1051_v60  ;;  %v835_v2 = vadd.f32 %v2075_v61, %v834_v63  ;;  %v1003_v3 = vpop.f32.mrf.mxu3 }
 0x158   : > { %v757_v4 = vpop.f32.mrf.mxu0 }
 0x159   : > { %1861 = vst [vmem:[%s2092_s4 + $0x50] sm:$0xff] %v1745_v1   ;;  %v1004_v5 = vadd.f32 %v1003_v3, %v835_v2  ;;  %v926_v6 = vpop.f32.mrf.mxu1  ;;  %v758_v10 = vadd.f32 %v2075_v61, %v757_v4 }
 0x15b   : > { %v1084_v8 = vmax.f32 %v1004_v5, 0.0  ;;  %v927_v14 = vadd.f32 %v926_v6, %v758_v10 }
 0x15d   : > { %v1825_v9 = vpack.c.bf16 %v1084_v8, %v1083_v7  ;;  %v1053_v19 = vmax.f32 %v927_v14, 0.0 }
 0x15e   : > { %v837_v11 = vpop.f32.mrf.mxu2 }
 0x15f   : > { %1877 = vst [vmem:[%s2092_s4 + $0xd0] sm:$0xff] %v1825_v9   ;;  %v1006_v12 = vpop.f32.mrf.mxu3  ;;  %v838_v17 = vadd.f32 %v2075_v61, %v837_v11 }
 0x160   : > { %v759_v13 = vpop.f32.mrf.mxu0 }
 0x161   : > { %v760_v15 = vadd.f32 %v2075_v61, %v759_v13  ;;  %v928_v16 = vpop.f32.mrf.mxu1  ;;  %v1007_v22 = vadd.f32 %v1006_v12, %v838_v17 }
 0x163   : > { %v929_v18 = vadd.f32 %v928_v16, %v760_v15  ;;  %v1085_v29 = vmax.f32 %v1007_v22, 0.0 }
 0x165   : > { %v1054_v20 = vmax.f32 %v929_v18, 0.0 }
 0x166   : > { %v839_v21 = vpop.f32.mrf.mxu2 }
 0x167   : > { %v1750_v23 = vpack.c.bf16 %v1054_v20, %v1053_v19  ;;  %v840_v24 = vadd.f32 %v2075_v61, %v839_v21  ;;  %v1008_v25 = vpop.f32.mrf.mxu3 }
 0x168   : > { %v762_v26 = vpop.f32.mrf.mxu0 }
 0x169   : > { %1862 = vst [vmem:[%s2092_s4 + $0x58] sm:$0xff] %v1750_v23   ;;  %v1009_v27 = vadd.f32 %v1008_v25, %v840_v24  ;;  %v931_v28 = vpop.f32.mrf.mxu1  ;;  %v763_v32 = vadd.f32 %v2075_v61, %v762_v26 }
 0x16b   : > { %v1086_v30 = vmax.f32 %v1009_v27, 0.0  ;;  %v932_v36 = vadd.f32 %v931_v28, %v763_v32 }
 0x16d   : > { %v1830_v31 = vpack.c.bf16 %v1086_v30, %v1085_v29  ;;  %v1055_v41 = vmax.f32 %v932_v36, 0.0 }
 0x16e   : > { %v842_v33 = vpop.f32.mrf.mxu2 }
 0x16f   : > { %1878 = vst [vmem:[%s2092_s4 + $0xd8] sm:$0xff] %v1830_v31   ;;  %v1011_v34 = vpop.f32.mrf.mxu3  ;;  %v843_v39 = vadd.f32 %v2075_v61, %v842_v33 }
 0x170   : > { %v764_v35 = vpop.f32.mrf.mxu0 }
 0x171   : > { %v765_v37 = vadd.f32 %v2075_v61, %v764_v35  ;;  %v933_v38 = vpop.f32.mrf.mxu1  ;;  %v1012_v44 = vadd.f32 %v1011_v34, %v843_v39 }
 0x173   : > { %v934_v40 = vadd.f32 %v933_v38, %v765_v37  ;;  %v1087_v51 = vmax.f32 %v1012_v44, 0.0 }
 0x175   : > { %v1056_v42 = vmax.f32 %v934_v40, 0.0 }
 0x176   : > { %v844_v43 = vpop.f32.mrf.mxu2 }
 0x177   : > { %v1755_v45 = vpack.c.bf16 %v1056_v42, %v1055_v41  ;;  %v845_v46 = vadd.f32 %v2075_v61, %v844_v43  ;;  %v1013_v47 = vpop.f32.mrf.mxu3 }
 0x178   : > { %v767_v48 = vpop.f32.mrf.mxu0 }
 0x179   : > { %1863 = vst [vmem:[%s2092_s4 + $0x60] sm:$0xff] %v1755_v45   ;;  %v1014_v49 = vadd.f32 %v1013_v47, %v845_v46  ;;  %v936_v50 = vpop.f32.mrf.mxu1  ;;  %v768_v54 = vadd.f32 %v2075_v61, %v767_v48 }
 0x17b   : > { %v1088_v52 = vmax.f32 %v1014_v49, 0.0  ;;  %v937_v58 = vadd.f32 %v936_v50, %v768_v54 }
 0x17d   : > { %v1835_v53 = vpack.c.bf16 %v1088_v52, %v1087_v51  ;;  %v1057_v0 = vmax.f32 %v937_v58, 0.0 }
 0x17e   : > { %v847_v55 = vpop.f32.mrf.mxu2 }
 0x17f   : > { %1879 = vst [vmem:[%s2092_s4 + $0xe0] sm:$0xff] %v1835_v53   ;;  %v1016_v56 = vpop.f32.mrf.mxu3  ;;  %v848_v62 = vadd.f32 %v2075_v61, %v847_v55 }
 0x180   : > { %v769_v57 = vpop.f32.mrf.mxu0 }
 0x181   : > { %v770_v59 = vadd.f32 %v2075_v61, %v769_v57  ;;  %v938_v60 = vpop.f32.mrf.mxu1  ;;  %v1017_v3 = vadd.f32 %v1016_v56, %v848_v62 }
 0x183   : > { %v939_v63 = vadd.f32 %v938_v60, %v770_v59  ;;  %v1089_v10 = vmax.f32 %v1017_v3, 0.0 }
 0x185   : > { %v1058_v1 = vmax.f32 %v939_v63, 0.0 }
 0x186   : > { %v849_v2 = vpop.f32.mrf.mxu2 }
 0x187   : > { %v1760_v4 = vpack.c.bf16 %v1058_v1, %v1057_v0  ;;  %v850_v5 = vadd.f32 %v2075_v61, %v849_v2  ;;  %v1018_v6 = vpop.f32.mrf.mxu3 }
 0x188   : > { %v772_v7 = vpop.f32.mrf.mxu0 }
 0x189   : > { %1864 = vst [vmem:[%s2092_s4 + $0x68] sm:$0xff] %v1760_v4   ;;  %v1019_v8 = vadd.f32 %v1018_v6, %v850_v5  ;;  %v941_v9 = vpop.f32.mrf.mxu1  ;;  %v773_v13 = vadd.f32 %v2075_v61, %v772_v7 }
 0x18b   : > { %v1090_v11 = vmax.f32 %v1019_v8, 0.0  ;;  %v942_v17 = vadd.f32 %v941_v9, %v773_v13 }
 0x18d   : > { %v1840_v12 = vpack.c.bf16 %v1090_v11, %v1089_v10  ;;  %v1059_v22 = vmax.f32 %v942_v17, 0.0 }
 0x18e   : > { %v852_v14 = vpop.f32.mrf.mxu2 }
 0x18f   : > { %1880 = vst [vmem:[%s2092_s4 + $0xe8] sm:$0xff] %v1840_v12   ;;  %v1021_v15 = vpop.f32.mrf.mxu3  ;;  %v853_v20 = vadd.f32 %v2075_v61, %v852_v14 }
 0x190   : > { %v774_v16 = vpop.f32.mrf.mxu0 }
 0x191   : > { %v775_v18 = vadd.f32 %v2075_v61, %v774_v16  ;;  %v943_v19 = vpop.f32.mrf.mxu1  ;;  %v1022_v25 = vadd.f32 %v1021_v15, %v853_v20 }
 0x193   : > { %v944_v21 = vadd.f32 %v943_v19, %v775_v18  ;;  %v1091_v32 = vmax.f32 %v1022_v25, 0.0 }
 0x195   : > { %v1060_v23 = vmax.f32 %v944_v21, 0.0 }
 0x196   : > { %v854_v24 = vpop.f32.mrf.mxu2 }
 0x197   : > { %v1765_v26 = vpack.c.bf16 %v1060_v23, %v1059_v22  ;;  %v855_v27 = vadd.f32 %v2075_v61, %v854_v24  ;;  %v1023_v28 = vpop.f32.mrf.mxu3 }
 0x198   : > { %v777_v29 = vpop.f32.mrf.mxu0 }
 0x199   : > { %1865 = vst [vmem:[%s2092_s4 + $0x70] sm:$0xff] %v1765_v26   ;;  %v1024_v30 = vadd.f32 %v1023_v28, %v855_v27  ;;  %v946_v31 = vpop.f32.mrf.mxu1  ;;  %v778_v35 = vadd.f32 %v2075_v61, %v777_v29 }
 0x19b   : > { %v1092_v33 = vmax.f32 %v1024_v30, 0.0  ;;  %v947_v39 = vadd.f32 %v946_v31, %v778_v35 }
 0x19d   : > { %v1845_v34 = vpack.c.bf16 %v1092_v33, %v1091_v32  ;;  %v1061_v44 = vmax.f32 %v947_v39, 0.0 }
 0x19e   : > { %v857_v36 = vpop.f32.mrf.mxu2 }
 0x19f   : > { %1881 = vst [vmem:[%s2092_s4 + $0xf0] sm:$0xff] %v1845_v34   ;;  %v1026_v37 = vpop.f32.mrf.mxu3  ;;  %v858_v42 = vadd.f32 %v2075_v61, %v857_v36 }
 0x1a0   : > { %v779_v38 = vpop.f32.mrf.mxu0 }
 0x1a1   : > { %v780_v40 = vadd.f32 %v2075_v61, %v779_v38  ;;  %v948_v41 = vpop.f32.mrf.mxu1  ;;  %v1027_v47 = vadd.f32 %v1026_v37, %v858_v42 }
 0x1a3   : > { %v949_v43 = vadd.f32 %v948_v41, %v780_v40  ;;  %v1093_v52 = vmax.f32 %v1027_v47, 0.0 }
 0x1a5   : > { %v1062_v45 = vmax.f32 %v949_v43, 0.0 }
 0x1a6   : > { %v859_v46 = vpop.f32.mrf.mxu2 }
 0x1a7   : > { %v1770_v48 = vpack.c.bf16 %v1062_v45, %v1061_v44  ;;  %v860_v49 = vadd.f32 %v2075_v61, %v859_v46  ;;  %v1028_v50 = vpop.f32.mrf.mxu3 }
 0x1a9   : > { %1866 = vst [vmem:[%s2092_s4 + $0x78] sm:$0xff] %v1770_v48   ;;  %v1029_v51 = vadd.f32 %v1028_v50, %v860_v49 }
 0x1ab   : > { %v1094_v53 = vmax.f32 %v1029_v51, 0.0 }
 0x1ad   : > { %v1850_v54 = vpack.c.bf16 %v1094_v53, %v1093_v52 }
 0x1af   : > { %1882 = vst [vmem:[%s2092_s4 + $0xf8] sm:$0xff] %v1850_v54  }
 0x1b0 PF: > { %s13_s12 = sadd.s32 1, %s1914_s12  }
 0x1b1   : > { %p10_p4 = scmp.ge.s32.totalorder %s13_s12, 6  }
 0x1b3   :  { %12 = sbr.rel (!%p10_p4) target bundleno = 1 (0x1), region = 62 }

// kernel: resnest_forward.11
= control target key start
LH: loop header
LB: loop body
LE: loop exit
PB: predicated region body
PF: predicated region fallthrough
CT: control target
= control target key end

     0   :  { %s1320_s30 = smov 0   ;;  %s1322_s10 = smov 0   ;;  %s1411_s0 = inlined_call_operand.vmem [shape: bf16[2,34,16,128], index: 0, kind: input, shape index: {}, may-alias: {0,1,2}]   ;;  %s1412_s1 = inlined_call_operand.vmem [shape: bf16[2,34,16,128], index: 1, kind: input, shape index: {}, may-alias: {0,1,2}]   ;;  %s1413_s2 = inlined_call_operand.vmem [shape: bf16[2,34,16,128], index: 2, kind: input, shape index: {}, may-alias: {0,1,2}]   ;;  %s1414_s3 = inlined_call_operand.vmem [shape: bf16[2,34,16,128], index: 3, kind: input, shape index: {}, may-alias: {3,4,5}]   ;;  %s1415_s4 = inlined_call_operand.vmem [shape: bf16[2,34,16,128], index: 4, kind: input, shape index: {}, may-alias: {3,4,5}]   ;;  %s1416_s5 = inlined_call_operand.vmem [shape: bf16[2,34,16,128], index: 5, kind: input, shape index: {}, may-alias: {3,4,5}]   ;;  %s1417_s6 = inlined_call_operand.vmem [shape: bf16[2,34,16,128], index: 6, kind: input, shape index: {}, may-alias: {6,7,8}]   ;;  %s1418_s7 = inlined_call_operand.vmem [shape: bf16[2,34,16,128], index: 7, kind: input, shape index: {}, may-alias: {6,7,8}]   ;;  %s1419_s8 = inlined_call_operand.vmem [shape: bf16[2,34,16,128], index: 8, kind: input, shape index: {}, may-alias: {6,7,8}]   ;;  %s1420_s9 = inlined_call_operand.vmem [shape: bf16[2,16,16,128], index: 9, kind: output, shape index: {}]  }
   0x1   :  { %1423 = sst [smem:[#allocation6_spill]] %s1411_s0  ;;  %s1324_s11 = smov 0  }
   0x2   :  { %s1326_s12 = smov 0   ;;  %s1328_s13 = smov 0  }
   0x3 LB: > { %1424 = sst [smem:[#allocation2_spill]] %s1260_s11  ;;  %s28_s14 = sadd.s32 1, %s1260_s11  ;;  %s1268_s13 = sphi %s1328_s13, %s19_s13   ;;  %s1264_s12 = sphi %s1326_s12, %s1432_s12   ;;  %s1260_s11 = sphi %s1324_s11, %s1431_s11   ;;  %s1256_s10 = sphi %s1322_s10, %s1430_s10   ;;  %s1252_s30 = sphi %s1320_s30, %s1429_s30  }
   0x4   : > { %1425 = sst [smem:[#allocation3_spill]] %s1264_s12  ;;  %s31_s15 = sadd.s32 1, %s1264_s12 }
   0x5   : > { %p29_p0 = scmp.ge.s32.totalorder %s28_s14, 16  ;;  %p1115_p1 = scmp.ge.s32.totalorder %s1268_s13, 1 }
   0x6   : > { %p495_p2 = scmp.lt.s32.totalorder %s1268_s13, 33 }
   0x7   : > { %s1434_s14 = smov (%p29_p0, %s28_s14), 0  ;;  %s1436_s15 = smov (!%p29_p0, %s31_s15), %s1264_s12 }
   0x8   : > { %1426 = sst [smem:[#allocation4_spill]] %s1434_s14  ;;  %p496_p3 = pnand %p1115_p1, %p495_p2 }
   0x9   : > { %p33_p4 = scmp.ge.s32.totalorder %s1436_s15, 2  ;;  %s1116_s16 = sshll.u32 (!%p496_p3), %s1252_s30, 1 }
   0xa   : > { %499 = sbr.rel (%p496_p3) target bundleno = 43 (0x2b), region = 56  ;;  %p627_p5 = scmp.lt.s32.totalorder (!%p496_p3), %s1256_s10, 1 }
   0xb   : > { %s1438_s15 = smov (%p33_p4, %s1436_s15), 0  ;;  %p629_p6 = scmp.lt.s32.totalorder (!%p496_p3), %s1116_s16, 33 }
   0xc   : > { %1427 = sst [smem:[#allocation5_spill]] %s1438_s15  ;;  %s638_s17 = sadd.s32 (!%p496_p3), 1, %s1116_s16 }
   0xd   : > { %p641_p7 = scmp.lt.s32.totalorder (!%p496_p3), %s638_s17, 33  ;;  %s651_s21 = sadd.s32 (!%p496_p3), 2, %s1116_s16 }
   0xe   : > { %p654_p8 = scmp.lt.s32.totalorder (!%p496_p3), %s651_s21, 33  ;;  %p739_p9 = scmp.lt.s32.totalorder (!%p496_p3), %s1252_s30, 15 }
   0xf   : > { %s1440_s10 = smov (!%p627_p5, %s1256_s10), 1  ;;  %s1428_s0 = sld [smem:[#allocation6_spill]] }
  0x10   : > { %s630_s18 = scalar_select %p629_p6, %s1116_s16, 33 }
  0x11   : > { %s1189_s19 = smul.u32 68, %s1440_s10  ;;  %s1442_s17 = smov (!%p641_p7, %s638_s17), 33 }
  0x12   : > { %s1117_s20 = sshll.u32 %s630_s18, 1  ;;  %s1444_s21 = smov (!%p654_p8, %s651_s21), 33 }
  0x13   : > { %s633_s22 = sadd.s32 %s1189_s19, %s1117_s20  ;;  %s1120_s15 = sshll.u32 %s1442_s17, 1 }
  0x14   : > { %s1118_s23 = sshll.u32 %s633_s22, 2  ;;  %s645_s16 = sadd.s32 %s1189_s19, %s1120_s15 }
  0x15   : > { %s635_s26 = scalar_lea.vmem %s1428_s0, %s1118_s23  ;;  %s672_s29 = scalar_lea.vmem %s1414_s3, %s1118_s23 }
  0x16   : > { %s709_s18 = scalar_lea.vmem %s1417_s6, %s1118_s23  ;;  %s1123_s20 = sshll.u32 %s1444_s21, 1  ;;  %v1149_v0 = vld [vmem:[%s635_s26] sm:$0xff]  }
  0x17   : > { %v1161_v1 = vld [vmem:[%s672_s29] sm:$0xff]   ;;  %s1121_s22 = sshll.u32 %s645_s16, 2  ;;  %s658_s11 = sadd.s32 %s1189_s19, %s1123_s20  ;;  %v1150_v3 = vunpack.c.l.bf16 %v1149_v0  ;;  %v1151_v4 = vunpack.c.h.bf16 %v1149_v0 }
  0x18   : > { %v1173_v2 = vld [vmem:[%s709_s18] sm:$0xff]   ;;  %s647_s0 = scalar_lea.vmem %s1412_s1, %s1121_s22  ;;  %s1369_s27 = sshll.u32 %s658_s11, 2  ;;  %v1162_v6 = vunpack.c.l.bf16 %v1161_v1  ;;  %v1163_v7 = vunpack.c.h.bf16 %v1161_v1 }
  0x19   : > { %s660_s12 = scalar_lea.vmem %s1413_s2, %s1369_s27  ;;  %s684_s21 = scalar_lea.vmem %s1415_s4, %s1121_s22  ;;  %v1153_v5 = vld [vmem:[%s647_s0] sm:$0xff]   ;;  %v1174_v12 = vunpack.c.l.bf16 %v1173_v2  ;;  %v1175_v13 = vunpack.c.h.bf16 %v1173_v2 }
  0x1a   : > { %s697_s11 = scalar_lea.vmem %s1416_s5, %s1369_s27  ;;  %s721_s18 = scalar_lea.vmem %s1418_s7, %s1121_s22  ;;  %v1154_v8 = vunpack.c.l.bf16 %v1153_v5  ;;  %v1155_v9 = vunpack.c.h.bf16 %v1153_v5  ;;  %v1157_v10 = vld [vmem:[%s660_s12] sm:$0xff]  }
  0x1b   : > { %v1165_v11 = vld [vmem:[%s684_s21] sm:$0xff]   ;;  %s734_s20 = scalar_lea.vmem %s1419_s8, %s1369_s27  ;;  %v1158_v14 = vunpack.c.l.bf16 %v1157_v10  ;;  %v1159_v15 = vunpack.c.h.bf16 %v1157_v10  ;;  %s1446_s30 = smov (!%p739_p9, %s1252_s30), 15 }
  0x1c   : > { %v1166_v16 = vunpack.c.l.bf16 %v1165_v11  ;;  %v1167_v17 = vunpack.c.h.bf16 %v1165_v11  ;;  %v1169_v18 = vld [vmem:[%s697_s11] sm:$0xff]   ;;  %s1144_s22 = sshll.u32 %s1440_s10, 5  ;;  %v768_v24 = vmax.f32 %v1150_v3, %v1154_v8  ;;  %v769_v25 = vmax.f32 %v1151_v4, %v1155_v9  ;;  %s1143_s24 = sshll.u32 %s1446_s30, 1 }
  0x1d   : > { %v1177_v19 = vld [vmem:[%s721_s18] sm:$0xff]   ;;  %v1170_v20 = vunpack.c.l.bf16 %v1169_v18  ;;  %v1171_v21 = vunpack.c.h.bf16 %v1169_v18  ;;  %v776_v27 = vmax.f32 %v1158_v14, %v1162_v6  ;;  %v777_v28 = vmax.f32 %v1159_v15, %v1163_v7  ;;  %s743_s25 = sadd.s32 %s1144_s22, %s1143_s24 }
  0x1e   : > { %v1178_v22 = vunpack.c.l.bf16 %v1177_v19  ;;  %v1179_v23 = vunpack.c.h.bf16 %v1177_v19  ;;  %v1181_v26 = vld [vmem:[%s734_s20] sm:$0xff]   ;;  %s1145_s27 = sshll.u32 %s743_s25, 2 }
  0x1f   : > { %v784_v29 = vmax.f32 %v1166_v16, %v1170_v20  ;;  %v785_v30 = vmax.f32 %v1167_v17, %v1171_v21  ;;  %v800_v33 = vmax.f32 %v768_v24, %v776_v27  ;;  %v801_v34 = vmax.f32 %v769_v25, %v777_v28  ;;  %s745_s28 = scalar_lea.vmem %s1420_s9, %s1145_s27 }
  0x20   : > { %v792_v31 = vmax.f32 %v1174_v12, %v1178_v22  ;;  %v793_v32 = vmax.f32 %v1175_v13, %v1179_v23  ;;  %v1182_v35 = vunpack.c.l.bf16 %v1181_v26  ;;  %v1183_v36 = vunpack.c.h.bf16 %v1181_v26 }
  0x22   : > { %v808_v37 = vmax.f32 %v784_v29, %v792_v31  ;;  %v809_v38 = vmax.f32 %v785_v30, %v793_v32 }
  0x24   : > { %v816_v39 = vmax.f32 %v800_v33, %v808_v37  ;;  %v817_v40 = vmax.f32 %v801_v34, %v809_v38 }
  0x26   : > { %v824_v41 = vmax.f32 %v816_v39, %v1182_v35  ;;  %v825_v42 = vmax.f32 %v817_v40, %v1183_v36 }
  0x28   : > { %v1187_v43 = vpack.c.bf16 %v825_v42, %v824_v41 }
  0x2a   : > { %1188 = vst [vmem:[%s745_s28] sm:$0xff] %v1187_v43  }
  0x2b PF: > { %s19_s13 = sadd.s32 1, %s1268_s13   ;;  %s1429_s30 = sld [smem:[#allocation2_spill]] }
  0x2c   : > { %p16_p10 = scmp.ge.s32.totalorder %s19_s13, 34   ;;  %s1430_s10 = sld [smem:[#allocation3_spill]] }
  0x2d   : > { %s1431_s11 = sld [smem:[#allocation4_spill]] }
  0x2e   : > { %s1432_s12 = sld [smem:[#allocation5_spill]]  ;;  %18 = sbr.rel (!%p16_p10) target bundleno = 3 (0x3), region = 110 }

// kernel: resnest_forward.12
= control target key start
LH: loop header
LB: loop body
LE: loop exit
PB: predicated region body
PF: predicated region fallthrough
CT: control target
= control target key end

     0   :  { %s1036_s18 = smov 0   ;;  %s1038_s19 = smov 0   ;;  %s1161_s0 = inlined_call_operand.vmem [shape: bf16[2,18,18,128], index: 0, kind: input, shape index: {}, may-alias: {0,1,2}]   ;;  %s1162_s1 = inlined_call_operand.vmem [shape: bf16[2,18,18,128], index: 1, kind: input, shape index: {}, may-alias: {0,1,2}]   ;;  %s1163_s2 = inlined_call_operand.vmem [shape: bf16[2,18,18,128], index: 2, kind: input, shape index: {}, may-alias: {0,1,2}]   ;;  %s1164_s3 = inlined_call_operand.vmem [shape: bf16[9,16,128], index: 3, kind: input, shape index: {}]   ;;  %s1165_s4 = inlined_call_operand.vmem [shape: f32[1,128], index: 4, kind: input, shape index: {}]   ;;  %s1166_s5 = inlined_call_operand.vmem [shape: bf16[2,16,16,128], index: 5, kind: output, shape index: {}]  }
   0x1   :  { %s1040_s20 = smov 0   ;;  %s1042_s21 = smov 0  }
   0x2   :  { %s1044_s22 = smov 0  }
   0x3 LB: > { %s24_s23 = sadd.s32 1, %s996_s20  ;;  %s27_s24 = sadd.s32 1, %s1000_s21  ;;  %s1004_s22 = sphi %s1044_s22, %s15_s22   ;;  %s1000_s21 = sphi %s1042_s21, %s1171_s21   ;;  %s996_s20 = sphi %s1040_s20, %s1170_s20   ;;  %s992_s19 = sphi %s1038_s19, %s1169_s19   ;;  %s988_s18 = sphi %s1036_s18, %s1168_s18  }
   0x4   : > { %p25_p0 = scmp.ge.s32.totalorder %s24_s23, 16  ;;  %p822_p1 = scmp.ge.s32.totalorder %s1004_s22, 1 }
   0x5   : > { %p247_p2 = scmp.lt.s32.totalorder %s1004_s22, 33 }
   0x6   : > { %s1173_s23 = smov (%p25_p0, %s24_s23), 0  ;;  %s1175_s24 = smov (!%p25_p0, %s27_s24), %s1000_s21 }
   0x7   : > { %p248_p3 = pnand %p822_p1, %p247_p2  ;;  %p29_p4 = scmp.ge.s32.totalorder %s1175_s24, 2 }
   0x8   : > { %p303_p5 = scmp.lt.s32.totalorder (!%p248_p3), %s992_s19, 1  ;;  %p305_p6 = scmp.lt.s32.totalorder (!%p248_p3), %s988_s18, 17 }
   0x9   : > { %s1177_s24 = smov (%p29_p4, %s1175_s24), 0  ;;  %251 = sbr.rel (%p248_p3) target bundleno = 207 (0xcf), region = 40 }
   0xa   : > { %s312_s8 = sadd.s32 (!%p248_p3), 1, %s988_s18  ;;  %s323_s27 = sadd.s32 (!%p248_p3), 2, %s988_s18 }
   0xb   : > { %p315_p7 = scmp.lt.s32.totalorder (!%p248_p3), %s312_s8, 17  ;;  %p1105_p8 = scmp.lt.s32.totalorder (!%p248_p3), %s323_s27, 17 }
   0xc   : > { %p336_p9 = scmp.lt.s32.totalorder (!%p248_p3), %s988_s18, 15 }
   0xe   : > { %v909_v0 = vld [vmem:[%s1164_s3 + $0x10] sm:$0xff]  ;;  %v908_v1 = vld [vmem:[%s1164_s3 + $0x8] sm:$0xff]  ;;  %v907_v2 = vld [vmem:[%s1164_s3] sm:$0xff]  ;;  %s1179_s19 = smov (!%p303_p5, %s992_s19), 1  ;;  %s1181_s8 = smov (!%p315_p7, %s312_s8), 17  ;;  %vm385_vm0 = vcmask 130048  }
   0xf   : > { %v910_v3 = vld [vmem:[%s1164_s3 + $0x18] sm:$0xff]  ;;  %v911_v4 = vld [vmem:[%s1164_s3 + $0x20] sm:$0xff]  ;;  %448 = vmatpush.bf16.msra.mxu2 %v909_v0  ;;  %396 = vmatpush.bf16.msra.mxu0 %v908_v1  ;;  %v913_v5 = vld [vmem:[%s1164_s3 + $0x30] sm:$0xff]  ;;  %s306_s17 = scalar_select %p305_p6, %s988_s18, 17  ;;  %vm428_vm1 = vcmask 1046528  }
  0x10   : > { %v914_v6 = vld [vmem:[%s1164_s3 + $0x38] sm:$0xff]  ;;  %v912_v7 = vld [vmem:[%s1164_s3 + $0x28] sm:$0xff]  ;;  %418 = vmatpush.bf16.msra.mxu1 %v907_v2  ;;  %481 = vmatpush.bf16.msra.mxu3 %v910_v3  ;;  %s1098_s25 = smul.u32 54, %s1179_s19  ;;  %s1183_s27 = smov (!%p1105_p8, %s323_s27), 17  ;;  %vm366_vm2 = vsmask.f32 7424 }
  0x11   : > { %s921_s26 = smul.u32 3, %s306_s17  ;;  %v915_v24 = vld [vmem:[%s1164_s3 + $0x40] sm:$0xff]  ;;  %s1185_s18 = smov (!%p336_p9, %s988_s18), 15 }
  0x12   : > { %s923_s30 = smul.u32 3, %s1181_s8  ;;  %s826_s7 = sshll.u32 %s1185_s18, 1 }
  0x13   : > { %523 = vmatpush.bf16.msrb.mxu0 %v911_v4  ;;  %587 = vmatpush.bf16.msrb.mxu2 %v913_v5  ;;  %s309_s28 = sadd.s32 %s1098_s25, %s921_s26  ;;  %s924_s15 = smul.u32 3, %s1183_s27 }
  0x14   : > { %629 = vmatpush.bf16.msrb.mxu3 %v914_v6  ;;  %554 = vmatpush.bf16.msrb.mxu1 %v912_v7  ;;  %s823_s29 = sshll.u32 %s309_s28, 2  ;;  %s319_s11 = sadd.s32 %s923_s30, %s1098_s25 }
  0x15   : > { %s311_s9 = scalar_lea.vmem %s1161_s0, %s823_s29  ;;  %s824_s12 = sshll.u32 %s319_s11, 2 }
  0x16   : > { %v904_v8 = vld [vmem:[%s311_s9] sm:$0xff]  ;;  %v346_v9 = vld [vmem:[%s311_s9 + $0x8] sm:$0x1]  ;;  %s321_s14 = scalar_lea.vmem %s1162_s1, %s824_s12  ;;  %s330_s16 = sadd.s32 %s924_s15, %s1098_s25 }
  0x17   : > { %v363_v10 = vunpack.c.l.b16 %v346_v9  ;;  %v368_v11 = vshrl.u32 %v904_v8, 16  ;;  %v370_v12 = vshll.u32 %v904_v8, 16  ;;  %844 = vmatmul.msk.bf16.vlgmr.msra.gmra.mxu1 %vm385_vm0, %v904_v8  ;;  %v429_v14 = vrot.slane %v904_v8, 1  ;;  %v905_v15 = vld [vmem:[%s321_s14] sm:$0xff]  ;;  %v349_v16 = vld [vmem:[%s321_s14 + $0x8] sm:$0x1] }
  0x18   : > { %862 = vmatmul.msk.bf16.vlgmr.msra.gmra.mxu3 %vm385_vm0, %v905_v15  ;;  %v494_v20 = vunpack.c.l.b16 %v349_v16  ;;  %s825_s28 = sshll.u32 %s330_s16, 2  ;;  %v498_v29 = vshll.u32 %v905_v15, 16  ;;  %v535_v31 = vrot.slane %v905_v15, 1  ;;  %v496_v36 = vshrl.u32 %v905_v15, 16  ;;  %s827_s9 = sshll.u32 %s1179_s19, 5 }
  0x19   : > { %v365_v13 = vpack.c.b16 %v363_v10, %v363_v10  ;;  %v372_v17 = vrot.slane %v370_v12, 1  ;;  %s332_s27 = scalar_lea.vmem %s1163_s2, %s825_s28  ;;  %s340_s10 = sadd.s32 %s827_s9, %s826_s7 }
  0x1a   : > { %v495_v26 = vpack.c.b16 %v494_v20, %v494_v20  ;;  %v906_v27 = vld [vmem:[%s332_s27] sm:$0xff]  ;;  %v352_v28 = vld [vmem:[%s332_s27 + $0x8] sm:$0x1]  ;;  %v500_v38 = vrot.slane %v498_v29, 1  ;;  %s828_s11 = sshll.u32 %s340_s10, 2 }
  0x1b   : > { %v430_v18 = vrot.slane %v365_v13, 1  ;;  %v375_v19 = vshll.u32 %v365_v13, 16  ;;  %v373_v21 = vor.u32 %v372_v17, %v368_v11  ;;  %v600_v30 = vunpack.c.l.b16 %v352_v28  ;;  %s342_s13 = scalar_lea.vmem %s1166_s5, %s828_s11 }
  0x1c   : > { %v536_v32 = vrot.slane %v495_v26, 1  ;;  %v602_v33 = vshrl.u32 %v906_v27, 16  ;;  %v604_v34 = vshll.u32 %v906_v27, 16  ;;  %v503_v39 = vshll.u32 %v495_v26, 16 }
  0x1d   : > { %v431_v22 = vsel %vm428_vm1, %v429_v14, %v430_v18  ;;  %v377_v23 = vrot.slane %v375_v19, 1  ;;  %v601_v35 = vpack.c.b16 %v600_v30, %v600_v30  ;;  %v501_v44 = vor.u32 %v500_v38, %v496_v36  ;;  %v965_v18 = vld [vmem:[%s1165_s4] ss:$0 sm:$0xff] }
  0x1e   : > { %851 = vmatmul.msk.bf16.vlgmr.msra.gmra.mxu2 %vm385_vm0, %v431_v22  ;;  %v606_v37 = vrot.slane %v604_v34, 1  ;;  %v537_v41 = vsel %vm428_vm1, %v535_v31, %v536_v32  ;;  %v505_v45 = vrot.slane %v503_v39, 1  ;;  %v641_v48 = vrot.slane %v906_v27, 1 }
  0x1f   : > { %v378_v25 = vsel %vm366_vm2, %v373_v21, %v377_v23  ;;  %v609_v40 = vshll.u32 %v601_v35, 16  ;;  %v642_v49 = vrot.slane %v601_v35, 1 }
  0x20   : > { %839 = vmatmul.msk.bf16.vlgmr.msra.gmra.mxu0 %vm385_vm0, %v378_v25  ;;  %v607_v42 = vor.u32 %v606_v37, %v602_v33  ;;  %v506_v47 = vsel %vm366_vm2, %v501_v44, %v505_v45 }
  0x21   : > { %660 = vmatpush.bf16.msra.mxu0 %v915_v24  ;;  %v611_v43 = vrot.slane %v609_v40, 1  ;;  %v643_v50 = vsel %vm428_vm1, %v641_v48, %v642_v49 }
  0x23   : > { %v612_v46 = vsel %vm366_vm2, %v607_v42, %v611_v43 }
  0x27   : > { %876 = vmatmul.msk.bf16.vlgmr.msrb.gmra.mxu1 %vm385_vm0, %v537_v41 }
  0x28   : > { %894 = vmatmul.msk.bf16.vlgmr.msrb.gmra.mxu3 %vm385_vm0, %v612_v46 }
  0x2e   : > { %887 = vmatmul.msk.bf16.vlgmr.msrb.gmra.mxu2 %vm385_vm0, %v906_v27 }
  0x30   : > { %869 = vmatmul.msk.bf16.vlgmr.msrb.gmra.mxu0 %vm385_vm0, %v506_v47 }
  0x40   : > { %901 = vmatmul.msk.bf16.vlgmr.msra.gmra.mxu0 %vm385_vm0, %v643_v50 }
  0x94   : > { %v420_v52 = vpop.f32.mrf.mxu1 }
  0x9b   : > { %v483_v54 = vpop.f32.mrf.mxu3 }
  0x9c   : > { %v422_v56 = vpop.f32.mrf.mxu1 }
  0x9d   : > { %v398_v51 = vpop.f32.mrf.mxu0 }
  0x9e   : > { %v421_v58 = vadd.f32 %v420_v52, %v398_v51 }
  0xa1   : > { %v450_v53 = vpop.f32.mrf.mxu2 }
  0xa2   : > { %v455_v61 = vadd.f32 %v450_v53, %v421_v58 }
  0xa3   : > { %v485_v59 = vpop.f32.mrf.mxu3 }
  0xa4   : > { %v556_v62 = vpop.f32.mrf.mxu1  ;;  %v488_v0 = vadd.f32 %v483_v54, %v455_v61 }
  0xa5   : > { %v400_v55 = vpop.f32.mrf.mxu0 }
  0xa6   : > { %v423_v63 = vadd.f32 %v422_v56, %v400_v55 }
  0xa9   : > { %v452_v57 = vpop.f32.mrf.mxu2 }
  0xaa   : > { %v456_v1 = vadd.f32 %v452_v57, %v423_v63 }
  0xab   : > { %v631_v6 = vpop.f32.mrf.mxu3 }
  0xac   : > { %v489_v5 = vadd.f32 %v485_v59, %v456_v1  ;;  %v558_v9 = vpop.f32.mrf.mxu1 }
  0xad   : > { %v525_v60 = vpop.f32.mrf.mxu0 }
  0xae   : > { %v530_v3 = vadd.f32 %v525_v60, %v488_v0 }
  0xb0   : > { %v561_v7 = vadd.f32 %v556_v62, %v530_v3 }
  0xb1   : > { %v589_v2 = vpop.f32.mrf.mxu2 }
  0xb2   : > { %v594_v10 = vadd.f32 %v589_v2, %v561_v7 }
  0xb3   : > { %v633_v16 = vpop.f32.mrf.mxu3 }
  0xb4   : > { %v636_v14 = vadd.f32 %v631_v6, %v594_v10 }
  0xb5   : > { %v527_v4 = vpop.f32.mrf.mxu0 }
  0xb6   : > { %v531_v8 = vadd.f32 %v527_v4, %v489_v5 }
  0xb8   : > { %v562_v11 = vadd.f32 %v558_v9, %v531_v8 }
  0xb9   : > { %v591_v12 = vpop.f32.mrf.mxu2 }
  0xba   : > { %v595_v15 = vadd.f32 %v591_v12, %v562_v11 }
  0xbc   : > { %v637_v19 = vadd.f32 %v633_v16, %v595_v15 }
  0xbd   : > { %v662_v13 = vpop.f32.mrf.mxu0 }
  0xbe   : > { %v667_v17 = vadd.f32 %v662_v13, %v636_v14 }
  0xc0   : > { %v673_v21 = vadd.f32 %v965_v18, %v667_v17 }
  0xc2   : > { %v675_v24 = vmax.f32 %v673_v21, 0.0 }
  0xc5   : > { %v664_v20 = vpop.f32.mrf.mxu0 }
  0xc6   : > { %v668_v22 = vadd.f32 %v664_v20, %v637_v19 }
  0xc8   : > { %v674_v23 = vadd.f32 %v965_v18, %v668_v22 }
  0xca   : > { %v676_v25 = vmax.f32 %v674_v23, 0.0 }
  0xcc   : > { %v919_v26 = vpack.c.bf16 %v676_v25, %v675_v24 }
  0xce   : > { %920 = vst [vmem:[%s342_s13] sm:$0xff] %v919_v26  }
  0xcf PF: > { %s15_s22 = sadd.s32 1, %s1004_s22   ;;  %s1168_s18 = smov %s996_s20 }
  0xd0   : > { %p12_p10 = scmp.ge.s32.totalorder %s15_s22, 34   ;;  %s1169_s19 = smov %s1000_s21 }
  0xd1   : > { %s1170_s20 = smov %s1173_s23  ;;  %s1171_s21 = smov %s1177_s24 }
  0xd2   :  { %14 = sbr.rel (!%p12_p10) target bundleno = 3 (0x3), region = 84 }

// kernel: resnest_forward.13
= control target key start
LH: loop header
LB: loop body
LE: loop exit
PB: predicated region body
PF: predicated region fallthrough
CT: control target
= control target key end

     0   :  { %s1136_s21 = smov 0   ;;  %s1138_s22 = smov 0   ;;  %s1264_s0 = inlined_call_operand.vmem [shape: bf16[2,18,18,128], index: 0, kind: input, shape index: {}, may-alias: {0,1,2}]   ;;  %s1265_s1 = inlined_call_operand.vmem [shape: bf16[2,18,18,128], index: 1, kind: input, shape index: {}, may-alias: {0,1,2}]   ;;  %s1266_s2 = inlined_call_operand.vmem [shape: bf16[2,18,18,128], index: 2, kind: input, shape index: {}, may-alias: {0,1,2}]   ;;  %s1267_s3 = inlined_call_operand.vmem [shape: bf16[9,16,128], index: 3, kind: input, shape index: {}]   ;;  %s1268_s4 = inlined_call_operand.vmem [shape: f32[1,128], index: 4, kind: input, shape index: {}]   ;;  %s1269_s5 = inlined_call_operand.vmem [shape: bf16[2,16,16,128], index: 5, kind: input, shape index: {}]   ;;  %s1270_s6 = inlined_call_operand.vmem [shape: bf16[2,16,16,128], index: 6, kind: output, shape index: {}]  }
   0x1   :  { %s1140_s23 = smov 0   ;;  %s1142_s24 = smov 0  }
   0x2   :  { %s1144_s25 = smov 0  }
   0x3 LB: > { %s25_s26 = sadd.s32 1, %s1091_s23  ;;  %s28_s27 = sadd.s32 1, %s1095_s24  ;;  %s1099_s25 = sphi %s1144_s25, %s16_s25   ;;  %s1095_s24 = sphi %s1142_s24, %s1275_s24   ;;  %s1091_s23 = sphi %s1140_s23, %s1274_s23   ;;  %s1087_s22 = sphi %s1138_s22, %s1273_s22   ;;  %s1083_s21 = sphi %s1136_s21, %s1272_s21  }
   0x4   : > { %p26_p0 = scmp.ge.s32.totalorder %s25_s26, 16  ;;  %p910_p1 = scmp.ge.s32.totalorder %s1099_s25, 1 }
   0x5   : > { %p288_p2 = scmp.lt.s32.totalorder %s1099_s25, 33 }
   0x6   : > { %s1277_s26 = smov (%p26_p0, %s25_s26), 0  ;;  %s1279_s27 = smov (!%p26_p0, %s28_s27), %s1095_s24 }
   0x7   : > { %p289_p3 = pnand %p910_p1, %p288_p2  ;;  %p30_p4 = scmp.ge.s32.totalorder %s1279_s27, 2 }
   0x8   : > { %p355_p5 = scmp.lt.s32.totalorder (!%p289_p3), %s1087_s22, 1  ;;  %p357_p6 = scmp.lt.s32.totalorder (!%p289_p3), %s1083_s21, 17 }
   0x9   : > { %s1281_s27 = smov (%p30_p4, %s1279_s27), 0  ;;  %292 = sbr.rel (%p289_p3) target bundleno = 209 (0xd1), region = 44 }
   0xa   : > { %s364_s12 = sadd.s32 (!%p289_p3), 1, %s1083_s21  ;;  %s375_s7 = sadd.s32 (!%p289_p3), 2, %s1083_s21 }
   0xb   : > { %p367_p7 = scmp.lt.s32.totalorder (!%p289_p3), %s364_s12, 17  ;;  %p1205_p8 = scmp.lt.s32.totalorder (!%p289_p3), %s375_s7, 17 }
   0xc   : > { %p388_p9 = scmp.lt.s32.totalorder (!%p289_p3), %s1083_s21, 15 }
   0xe   : > { %v1000_v0 = vld [vmem:[%s1267_s3 + $0x10] sm:$0xff]  ;;  %v999_v1 = vld [vmem:[%s1267_s3 + $0x8] sm:$0xff]  ;;  %v998_v2 = vld [vmem:[%s1267_s3] sm:$0xff]  ;;  %s1283_s22 = smov (!%p355_p5, %s1087_s22), 1  ;;  %s1285_s12 = smov (!%p367_p7, %s364_s12), 17  ;;  %vm446_vm0 = vcmask 130048  }
   0xf   : > { %v1001_v3 = vld [vmem:[%s1267_s3 + $0x18] sm:$0xff]  ;;  %v1002_v4 = vld [vmem:[%s1267_s3 + $0x20] sm:$0xff]  ;;  %509 = vmatpush.bf16.msra.mxu2 %v1000_v0  ;;  %457 = vmatpush.bf16.msra.mxu0 %v999_v1  ;;  %v1004_v5 = vld [vmem:[%s1267_s3 + $0x30] sm:$0xff]  ;;  %s358_s28 = scalar_select %p357_p6, %s1083_s21, 17  ;;  %vm489_vm1 = vcmask 1046528  }
  0x10   : > { %v1005_v6 = vld [vmem:[%s1267_s3 + $0x38] sm:$0xff]  ;;  %v1003_v7 = vld [vmem:[%s1267_s3 + $0x28] sm:$0xff]  ;;  %479 = vmatpush.bf16.msra.mxu1 %v998_v2  ;;  %542 = vmatpush.bf16.msra.mxu3 %v1001_v3  ;;  %s1198_s29 = smul.u32 54, %s1283_s22  ;;  %s1287_s7 = smov (!%p1205_p8, %s375_s7), 17  ;;  %vm427_vm2 = vsmask.f32 7424 }
  0x11   : > { %s1016_s30 = smul.u32 3, %s358_s28  ;;  %v1006_v24 = vld [vmem:[%s1267_s3 + $0x40] sm:$0xff]  ;;  %s1289_s21 = smov (!%p388_p9, %s1083_s21), 15 }
  0x12   : > { %s1018_s10 = smul.u32 3, %s1285_s12  ;;  %s915_s13 = sshll.u32 %s1283_s22, 5 }
  0x13   : > { %584 = vmatpush.bf16.msrb.mxu0 %v1002_v4  ;;  %648 = vmatpush.bf16.msrb.mxu2 %v1004_v5  ;;  %s361_s8 = sadd.s32 %s1198_s29, %s1016_s30  ;;  %s1019_s20 = smul.u32 3, %s1287_s7 }
  0x14   : > { %690 = vmatpush.bf16.msrb.mxu3 %v1005_v6  ;;  %615 = vmatpush.bf16.msrb.mxu1 %v1003_v7  ;;  %s911_s9 = sshll.u32 %s361_s8, 2  ;;  %s371_s16 = sadd.s32 %s1018_s10, %s1198_s29 }
  0x15   : > { %s363_s14 = scalar_lea.vmem %s1264_s0, %s911_s9  ;;  %s912_s17 = sshll.u32 %s371_s16, 2 }
  0x16   : > { %v995_v8 = vld [vmem:[%s363_s14] sm:$0xff]  ;;  %v407_v9 = vld [vmem:[%s363_s14 + $0x8] sm:$0x1]  ;;  %s373_s19 = scalar_lea.vmem %s1265_s1, %s912_s17  ;;  %s382_s28 = sadd.s32 %s1019_s20, %s1198_s29 }
  0x17   : > { %v424_v10 = vunpack.c.l.b16 %v407_v9  ;;  %v429_v11 = vshrl.u32 %v995_v8, 16  ;;  %v431_v12 = vshll.u32 %v995_v8, 16  ;;  %935 = vmatmul.msk.bf16.vlgmr.msra.gmra.mxu1 %vm446_vm0, %v995_v8  ;;  %v490_v14 = vrot.slane %v995_v8, 1  ;;  %v996_v15 = vld [vmem:[%s373_s19] sm:$0xff]  ;;  %v410_v16 = vld [vmem:[%s373_s19 + $0x8] sm:$0x1] }
  0x18   : > { %953 = vmatmul.msk.bf16.vlgmr.msra.gmra.mxu3 %vm446_vm0, %v996_v15  ;;  %v555_v20 = vunpack.c.l.b16 %v410_v16  ;;  %s913_s9 = sshll.u32 %s382_s28, 2  ;;  %v559_v29 = vshll.u32 %v996_v15, 16  ;;  %v596_v31 = vrot.slane %v996_v15, 1  ;;  %v557_v36 = vshrl.u32 %v996_v15, 16  ;;  %s914_s29 = sshll.u32 %s1289_s21, 1 }
  0x19   : > { %v426_v13 = vpack.c.b16 %v424_v10, %v424_v10  ;;  %v433_v17 = vrot.slane %v431_v12, 1  ;;  %s384_s7 = scalar_lea.vmem %s1266_s2, %s913_s9  ;;  %s392_s14 = sadd.s32 %s915_s13, %s914_s29 }
  0x1a   : > { %v556_v26 = vpack.c.b16 %v555_v20, %v555_v20  ;;  %v997_v27 = vld [vmem:[%s384_s7] sm:$0xff]  ;;  %v413_v28 = vld [vmem:[%s384_s7 + $0x8] sm:$0x1]  ;;  %v561_v38 = vrot.slane %v559_v29, 1  ;;  %s916_s15 = sshll.u32 %s392_s14, 2 }
  0x1b   : > { %v491_v18 = vrot.slane %v426_v13, 1  ;;  %v436_v19 = vshll.u32 %v426_v13, 16  ;;  %v434_v21 = vor.u32 %v433_v17, %v429_v11  ;;  %v661_v30 = vunpack.c.l.b16 %v413_v28  ;;  %s394_s12 = scalar_lea.vmem %s1269_s5, %s916_s15  ;;  %v1060_v17 = vld [vmem:[%s1268_s4] ss:$0 sm:$0xff]  ;;  %s403_s20 = scalar_lea.vmem %s1270_s6, %s916_s15 }
  0x1c   : > { %v597_v32 = vrot.slane %v556_v26, 1  ;;  %v663_v33 = vshrl.u32 %v997_v27, 16  ;;  %v665_v34 = vshll.u32 %v997_v27, 16  ;;  %v564_v39 = vshll.u32 %v556_v26, 16 }
  0x1d   : > { %v492_v22 = vsel %vm489_vm1, %v490_v14, %v491_v18  ;;  %v438_v23 = vrot.slane %v436_v19, 1  ;;  %v662_v35 = vpack.c.b16 %v661_v30, %v661_v30  ;;  %v562_v44 = vor.u32 %v561_v38, %v557_v36  ;;  %v1008_v19 = vld [vmem:[%s394_s12] sm:$0xff]  }
  0x1e   : > { %942 = vmatmul.msk.bf16.vlgmr.msra.gmra.mxu2 %vm446_vm0, %v492_v22  ;;  %v667_v37 = vrot.slane %v665_v34, 1  ;;  %v598_v41 = vsel %vm489_vm1, %v596_v31, %v597_v32  ;;  %v566_v45 = vrot.slane %v564_v39, 1  ;;  %v702_v48 = vrot.slane %v997_v27, 1 }
  0x1f   : > { %v439_v25 = vsel %vm427_vm2, %v434_v21, %v438_v23  ;;  %v670_v40 = vshll.u32 %v662_v35, 16  ;;  %v703_v49 = vrot.slane %v662_v35, 1  ;;  %v1009_v22 = vunpack.c.l.bf16 %v1008_v19 }
  0x20   : > { %930 = vmatmul.msk.bf16.vlgmr.msra.gmra.mxu0 %vm446_vm0, %v439_v25  ;;  %v668_v42 = vor.u32 %v667_v37, %v663_v33  ;;  %v567_v47 = vsel %vm427_vm2, %v562_v44, %v566_v45  ;;  %v1010_v25 = vunpack.c.h.bf16 %v1008_v19 }
  0x21   : > { %721 = vmatpush.bf16.msra.mxu0 %v1006_v24  ;;  %v672_v43 = vrot.slane %v670_v40, 1  ;;  %v704_v50 = vsel %vm489_vm1, %v702_v48, %v703_v49 }
  0x23   : > { %v673_v46 = vsel %vm427_vm2, %v668_v42, %v672_v43 }
  0x27   : > { %967 = vmatmul.msk.bf16.vlgmr.msrb.gmra.mxu1 %vm446_vm0, %v598_v41 }
  0x28   : > { %985 = vmatmul.msk.bf16.vlgmr.msrb.gmra.mxu3 %vm446_vm0, %v673_v46 }
  0x2e   : > { %978 = vmatmul.msk.bf16.vlgmr.msrb.gmra.mxu2 %vm446_vm0, %v997_v27 }
  0x30   : > { %960 = vmatmul.msk.bf16.vlgmr.msrb.gmra.mxu0 %vm446_vm0, %v567_v47 }
  0x40   : > { %992 = vmatmul.msk.bf16.vlgmr.msra.gmra.mxu0 %vm446_vm0, %v704_v50 }
  0x94   : > { %v481_v52 = vpop.f32.mrf.mxu1 }
  0x9b   : > { %v544_v54 = vpop.f32.mrf.mxu3 }
  0x9c   : > { %v483_v56 = vpop.f32.mrf.mxu1 }
  0x9d   : > { %v459_v51 = vpop.f32.mrf.mxu0 }
  0x9e   : > { %v482_v58 = vadd.f32 %v481_v52, %v459_v51 }
  0xa1   : > { %v511_v53 = vpop.f32.mrf.mxu2 }
  0xa2   : > { %v516_v59 = vadd.f32 %v511_v53, %v482_v58 }
  0xa3   : > { %v546_v60 = vpop.f32.mrf.mxu3 }
  0xa4   : > { %v617_v62 = vpop.f32.mrf.mxu1  ;;  %v549_v63 = vadd.f32 %v544_v54, %v516_v59 }
  0xa5   : > { %v461_v55 = vpop.f32.mrf.mxu0 }
  0xa6   : > { %v484_v0 = vadd.f32 %v483_v56, %v461_v55 }
  0xa9   : > { %v513_v57 = vpop.f32.mrf.mxu2 }
  0xaa   : > { %v517_v1 = vadd.f32 %v513_v57, %v484_v0 }
  0xab   : > { %v692_v7 = vpop.f32.mrf.mxu3 }
  0xac   : > { %v550_v5 = vadd.f32 %v546_v60, %v517_v1  ;;  %v619_v9 = vpop.f32.mrf.mxu1 }
  0xad   : > { %v586_v61 = vpop.f32.mrf.mxu0 }
  0xae   : > { %v591_v2 = vadd.f32 %v586_v61, %v549_v63 }
  0xb0   : > { %v622_v6 = vadd.f32 %v617_v62, %v591_v2 }
  0xb1   : > { %v650_v3 = vpop.f32.mrf.mxu2 }
  0xb2   : > { %v655_v10 = vadd.f32 %v650_v3, %v622_v6 }
  0xb3   : > { %v694_v18 = vpop.f32.mrf.mxu3 }
  0xb4   : > { %v697_v14 = vadd.f32 %v692_v7, %v655_v10 }
  0xb5   : > { %v588_v4 = vpop.f32.mrf.mxu0 }
  0xb6   : > { %v592_v8 = vadd.f32 %v588_v4, %v550_v5 }
  0xb8   : > { %v623_v11 = vadd.f32 %v619_v9, %v592_v8 }
  0xb9   : > { %v652_v12 = vpop.f32.mrf.mxu2 }
  0xba   : > { %v656_v15 = vadd.f32 %v652_v12, %v623_v11 }
  0xbc   : > { %v698_v20 = vadd.f32 %v694_v18, %v656_v15 }
  0xbd   : > { %v723_v13 = vpop.f32.mrf.mxu0 }
  0xbe   : > { %v728_v16 = vadd.f32 %v723_v13, %v697_v14 }
  0xc0   : > { %v734_v21 = vadd.f32 %v1060_v17, %v728_v16 }
  0xc2   : > { %v740_v26 = vadd.f32 %v1009_v22, %v734_v21 }
  0xc4   : > { %v742_v29 = vmax.f32 %v740_v26, 0.0 }
  0xc5   : > { %v725_v23 = vpop.f32.mrf.mxu0 }
  0xc6   : > { %v729_v24 = vadd.f32 %v725_v23, %v698_v20 }
  0xc8   : > { %v735_v27 = vadd.f32 %v1060_v17, %v729_v24 }
  0xca   : > { %v741_v28 = vadd.f32 %v1010_v25, %v735_v27 }
  0xcc   : > { %v743_v30 = vmax.f32 %v741_v28, 0.0 }
  0xce   : > { %v1014_v31 = vpack.c.bf16 %v743_v30, %v742_v29 }
  0xd0   : > { %1015 = vst [vmem:[%s403_s20] sm:$0xff] %v1014_v31  }
  0xd1 PF: > { %s16_s25 = sadd.s32 1, %s1099_s25   ;;  %s1272_s21 = smov %s1091_s23 }
  0xd2   : > { %p13_p10 = scmp.ge.s32.totalorder %s16_s25, 34   ;;  %s1273_s22 = smov %s1095_s24 }
  0xd3   : > { %s1274_s23 = smov %s1277_s26  ;;  %s1275_s24 = smov %s1281_s27 }
  0xd4   :  { %15 = sbr.rel (!%p13_p10) target bundleno = 3 (0x3), region = 91 }

// kernel: resnest_forward.14
= control target key start
LH: loop header
LB: loop body
LE: loop exit
PB: predicated region body
PF: predicated region fallthrough
CT: control target
= control target key end

     0   :  { %s1508_s17 = smov 0   ;;  %s1510_s18 = smov 0   ;;  %s1646_s0 = inlined_call_operand.vmem [shape: bf16[2,18,8,128], index: 0, kind: input, shape index: {}, may-alias: {0,1,2}]   ;;  %s1647_s1 = inlined_call_operand.vmem [shape: bf16[2,18,8,128], index: 1, kind: input, shape index: {}, may-alias: {0,1,2}]   ;;  %s1648_s2 = inlined_call_operand.vmem [shape: bf16[2,18,8,128], index: 2, kind: input, shape index: {}, may-alias: {0,1,2}]   ;;  %s1649_s3 = inlined_call_operand.vmem [shape: bf16[2,18,8,128], index: 3, kind: input, shape index: {}, may-alias: {3,4,5}]   ;;  %s1650_s4 = inlined_call_operand.vmem [shape: bf16[2,18,8,128], index: 4, kind: input, shape index: {}, may-alias: {3,4,5}]   ;;  %s1651_s5 = inlined_call_operand.vmem [shape: bf16[2,18,8,128], index: 5, kind: input, shape index: {}, may-alias: {3,4,5}]   ;;  %s1652_s6 = inlined_call_operand.vmem [shape: bf16[2,18,8,128], index: 6, kind: input, shape index: {}, may-alias: {6,7,8}]   ;;  %s1653_s7 = inlined_call_operand.vmem [shape: bf16[2,18,8,128], index: 7, kind: input, shape index: {}, may-alias: {6,7,8}]   ;;  %s1654_s8 = inlined_call_operand.vmem [shape: bf16[2,18,8,128], index: 8, kind: input, shape index: {}, may-alias: {6,7,8}]   ;;  %s1655_s9 = inlined_call_operand.vmem [shape: bf16[9,16,128], index: 9, kind: input, shape index: {}]   ;;  %s1656_s10 = inlined_call_operand.vmem [shape: f32[1,128], index: 10, kind: input, shape index: {}]   ;;  %s1657_s11 = inlined_call_operand.vmem [shape: bf16[2,8,8,128], index: 11, kind: output, shape index: {}]  }
   0x1   :  { %1660 = sst [smem:[#allocation5_spill]] %s1646_s0  ;;  %s1512_s19 = smov 0  }
   0x2   :  { %1661 = sst [smem:[#allocation6_spill]] %s1649_s3  ;;  %s1514_s20 = smov 0  }
   0x3   :  { %s1516_s21 = smov 0  }
   0x4 LB: > { %1662 = sst [smem:[#allocation2_spill]] %s1442_s20  ;;  %s30_s22 = sadd.s32 1, %s1438_s19  ;;  %s1446_s21 = sphi %s1516_s21, %s21_s21   ;;  %s1442_s20 = sphi %s1514_s20, %s1670_s20   ;;  %s1438_s19 = sphi %s1512_s19, %s1672_s19   ;;  %s1434_s18 = sphi %s1510_s18, %s1668_s18   ;;  %s1430_s17 = sphi %s1508_s17, %s1671_s17  }
   0x5   : > { %s33_s23 = sadd.s32 1, %s1442_s20  ;;  %p31_p0 = scmp.ge.s32.totalorder %s30_s22, 8 }
   0x6   : > { %p1273_p1 = scmp.ge.s32.totalorder %s1446_s21, 1  ;;  %p536_p2 = scmp.lt.s32.totalorder %s1446_s21, 17 }
   0x7   : > { %s1674_s22 = smov (%p31_p0, %s30_s22), 0  ;;  %s1676_s23 = smov (!%p31_p0, %s33_s23), %s1442_s20 }
   0x8   : > { %1663 = sst [smem:[#allocation3_spill]] %s1674_s22  ;;  %p537_p3 = pnand %p1273_p1, %p536_p2 }
   0x9   : > { %p35_p4 = scmp.ge.s32.totalorder %s1676_s23, 2  ;;  %s1550_s30 = sshll.u32 (!%p537_p3), %s1430_s17, 1 }
   0xa   : > { %540 = sbr.rel (%p537_p3) target bundleno = 190 (0xbe), region = 64  ;;  %p662_p5 = scmp.lt.s32.totalorder (!%p537_p3), %s1434_s18, 1 }
   0xb   : > { %s1678_s23 = smov (%p35_p4, %s1676_s23), 0  ;;  %p664_p6 = scmp.lt.s32.totalorder (!%p537_p3), %s1550_s30, 17 }
   0xc   : > { %1664 = sst [smem:[#allocation4_spill]] %s1678_s23  ;;  %s1659_s14 = sadd.s32 (!%p537_p3), 1, %s1550_s30 }
   0xd   : > { %s684_s15 = sadd.s32 (!%p537_p3), 2, %s1550_s30  ;;  %p675_p7 = scmp.lt.s32.totalorder (!%p537_p3), %s1659_s14, 17 }
   0xe   : > { %p687_p8 = scmp.lt.s32.totalorder (!%p537_p3), %s684_s15, 17  ;;  %s1665_s3 = sld [smem:[#allocation6_spill]] (!%p537_p3) }
   0xf   : > { %v1358_v0 = vld [vmem:[%s1655_s9 + $0x8] sm:$0xff]  ;;  %v1357_v1 = vld [vmem:[%s1655_s9] sm:$0xff]  ;;  %v1359_v2 = vld [vmem:[%s1655_s9 + $0x10] sm:$0xff]  ;;  %s1680_s18 = smov (!%p662_p5, %s1434_s18), 1  ;;  %vm792_vm0 = vcmask 130048   ;;  %s1666_s0 = sld [smem:[#allocation5_spill]] }
  0x10   : > { %v1360_v3 = vld [vmem:[%s1655_s9 + $0x18] sm:$0xff]  ;;  %v1361_v4 = vld [vmem:[%s1655_s9 + $0x20] sm:$0xff]  ;;  %v1363_v5 = vld [vmem:[%s1655_s9 + $0x30] sm:$0xff]  ;;  %803 = vmatpush.bf16.msra.mxu0 %v1358_v0  ;;  %825 = vmatpush.bf16.msra.mxu1 %v1357_v1  ;;  %s665_s12 = scalar_select %p664_p6, %s1550_s30, 17 }
  0x11   : > { %v1364_v6 = vld [vmem:[%s1655_s9 + $0x38] sm:$0xff]  ;;  %v1362_v7 = vld [vmem:[%s1655_s9 + $0x28] sm:$0xff]  ;;  %850 = vmatpush.bf16.msra.mxu2 %v1359_v2  ;;  %876 = vmatpush.bf16.msra.mxu3 %v1360_v3  ;;  %s1573_s13 = smul.u32 18, %s1680_s18  ;;  %v1365_v8 = vld [vmem:[%s1655_s9 + $0x40] sm:$0xff]  ;;  %s1667_s25 = sadd.s32 1, %s1550_s30 }
  0x12   : > { %s1682_s25 = smov (!%p675_p7, %s1667_s25), 17  ;;  %s1684_s15 = smov (!%p687_p8, %s684_s15), 17  ;;  %v1407_v40 = vld [vmem:[%s1656_s10] ss:$0 sm:$0xff] }
  0x13   : > { %s667_s16 = sadd.s32 %s1573_s13, %s665_s12  ;;  %s678_s22 = sadd.s32 %s1573_s13, %s1682_s25 }
  0x14   : > { %902 = vmatpush.bf16.msrb.mxu0 %v1361_v4  ;;  %928 = vmatpush.bf16.msrb.mxu1 %v1362_v7  ;;  %s1275_s24 = sshll.u32 %s667_s16, 2  ;;  %s1277_s23 = sshll.u32 %s678_s22, 2 }
  0x15   : > { %954 = vmatpush.bf16.msrb.mxu2 %v1363_v5  ;;  %980 = vmatpush.bf16.msrb.mxu3 %v1364_v6  ;;  %s703_s29 = scalar_lea.vmem %s1665_s3, %s1275_s24  ;;  %s669_s20 = scalar_lea.vmem %s1666_s0, %s1275_s24 }
  0x16   : > { %v775_v9 = vld [vmem:[%s703_s29] sm:$0xf]  ;;  %s737_s14 = scalar_lea.vmem %s1652_s6, %s1275_s24  ;;  %s690_s28 = sadd.s32 %s1573_s13, %s1684_s15 }
  0x17   : > { %v772_v10 = vld [vmem:[%s669_s20] sm:$0xf]  ;;  %1300 = vmatmul.msk.bf16.vlgmr.msra.gmra.mxu0 %vm792_vm0, %v775_v9  ;;  %s680_s20 = scalar_lea.vmem %s1647_s1, %s1277_s23  ;;  %s1279_s24 = sshll.u32 %s690_s28, 2 }
  0x18   : > { %1305 = vmatmul.msk.bf16.vlgmr.msra.gmra.mxu1 %vm792_vm0, %v772_v10  ;;  %v778_v11 = vld [vmem:[%s737_s14] sm:$0xf]  ;;  %1006 = vmatpush.bf16.msra.mxu0 %v1365_v8  ;;  %s714_s30 = scalar_lea.vmem %s1650_s4, %s1277_s23  ;;  %s748_s0 = scalar_lea.vmem %s1653_s7, %s1277_s23 }
  0x19   : > { %1312 = vmatmul.msk.bf16.vlgmr.msra.gmra.mxu2 %vm792_vm0, %v778_v11  ;;  %v773_v12 = vld [vmem:[%s680_s20] sm:$0xf]  ;;  %s692_s22 = scalar_lea.vmem %s1648_s2, %s1279_s24  ;;  %s726_s26 = scalar_lea.vmem %s1651_s5, %s1279_s24 }
  0x1a   : > { %1319 = vmatmul.msk.bf16.vlgmr.msra.gmra.mxu3 %vm792_vm0, %v773_v12  ;;  %v776_v13 = vld [vmem:[%s714_s30] sm:$0xf]  ;;  %s760_s3 = scalar_lea.vmem %s1654_s8, %s1279_s24  ;;  %p765_p9 = scmp.lt.s32.totalorder %s1430_s17, 7 }
  0x1b   : > { %v779_v14 = vld [vmem:[%s748_s0] sm:$0xf]  ;;  %s1292_s0 = sshll.u32 %s1680_s18, 3 }
  0x1c   : > { %v774_v15 = vld [vmem:[%s692_s22] sm:$0xf]  ;;  %s1686_s17 = smov (!%p765_p9, %s1430_s17), 7 }
  0x1d   : > { %v777_v16 = vld [vmem:[%s726_s26] sm:$0xf]  ;;  %s768_s24 = sadd.s32 %s1292_s0, %s1686_s17 }
  0x1e   : > { %v780_v17 = vld [vmem:[%s760_s3] sm:$0xf]  ;;  %s1293_s29 = sshll.u32 %s768_s24, 2 }
  0x1f   : > { %s770_s14 = scalar_lea.vmem %s1657_s11, %s1293_s29 }
  0x27   : > { %1326 = vmatmul.msk.bf16.vlgmr.msrb.gmra.mxu0 %vm792_vm0, %v776_v13 }
  0x28   : > { %1333 = vmatmul.msk.bf16.vlgmr.msrb.gmra.mxu1 %vm792_vm0, %v779_v14 }
  0x29   : > { %1340 = vmatmul.msk.bf16.vlgmr.msrb.gmra.mxu2 %vm792_vm0, %v774_v15 }
  0x2a   : > { %1347 = vmatmul.msk.bf16.vlgmr.msrb.gmra.mxu3 %vm792_vm0, %v777_v16 }
  0x37   : > { %1354 = vmatmul.msk.bf16.vlgmr.msra.gmra.mxu0 %vm792_vm0, %v780_v17 }
  0x94   : > { %v805_v18 = vpop.f32.mrf.mxu0 }
  0x95   : > { %v827_v19 = vpop.f32.mrf.mxu1 }
  0x96   : > { %v828_v24 = vadd.f32 %v827_v19, %v805_v18 }
  0x9c   : > { %v852_v20 = vpop.f32.mrf.mxu2  ;;  %v807_v21 = vpop.f32.mrf.mxu0 }
  0x9d   : > { %v829_v22 = vpop.f32.mrf.mxu1  ;;  %v878_v23 = vpop.f32.mrf.mxu3  ;;  %v856_v25 = vadd.f32 %v852_v20, %v828_v24 }
  0x9f   : > { %v882_v29 = vadd.f32 %v878_v23, %v856_v25 }
  0xa4   : > { %v854_v26 = vpop.f32.mrf.mxu2  ;;  %v904_v27 = vpop.f32.mrf.mxu0 }
  0xa5   : > { %v930_v28 = vpop.f32.mrf.mxu1  ;;  %v880_v30 = vpop.f32.mrf.mxu3  ;;  %v908_v31 = vadd.f32 %v904_v27, %v882_v29 }
  0xa7   : > { %v934_v35 = vadd.f32 %v930_v28, %v908_v31 }
  0xac   : > { %v956_v32 = vpop.f32.mrf.mxu2  ;;  %v906_v33 = vpop.f32.mrf.mxu0 }
  0xad   : > { %v932_v34 = vpop.f32.mrf.mxu1  ;;  %v960_v36 = vadd.f32 %v956_v32, %v934_v35  ;;  %v982_v37 = vpop.f32.mrf.mxu3 }
  0xaf   : > { %v986_v38 = vadd.f32 %v982_v37, %v960_v36 }
  0xb4   : > { %v958_v39 = vpop.f32.mrf.mxu2  ;;  %v1008_v41 = vpop.f32.mrf.mxu0 }
  0xb5   : > { %v1012_v42 = vadd.f32 %v1008_v41, %v986_v38  ;;  %v984_v44 = vpop.f32.mrf.mxu3 }
  0xb7   : > { %v1017_v43 = vadd.f32 %v1407_v40, %v1012_v42 }
  0xb9   : > { %v1018_v45 = vmax.f32 %v1017_v43, 0.0 }
  0xbb   : > { %v1019_v46 = vpack.c.bf16 %v1018_v45, %v1018_v45 }
  0xbc   : > { %v1010_v47 = vpop.f32.mrf.mxu0 }
  0xbd   : > { %1020 = vst [vmem:[%s770_s14] sm:$0xf] %v1019_v46 }
  0xbe PF: > { %s21_s21 = sadd.s32 1, %s1446_s21   ;;  %s1668_s18 = sld [smem:[#allocation2_spill]] }
  0xbf   : > { %p18_p10 = scmp.ge.s32.totalorder %s21_s21, 18   ;;  %s1669_s16 = sld [smem:[#allocation3_spill]] }
  0xc0   : > { %s1670_s20 = sld [smem:[#allocation4_spill]]  ;;  %s1671_s17 = smov %s1438_s19 }
  0xc1   :  { %20 = sbr.rel (!%p18_p10) target bundleno = 4 (0x4), region = 126 }
  0xc5   : > { %s1672_s19 = smov %s1669_s16 }

// kernel: resnest_forward.15
= control target key start
LH: loop header
LB: loop body
LE: loop exit
PB: predicated region body
PF: predicated region fallthrough
CT: control target
= control target key end

     0   :  { %s1261_s24 = smov 0   ;;  %s1263_s25 = smov 0   ;;  %s1425_s0 = inlined_call_operand.vmem [shape: bf16[2,10,10,128], index: 0, kind: input, shape index: {}, may-alias: {0,1,2}]   ;;  %s1426_s1 = inlined_call_operand.vmem [shape: bf16[2,10,10,128], index: 1, kind: input, shape index: {}, may-alias: {0,1,2}]   ;;  %s1427_s2 = inlined_call_operand.vmem [shape: bf16[2,10,10,128], index: 2, kind: input, shape index: {}, may-alias: {0,1,2}]   ;;  %s1428_s3 = inlined_call_operand.vmem [shape: bf16[9,32,128], index: 3, kind: input, shape index: {}]   ;;  %s1429_s4 = inlined_call_operand.vmem [shape: f32[1,128], index: 4, kind: input, shape index: {}]   ;;  %s1430_s5 = inlined_call_operand.vmem [shape: bf16[2,16,8,128], index: 5, kind: input, shape index: {}]   ;;  %s1431_s6 = inlined_call_operand.vmem [shape: bf16[16,128], index: 6, kind: input, shape index: {}]   ;;  %s1432_s7 = inlined_call_operand.vmem [shape: bf16[2,8,8,128], index: 7, kind: output, shape index: {}]  }
   0x1   :  { %s1265_s26 = smov 0   ;;  %s1267_s27 = smov 0  }
   0x2   :  { %s1269_s28 = smov 0  }
   0x3 LB: > { %s26_s29 = sadd.s32 1, %s1211_s26  ;;  %s29_s30 = sadd.s32 1, %s1215_s27  ;;  %s1219_s28 = sphi %s1269_s28, %s17_s28   ;;  %s1215_s27 = sphi %s1267_s27, %s1438_s27   ;;  %s1211_s26 = sphi %s1265_s26, %s1437_s26   ;;  %s1207_s25 = sphi %s1263_s25, %s1436_s25   ;;  %s1203_s24 = sphi %s1261_s24, %s1435_s24  }
   0x4   : > { %p27_p0 = scmp.ge.s32.totalorder %s26_s29, 8  ;;  %p973_p1 = scmp.ge.s32.totalorder %s1219_s28, 1 }
   0x5   : > { %p316_p2 = scmp.lt.s32.totalorder %s1219_s28, 17 }
   0x6   : > { %s1440_s29 = smov (%p27_p0, %s26_s29), 0  ;;  %s1442_s30 = smov (!%p27_p0, %s29_s30), %s1215_s27 }
   0x7   : > { %p317_p3 = pnand %p973_p1, %p316_p2  ;;  %p31_p4 = scmp.ge.s32.totalorder %s1442_s30, 2 }
   0x8   : > { %p384_p5 = scmp.lt.s32.totalorder (!%p317_p3), %s1207_s25, 1  ;;  %p386_p6 = scmp.lt.s32.totalorder (!%p317_p3), %s1203_s24, 9 }
   0x9   : > { %s1444_s30 = smov (%p31_p4, %s1442_s30), 0  ;;  %320 = sbr.rel (%p317_p3) target bundleno = 200 (0xc8), region = 48 }
   0xa   : > { %s393_s16 = sadd.s32 (!%p317_p3), 1, %s1203_s24  ;;  %s404_s15 = sadd.s32 (!%p317_p3), 2, %s1203_s24 }
   0xb   : > { %p1341_p7 = scmp.lt.s32.totalorder (!%p317_p3), %s393_s16, 9  ;;  %p1348_p8 = scmp.lt.s32.totalorder (!%p317_p3), %s404_s15, 9 }
   0xc   : > { %p427_p10 = scmp.lt.s32.totalorder (!%p317_p3), %s1203_s24, 7 }
   0xe   : > { %v1121_v0 = vld [vmem:[%s1428_s3 + $0x8] sm:$0xff]  ;;  %v1127_v2 = vld [vmem:[%s1428_s3 + $0x38] sm:$0xff]  ;;  %v1120_v4 = vld [vmem:[%s1428_s3] sm:$0xff]  ;;  %s1446_s25 = smov (!%p384_p5, %s1207_s25), 1  ;;  %vm473_vm0 = vcmask 261120   ;;  %s1448_s16 = smov (!%p1341_p7, %s393_s16), 9 }
   0xf   : > { %v1125_v1 = vld [vmem:[%s1428_s3 + $0x28] sm:$0xff]  ;;  %v1123_v3 = vld [vmem:[%s1428_s3 + $0x18] sm:$0xff]  ;;  %511 = vmatpush.bf16.msra.mxu1 %v1121_v0  ;;  %v1124_v5 = vld [vmem:[%s1428_s3 + $0x20] sm:$0xff]  ;;  %579 = vmatpush.bf16.msra.mxu3 %v1127_v2  ;;  %s387_s21 = scalar_select %p386_p6, %s1203_s24, 9  ;;  %vm797_vm1 = vcmask 130048  }
  0x10   : > { %545 = vmatpush.bf16.msra.mxu2 %v1125_v1  ;;  %483 = vmatpush.bf16.msra.mxu0 %v1123_v3  ;;  %v1126_v6 = vld [vmem:[%s1428_s3 + $0x30] sm:$0xff]  ;;  %s1323_s10 = smul.u32 20, %s1446_s25  ;;  %v1129_v8 = vld [vmem:[%s1428_s3 + $0x48] sm:$0xff]  ;;  %v1131_v9 = vld [vmem:[%s1428_s3 + $0x58] sm:$0xff]  ;;  %s1450_s15 = smov (!%p1348_p8, %s404_s15), 9 }
  0x11   : > { %v1122_v7 = vld [vmem:[%s1428_s3 + $0x10] sm:$0xff]  ;;  %s974_s17 = sshll.u32 %s387_s21, 1  ;;  %v1133_v10 = vld [vmem:[%s1428_s3 + $0x68] sm:$0xff]  ;;  %v1135_v11 = vld [vmem:[%s1428_s3 + $0x78] sm:$0xff]  ;;  %s976_s13 = sshll.u32 %s1448_s16, 1 }
  0x12   : > { %s390_s23 = sadd.s32 %s1323_s10, %s974_s17  ;;  %v1128_v12 = vld [vmem:[%s1428_s3 + $0x40] sm:$0xff]  ;;  %v1130_v13 = vld [vmem:[%s1428_s3 + $0x50] sm:$0xff]  ;;  %s400_s14 = sadd.s32 %s1323_s10, %s976_s13  ;;  %v1137_v25 = vld [vmem:[%s1428_s3 + $0x88] sm:$0xff] }
  0x13   : > { %512 = vmatpush.bf16.msra.mxu1 %v1120_v4  ;;  %s975_s9 = sshll.u32 %s390_s23, 2  ;;  %580 = vmatpush.bf16.msra.mxu3 %v1126_v6  ;;  %v1132_v14 = vld [vmem:[%s1428_s3 + $0x60] sm:$0xff]  ;;  %v1134_v15 = vld [vmem:[%s1428_s3 + $0x70] sm:$0xff]  ;;  %s977_s8 = sshll.u32 %s400_s14, 2 }
  0x14   : > { %546 = vmatpush.bf16.msra.mxu2 %v1124_v5  ;;  %484 = vmatpush.bf16.msra.mxu0 %v1122_v7  ;;  %s392_s17 = scalar_lea.vmem %s1425_s0, %s975_s9  ;;  %v1138_v20 = vld [vmem:[%s1431_s6] sm:$0xff]  ;;  %s402_s12 = scalar_lea.vmem %s1426_s1, %s977_s8 }
  0x15   : > { %v434_v16 = vld [vmem:[%s392_s17] sm:$0xf]  ;;  %v1117_v18 = vld [vmem:[%s392_s17] sm:$0x10]  ;;  %s980_s13 = sshll.u32 %s1203_s24, 1  ;;  %s981_s14 = sshll.u32 %s1446_s25, 4 }
  0x16   : > { %v991_v17 = vld [vmem:[%s392_s17] sm:$0xf]  ;;  %1010 = vmatmul.msk.bf16.vlgmr.msra.gmra.mxu1 %vm473_vm0, %v434_v16  ;;  %s978_s17 = sshll.u32 %s1450_s15, 1  ;;  %v1118_v28 = vld [vmem:[%s402_s12] sm:$0x10]  ;;  %p418_p9 = scmp.lt.s32.totalorder %s980_s13, 15 }
  0x17   : > { %660 = vmatpush.bf16.msrb.mxu1 %v1131_v9  ;;  %740 = vmatpush.bf16.msrb.mxu3 %v1135_v11  ;;  %v992_v19 = vor.u32 %v1117_v18, %v991_v17  ;;  %s411_s18 = sadd.s32 %s1323_s10, %s978_s17  ;;  %v436_v26 = vld [vmem:[%s402_s12] sm:$0xf]  ;;  %s1454_s24 = smov (!%p427_p10, %s1203_s24), 7 }
  0x18   : > { %625 = vmatpush.bf16.msrb.mxu0 %v1129_v8  ;;  %694 = vmatpush.bf16.msrb.mxu2 %v1133_v10  ;;  %s979_s16 = sshll.u32 %s411_s18, 2  ;;  %v1043_v27 = vld [vmem:[%s402_s12] sm:$0xf]  ;;  %s1452_s13 = smov (!%p418_p9, %s980_s13), 15 }
  0x19   : > { %v523_v21 = vrot.slane %v992_v19, 1  ;;  %v455_v22 = vshrl.u32 %v992_v19, 16  ;;  %v457_v23 = vshll.u32 %v992_v19, 16  ;;  %s413_s9 = scalar_lea.vmem %s1427_s2, %s979_s16  ;;  %1036 = vmatmul.msk.bf16.vlgmr.msra.gmra.mxu3 %vm473_vm0, %v436_v26  ;;  %v1044_v32 = vor.u32 %v1118_v28, %v1043_v27  ;;  %v1136_v34 = vld [vmem:[%s1428_s3 + $0x80] sm:$0xff]  ;;  %s421_s17 = sadd.s32 %s981_s14, %s1452_s13 }
  0x1a   : > { %v1086_v30 = vld [vmem:[%s413_s9] sm:$0xf]  ;;  %v1119_v31 = vld [vmem:[%s413_s9] sm:$0x10]  ;;  %s982_s8 = sshll.u32 %s421_s17, 2  ;;  %s983_s12 = sshll.u32 %s1446_s25, 3 }
  0x1b   : > { %661 = vmatpush.bf16.msrb.mxu1 %v1130_v13  ;;  %741 = vmatpush.bf16.msrb.mxu3 %v1134_v15  ;;  %v459_v24 = vrot.slane %v457_v23, 1  ;;  %v1087_v33 = vor.u32 %v1119_v31, %v1086_v30  ;;  %v638_v36 = vrot.slane %v1044_v32, 1  ;;  %v600_v37 = vshll.u32 %v1044_v32, 16  ;;  %v438_v42 = vld [vmem:[%s413_s9] sm:$0xf]  ;;  %s423_s20 = scalar_lea.vmem %s1430_s5, %s982_s8  ;;  %s430_s23 = sadd.s32 %s983_s12, %s1454_s24 }
  0x1c   : > { %626 = vmatpush.bf16.msrb.mxu0 %v1128_v12  ;;  %695 = vmatpush.bf16.msrb.mxu2 %v1132_v14  ;;  %v598_v40 = vshrl.u32 %v1044_v32, 16  ;;  %v788_v45 = vld [vmem:[%s423_s20] sm:$0xf]  ;;  %s984_s15 = sshll.u32 %s430_s23, 2 }
  0x1d   : > { %1023 = vmatmul.msk.bf16.vlgmr.msra.gmra.mxu2 %vm473_vm0, %v523_v21  ;;  %v460_v29 = vor.u32 %v459_v24, %v455_v22  ;;  %v715_v35 = vshll.u32 %v1087_v33, 16  ;;  %v713_v38 = vshrl.u32 %v1087_v33, 16  ;;  %v602_v41 = vrot.slane %v600_v37, 1  ;;  %v1180_v7 = vld [vmem:[%s1429_s4] ss:$0 sm:$0xff]  ;;  %s432_s10 = scalar_lea.vmem %s1432_s7, %s984_s15 }
  0x1e   : > { %v753_v46 = vrot.slane %v1087_v33, 1 }
  0x1f   : > { %808 = vmatpush.bf16.msra.mxu1 %v1138_v20  ;;  %1001 = vmatmul.msk.bf16.vlgmr.msra.gmra.mxu0 %vm473_vm0, %v460_v29  ;;  %v717_v39 = vrot.slane %v715_v35, 1  ;;  %v603_v44 = vor.u32 %v602_v41, %v598_v40 }
  0x20   : > { %775 = vmatpush.bf16.msra.mxu0 %v1137_v25 }
  0x21   : > { %v718_v43 = vor.u32 %v717_v39, %v713_v38 }
  0x24   : > { %776 = vmatpush.bf16.msra.mxu0 %v1136_v34 }
  0x26   : > { %1066 = vmatmul.msk.bf16.vlgmr.msrb.gmra.mxu1 %vm473_vm0, %v638_v36 }
  0x29   : > { %1096 = vmatmul.msk.bf16.vlgmr.msrb.gmra.mxu3 %vm473_vm0, %v718_v43 }
  0x2d   : > { %1079 = vmatmul.msk.bf16.vlgmr.msrb.gmra.mxu2 %vm473_vm0, %v438_v42 }
  0x2f   : > { %1053 = vmatmul.msk.bf16.vlgmr.msrb.gmra.mxu0 %vm473_vm0, %v603_v44 }
  0x36   : > { %1114 = vmatmul.msk.bf16.vlgmr.msra.gmra.mxu1 %vm797_vm1, %v788_v45 }
  0x3f   : > { %1109 = vmatmul.msk.bf16.vlgmr.msra.gmra.mxu0 %vm473_vm0, %v753_v46 }
  0x93   : > { %v514_v47 = vpop.f32.mrf.mxu1 }
  0x9b   : > { %v516_v49 = vpop.f32.mrf.mxu1 }
  0x9c   : > { %v486_v48 = vpop.f32.mrf.mxu0  ;;  %v582_v51 = vpop.f32.mrf.mxu3 }
  0x9d   : > { %v515_v54 = vadd.f32 %v514_v47, %v486_v48 }
  0xa0   : > { %v548_v50 = vpop.f32.mrf.mxu2 }
  0xa1   : > { %v552_v56 = vadd.f32 %v548_v50, %v515_v54 }
  0xa3   : > { %v663_v53 = vpop.f32.mrf.mxu1  ;;  %v586_v60 = vadd.f32 %v582_v51, %v552_v56 }
  0xa4   : > { %v488_v52 = vpop.f32.mrf.mxu0  ;;  %v584_v57 = vpop.f32.mrf.mxu3 }
  0xa8   : > { %v550_v55 = vpop.f32.mrf.mxu2 }
  0xab   : > { %v665_v59 = vpop.f32.mrf.mxu1 }
  0xac   : > { %v628_v58 = vpop.f32.mrf.mxu0  ;;  %v743_v63 = vpop.f32.mrf.mxu3 }
  0xad   : > { %v632_v62 = vadd.f32 %v628_v58, %v586_v60 }
  0xaf   : > { %v667_v0 = vadd.f32 %v663_v53, %v632_v62 }
  0xb0   : > { %v697_v61 = vpop.f32.mrf.mxu2 }
  0xb1   : > { %v701_v4 = vadd.f32 %v697_v61, %v667_v0 }
  0xb3   : > { %v810_v2 = vpop.f32.mrf.mxu1  ;;  %v747_v6 = vadd.f32 %v743_v63, %v701_v4 }
  0xb4   : > { %v630_v1 = vpop.f32.mrf.mxu0  ;;  %v745_v5 = vpop.f32.mrf.mxu3 }
  0xb8   : > { %v699_v3 = vpop.f32.mrf.mxu2 }
  0xbb   : > { %v812_v9 = vpop.f32.mrf.mxu1 }
  0xbc   : > { %v778_v8 = vpop.f32.mrf.mxu0 }
  0xbd   : > { %v782_v10 = vadd.f32 %v778_v8, %v747_v6 }
  0xbf   : > { %v787_v11 = vadd.f32 %v1180_v7, %v782_v10 }
  0xc1   : > { %v814_v12 = vadd.f32 %v810_v2, %v787_v11 }
  0xc3   : > { %v815_v13 = vmax.f32 %v814_v12, 0.0 }
  0xc4   : > { %v780_v14 = vpop.f32.mrf.mxu0 }
  0xc5   : > { %v816_v15 = vpack.c.bf16 %v815_v13, %v815_v13 }
  0xc7   : > { %817 = vst [vmem:[%s432_s10] sm:$0xf] %v816_v15 }
  0xc8 PF: > { %s17_s28 = sadd.s32 1, %s1219_s28   ;;  %s1435_s24 = smov %s1211_s26 }
  0xc9   : > { %p14_p11 = scmp.ge.s32.totalorder %s17_s28, 18   ;;  %s1436_s25 = smov %s1215_s27 }
  0xca   : > { %s1437_s26 = smov %s1440_s29  ;;  %s1438_s27 = smov %s1444_s30 }
  0xcb   :  { %16 = sbr.rel (!%p14_p11) target bundleno = 3 (0x3), region = 95 }

// kernel: resnest_forward.16
= control target key start
LH: loop header
LB: loop body
LE: loop exit
PB: predicated region body
PF: predicated region fallthrough
CT: control target
= control target key end

     0   :  { %s1641_s17 = smov 0   ;;  %s1643_s18 = smov 0   ;;  %s1818_s0 = inlined_call_operand.vmem [shape: bf16[2,10,4,128], index: 0, kind: input, shape index: {}, may-alias: {0,1,2}]   ;;  %s1819_s1 = inlined_call_operand.vmem [shape: bf16[2,10,4,128], index: 1, kind: input, shape index: {}, may-alias: {0,1,2}]   ;;  %s1820_s2 = inlined_call_operand.vmem [shape: bf16[2,10,4,128], index: 2, kind: input, shape index: {}, may-alias: {0,1,2}]   ;;  %s1821_s3 = inlined_call_operand.vmem [shape: bf16[2,10,4,128], index: 3, kind: input, shape index: {}, may-alias: {3,4,5}]   ;;  %s1822_s4 = inlined_call_operand.vmem [shape: bf16[2,10,4,128], index: 4, kind: input, shape index: {}, may-alias: {3,4,5}]   ;;  %s1823_s5 = inlined_call_operand.vmem [shape: bf16[2,10,4,128], index: 5, kind: input, shape index: {}, may-alias: {3,4,5}]   ;;  %s1824_s6 = inlined_call_operand.vmem [shape: bf16[2,10,4,128], index: 6, kind: input, shape index: {}, may-alias: {6,7,8}]   ;;  %s1825_s7 = inlined_call_operand.vmem [shape: bf16[2,10,4,128], index: 7, kind: input, shape index: {}, may-alias: {6,7,8}]   ;;  %s1826_s8 = inlined_call_operand.vmem [shape: bf16[2,10,4,128], index: 8, kind: input, shape index: {}, may-alias: {6,7,8}]   ;;  %s1827_s9 = inlined_call_operand.vmem [shape: bf16[9,32,128], index: 9, kind: input, shape index: {}]   ;;  %s1828_s10 = inlined_call_operand.vmem [shape: f32[1,128], index: 10, kind: input, shape index: {}]   ;;  %s1829_s11 = inlined_call_operand.vmem [shape: bf16[2,4,4,128], index: 11, kind: output, shape index: {}]  }
   0x1   :  { %1832 = sst [smem:[#allocation6_spill]] %s1818_s0  ;;  %s1645_s19 = smov 0  }
   0x2   :  { %s1647_s20 = smov 0   ;;  %s1649_s21 = smov 0  }
   0x3 LB: > { %1833 = sst [smem:[#allocation2_spill]] %s1571_s19  ;;  %s30_s22 = sadd.s32 1, %s1571_s19  ;;  %s1579_s21 = sphi %s1649_s21, %s21_s21   ;;  %s1575_s20 = sphi %s1647_s20, %s1845_s20   ;;  %s1571_s19 = sphi %s1645_s19, %s1844_s19   ;;  %s1567_s18 = sphi %s1643_s18, %s1843_s18   ;;  %s1563_s17 = sphi %s1641_s17, %s1842_s17  }
   0x4   : > { %1834 = sst [smem:[#allocation3_spill]] %s1575_s20  ;;  %s33_s23 = sadd.s32 1, %s1575_s20 }
   0x5   : > { %p31_p0 = scmp.ge.s32.totalorder %s30_s22, 4  ;;  %p1345_p1 = scmp.ge.s32.totalorder %s1579_s21, 1 }
   0x6   : > { %p536_p2 = scmp.lt.s32.totalorder %s1579_s21, 9 }
   0x7   : > { %s1847_s22 = smov (%p31_p0, %s30_s22), 0  ;;  %s1849_s23 = smov (!%p31_p0, %s33_s23), %s1575_s20 }
   0x8   : > { %1835 = sst [smem:[#allocation4_spill]] %s1847_s22  ;;  %p537_p3 = pnand %p1345_p1, %p536_p2 }
   0x9   : > { %p35_p4 = scmp.ge.s32.totalorder %s1849_s23, 2  ;;  %s1683_s30 = sshll.u32 (!%p537_p3), %s1563_s17, 1 }
   0xa   : > { %540 = sbr.rel (%p537_p3) target bundleno = 190 (0xbe), region = 64  ;;  %p662_p5 = scmp.lt.s32.totalorder (!%p537_p3), %s1567_s18, 1 }
   0xb   : > { %s1851_s23 = smov (%p35_p4, %s1849_s23), 0  ;;  %p664_p6 = scmp.lt.s32.totalorder (!%p537_p3), %s1683_s30, 9 }
   0xc   : > { %1836 = sst [smem:[#allocation5_spill]] %s1851_s23  ;;  %s684_s28 = sadd.s32 (!%p537_p3), 2, %s1683_s30 }
   0xd   : > { %s1837_s22 = sadd.s32 (!%p537_p3), 1, %s1683_s30  ;;  %p1728_p8 = scmp.lt.s32.totalorder (!%p537_p3), %s684_s28, 9 }
   0xe   : > { %p1724_p7 = scmp.lt.s32.totalorder (!%p537_p3), %s1837_s22, 9  ;;  %s1840_s0 = sld [smem:[#allocation6_spill]] (!%p537_p3) }
   0xf   : > { %v1484_v0 = vld [vmem:[%s1827_s9 + $0x18] sm:$0xff]  ;;  %v1482_v1 = vld [vmem:[%s1827_s9 + $0x8] sm:$0xff]  ;;  %v1483_v4 = vld [vmem:[%s1827_s9 + $0x10] sm:$0xff]  ;;  %s1853_s18 = smov (!%p662_p5, %s1567_s18), 1  ;;  %vm802_vm0 = vcmask 261120   ;;  %s1841_s19 = sadd.s32 1, %s1683_s30 }
  0x10   : > { %v1486_v2 = vld [vmem:[%s1827_s9 + $0x28] sm:$0xff]  ;;  %v1488_v3 = vld [vmem:[%s1827_s9 + $0x38] sm:$0xff]  ;;  %812 = vmatpush.bf16.msra.mxu0 %v1484_v0  ;;  %840 = vmatpush.bf16.msra.mxu1 %v1482_v1  ;;  %v1481_v5 = vld [vmem:[%s1827_s9] sm:$0xff]  ;;  %s665_s12 = scalar_select %p664_p6, %s1683_s30, 9 }
  0x11   : > { %873 = vmatpush.bf16.msra.mxu2 %v1486_v2  ;;  %907 = vmatpush.bf16.msra.mxu3 %v1488_v3  ;;  %v1485_v6 = vld [vmem:[%s1827_s9 + $0x20] sm:$0xff]  ;;  %v1487_v7 = vld [vmem:[%s1827_s9 + $0x30] sm:$0xff]  ;;  %s1706_s13 = smul.u32 10, %s1853_s18  ;;  %v1490_v8 = vld [vmem:[%s1827_s9 + $0x48] sm:$0xff]  ;;  %s1855_s19 = smov (!%p1724_p7, %s1841_s19), 9 }
  0x12   : > { %v1494_v9 = vld [vmem:[%s1827_s9 + $0x68] sm:$0xff]  ;;  %v1496_v10 = vld [vmem:[%s1827_s9 + $0x78] sm:$0xff]  ;;  %v1489_v12 = vld [vmem:[%s1827_s9 + $0x40] sm:$0xff]  ;;  %s1857_s28 = smov (!%p1728_p8, %s684_s28), 9  ;;  %p765_p9 = scmp.lt.s32.totalorder %s1563_s17, 3 }
  0x13   : > { %v1492_v11 = vld [vmem:[%s1827_s9 + $0x58] sm:$0xff]  ;;  %s667_s29 = sadd.s32 %s1706_s13, %s665_s12  ;;  %v1493_v13 = vld [vmem:[%s1827_s9 + $0x60] sm:$0xff]  ;;  %v1495_v14 = vld [vmem:[%s1827_s9 + $0x70] sm:$0xff]  ;;  %s690_s26 = sadd.s32 %s1706_s13, %s1857_s28 }
  0x14   : > { %813 = vmatpush.bf16.msra.mxu0 %v1483_v4  ;;  %841 = vmatpush.bf16.msra.mxu1 %v1481_v5  ;;  %s1347_s16 = sshll.u32 %s667_s29, 1  ;;  %v1491_v17 = vld [vmem:[%s1827_s9 + $0x50] sm:$0xff]  ;;  %v1498_v19 = vld [vmem:[%s1827_s9 + $0x88] sm:$0xff]  ;;  %v1497_v20 = vld [vmem:[%s1827_s9 + $0x80] sm:$0xff]  ;;  %s1351_s23 = sshll.u32 %s690_s26, 1 }
  0x15   : > { %874 = vmatpush.bf16.msra.mxu2 %v1485_v6  ;;  %908 = vmatpush.bf16.msra.mxu3 %v1487_v7  ;;  %s703_s25 = scalar_lea.vmem %s1821_s3, %s1347_s16  ;;  %s669_s22 = scalar_lea.vmem %s1840_s0, %s1347_s16  ;;  %v1540_v49 = vld [vmem:[%s1828_s10] ss:$0 sm:$0xff] }
  0x16   : > { %v775_v15 = vld [vmem:[%s703_s25] sm:$0x3]  ;;  %s737_s0 = scalar_lea.vmem %s1824_s6, %s1347_s16  ;;  %s678_s16 = sadd.s32 %s1706_s13, %s1855_s19 }
  0x17   : > { %v772_v16 = vld [vmem:[%s669_s22] sm:$0x3]  ;;  %1378 = vmatmul.msk.bf16.vlgmr.msra.gmra.mxu0 %vm802_vm0, %v775_v15  ;;  %s1349_s29 = sshll.u32 %s678_s16, 1  ;;  %s692_s24 = scalar_lea.vmem %s1820_s2, %s1351_s23 }
  0x18   : > { %941 = vmatpush.bf16.msrb.mxu0 %v1490_v8  ;;  %975 = vmatpush.bf16.msrb.mxu1 %v1492_v11  ;;  %v778_v18 = vld [vmem:[%s737_s0] sm:$0x3]  ;;  %s680_s0 = scalar_lea.vmem %s1819_s1, %s1349_s29  ;;  %s714_s12 = scalar_lea.vmem %s1822_s4, %s1349_s29 }
  0x19   : > { %1009 = vmatpush.bf16.msrb.mxu2 %v1494_v9  ;;  %1043 = vmatpush.bf16.msrb.mxu3 %v1496_v10  ;;  %v773_v21 = vld [vmem:[%s680_s0] sm:$0x3]  ;;  %s748_s22 = scalar_lea.vmem %s1825_s7, %s1349_s29  ;;  %s726_s0 = scalar_lea.vmem %s1823_s5, %s1351_s23 }
  0x1a   : > { %1387 = vmatmul.msk.bf16.vlgmr.msra.gmra.mxu1 %vm802_vm0, %v772_v16  ;;  %1400 = vmatmul.msk.bf16.vlgmr.msra.gmra.mxu2 %vm802_vm0, %v778_v18  ;;  %v776_v22 = vld [vmem:[%s714_s12] sm:$0x3]  ;;  %s760_s15 = scalar_lea.vmem %s1826_s8, %s1351_s23  ;;  %s1859_s17 = smov (!%p765_p9, %s1563_s17), 3 }
  0x1b   : > { %1413 = vmatmul.msk.bf16.vlgmr.msra.gmra.mxu3 %vm802_vm0, %v773_v21  ;;  %v779_v23 = vld [vmem:[%s748_s22] sm:$0x3]  ;;  %s1364_s26 = sshll.u32 %s1853_s18, 2 }
  0x1c   : > { %942 = vmatpush.bf16.msrb.mxu0 %v1489_v12  ;;  %976 = vmatpush.bf16.msrb.mxu1 %v1491_v17  ;;  %v774_v24 = vld [vmem:[%s692_s24] sm:$0x3]  ;;  %s768_s20 = sadd.s32 %s1364_s26, %s1859_s17 }
  0x1d   : > { %1010 = vmatpush.bf16.msrb.mxu2 %v1493_v13  ;;  %1044 = vmatpush.bf16.msrb.mxu3 %v1495_v14  ;;  %v777_v25 = vld [vmem:[%s726_s0] sm:$0x3]  ;;  %s1365_s12 = sshll.u32 %s768_s20, 1 }
  0x1e   : > { %v780_v26 = vld [vmem:[%s760_s15] sm:$0x3]  ;;  %s770_s22 = scalar_lea.vmem %s1829_s11, %s1365_s12 }
  0x20   : > { %1077 = vmatpush.bf16.msra.mxu0 %v1498_v19 }
  0x24   : > { %1078 = vmatpush.bf16.msra.mxu0 %v1497_v20 }
  0x27   : > { %1426 = vmatmul.msk.bf16.vlgmr.msrb.gmra.mxu0 %vm802_vm0, %v776_v22 }
  0x2a   : > { %1439 = vmatmul.msk.bf16.vlgmr.msrb.gmra.mxu1 %vm802_vm0, %v779_v23  ;;  %1452 = vmatmul.msk.bf16.vlgmr.msrb.gmra.mxu2 %vm802_vm0, %v774_v24 }
  0x2b   : > { %1465 = vmatmul.msk.bf16.vlgmr.msrb.gmra.mxu3 %vm802_vm0, %v777_v25 }
  0x37   : > { %1478 = vmatmul.msk.bf16.vlgmr.msra.gmra.mxu0 %vm802_vm0, %v780_v26 }
  0x94   : > { %v815_v27 = vpop.f32.mrf.mxu0 }
  0x97   : > { %v843_v28 = vpop.f32.mrf.mxu1 }
  0x98   : > { %v844_v33 = vadd.f32 %v843_v28, %v815_v27 }
  0x9c   : > { %v817_v30 = vpop.f32.mrf.mxu0 }
  0x9d   : > { %v876_v29 = vpop.f32.mrf.mxu2 }
  0x9e   : > { %v910_v32 = vpop.f32.mrf.mxu3  ;;  %v880_v34 = vadd.f32 %v876_v29, %v844_v33 }
  0x9f   : > { %v845_v31 = vpop.f32.mrf.mxu1 }
  0xa0   : > { %v914_v38 = vadd.f32 %v910_v32, %v880_v34 }
  0xa4   : > { %v944_v36 = vpop.f32.mrf.mxu0 }
  0xa5   : > { %v878_v35 = vpop.f32.mrf.mxu2  ;;  %v948_v40 = vadd.f32 %v944_v36, %v914_v38 }
  0xa6   : > { %v912_v39 = vpop.f32.mrf.mxu3 }
  0xa7   : > { %v978_v37 = vpop.f32.mrf.mxu1 }
  0xa8   : > { %v982_v44 = vadd.f32 %v978_v37, %v948_v40 }
  0xac   : > { %v946_v42 = vpop.f32.mrf.mxu0 }
  0xad   : > { %v1012_v41 = vpop.f32.mrf.mxu2 }
  0xae   : > { %v1016_v45 = vadd.f32 %v1012_v41, %v982_v44  ;;  %v1046_v46 = vpop.f32.mrf.mxu3 }
  0xaf   : > { %v980_v43 = vpop.f32.mrf.mxu1 }
  0xb0   : > { %v1050_v47 = vadd.f32 %v1046_v46, %v1016_v45 }
  0xb4   : > { %v1080_v50 = vpop.f32.mrf.mxu0 }
  0xb5   : > { %v1014_v48 = vpop.f32.mrf.mxu2  ;;  %v1084_v51 = vadd.f32 %v1080_v50, %v1050_v47 }
  0xb6   : > { %v1048_v53 = vpop.f32.mrf.mxu3 }
  0xb7   : > { %v1089_v52 = vadd.f32 %v1540_v49, %v1084_v51 }
  0xb9   : > { %v1090_v54 = vmax.f32 %v1089_v52, 0.0 }
  0xbb   : > { %v1091_v55 = vpack.c.bf16 %v1090_v54, %v1090_v54 }
  0xbc   : > { %v1082_v56 = vpop.f32.mrf.mxu0 }
  0xbd   : > { %1092 = vst [vmem:[%s770_s22] sm:$0x3] %v1091_v55 }
  0xbe PF: > { %s21_s21 = sadd.s32 1, %s1579_s21   ;;  %s1842_s17 = sld [smem:[#allocation2_spill]] }
  0xbf   : > { %p18_p10 = scmp.ge.s32.totalorder %s21_s21, 10   ;;  %s1843_s18 = sld [smem:[#allocation3_spill]] }
  0xc0   : > { %s1844_s19 = sld [smem:[#allocation4_spill]] }
  0xc1   : > { %s1845_s20 = sld [smem:[#allocation5_spill]]  ;;  %20 = sbr.rel (!%p18_p10) target bundleno = 3 (0x3), region = 126 }

// kernel: resnest_forward.17
= control target key start
LH: loop header
LB: loop body
LE: loop exit
PB: predicated region body
PF: predicated region fallthrough
CT: control target
= control target key end

     0   :  { %s1495_s24 = smov 0   ;;  %s1497_s25 = smov 0   ;;  %s1716_s0 = inlined_call_operand.vmem [shape: bf16[2,6,6,128], index: 0, kind: input, shape index: {}, may-alias: {0,1,2}]   ;;  %s1717_s1 = inlined_call_operand.vmem [shape: bf16[2,6,6,128], index: 1, kind: input, shape index: {}, may-alias: {0,1,2}]   ;;  %s1718_s2 = inlined_call_operand.vmem [shape: bf16[2,6,6,128], index: 2, kind: input, shape index: {}, may-alias: {0,1,2}]   ;;  %s1719_s3 = inlined_call_operand.vmem [shape: bf16[9,64,128], index: 3, kind: input, shape index: {}]   ;;  %s1720_s4 = inlined_call_operand.vmem [shape: f32[1,128], index: 4, kind: input, shape index: {}]   ;;  %s1721_s5 = inlined_call_operand.vmem [shape: bf16[2,8,4,128], index: 5, kind: input, shape index: {}]   ;;  %s1722_s6 = inlined_call_operand.vmem [shape: bf16[32,128], index: 6, kind: input, shape index: {}]   ;;  %s1723_s7 = inlined_call_operand.vmem [shape: bf16[2,4,4,128], index: 7, kind: output, shape index: {}]  }
   0x1   :  { %s1499_s26 = smov 0   ;;  %s1501_s27 = smov 0  }
   0x2   :  { %s1503_s28 = smov 0  }
   0x3 LB: > { %s26_s29 = sadd.s32 1, %s1445_s26  ;;  %s29_s30 = sadd.s32 1, %s1449_s27  ;;  %s1453_s28 = sphi %s1503_s28, %s17_s28   ;;  %s1449_s27 = sphi %s1501_s27, %s1729_s27   ;;  %s1445_s26 = sphi %s1499_s26, %s1728_s26   ;;  %s1441_s25 = sphi %s1497_s25, %s1727_s25   ;;  %s1437_s24 = sphi %s1495_s24, %s1726_s24  }
   0x4   : > { %p27_p0 = scmp.ge.s32.totalorder %s26_s29, 4  ;;  %p1098_p1 = scmp.ge.s32.totalorder %s1453_s28, 1 }
   0x5   : > { %p313_p2 = scmp.lt.s32.totalorder %s1453_s28, 9 }
   0x6   : > { %s1731_s29 = smov (%p27_p0, %s26_s29), 0  ;;  %s1733_s30 = smov (!%p27_p0, %s29_s30), %s1449_s27 }
   0x7   : > { %p314_p3 = pnand %p1098_p1, %p313_p2  ;;  %p31_p4 = scmp.ge.s32.totalorder %s1733_s30, 2 }
   0x8   : > { %p378_p5 = scmp.lt.s32.totalorder (!%p314_p3), %s1441_s25, 1  ;;  %p380_p6 = scmp.lt.s32.totalorder (!%p314_p3), %s1437_s24, 5 }
   0x9   : > { %s1735_s30 = smov (%p31_p4, %s1733_s30), 0  ;;  %317 = sbr.rel (%p314_p3) target bundleno = 201 (0xc9), region = 48 }
   0xa   : > { %s386_s16 = sadd.s32 (!%p314_p3), 1, %s1437_s24  ;;  %s396_s17 = sadd.s32 (!%p314_p3), 2, %s1437_s24 }
   0xb   : > { %p1560_p7 = scmp.lt.s32.totalorder (!%p314_p3), %s386_s16, 5  ;;  %p1573_p8 = scmp.lt.s32.totalorder (!%p314_p3), %s396_s17, 5 }
   0xc   : > { %p418_p10 = scmp.lt.s32.totalorder (!%p314_p3), %s1437_s24, 3 }
   0xe   : > { %v1338_v0 = vld [vmem:[%s1719_s3 + $0x18] sm:$0xff]  ;;  %v1337_v4 = vld [vmem:[%s1719_s3 + $0x10] sm:$0xff]  ;;  %s1737_s25 = smov (!%p378_p5, %s1441_s25), 1  ;;  %v1336_v8 = vld [vmem:[%s1719_s3 + $0x8] sm:$0xff]  ;;  %s1739_s16 = smov (!%p1560_p7, %s386_s16), 5  ;;  %vm479_vm0 = vcmask 523264  }
   0xf   : > { %v1346_v1 = vld [vmem:[%s1719_s3 + $0x58] sm:$0xff]  ;;  %527 = vmatpush.bf16.msra.mxu1 %v1338_v0  ;;  %v1345_v5 = vld [vmem:[%s1719_s3 + $0x50] sm:$0xff]  ;;  %s381_s10 = scalar_select %p380_p6, %s1437_s24, 5  ;;  %v1344_v9 = vld [vmem:[%s1719_s3 + $0x48] sm:$0xff]  ;;  %vm931_vm1 = vcmask 261120  }
  0x10   : > { %v1342_v2 = vld [vmem:[%s1719_s3 + $0x38] sm:$0xff]  ;;  %577 = vmatpush.bf16.msra.mxu2 %v1346_v1  ;;  %v1341_v6 = vld [vmem:[%s1719_s3 + $0x30] sm:$0xff]  ;;  %s1558_s11 = smul.u32 6, %s1737_s25  ;;  %v1340_v10 = vld [vmem:[%s1719_s3 + $0x28] sm:$0xff]  ;;  %s1741_s17 = smov (!%p1573_p8, %s396_s17), 5 }
  0x11   : > { %v1350_v3 = vld [vmem:[%s1719_s3 + $0x78] sm:$0xff]  ;;  %487 = vmatpush.bf16.msra.mxu0 %v1342_v2  ;;  %v1349_v7 = vld [vmem:[%s1719_s3 + $0x70] sm:$0xff]  ;;  %v1348_v11 = vld [vmem:[%s1719_s3 + $0x68] sm:$0xff] }
  0x12   : > { %627 = vmatpush.bf16.msra.mxu3 %v1350_v3  ;;  %s383_s19 = sadd.s32 %s1558_s11, %s381_s10  ;;  %v1335_v13 = vld [vmem:[%s1719_s3] sm:$0xff]  ;;  %v1358_v19 = vld [vmem:[%s1719_s3 + $0xb8] sm:$0xff]  ;;  %s402_s18 = sadd.s32 %s1558_s11, %s1741_s17  ;;  %v1357_v30 = vld [vmem:[%s1719_s3 + $0xb0] sm:$0xff] }
  0x13   : > { %528 = vmatpush.bf16.msra.mxu1 %v1337_v4  ;;  %s1099_s9 = sshll.u32 %s383_s19, 2  ;;  %v1343_v14 = vld [vmem:[%s1719_s3 + $0x40] sm:$0xff]  ;;  %v1362_v20 = vld [vmem:[%s1719_s3 + $0xd8] sm:$0xff]  ;;  %s1101_s12 = sshll.u32 %s402_s18, 2  ;;  %v1361_v32 = vld [vmem:[%s1719_s3 + $0xd0] sm:$0xff] }
  0x14   : > { %578 = vmatpush.bf16.msra.mxu2 %v1345_v5  ;;  %s385_s14 = scalar_lea.vmem %s1716_s0, %s1099_s9  ;;  %v1339_v16 = vld [vmem:[%s1719_s3 + $0x20] sm:$0xff]  ;;  %s392_s9 = sadd.s32 %s1558_s11, %s1739_s16  ;;  %v1354_v24 = vld [vmem:[%s1719_s3 + $0x98] sm:$0xff]  ;;  %v1353_v34 = vld [vmem:[%s1719_s3 + $0x90] sm:$0xff] }
  0x15   : > { %488 = vmatpush.bf16.msra.mxu0 %v1341_v6  ;;  %v425_v12 = vld [vmem:[%s385_s14] sm:$0x7]  ;;  %s1100_s20 = sshll.u32 %s392_s9, 2  ;;  %s404_s9 = scalar_lea.vmem %s1718_s2, %s1101_s12  ;;  %v1366_v26 = vld [vmem:[%s1719_s3 + $0xf8] sm:$0xff]  ;;  %v1365_v36 = vld [vmem:[%s1719_s3 + $0xf0] sm:$0xff] }
  0x16   : > { %628 = vmatpush.bf16.msra.mxu3 %v1349_v7  ;;  %v446_v15 = vunpack.c.l.b16 %v425_v12  ;;  %v1347_v17 = vld [vmem:[%s1719_s3 + $0x60] sm:$0xff]  ;;  %s394_s19 = scalar_lea.vmem %s1717_s1, %s1100_s20  ;;  %v1356_v38 = vld [vmem:[%s1719_s3 + $0xa8] sm:$0xff]  ;;  %s1102_s12 = sshll.u32 %s1437_s24, 1  ;;  %v1370_v51 = vld [vmem:[%s1719_s3 + $0x118] sm:$0xff] }
  0x17   : > { %529 = vmatpush.bf16.msra.mxu1 %v1336_v8  ;;  %v426_v25 = vld [vmem:[%s394_s19] sm:$0x7]  ;;  %v1360_v39 = vld [vmem:[%s1719_s3 + $0xc8] sm:$0xff]  ;;  %p409_p9 = scmp.lt.s32.totalorder %s1102_s12, 7  ;;  %v1369_v57 = vld [vmem:[%s1719_s3 + $0x110] sm:$0xff]  ;;  %s1103_s14 = sshll.u32 %s1737_s25, 3 }
  0x18   : > { %579 = vmatpush.bf16.msra.mxu2 %v1344_v9  ;;  %v447_v18 = vpack.c.b16 %v446_v15, %v446_v15  ;;  %v427_v27 = vld [vmem:[%s404_s9] sm:$0x7]  ;;  %v647_v29 = vunpack.c.l.b16 %v426_v25  ;;  %v1352_v40 = vld [vmem:[%s1719_s3 + $0x88] sm:$0xff]  ;;  %s1745_s24 = smov (!%p418_p10, %s1437_s24), 3 }
  0x19   : > { %489 = vmatpush.bf16.msra.mxu0 %v1340_v10  ;;  %v808_v31 = vunpack.c.l.b16 %v427_v27  ;;  %v1364_v42 = vld [vmem:[%s1719_s3 + $0xe8] sm:$0xff]  ;;  %v1355_v44 = vld [vmem:[%s1719_s3 + $0xa0] sm:$0xff]  ;;  %s1743_s12 = smov (!%p409_p9, %s1102_s12), 7 }
  0x1a   : > { %629 = vmatpush.bf16.msra.mxu3 %v1348_v11  ;;  %v545_v21 = vrot.slane %v447_v18, 1  ;;  %v449_v22 = vshrl.u32 %v447_v18, 16  ;;  %v451_v23 = vshll.u32 %v447_v18, 16  ;;  %v648_v37 = vpack.c.b16 %v647_v29, %v647_v29  ;;  %v1359_v45 = vld [vmem:[%s1719_s3 + $0xc0] sm:$0xff]  ;;  %v1372_v46 = vld [vmem:[%s1722_s6 + $0x8] sm:$0xff]  ;;  %s412_s18 = sadd.s32 %s1103_s14, %s1743_s12  ;;  %s1105_s12 = sshll.u32 %s1737_s25, 2 }
  0x1b   : > { %530 = vmatpush.bf16.msra.mxu1 %v1335_v13  ;;  %v809_v35 = vpack.c.b16 %v808_v31, %v808_v31  ;;  %v1351_v47 = vld [vmem:[%s1719_s3 + $0x80] sm:$0xff]  ;;  %v1368_v59 = vld [vmem:[%s1719_s3 + $0x108] sm:$0xff]  ;;  %s1104_s19 = sshll.u32 %s412_s18, 1  ;;  %s421_s17 = sadd.s32 %s1105_s12, %s1745_s24 }
  0x1c   : > { %580 = vmatpush.bf16.msra.mxu2 %v1343_v14  ;;  %v453_v28 = vrot.slane %v451_v23, 1  ;;  %v652_v43 = vshll.u32 %v648_v37, 16  ;;  %v1363_v50 = vld [vmem:[%s1719_s3 + $0xe0] sm:$0xff]  ;;  %v650_v52 = vshrl.u32 %v648_v37, 16  ;;  %v706_v54 = vrot.slane %v648_v37, 1  ;;  %s414_s8 = scalar_lea.vmem %s1721_s5, %s1104_s19  ;;  %s1106_s11 = sshll.u32 %s421_s17, 1 }
  0x1d   : > { %490 = vmatpush.bf16.msra.mxu0 %v1339_v16  ;;  %v813_v41 = vshll.u32 %v809_v35, 16  ;;  %v811_v48 = vshrl.u32 %v809_v35, 16  ;;  %v1371_v56 = vld [vmem:[%s1722_s6] sm:$0xff]  ;;  %v867_v62 = vrot.slane %v809_v35, 1  ;;  %s423_s15 = scalar_lea.vmem %s1723_s7, %s1106_s11 }
  0x1e   : > { %630 = vmatpush.bf16.msra.mxu3 %v1347_v17  ;;  %1148 = vmatmul.msk.bf16.vlgmr.msra.gmra.mxu1 %vm479_vm0, %v425_v12  ;;  %v454_v33 = vor.u32 %v453_v28, %v449_v22  ;;  %v654_v53 = vrot.slane %v652_v43, 1  ;;  %v1367_v60 = vld [vmem:[%s1719_s3 + $0x100] sm:$0xff] }
  0x1f   : > { %738 = vmatpush.bf16.msrb.mxu1 %v1358_v19  ;;  %1173 = vmatmul.msk.bf16.vlgmr.msra.gmra.mxu2 %vm479_vm0, %v545_v21  ;;  %v815_v49 = vrot.slane %v813_v41, 1  ;;  %v914_v61 = vld [vmem:[%s414_s8] sm:$0x3] }
  0x20   : > { %788 = vmatpush.bf16.msrb.mxu2 %v1362_v20  ;;  %1131 = vmatmul.msk.bf16.vlgmr.msra.gmra.mxu0 %vm479_vm0, %v454_v33  ;;  %v655_v58 = vor.u32 %v654_v53, %v650_v52  ;;  %v1414_v23 = vld [vmem:[%s1720_s4] ss:$0 sm:$0xff] }
  0x21   : > { %1198 = vmatmul.msk.bf16.vlgmr.msra.gmra.mxu3 %vm479_vm0, %v426_v25  ;;  %687 = vmatpush.bf16.msrb.mxu0 %v1354_v24  ;;  %v816_v55 = vor.u32 %v815_v49, %v811_v48 }
  0x22   : > { %848 = vmatpush.bf16.msrb.mxu3 %v1366_v26 }
  0x23   : > { %739 = vmatpush.bf16.msrb.mxu1 %v1357_v30 }
  0x24   : > { %789 = vmatpush.bf16.msrb.mxu2 %v1361_v32 }
  0x25   : > { %688 = vmatpush.bf16.msrb.mxu0 %v1353_v34 }
  0x26   : > { %849 = vmatpush.bf16.msrb.mxu3 %v1365_v36 }
  0x27   : > { %740 = vmatpush.bf16.msrb.mxu1 %v1356_v38 }
  0x28   : > { %790 = vmatpush.bf16.msrb.mxu2 %v1360_v39 }
  0x29   : > { %689 = vmatpush.bf16.msrb.mxu0 %v1352_v40 }
  0x2a   : > { %850 = vmatpush.bf16.msrb.mxu3 %v1364_v42 }
  0x2b   : > { %741 = vmatpush.bf16.msrb.mxu1 %v1355_v44 }
  0x2c   : > { %791 = vmatpush.bf16.msrb.mxu2 %v1359_v45 }
  0x2d   : > { %690 = vmatpush.bf16.msrb.mxu0 %v1351_v47 }
  0x2e   : > { %851 = vmatpush.bf16.msrb.mxu3 %v1363_v50  ;;  %1248 = vmatmul.msk.bf16.vlgmr.msrb.gmra.mxu1 %vm479_vm0, %v706_v54 }
  0x2f   : > { %941 = vmatpush.bf16.msra.mxu1 %v1372_v46  ;;  %1273 = vmatmul.msk.bf16.vlgmr.msrb.gmra.mxu2 %vm479_vm0, %v427_v27 }
  0x30   : > { %1223 = vmatmul.msk.bf16.vlgmr.msrb.gmra.mxu0 %vm479_vm0, %v655_v58 }
  0x31   : > { %899 = vmatpush.bf16.msra.mxu0 %v1370_v51  ;;  %1298 = vmatmul.msk.bf16.vlgmr.msrb.gmra.mxu3 %vm479_vm0, %v816_v55 }
  0x33   : > { %942 = vmatpush.bf16.msra.mxu1 %v1371_v56 }
  0x35   : > { %900 = vmatpush.bf16.msra.mxu0 %v1369_v57 }
  0x39   : > { %901 = vmatpush.bf16.msra.mxu0 %v1368_v59 }
  0x3d   : > { %902 = vmatpush.bf16.msra.mxu0 %v1367_v60 }
  0x3e   : > { %1332 = vmatmul.msk.bf16.vlgmr.msra.gmra.mxu1 %vm931_vm1, %v914_v61 }
  0x40   : > { %1323 = vmatmul.msk.bf16.vlgmr.msra.gmra.mxu0 %vm479_vm0, %v867_v62 }
  0x9b   : > { %v532_v63 = vpop.f32.mrf.mxu1 }
  0x9d   : > { %v492_v0 = vpop.f32.mrf.mxu0 }
  0x9e   : > { %v533_v5 = vadd.f32 %v532_v63, %v492_v0 }
  0xa2   : > { %v582_v1 = vpop.f32.mrf.mxu2 }
  0xa3   : > { %v534_v3 = vpop.f32.mrf.mxu1  ;;  %v586_v8 = vadd.f32 %v582_v1, %v533_v5 }
  0xa4   : > { %v632_v2 = vpop.f32.mrf.mxu3 }
  0xa5   : > { %v494_v4 = vpop.f32.mrf.mxu0  ;;  %v636_v11 = vadd.f32 %v632_v2, %v586_v8 }
  0xaa   : > { %v584_v6 = vpop.f32.mrf.mxu2 }
  0xab   : > { %v743_v9 = vpop.f32.mrf.mxu1 }
  0xac   : > { %v634_v7 = vpop.f32.mrf.mxu3 }
  0xad   : > { %v692_v10 = vpop.f32.mrf.mxu0 }
  0xae   : > { %v696_v12 = vadd.f32 %v692_v10, %v636_v11 }
  0xb0   : > { %v747_v16 = vadd.f32 %v743_v9, %v696_v12 }
  0xb2   : > { %v793_v13 = vpop.f32.mrf.mxu2 }
  0xb3   : > { %v745_v15 = vpop.f32.mrf.mxu1  ;;  %v797_v18 = vadd.f32 %v793_v13, %v747_v16 }
  0xb4   : > { %v853_v14 = vpop.f32.mrf.mxu3 }
  0xb5   : > { %v694_v17 = vpop.f32.mrf.mxu0  ;;  %v857_v22 = vadd.f32 %v853_v14, %v797_v18 }
  0xba   : > { %v795_v19 = vpop.f32.mrf.mxu2 }
  0xbb   : > { %v944_v21 = vpop.f32.mrf.mxu1 }
  0xbc   : > { %v855_v20 = vpop.f32.mrf.mxu3 }
  0xbd   : > { %v904_v24 = vpop.f32.mrf.mxu0 }
  0xbe   : > { %v908_v25 = vadd.f32 %v904_v24, %v857_v22 }
  0xc0   : > { %v913_v26 = vadd.f32 %v1414_v23, %v908_v25 }
  0xc2   : > { %v948_v27 = vadd.f32 %v944_v21, %v913_v26 }
  0xc3   : > { %v946_v28 = vpop.f32.mrf.mxu1 }
  0xc4   : > { %v949_v29 = vmax.f32 %v948_v27, 0.0 }
  0xc5   : > { %v906_v30 = vpop.f32.mrf.mxu0 }
  0xc6   : > { %v950_v31 = vpack.c.bf16 %v949_v29, %v949_v29 }
  0xc8   : > { %951 = vst [vmem:[%s423_s15] sm:$0x3] %v950_v31 }
  0xc9 PF: > { %s17_s28 = sadd.s32 1, %s1453_s28   ;;  %s1726_s24 = smov %s1445_s26 }
  0xca   : > { %p14_p11 = scmp.ge.s32.totalorder %s17_s28, 10   ;;  %s1727_s25 = smov %s1449_s27 }
  0xcb   : > { %s1728_s26 = smov %s1731_s29  ;;  %s1729_s27 = smov %s1735_s30 }
  0xcc   :  { %16 = sbr.rel (!%p14_p11) target bundleno = 3 (0x3), region = 95 }

// kernel: resnest_forward.18
= control target key start
LH: loop header
LB: loop body
LE: loop exit
PB: predicated region body
PF: predicated region fallthrough
CT: control target
= control target key end

     0   :  { %s1835_s17 = smov 0   ;;  %s1837_s18 = smov 0   ;;  %s2060_s0 = inlined_call_operand.vmem [shape: bf16[2,6,2,128], index: 0, kind: input, shape index: {}, may-alias: {0,1,2}]   ;;  %s2061_s1 = inlined_call_operand.vmem [shape: bf16[2,6,2,128], index: 1, kind: input, shape index: {}, may-alias: {0,1,2}]   ;;  %s2062_s2 = inlined_call_operand.vmem [shape: bf16[2,6,2,128], index: 2, kind: input, shape index: {}, may-alias: {0,1,2}]   ;;  %s2063_s3 = inlined_call_operand.vmem [shape: bf16[2,6,2,128], index: 3, kind: input, shape index: {}, may-alias: {3,4,5}]   ;;  %s2064_s4 = inlined_call_operand.vmem [shape: bf16[2,6,2,128], index: 4, kind: input, shape index: {}, may-alias: {3,4,5}]   ;;  %s2065_s5 = inlined_call_operand.vmem [shape: bf16[2,6,2,128], index: 5, kind: input, shape index: {}, may-alias: {3,4,5}]   ;;  %s2066_s6 = inlined_call_operand.vmem [shape: bf16[2,6,2,128], index: 6, kind: input, shape index: {}, may-alias: {6,7,8}]   ;;  %s2067_s7 = inlined_call_operand.vmem [shape: bf16[2,6,2,128], index: 7, kind: input, shape index: {}, may-alias: {6,7,8}]   ;;  %s2068_s8 = inlined_call_operand.vmem [shape: bf16[2,6,2,128], index: 8, kind: input, shape index: {}, may-alias: {6,7,8}]   ;;  %s2069_s9 = inlined_call_operand.vmem [shape: bf16[9,64,128], index: 9, kind: input, shape index: {}]   ;;  %s2070_s10 = inlined_call_operand.vmem [shape: f32[1,128], index: 10, kind: input, shape index: {}]   ;;  %s2071_s11 = inlined_call_operand.vmem [shape: bf16[2,2,2,128], index: 11, kind: output, shape index: {}]  }
   0x1   :  { %2075 = sst [smem:[#allocation7_spill]] %s2063_s3  ;;  %s1839_s19 = smov 0  }
   0x2   :  { %2076 = sst [smem:[#allocation8_spill]] %s2071_s11  ;;  %s1841_s20 = smov 0  }
   0x3   :  { %s1843_s21 = smov 0  }
   0x4 LB: > { %2077 = sst [smem:[#allocation2_spill]] %s1765_s19  ;;  %s30_s22 = sadd.s32 1, %s1765_s19  ;;  %s1773_s21 = sphi %s1843_s21, %s21_s21   ;;  %s1769_s20 = sphi %s1841_s20, %s2088_s20   ;;  %s1765_s19 = sphi %s1839_s19, %s2087_s19   ;;  %s1761_s18 = sphi %s1837_s18, %s2086_s18   ;;  %s1757_s17 = sphi %s1835_s17, %s2085_s17  }
   0x5   : > { %2078 = sst [smem:[#allocation3_spill]] %s1769_s20  ;;  %s33_s23 = sadd.s32 1, %s1769_s20 }
   0x6   : > { %2079 = sst [smem:[#allocation4_spill]] %s1773_s21  ;;  %p31_p0 = scmp.ge.s32.totalorder %s30_s22, 2 }
   0x7   : > { %p1427_p1 = scmp.ge.s32.totalorder %s1773_s21, 1  ;;  %p527_p2 = scmp.lt.s32.totalorder %s1773_s21, 5 }
   0x8   : > { %s2090_s22 = smov (%p31_p0, %s30_s22), 0  ;;  %s2092_s23 = smov (!%p31_p0, %s33_s23), %s1769_s20 }
   0x9   : > { %2080 = sst [smem:[#allocation5_spill]] %s2090_s22  ;;  %p528_p3 = pnand %p1427_p1, %p527_p2 }
   0xa   : > { %p35_p4 = scmp.ge.s32.totalorder %s2092_s23, 2  ;;  %s1877_s30 = sshll.u32 (!%p528_p3), %s1757_s17, 1 }
   0xb   : > { %531 = sbr.rel (%p528_p3) target bundleno = 199 (0xc7), region = 64  ;;  %p643_p5 = scmp.lt.s32.totalorder (!%p528_p3), %s1761_s18, 1 }
   0xc   : > { %s2094_s23 = smov (%p35_p4, %s2092_s23), 0  ;;  %p645_p6 = scmp.lt.s32.totalorder (!%p528_p3), %s1877_s30, 5 }
   0xd   : > { %2081 = sst [smem:[#allocation6_spill]] %s2094_s23  ;;  %s652_s14 = sadd.s32 (!%p528_p3), 1, %s1877_s30 }
   0xe   : > { %p655_p7 = scmp.lt.s32.totalorder (!%p528_p3), %s652_s14, 5  ;;  %s2082_s3 = sld [smem:[#allocation7_spill]] (!%p528_p3) }
   0xf   : > { %p737_p9 = scmp.lt.s32.totalorder (!%p528_p3), %s1757_s17, 1 }
  0x10   : > { %v1664_v0 = vld [vmem:[%s2069_s9 + $0x38] sm:$0xff]  ;;  %v1663_v4 = vld [vmem:[%s2069_s9 + $0x30] sm:$0xff]  ;;  %s2096_s18 = smov (!%p643_p5, %s1761_s18), 1  ;;  %v1662_v8 = vld [vmem:[%s2069_s9 + $0x28] sm:$0xff]  ;;  %s2098_s14 = smov (!%p655_p7, %s652_s14), 5  ;;  %vm793_vm0 = vcmask 523264  }
  0x11   : > { %v1660_v1 = vld [vmem:[%s2069_s9 + $0x18] sm:$0xff]  ;;  %801 = vmatpush.bf16.msra.mxu0 %v1664_v0  ;;  %v1659_v5 = vld [vmem:[%s2069_s9 + $0x10] sm:$0xff]  ;;  %s646_s12 = scalar_select %p645_p6, %s1877_s30, 5  ;;  %v1658_v9 = vld [vmem:[%s2069_s9 + $0x8] sm:$0xff] }
  0x12   : > { %v1668_v2 = vld [vmem:[%s2069_s9 + $0x58] sm:$0xff]  ;;  %841 = vmatpush.bf16.msra.mxu1 %v1660_v1  ;;  %v1667_v6 = vld [vmem:[%s2069_s9 + $0x50] sm:$0xff]  ;;  %s1900_s13 = smul.u32 6, %s2096_s18  ;;  %v1666_v10 = vld [vmem:[%s2069_s9 + $0x48] sm:$0xff]  ;;  %s2102_s17 = smov (!%p737_p9, %s1757_s17), 1 }
  0x13   : > { %v1672_v3 = vld [vmem:[%s2069_s9 + $0x78] sm:$0xff]  ;;  %890 = vmatpush.bf16.msra.mxu2 %v1668_v2  ;;  %v1671_v7 = vld [vmem:[%s2069_s9 + $0x70] sm:$0xff]  ;;  %v1670_v11 = vld [vmem:[%s2069_s9 + $0x68] sm:$0xff] }
  0x14   : > { %940 = vmatpush.bf16.msra.mxu3 %v1672_v3  ;;  %s648_s23 = sadd.s32 %s1900_s13, %s646_s12  ;;  %v1661_v12 = vld [vmem:[%s2069_s9 + $0x20] sm:$0xff]  ;;  %s1934_s25 = sadd.s32 %s1900_s13, %s2098_s14  ;;  %v1676_v16 = vld [vmem:[%s2069_s9 + $0x98] sm:$0xff]  ;;  %v1675_v24 = vld [vmem:[%s2069_s9 + $0x90] sm:$0xff] }
  0x15   : > { %802 = vmatpush.bf16.msra.mxu0 %v1663_v4  ;;  %v1657_v13 = vld [vmem:[%s2069_s9] sm:$0xff]  ;;  %s680_s26 = scalar_lea.vmem %s2082_s3, %s648_s23  ;;  %s649_s24 = scalar_lea.vmem %s2060_s0, %s648_s23  ;;  %v1684_v17 = vld [vmem:[%s2069_s9 + $0xd8] sm:$0xff]  ;;  %v1683_v25 = vld [vmem:[%s2069_s9 + $0xd0] sm:$0xff] }
  0x16   : > { %842 = vmatpush.bf16.msra.mxu1 %v1659_v5  ;;  %v1665_v14 = vld [vmem:[%s2069_s9 + $0x40] sm:$0xff]  ;;  %s711_s22 = scalar_lea.vmem %s2066_s6, %s648_s23  ;;  %s659_s27 = scalar_lea.vmem %s2061_s1, %s1934_s25  ;;  %v1688_v20 = vld [vmem:[%s2069_s9 + $0xf8] sm:$0xff]  ;;  %v1687_v26 = vld [vmem:[%s2069_s9 + $0xf0] sm:$0xff] }
  0x17   : > { %891 = vmatpush.bf16.msra.mxu2 %v1667_v6  ;;  %v1669_v15 = vld [vmem:[%s2069_s9 + $0x60] sm:$0xff]  ;;  %s663_s23 = sadd.s32 2, %s1877_s30  ;;  %v1680_v23 = vld [vmem:[%s2069_s9 + $0xb8] sm:$0xff]  ;;  %v1679_v27 = vld [vmem:[%s2069_s9 + $0xb0] sm:$0xff]  ;;  %s1437_s14 = sshll.u32 %s2096_s18, 1 }
  0x18   : > { %941 = vmatpush.bf16.msra.mxu3 %v1671_v7  ;;  %v746_v18 = vld [vmem:[%s680_s26] sm:$0x1]  ;;  %p666_p8 = scmp.lt.s32.totalorder %s663_s23, 5  ;;  %v1674_v28 = vld [vmem:[%s2069_s9 + $0x88] sm:$0xff]  ;;  %v1692_v34 = vld [vmem:[%s2069_s9 + $0x118] sm:$0xff] }
  0x19   : > { %803 = vmatpush.bf16.msra.mxu0 %v1662_v8  ;;  %v743_v19 = vld [vmem:[%s649_s24] sm:$0x1]  ;;  %v1682_v29 = vld [vmem:[%s2069_s9 + $0xc8] sm:$0xff]  ;;  %s721_s24 = scalar_lea.vmem %s2067_s7, %s1934_s25  ;;  %v1691_v40 = vld [vmem:[%s2069_s9 + $0x110] sm:$0xff] }
  0x1a   : > { %843 = vmatpush.bf16.msra.mxu1 %v1658_v9  ;;  %v749_v21 = vld [vmem:[%s711_s22] sm:$0x1]  ;;  %s2100_s23 = smov (!%p666_p8, %s663_s23), 5  ;;  %v1686_v30 = vld [vmem:[%s2069_s9 + $0xe8] sm:$0xff] }
  0x1b   : > { %892 = vmatpush.bf16.msra.mxu2 %v1666_v10  ;;  %v744_v22 = vld [vmem:[%s659_s27] sm:$0x1]  ;;  %v1678_v31 = vld [vmem:[%s2069_s9 + $0xa8] sm:$0xff]  ;;  %s1991_s30 = sadd.s32 %s1900_s13, %s2100_s23  ;;  %s690_s13 = scalar_lea.vmem %s2064_s4, %s1934_s25 }
  0x1c   : > { %942 = vmatpush.bf16.msra.mxu3 %v1670_v11  ;;  %v1673_v32 = vld [vmem:[%s2069_s9 + $0x80] sm:$0xff]  ;;  %s670_s3 = scalar_lea.vmem %s2062_s2, %s1991_s30  ;;  %s701_s15 = scalar_lea.vmem %s2065_s5, %s1991_s30  ;;  %v1690_v42 = vld [vmem:[%s2069_s9 + $0x108] sm:$0xff] }
  0x1d   : > { %804 = vmatpush.bf16.msra.mxu0 %v1661_v12  ;;  %v1681_v33 = vld [vmem:[%s2069_s9 + $0xc0] sm:$0xff] }
  0x1e   : > { %844 = vmatpush.bf16.msra.mxu1 %v1657_v13  ;;  %v1685_v35 = vld [vmem:[%s2069_s9 + $0xe0] sm:$0xff] }
  0x1f   : > { %893 = vmatpush.bf16.msra.mxu2 %v1665_v14  ;;  %v1677_v36 = vld [vmem:[%s2069_s9 + $0xa0] sm:$0xff] }
  0x20   : > { %943 = vmatpush.bf16.msra.mxu3 %v1669_v15  ;;  %1462 = vmatmul.msk.bf16.vlgmr.msra.gmra.mxu0 %vm793_vm0, %v746_v18  ;;  %v747_v37 = vld [vmem:[%s690_s13] sm:$0x1]  ;;  %s732_s13 = scalar_lea.vmem %s2068_s8, %s1991_s30 }
  0x21   : > { %990 = vmatpush.bf16.msrb.mxu0 %v1676_v16  ;;  %1479 = vmatmul.msk.bf16.vlgmr.msra.gmra.mxu1 %vm793_vm0, %v743_v19  ;;  %v745_v38 = vld [vmem:[%s670_s3] sm:$0x1]  ;;  %s740_s3 = sadd.s32 %s1437_s14, %s2102_s17 }
  0x22   : > { %1504 = vmatmul.msk.bf16.vlgmr.msra.gmra.mxu2 %vm793_vm0, %v749_v21  ;;  %1040 = vmatpush.bf16.msrb.mxu1 %v1680_v23  ;;  %v748_v39 = vld [vmem:[%s701_s15] sm:$0x1]  ;;  %s2083_s15 = sld [smem:[#allocation8_spill]] }
  0x23   : > { %1090 = vmatpush.bf16.msrb.mxu2 %v1684_v17  ;;  %1529 = vmatmul.msk.bf16.vlgmr.msra.gmra.mxu3 %vm793_vm0, %v744_v22  ;;  %v750_v41 = vld [vmem:[%s721_s24] sm:$0x1] }
  0x24   : > { %1140 = vmatpush.bf16.msrb.mxu3 %v1688_v20  ;;  %v1689_v43 = vld [vmem:[%s2069_s9 + $0x100] sm:$0xff] }
  0x25   : > { %991 = vmatpush.bf16.msrb.mxu0 %v1675_v24  ;;  %v751_v44 = vld [vmem:[%s732_s13] sm:$0x1] }
  0x26   : > { %1041 = vmatpush.bf16.msrb.mxu1 %v1679_v27  ;;  %v1734_v4 = vld [vmem:[%s2070_s10] ss:$0 sm:$0xff] }
  0x27   : > { %1091 = vmatpush.bf16.msrb.mxu2 %v1683_v25 }
  0x28   : > { %1141 = vmatpush.bf16.msrb.mxu3 %v1687_v26  ;;  %s741_s26 = scalar_lea.vmem %s2083_s15, %s740_s3 }
  0x29   : > { %992 = vmatpush.bf16.msrb.mxu0 %v1674_v28 }
  0x2a   : > { %1042 = vmatpush.bf16.msrb.mxu1 %v1678_v31 }
  0x2b   : > { %1092 = vmatpush.bf16.msrb.mxu2 %v1682_v29 }
  0x2c   : > { %1142 = vmatpush.bf16.msrb.mxu3 %v1686_v30 }
  0x2d   : > { %993 = vmatpush.bf16.msrb.mxu0 %v1673_v32 }
  0x2e   : > { %1043 = vmatpush.bf16.msrb.mxu1 %v1677_v36 }
  0x2f   : > { %1093 = vmatpush.bf16.msrb.mxu2 %v1681_v33 }
  0x30   : > { %1143 = vmatpush.bf16.msrb.mxu3 %v1685_v35  ;;  %1554 = vmatmul.msk.bf16.vlgmr.msrb.gmra.mxu0 %vm793_vm0, %v747_v37 }
  0x31   : > { %1190 = vmatpush.bf16.msra.mxu0 %v1692_v34  ;;  %1579 = vmatmul.msk.bf16.vlgmr.msrb.gmra.mxu1 %vm793_vm0, %v750_v41 }
  0x32   : > { %1604 = vmatmul.msk.bf16.vlgmr.msrb.gmra.mxu2 %vm793_vm0, %v745_v38 }
  0x33   : > { %1629 = vmatmul.msk.bf16.vlgmr.msrb.gmra.mxu3 %vm793_vm0, %v748_v39 }
  0x35   : > { %1191 = vmatpush.bf16.msra.mxu0 %v1691_v40 }
  0x39   : > { %1192 = vmatpush.bf16.msra.mxu0 %v1690_v42 }
  0x3d   : > { %1193 = vmatpush.bf16.msra.mxu0 %v1689_v43 }
  0x40   : > { %1654 = vmatmul.msk.bf16.vlgmr.msra.gmra.mxu0 %vm793_vm0, %v751_v44 }
  0x9d   : > { %v806_v45 = vpop.f32.mrf.mxu0 }
  0x9e   : > { %v846_v46 = vpop.f32.mrf.mxu1 }
  0x9f   : > { %v847_v51 = vadd.f32 %v846_v46, %v806_v45 }
  0xa5   : > { %v895_v47 = vpop.f32.mrf.mxu2  ;;  %v808_v49 = vpop.f32.mrf.mxu0 }
  0xa6   : > { %v945_v48 = vpop.f32.mrf.mxu3  ;;  %v848_v50 = vpop.f32.mrf.mxu1  ;;  %v899_v52 = vadd.f32 %v895_v47, %v847_v51 }
  0xa8   : > { %v949_v57 = vadd.f32 %v945_v48, %v899_v52 }
  0xad   : > { %v897_v53 = vpop.f32.mrf.mxu2  ;;  %v995_v55 = vpop.f32.mrf.mxu0 }
  0xae   : > { %v947_v54 = vpop.f32.mrf.mxu3  ;;  %v1045_v56 = vpop.f32.mrf.mxu1  ;;  %v999_v58 = vadd.f32 %v995_v55, %v949_v57 }
  0xb0   : > { %v1049_v62 = vadd.f32 %v1045_v56, %v999_v58 }
  0xb5   : > { %v1095_v59 = vpop.f32.mrf.mxu2  ;;  %v997_v61 = vpop.f32.mrf.mxu0 }
  0xb6   : > { %v1145_v60 = vpop.f32.mrf.mxu3  ;;  %v1047_v63 = vpop.f32.mrf.mxu1  ;;  %v1099_v0 = vadd.f32 %v1095_v59, %v1049_v62 }
  0xb8   : > { %v1149_v1 = vadd.f32 %v1145_v60, %v1099_v0 }
  0xbd   : > { %v1097_v2 = vpop.f32.mrf.mxu2  ;;  %v1195_v5 = vpop.f32.mrf.mxu0 }
  0xbe   : > { %v1147_v3 = vpop.f32.mrf.mxu3  ;;  %v1199_v6 = vadd.f32 %v1195_v5, %v1149_v1 }
  0xc0   : > { %v1204_v7 = vadd.f32 %v1734_v4, %v1199_v6 }
  0xc2   : > { %v1205_v8 = vmax.f32 %v1204_v7, 0.0 }
  0xc4   : > { %v1206_v9 = vpack.c.bf16 %v1205_v8, %v1205_v8 }
  0xc5   : > { %v1197_v10 = vpop.f32.mrf.mxu0 }
  0xc6   : > { %1207 = vst [vmem:[%s741_s26] sm:$0x1] %v1206_v9 }
  0xc7 PF: > { %s2084_s16 = sld [smem:[#allocation4_spill]] }
  0xc8   : > { %s2085_s17 = sld [smem:[#allocation2_spill]] }
  0xc9   : > { %s2086_s18 = sld [smem:[#allocation3_spill]] }
  0xca   : > { %s2087_s19 = sld [smem:[#allocation5_spill]] }
  0xcb   : > { %s2088_s20 = sld [smem:[#allocation6_spill]] }
  0xcd   : > { %s21_s21 = sadd.s32 1, %s2084_s16  }
  0xce   : > { %p18_p10 = scmp.ge.s32.totalorder %s21_s21, 6  }
  0xd0   :  { %20 = sbr.rel (!%p18_p10) target bundleno = 4 (0x4), region = 126 }

// kernel: resnest_forward.19
= control target key start
LH: loop header
LB: loop body
LE: loop exit
PB: predicated region body
PF: predicated region fallthrough
CT: control target
= control target key end

     0   :  { %s2014_s24 = smov 0   ;;  %s2016_s25 = smov 0   ;;  %s2339_s0 = inlined_call_operand.vmem [shape: bf16[2,4,4,128], index: 0, kind: input, shape index: {}, may-alias: {0,1,2}]   ;;  %s2340_s1 = inlined_call_operand.vmem [shape: bf16[2,4,4,128], index: 1, kind: input, shape index: {}, may-alias: {0,1,2}]   ;;  %s2341_s2 = inlined_call_operand.vmem [shape: bf16[2,4,4,128], index: 2, kind: input, shape index: {}, may-alias: {0,1,2}]   ;;  %s2342_s3 = inlined_call_operand.vmem [shape: bf16[9,128,128], index: 3, kind: input, shape index: {}]   ;;  %s2343_s4 = inlined_call_operand.vmem [shape: f32[1,128], index: 4, kind: input, shape index: {}]   ;;  %s2344_s5 = inlined_call_operand.vmem [shape: bf16[2,4,2,128], index: 5, kind: input, shape index: {}]   ;;  %s2345_s6 = inlined_call_operand.vmem [shape: bf16[64,128], index: 6, kind: input, shape index: {}]   ;;  %s2346_s7 = inlined_call_operand.vmem [shape: bf16[2,2,2,128], index: 7, kind: output, shape index: {}]  }
   0x1   :  { %s2018_s26 = smov 0   ;;  %s2020_s27 = smov 0  }
   0x2   :  { %s2022_s28 = smov 0  }
   0x3 LB: > { %s26_s29 = sadd.s32 1, %s1964_s26  ;;  %s29_s30 = sadd.s32 1, %s1968_s27  ;;  %s1972_s28 = sphi %s2022_s28, %s17_s28   ;;  %s1968_s27 = sphi %s2020_s27, %s2351_s27   ;;  %s1964_s26 = sphi %s2018_s26, %s2350_s26   ;;  %s1960_s25 = sphi %s2016_s25, %s2349_s25   ;;  %s1956_s24 = sphi %s2014_s24, %s2348_s24  }
   0x4   : > { %p27_p0 = scmp.ge.s32.totalorder %s26_s29, 2  ;;  %p1372_p1 = scmp.ge.s32.totalorder %s1972_s28, 1 }
   0x5   : > { %p312_p2 = scmp.lt.s32.totalorder %s1972_s28, 5 }
   0x6   : > { %s2353_s29 = smov (%p27_p0, %s26_s29), 0  ;;  %s2355_s30 = smov (!%p27_p0, %s29_s30), %s1968_s27 }
   0x7   : > { %p313_p3 = pnand %p1372_p1, %p312_p2  ;;  %p31_p4 = scmp.ge.s32.totalorder %s2355_s30, 2 }
   0x8   : > { %p375_p5 = scmp.lt.s32.totalorder (!%p313_p3), %s1960_s25, 1  ;;  %p377_p6 = scmp.lt.s32.totalorder (!%p313_p3), %s1956_s24, 3 }
   0x9   : > { %s2357_s30 = smov (%p31_p4, %s2355_s30), 0  ;;  %316 = sbr.rel (%p313_p3) target bundleno = 247 (0xf7), region = 48 }
   0xa   : > { %s383_s20 = sadd.s32 (!%p313_p3), 1, %s1956_s24  ;;  %p414_p10 = scmp.lt.s32.totalorder (!%p313_p3), %s1956_s24, 1 }
   0xb   : > { %p386_p7 = scmp.lt.s32.totalorder (!%p313_p3), %s383_s20, 3 }
   0xe   : > { %v1832_v0 = vld [vmem:[%s2342_s3 + $0x78] sm:$0xff]  ;;  %v1831_v4 = vld [vmem:[%s2342_s3 + $0x70] sm:$0xff]  ;;  %s2359_s25 = smov (!%p375_p5, %s1960_s25), 1  ;;  %v1830_v8 = vld [vmem:[%s2342_s3 + $0x68] sm:$0xff]  ;;  %s2361_s20 = smov (!%p386_p7, %s383_s20), 3  ;;  %vm1214_vm0 = vcmask 523264  }
   0xf   : > { %v1840_v1 = vld [vmem:[%s2342_s3 + $0xb8] sm:$0xff]  ;;  %514 = vmatpush.bf16.msra.mxu0 %v1832_v0  ;;  %v1839_v5 = vld [vmem:[%s2342_s3 + $0xb0] sm:$0xff]  ;;  %s378_s8 = scalar_select %p377_p6, %s1956_s24, 3  ;;  %v1838_v9 = vld [vmem:[%s2342_s3 + $0xa8] sm:$0xff] }
  0x10   : > { %v1848_v2 = vld [vmem:[%s2342_s3 + $0xf8] sm:$0xff]  ;;  %658 = vmatpush.bf16.msra.mxu2 %v1840_v1  ;;  %v1847_v6 = vld [vmem:[%s2342_s3 + $0xf0] sm:$0xff]  ;;  %s2075_s9 = sshll.u32 %s2359_s25, 2  ;;  %v1846_v10 = vld [vmem:[%s2342_s3 + $0xe8] sm:$0xff] }
  0x11   : > { %v1824_v3 = vld [vmem:[%s2342_s3 + $0x38] sm:$0xff]  ;;  %737 = vmatpush.bf16.msra.mxu3 %v1848_v2  ;;  %v1823_v7 = vld [vmem:[%s2342_s3 + $0x30] sm:$0xff]  ;;  %s380_s14 = sadd.s32 %s2075_s9, %s378_s8  ;;  %v1822_v11 = vld [vmem:[%s2342_s3 + $0x28] sm:$0xff]  ;;  %s389_s21 = sadd.s32 %s2075_s9, %s2361_s20 }
  0x12   : > { %575 = vmatpush.bf16.msra.mxu1 %v1824_v3  ;;  %s1374_s19 = sshll.u32 %s380_s14, 1  ;;  %v1829_v12 = vld [vmem:[%s2342_s3 + $0x60] sm:$0xff]  ;;  %v1828_v16 = vld [vmem:[%s2342_s3 + $0x58] sm:$0xff]  ;;  %v1827_v21 = vld [vmem:[%s2342_s3 + $0x50] sm:$0xff]  ;;  %s1376_s20 = sshll.u32 %s389_s21, 1 }
  0x13   : > { %515 = vmatpush.bf16.msra.mxu0 %v1831_v4  ;;  %v1837_v13 = vld [vmem:[%s2342_s3 + $0xa0] sm:$0xff]  ;;  %s382_s16 = scalar_lea.vmem %s2339_s0, %s1374_s19  ;;  %v1836_v17 = vld [vmem:[%s2342_s3 + $0x98] sm:$0xff]  ;;  %v1835_v22 = vld [vmem:[%s2342_s3 + $0x90] sm:$0xff]  ;;  %s393_s14 = sadd.s32 2, %s1956_s24 }
  0x14   : > { %659 = vmatpush.bf16.msra.mxu2 %v1839_v5  ;;  %v1845_v14 = vld [vmem:[%s2342_s3 + $0xe0] sm:$0xff]  ;;  %v1844_v18 = vld [vmem:[%s2342_s3 + $0xd8] sm:$0xff]  ;;  %v1843_v23 = vld [vmem:[%s2342_s3 + $0xd0] sm:$0xff]  ;;  %s391_s21 = scalar_lea.vmem %s2340_s1, %s1376_s20  ;;  %p2171_p8 = scmp.lt.s32.totalorder %s393_s14, 3 }
  0x15   : > { %738 = vmatpush.bf16.msra.mxu3 %v1847_v6  ;;  %v1821_v15 = vld [vmem:[%s2342_s3 + $0x20] sm:$0xff]  ;;  %v1820_v19 = vld [vmem:[%s2342_s3 + $0x18] sm:$0xff]  ;;  %v1819_v24 = vld [vmem:[%s2342_s3 + $0x10] sm:$0xff] }
  0x16   : > { %576 = vmatpush.bf16.msra.mxu1 %v1823_v7  ;;  %v2118_v20 = vld [vmem:[%s382_s16] sm:$0x3]  ;;  %v1826_v25 = vld [vmem:[%s2342_s3 + $0x48] sm:$0xff]  ;;  %v1856_v35 = vld [vmem:[%s2342_s3 + $0x138] sm:$0xff]  ;;  %s2363_s14 = smov (!%p2171_p8, %s393_s14), 3 }
  0x17   : > { %516 = vmatpush.bf16.msra.mxu0 %v1830_v8  ;;  %457 = vst [vmem:[#allocation1] ss:$4 sm:$0xff] %v2118_v20  ;;  %v1834_v26 = vld [vmem:[%s2342_s3 + $0x88] sm:$0xff]  ;;  %v1825_v31 = vld [vmem:[%s2342_s3 + $0x40] sm:$0xff]  ;;  %v1872_v36 = vld [vmem:[%s2342_s3 + $0x1b8] sm:$0xff]  ;;  %s399_s22 = sadd.s32 %s2075_s9, %s2363_s14 }
  0x18   : > { %660 = vmatpush.bf16.msra.mxu2 %v1838_v9  ;;  %v1842_v27 = vld [vmem:[%s2342_s3 + $0xc8] sm:$0xff]  ;;  %v1833_v32 = vld [vmem:[%s2342_s3 + $0x80] sm:$0xff]  ;;  %v1880_v39 = vld [vmem:[%s2342_s3 + $0x1f8] sm:$0xff]  ;;  %s1378_s14 = sshll.u32 %s399_s22, 1  ;;  %s1381_s22 = sshll.u32 %s2359_s25, 1 }
  0x19   : > { %739 = vmatpush.bf16.msra.mxu3 %v1846_v10  ;;  %v1818_v28 = vld [vmem:[%s2342_s3 + $0x8] sm:$0xff]  ;;  %v1841_v37 = vld [vmem:[%s2342_s3 + $0xc0] sm:$0xff]  ;;  %v1864_v40 = vld [vmem:[%s2342_s3 + $0x178] sm:$0xff]  ;;  %s401_s8 = scalar_lea.vmem %s2341_s2, %s1378_s14  ;;  %s1379_s14 = sshll.u32 %s1956_s24, 1 }
  0x1a   : > { %577 = vmatpush.bf16.msra.mxu1 %v1822_v11  ;;  %v1817_v38 = vld [vmem:[%s2342_s3] sm:$0xff]  ;;  %v1855_v43 = vld [vmem:[%s2342_s3 + $0x130] sm:$0xff]  ;;  %v1854_v49 = vld [vmem:[%s2342_s3 + $0x128] sm:$0xff]  ;;  %p406_p9 = scmp.lt.s32.totalorder %s1379_s14, 3  ;;  %s2367_s24 = smov (!%p414_p10, %s1956_s24), 1 }
  0x1b   : > { %517 = vmatpush.bf16.msra.mxu0 %v1829_v12  ;;  %v421_v41 = vld [vmem:[%s391_s21] sm:$0x3]  ;;  %v1871_v44 = vld [vmem:[%s2342_s3 + $0x1b0] sm:$0xff]  ;;  %v1870_v50 = vld [vmem:[%s2342_s3 + $0x1a8] sm:$0xff]  ;;  %s417_s11 = sadd.s32 %s1381_s22, %s2367_s24 }
  0x1c   : > { %661 = vmatpush.bf16.msra.mxu2 %v1837_v13  ;;  %v1879_v47 = vld [vmem:[%s2342_s3 + $0x1f0] sm:$0xff]  ;;  %v1878_v51 = vld [vmem:[%s2342_s3 + $0x1e8] sm:$0xff]  ;;  %v1853_v53 = vld [vmem:[%s2342_s3 + $0x120] sm:$0xff]  ;;  %s2365_s14 = smov (!%p406_p9, %s1379_s14), 3 }
  0x1d   : > { %740 = vmatpush.bf16.msra.mxu3 %v1845_v14  ;;  %v1863_v48 = vld [vmem:[%s2342_s3 + $0x170] sm:$0xff]  ;;  %v1862_v52 = vld [vmem:[%s2342_s3 + $0x168] sm:$0xff]  ;;  %v1869_v54 = vld [vmem:[%s2342_s3 + $0x1a0] sm:$0xff]  ;;  %s409_s13 = sadd.s32 %s2075_s9, %s2365_s14 }
  0x1e   : > { %578 = vmatpush.bf16.msra.mxu1 %v1821_v15  ;;  %v458_v29 = vld.sshfl [vmem:[#allocation1] sm:$0xff pattern:$0x73625140]  ;;  %v1852_v58 = vld [vmem:[%s2342_s3 + $0x118] sm:$0xff]  ;;  %v1851_v63 = vld [vmem:[%s2342_s3 + $0x110] sm:$0xff]  ;;  %s410_s16 = scalar_lea.vmem %s2344_s5, %s409_s13  ;;  %s418_s13 = scalar_lea.vmem %s2346_s7, %s417_s11 }
  0x1f   : > { %518 = vmatpush.bf16.msra.mxu0 %v1828_v16  ;;  %605 = vst [vmem:[#allocation1] ss:$4 sm:$0xff] %v2118_v20  ;;  %v461_v30 = vshll.u32 %v458_v29, 16  ;;  %v459_v33 = vshrl.u32 %v458_v29, 16  ;;  %v1877_v56 = vld [vmem:[%s2342_s3 + $0x1e0] sm:$0xff]  ;;  %v1868_v59 = vld [vmem:[%s2342_s3 + $0x198] sm:$0xff] }
  0x20   : > { %662 = vmatpush.bf16.msra.mxu2 %v1836_v17  ;;  %v1861_v57 = vld [vmem:[%s2342_s3 + $0x160] sm:$0xff]  ;;  %v1876_v60 = vld [vmem:[%s2342_s3 + $0x1d8] sm:$0xff]  ;;  %v1867_v0 = vld [vmem:[%s2342_s3 + $0x190] sm:$0xff] }
  0x21   : > { %741 = vmatpush.bf16.msra.mxu3 %v1844_v18  ;;  %v463_v34 = vrot.slane %v461_v30, 1  ;;  %v1860_v61 = vld [vmem:[%s2342_s3 + $0x158] sm:$0xff]  ;;  %v422_v62 = vld [vmem:[%s401_s8] sm:$0x3]  ;;  %v1875_v2 = vld [vmem:[%s2342_s3 + $0x1d0] sm:$0xff] }
  0x22   : > { %579 = vmatpush.bf16.msra.mxu1 %v1820_v19  ;;  %v1859_v3 = vld [vmem:[%s2342_s3 + $0x150] sm:$0xff]  ;;  %v1850_v5 = vld [vmem:[%s2342_s3 + $0x108] sm:$0xff]  ;;  %v1849_v11 = vld [vmem:[%s2342_s3 + $0x100] sm:$0xff] }
  0x23   : > { %519 = vmatpush.bf16.msra.mxu0 %v1827_v21  ;;  %v464_v42 = vor.u32 %v463_v34, %v459_v33  ;;  %v1866_v6 = vld [vmem:[%s2342_s3 + $0x188] sm:$0xff]  ;;  %v1865_v12 = vld [vmem:[%s2342_s3 + $0x180] sm:$0xff]  ;;  %v1888_v14 = vld [vmem:[%s2342_s3 + $0x238] sm:$0xff] }
  0x24   : > { %663 = vmatpush.bf16.msra.mxu2 %v1835_v22  ;;  %v1874_v7 = vld [vmem:[%s2342_s3 + $0x1c8] sm:$0xff]  ;;  %v1873_v17 = vld [vmem:[%s2342_s3 + $0x1c0] sm:$0xff]  ;;  %v1892_v21 = vld [vmem:[%s2345_s6 + $0x18] sm:$0xff] }
  0x25   : > { %742 = vmatpush.bf16.msra.mxu3 %v1843_v23  ;;  %v1858_v8 = vld [vmem:[%s2342_s3 + $0x148] sm:$0xff]  ;;  %v1857_v18 = vld [vmem:[%s2342_s3 + $0x140] sm:$0xff]  ;;  %v1887_v22 = vld [vmem:[%s2342_s3 + $0x230] sm:$0xff] }
  0x26   : > { %580 = vmatpush.bf16.msra.mxu1 %v1819_v24  ;;  %v606_v45 = vld.sshfl [vmem:[#allocation1] sm:$0xff pattern:$0x73625140]  ;;  %v1884_v30 = vld [vmem:[%s2342_s3 + $0x218] sm:$0xff]  ;;  %v1882_v33 = vld [vmem:[%s2342_s3 + $0x208] sm:$0xff] }
  0x27   : > { %520 = vmatpush.bf16.msra.mxu0 %v1826_v25  ;;  %v608_v46 = vrot.slane %v606_v45, 1  ;;  %769 = vst [vmem:[#allocation1] ss:$4 sm:$0xff] %v421_v41  ;;  %v1891_v25 = vld [vmem:[%s2345_s6 + $0x10] sm:$0xff]  ;;  %v1889_v29 = vld [vmem:[%s2345_s6] sm:$0xff] }
  0x28   : > { %664 = vmatpush.bf16.msra.mxu2 %v1834_v26  ;;  %v1886_v26 = vld [vmem:[%s2342_s3 + $0x228] sm:$0xff]  ;;  %v1881_v34 = vld [vmem:[%s2342_s3 + $0x200] sm:$0xff] }
  0x29   : > { %743 = vmatpush.bf16.msra.mxu3 %v1842_v27  ;;  %v1890_v27 = vld [vmem:[%s2345_s6 + $0x8] sm:$0xff] }
  0x2a   : > { %581 = vmatpush.bf16.msra.mxu1 %v1818_v28  ;;  %v1885_v28 = vld [vmem:[%s2342_s3 + $0x220] sm:$0xff] }
  0x2b   : > { %521 = vmatpush.bf16.msra.mxu0 %v1825_v31  ;;  %v1883_v31 = vld [vmem:[%s2342_s3 + $0x210] sm:$0xff] }
  0x2c   : > { %665 = vmatpush.bf16.msra.mxu2 %v1833_v32  ;;  %v1181_v32 = vld [vmem:[%s410_s16] sm:$0x1] }
  0x2d   : > { %744 = vmatpush.bf16.msra.mxu3 %v1841_v37 }
  0x2e   : > { %582 = vmatpush.bf16.msra.mxu1 %v1817_v38  ;;  %522 = vmatmul.bf16.vlgmr.msra.gmra.mxu0 %v464_v42  ;;  %v770_v55 = vld.sshfl [vmem:[#allocation1] sm:$0xff pattern:$0x73625140] }
  0x2f   : > { %826 = vmatpush.bf16.msrb.mxu0 %v1856_v35  ;;  %666 = vmatmul.bf16.vlgmr.msra.gmra.mxu2 %v608_v46  ;;  %857 = vst [vmem:[#allocation1] ss:$4 sm:$0xff] %v421_v41  ;;  %v773_v4 = vshll.u32 %v770_v55, 16  ;;  %v771_v9 = vshrl.u32 %v770_v55, 16 }
  0x30   : > { %989 = vmatpush.bf16.msrb.mxu2 %v1872_v36  ;;  %745 = vmatmul.bf16.vlgmr.msra.gmra.mxu3 %v421_v41 }
  0x31   : > { %1078 = vmatpush.bf16.msrb.mxu3 %v1880_v39  ;;  %583 = vmatmul.bf16.vlgmr.msra.gmra.mxu1 %v2118_v20  ;;  %v775_v10 = vrot.slane %v773_v4, 1 }
  0x32   : > { %910 = vmatpush.bf16.msrb.mxu1 %v1864_v40 }
  0x33   : > { %827 = vmatpush.bf16.msrb.mxu0 %v1855_v43  ;;  %v776_v19 = vor.u32 %v775_v10, %v771_v9 }
  0x34   : > { %990 = vmatpush.bf16.msrb.mxu2 %v1871_v44 }
  0x35   : > { %1079 = vmatpush.bf16.msrb.mxu3 %v1879_v47 }
  0x36   : > { %911 = vmatpush.bf16.msrb.mxu1 %v1863_v48  ;;  %v858_v1 = vld.sshfl [vmem:[#allocation1] sm:$0xff pattern:$0x73625140] }
  0x37   : > { %828 = vmatpush.bf16.msrb.mxu0 %v1854_v49  ;;  %1021 = vst [vmem:[#allocation1] ss:$4 sm:$0xff] %v422_v62  ;;  %v860_v24 = vrot.slane %v858_v1, 1 }
  0x38   : > { %991 = vmatpush.bf16.msrb.mxu2 %v1870_v50 }
  0x39   : > { %1080 = vmatpush.bf16.msrb.mxu3 %v1878_v51 }
  0x3a   : > { %912 = vmatpush.bf16.msrb.mxu1 %v1862_v52 }
  0x3b   : > { %829 = vmatpush.bf16.msrb.mxu0 %v1853_v53 }
  0x3c   : > { %992 = vmatpush.bf16.msrb.mxu2 %v1869_v54 }
  0x3d   : > { %1081 = vmatpush.bf16.msrb.mxu3 %v1877_v56 }
  0x3e   : > { %913 = vmatpush.bf16.msrb.mxu1 %v1861_v57  ;;  %v1022_v13 = vld.sshfl [vmem:[#allocation1] sm:$0xff pattern:$0x73625140] }
  0x3f   : > { %830 = vmatpush.bf16.msrb.mxu0 %v1852_v58  ;;  %v1023_v15 = vshrl.u32 %v1022_v13, 16  ;;  %v1025_v16 = vshll.u32 %v1022_v13, 16  ;;  %1109 = vst [vmem:[#allocation1] ss:$4 sm:$0xff] %v422_v62 }
  0x40   : > { %993 = vmatpush.bf16.msrb.mxu2 %v1868_v59 }
  0x41   : > { %1082 = vmatpush.bf16.msrb.mxu3 %v1876_v60  ;;  %v1027_v20 = vrot.slane %v1025_v16, 1 }
  0x42   : > { %914 = vmatpush.bf16.msrb.mxu1 %v1860_v61 }
  0x43   : > { %831 = vmatpush.bf16.msrb.mxu0 %v1851_v63  ;;  %v1028_v23 = vor.u32 %v1027_v20, %v1023_v15 }
  0x44   : > { %994 = vmatpush.bf16.msrb.mxu2 %v1867_v0 }
  0x45   : > { %1083 = vmatpush.bf16.msrb.mxu3 %v1875_v2 }
  0x46   : > { %915 = vmatpush.bf16.msrb.mxu1 %v1859_v3  ;;  %v1110_v35 = vld.sshfl [vmem:[#allocation1] sm:$0xff pattern:$0x73625140] }
  0x47   : > { %832 = vmatpush.bf16.msrb.mxu0 %v1850_v5  ;;  %v1112_v36 = vrot.slane %v1110_v35, 1 }
  0x48   : > { %995 = vmatpush.bf16.msrb.mxu2 %v1866_v6 }
  0x49   : > { %1084 = vmatpush.bf16.msrb.mxu3 %v1874_v7 }
  0x4a   : > { %916 = vmatpush.bf16.msrb.mxu1 %v1858_v8 }
  0x4b   : > { %833 = vmatpush.bf16.msrb.mxu0 %v1849_v11 }
  0x4c   : > { %996 = vmatpush.bf16.msrb.mxu2 %v1865_v12 }
  0x4d   : > { %1085 = vmatpush.bf16.msrb.mxu3 %v1873_v17 }
  0x4e   : > { %917 = vmatpush.bf16.msrb.mxu1 %v1857_v18  ;;  %834 = vmatmul.bf16.vlgmr.msrb.gmra.mxu0 %v776_v19 }
  0x4f   : > { %1162 = vmatpush.bf16.msra.mxu0 %v1888_v14  ;;  %997 = vmatmul.bf16.vlgmr.msrb.gmra.mxu2 %v422_v62  ;;  %v1933_v62 = vld [vmem:[%s2343_s4] ss:$0 sm:$0xff] }
  0x50   : > { %1086 = vmatmul.bf16.vlgmr.msrb.gmra.mxu3 %v1028_v23 }
  0x51   : > { %918 = vmatmul.bf16.vlgmr.msrb.gmra.mxu1 %v860_v24 }
  0x52   : > { %1222 = vmatpush.bf16.msra.mxu1 %v1892_v21 }
  0x53   : > { %1163 = vmatpush.bf16.msra.mxu0 %v1887_v22 }
  0x56   : > { %1223 = vmatpush.bf16.msra.mxu1 %v1891_v25 }
  0x57   : > { %1164 = vmatpush.bf16.msra.mxu0 %v1886_v26 }
  0x5a   : > { %1224 = vmatpush.bf16.msra.mxu1 %v1890_v27 }
  0x5b   : > { %1165 = vmatpush.bf16.msra.mxu0 %v1885_v28 }
  0x5e   : > { %1225 = vmatpush.bf16.msra.mxu1 %v1889_v29 }
  0x5f   : > { %1166 = vmatpush.bf16.msra.mxu0 %v1884_v30 }
  0x61   : > { %1814 = vmatmul.msk.bf16.vlgmr.msra.gmra.mxu1 %vm1214_vm0, %v1181_v32 }
  0x63   : > { %1167 = vmatpush.bf16.msra.mxu0 %v1883_v31 }
  0x67   : > { %1168 = vmatpush.bf16.msra.mxu0 %v1882_v33 }
  0x6b   : > { %1169 = vmatpush.bf16.msra.mxu0 %v1881_v34 }
  0x6e   : > { %1170 = vmatmul.bf16.vlgmr.msra.gmra.mxu0 %v1112_v36 }
  0xab   : > { %v523_v37 = vpop.f32.mrf.mxu0 }
  0xae   : > { %v584_v38 = vpop.f32.mrf.mxu1 }
  0xaf   : > { %v585_v47 = vadd.f32 %v584_v38, %v523_v37 }
  0xb2   : > { %v667_v39 = vpop.f32.mrf.mxu2 }
  0xb3   : > { %v746_v40 = vpop.f32.mrf.mxu3  ;;  %v525_v41 = vpop.f32.mrf.mxu0  ;;  %v671_v49 = vadd.f32 %v667_v39, %v585_v47 }
  0xb5   : > { %v750_v53 = vadd.f32 %v746_v40, %v671_v49 }
  0xb6   : > { %v586_v42 = vpop.f32.mrf.mxu1 }
  0xba   : > { %v669_v43 = vpop.f32.mrf.mxu2 }
  0xbb   : > { %v748_v44 = vpop.f32.mrf.mxu3 }
  0xcb   : > { %v835_v45 = vpop.f32.mrf.mxu0 }
  0xcc   : > { %v839_v55 = vadd.f32 %v835_v45, %v750_v53 }
  0xce   : > { %v919_v46 = vpop.f32.mrf.mxu1 }
  0xcf   : > { %v923_v58 = vadd.f32 %v919_v46, %v839_v55 }
  0xd2   : > { %v998_v48 = vpop.f32.mrf.mxu2 }
  0xd3   : > { %v1087_v50 = vpop.f32.mrf.mxu3  ;;  %v837_v51 = vpop.f32.mrf.mxu0  ;;  %v1002_v59 = vadd.f32 %v998_v48, %v923_v58 }
  0xd5   : > { %v1091_v61 = vadd.f32 %v1087_v50, %v1002_v59 }
  0xd6   : > { %v921_v52 = vpop.f32.mrf.mxu1 }
  0xda   : > { %v1000_v54 = vpop.f32.mrf.mxu2 }
  0xdb   : > { %v1089_v56 = vpop.f32.mrf.mxu3 }
  0xde   : > { %v1227_v57 = vpop.f32.mrf.mxu1 }
  0xe6   : > { %v1229_v60 = vpop.f32.mrf.mxu1 }
  0xeb   : > { %v1171_v63 = vpop.f32.mrf.mxu0 }
  0xec   : > { %v1175_v0 = vadd.f32 %v1171_v63, %v1091_v61 }
  0xee   : > { %v1180_v1 = vadd.f32 %v1933_v62, %v1175_v0 }
  0xf0   : > { %v1231_v2 = vadd.f32 %v1227_v57, %v1180_v1 }
  0xf2   : > { %v1232_v3 = vmax.f32 %v1231_v2, 0.0 }
  0xf3   : > { %v1173_v4 = vpop.f32.mrf.mxu0 }
  0xf4   : > { %v1233_v5 = vpack.c.bf16 %v1232_v3, %v1232_v3 }
  0xf6   : > { %1234 = vst [vmem:[%s418_s13] sm:$0x1] %v1233_v5 }
  0xf7 PF: > { %s17_s28 = sadd.s32 1, %s1972_s28   ;;  %s2348_s24 = smov %s1964_s26 }
  0xf8   : > { %p14_p11 = scmp.ge.s32.totalorder %s17_s28, 6   ;;  %s2349_s25 = smov %s1968_s27 }
  0xf9   : > { %s2350_s26 = smov %s2353_s29  ;;  %s2351_s27 = smov %s2357_s30 }
  0xfa   :  { %16 = sbr.rel (!%p14_p11) target bundleno = 3 (0x3), region = 95 }

</bundles_post_ra>
